<compile_context>
chip_gen: v5e
topology: v5e:2x2
jax: 0.10.0
libtpu: 0.0.40
codegen_flags: <defaults>
</compile_context>

<pallas_src>
import jax
import jax.numpy as jnp
import numpy as np
from jax import lax
from jax.experimental import pallas as pl
from jax.experimental.pallas import tpu as pltpu

LANES = 128  # TPU vreg lane width; every GEMM N dim is zero-padded to this.


def conv_out_hw(h, w, stride):
    """Output spatial size of a 3x3 / padding=1 conv."""
    return (h + 2 - 3) // stride + 1, (w + 2 - 3) // stride + 1


# ---------------------------------------------------------------------------
# In-kernel helpers
# ---------------------------------------------------------------------------
def _conv3x3_slab(in_ref, w_ref, b_ref, y_ref, *, wp, n_rows, cin, chunk=128):
    """3x3 / pad-1 conv over a flattened, spatially padded plane.

    Computed at stride 1 with the flat-index trick
        y[p] = relu(bias + sum_{di,dj} in[p + di*wp + dj] @ W[di, dj])
    so each tap is one contiguous-slab GEMM chunk.  Rows that decode to the
    two right-hand padding columns or that straddle an image boundary hold
    garbage and are simply never read back.

    in_ref : (>= n_rows, >= cin), row index = b*Hp*Wp + h*wp + w
    w_ref  : (9*cin, 128), rows ordered (di, dj, ci); lanes >= Cout are zero
    b_ref  : (1, 128)
    y_ref  : scratch; rows [0, n_rows - 2*wp - 2) are written.
    """
    m = n_rows - 2 * wp - 2
    bias = b_ref[...]
    for r0 in range(0, m, chunk):
        rows = min(chunk, m - r0)
        acc = None
        for di in range(3):
            for dj in range(3):
                t = di * 3 + dj
                lhs = in_ref[pl.ds(r0 + di * wp + dj, rows), pl.ds(0, cin)]
                d = jnp.dot(lhs, w_ref[pl.ds(t * cin, cin), :],
                            preferred_element_type=jnp.float32)
                acc = d if acc is None else acc + d
        y_ref[pl.ds(r0, rows), :] = jnp.maximum(acc + bias, 0.0)


def _decimate_into_padded(y_ref, dst_ref, *, src_wp, src_rows, dst_rows,
                          oh_n, ow_n, stride, bt):
    """Move the valid (stride-decimated) conv outputs from the stride-1 result
    `y` into the next layer's zero-padded activation scratch.  Every
    destination row is rewritten on every call: interior rows as
    [0 | data | 0] blocks, top/bottom padding rows as zeros.  All stores are
    dense 128-lane stores."""
    dst_wp = ow_n + 2
    zrow = jnp.zeros((dst_wp, LANES), jnp.float32)
    zpad = jnp.zeros((1, LANES), jnp.float32)
    for b in range(bt):
        base = b * dst_rows
        dst_ref[pl.ds(base, dst_wp), :] = zrow                         # top pad
        dst_ref[pl.ds(base + (oh_n + 1) * dst_wp, dst_wp), :] = zrow   # bottom pad
        for oh in range(oh_n):
            src0 = b * src_rows + stride * oh * src_wp
            if stride == 1:
                rows = y_ref[pl.ds(src0, ow_n), :]
            else:
                rows = y_ref[pl.ds(src0, ow_n, stride=stride), :]
            blk = jnp.concatenate([zpad, rows, zpad], axis=0)          # (dst_wp, 128)
            dst_ref[pl.ds(base + (oh + 1) * dst_wp, dst_wp), :] = blk


# ---------------------------------------------------------------------------
# Fused forward-pass builder
# ---------------------------------------------------------------------------
def make_forward(in_ch, n_units, filter_size, filter_stride, input_dims,
                 n_hid, n_actions, batch_tile=8):
    assert all(k == 3 for k in filter_size), "kernel specialised to 3x3 convs"
    assert all(s >= 1 for s in filter_stride)
    H, W = input_dims
    s1, s2, s3 = filter_stride
    C0, C1, C2, C3 = in_ch, n_units[0], n_units[1], n_units[2]
    nh0, nh1 = n_hid
    assert max(C1, C2, C3, nh0, nh1, n_actions) <= LANES

    H0p, W0p = H + 2, W + 2
    H1, W1 = conv_out_hw(H, W, s1)
    H1p, W1p = H1 + 2, W1 + 2
    H2, W2 = conv_out_hw(H1, W1, s2)
    H2p, W2p = H2 + 2, W2 + 2
    H3, W3 = conv_out_hw(H2, W2, s3)
    P3 = H3 * W3

    def make_kernel(bt):
        r0 = bt * H0p * W0p      # padded input-plane rows per grid step
        r1 = bt * H1p * W1p
        r2 = bt * H2p * W2p

        def kernel(x_ref, w1_ref, b1_ref, w2_ref, b2_ref, w3_ref, b3_ref,
                   wf1_ref, bf1_ref, wf2_ref, bf2_ref, wf3_ref, bf3_ref,
                   o_ref, y_ref, a1_ref, a2_ref):
            # conv1 (stride s1): 9 slab GEMMs, then strided decimation into a1.
            _conv3x3_slab(x_ref, w1_ref, b1_ref, y_ref, wp=W0p, n_rows=r0, cin=C0)
            _decimate_into_padded(y_ref, a1_ref, src_wp=W0p, src_rows=H0p * W0p,
                                  dst_rows=H1p * W1p, oh_n=H1, ow_n=W1,
                                  stride=s1, bt=bt)
            # conv2 (stride s2)
            _conv3x3_slab(a1_ref, w2_ref, b2_ref, y_ref, wp=W1p, n_rows=r1, cin=C1)
            _decimate_into_padded(y_ref, a2_ref, src_wp=W1p, src_rows=H1p * W1p,
                                  dst_rows=H2p * W2p, oh_n=H2, ow_n=W2,
                                  stride=s2, bt=bt)
            # conv3 (stride s3): valid outputs are read in place by the FC head.
            _conv3x3_slab(a2_ref, w3_ref, b3_ref, y_ref, wp=W2p, n_rows=r2, cin=C2)

            # FC1: contraction over the P3 spatial positions.  Each term is an
            # independent (bt, C3) x (C3, 128) GEMM; terms are tree-summed.
            img3 = H2p * W2p
            parts = []
            for hh in range(H3):
                for ww in range(W3):
                    p = hh * W3 + ww
                    src = s3 * (hh * W2p + ww)
                    if bt == 1:
                        lhs = y_ref[pl.ds(src, 1), pl.ds(0, C3)]
                    else:
                        lhs = y_ref[pl.ds(src, bt, stride=img3), pl.ds(0, C3)]
                    parts.append(jnp.dot(lhs, wf1_ref[pl.ds(p * C3, C3), :],
                                         preferred_element_type=jnp.float32))
            while len(parts) > 1:
                nxt = [parts[i] + parts[i + 1] for i in range(0, len(parts) - 1, 2)]
                if len(parts) % 2:
                    nxt.append(parts[-1])
                parts = nxt
            fc1 = jnp.maximum(parts[0] + bf1_ref[...], 0.0)             # (bt, 128)
            fc2 = jnp.maximum(
                jnp.dot(fc1[:, :nh0], wf2_ref[...],
                        preferred_element_type=jnp.float32) + bf2_ref[...], 0.0)
            o_ref[...] = (jnp.dot(fc2[:, :nh1], wf3_ref[...],
                                  preferred_element_type=jnp.float32)
                          + bf3_ref[...])

        return kernel, r0, r1, r2

    def forward(kp, x):
        B = x.shape[0]
        bt = min(B, batch_tile)
        nsteps = pl.cdiv(B, bt)
        bpad = nsteps * bt

        kernel, r0, r1, r2 = make_kernel(bt)

        xn = jnp.transpose(x, (0, 2, 3, 1)).astype(jnp.float32)        # NCHW -> NHWC
        xn = jnp.pad(xn, ((0, bpad - B), (1, 1), (1, 1), (0, 0)))      # batch + spatial pad
        x3 = xn.reshape(nsteps, r0, C0)

        out = pl.pallas_call(
            kernel,
            out_shape=jax.ShapeDtypeStruct((nsteps, bt, LANES), jnp.float32),
            grid=(nsteps,),
            in_specs=[
                pl.BlockSpec((None, r0, C0), lambda i: (i, 0, 0)),
                pl.BlockSpec((9 * C0, LANES), lambda i: (0, 0)),
                pl.BlockSpec((1, LANES), lambda i: (0, 0)),
                pl.BlockSpec((9 * C1, LANES), lambda i: (0, 0)),
                pl.BlockSpec((1, LANES), lambda i: (0, 0)),
                pl.BlockSpec((9 * C2, LANES), lambda i: (0, 0)),
                pl.BlockSpec((1, LANES), lambda i: (0, 0)),
                pl.BlockSpec((P3 * C3, LANES), lambda i: (0, 0)),
                pl.BlockSpec((1, LANES), lambda i: (0, 0)),
                pl.BlockSpec((nh0, LANES), lambda i: (0, 0)),
                pl.BlockSpec((1, LANES), lambda i: (0, 0)),
                pl.BlockSpec((nh1, LANES), lambda i: (0, 0)),
                pl.BlockSpec((1, LANES), lambda i: (0, 0)),
            ],
            out_specs=pl.BlockSpec((None, bt, LANES), lambda i: (i, 0, 0)),
            scratch_shapes=[
                pltpu.VMEM((r0, LANES), jnp.float32),   # shared stride-1 conv result
                pltpu.VMEM((r1, LANES), jnp.float32),   # padded conv1 activations
                pltpu.VMEM((r2, LANES), jnp.float32),   # padded conv2 activations
            ],
            compiler_params=pltpu.CompilerParams(
                dimension_semantics=("parallel",)),
        )(x3, kp["w1"], kp["b1"], kp["w2"], kp["b2"], kp["w3"], kp["b3"],
          kp["wf1"], kp["bf1"], kp["wf2"], kp["bf2"], kp["wf3"], kp["bf3"])

        return out.reshape(bpad, LANES)[:B, :n_actions]

    return jax.jit(forward)


# ---------------------------------------------------------------------------
# One-time parameter preparation (matmul-ready, lane-padded to 128)
# ---------------------------------------------------------------------------
def prepare_params(params, C3, H3, W3):
    def pad_lanes(a):
        return jnp.pad(a, [(0, 0)] * (a.ndim - 1) + [(0, LANES - a.shape[-1])])

    def conv_mat(w):   # OIHW (Cout, Cin, 3, 3) -> (9*Cin, 128); rows (di, dj, ci)
        co, ci, kh, kw = w.shape
        return pad_lanes(jnp.transpose(w, (2, 3, 1, 0)).reshape(kh * kw * ci, co))

    f1 = params["f1_w"]                               # (nh0, C3*H3*W3), flatten (c,h,w)
    nh0 = f1.shape[0]
    wf1 = jnp.transpose(f1.reshape(nh0, C3, H3, W3),
                        (2, 3, 1, 0)).reshape(H3 * W3 * C3, nh0)   # rows (h, w, c)
    return {
        "w1": conv_mat(params["c1_w"]), "b1": pad_lanes(params["c1_b"].reshape(1, -1)),
        "w2": conv_mat(params["c2_w"]), "b2": pad_lanes(params["c2_b"].reshape(1, -1)),
        "w3": conv_mat(params["c3_w"]), "b3": pad_lanes(params["c3_b"].reshape(1, -1)),
        "wf1": pad_lanes(wf1), "bf1": pad_lanes(params["f1_b"].reshape(1, -1)),
        "wf2": pad_lanes(params["f2_w"].T), "bf2": pad_lanes(params["f2_b"].reshape(1, -1)),
        "wf3": pad_lanes(params["f3_w"].T), "bf3": pad_lanes(params["f3_b"].reshape(1, -1)),
    }


# ---------------------------------------------------------------------------
# Parameter construction (deterministic, synthetic, PyTorch layouts)
# ---------------------------------------------------------------------------
def init_params(key, in_ch, n_units, filter_size, nel, n_hid, n_actions):
    ks = jax.random.split(key, 12)

    def conv_w(k, cout, cin, ksz):
        scale = 1.0 / np.sqrt(cin * ksz * ksz)
        return jax.random.uniform(k, (cout, cin, ksz, ksz), jnp.float32, -scale, scale)

    def vec(k, n, fan_in):
        scale = 1.0 / np.sqrt(fan_in)
        return jax.random.uniform(k, (n,), jnp.float32, -scale, scale)

    def lin_w(k, out_f, in_f):
        scale = 1.0 / np.sqrt(in_f)
        return jax.random.uniform(k, (out_f, in_f), jnp.float32, -scale, scale)

    return {
        "c1_w": conv_w(ks[0], n_units[0], in_ch, filter_size[0]),
        "c1_b": vec(ks[1], n_units[0], in_ch * filter_size[0] ** 2),
        "c2_w": conv_w(ks[2], n_units[1], n_units[0], filter_size[1]),
        "c2_b": vec(ks[3], n_units[1], n_units[0] * filter_size[1] ** 2),
        "c3_w": conv_w(ks[4], n_units[2], n_units[1], filter_size[2]),
        "c3_b": vec(ks[5], n_units[2], n_units[1] * filter_size[2] ** 2),
        "f1_w": lin_w(ks[6], n_hid[0], nel),
        "f1_b": vec(ks[7], n_hid[0], nel),
        "f2_w": lin_w(ks[8], n_hid[1], n_hid[0]),
        "f2_b": vec(ks[9], n_hid[1], n_hid[0]),
        "f3_w": lin_w(ks[10], n_actions, n_hid[1]),
        "f3_b": vec(ks[11], n_actions, n_hid[1]),
    }


# ---------------------------------------------------------------------------
# Pure-JAX reference (PyTorch semantics) for the correctness check
# ---------------------------------------------------------------------------
def convnet_reference(params, x, filter_stride):
    def conv(x, w, b, s):
        y = lax.conv_general_dilated(
            x, w, window_strides=(s, s), padding=((1, 1), (1, 1)),
            dimension_numbers=("NCHW", "OIHW", "NCHW"))
        return jnp.maximum(y + b[None, :, None, None], 0.0)

    B = x.shape[0]
    x = conv(x, params["c1_w"], params["c1_b"], filter_stride[0])
    x = conv(x, params["c2_w"], params["c2_b"], filter_stride[1])
    x = conv(x, params["c3_w"], params["c3_b"], filter_stride[2])
    x = x.reshape(B, -1)                              # nn.Flatten (NCHW order)
    x = jnp.maximum(x @ params["f1_w"].T + params["f1_b"], 0.0)
    x = jnp.maximum(x @ params["f2_w"].T + params["f2_b"], 0.0)
    x = x @ params["f3_w"].T + params["f3_b"]
    return x


# ---------------------------------------------------------------------------
if __name__ == "__main__":
    # Module hyper-parameters (small, consistent with ConvNet.__init__)
    input_dims = (16, 16)
    hist_len, ncols = 4, 1                 # in_channels = hist_len * ncols = 4
    n_units = [8, 16, 16]
    filter_size = [3, 3, 3]
    filter_stride = [2, 2, 1]
    n_hid = [32, 32]
    n_actions = 6
    batch = 2

    in_ch = hist_len * ncols
    H, W = input_dims
    h1, w1 = conv_out_hw(H, W, filter_stride[0])
    h2, w2 = conv_out_hw(h1, w1, filter_stride[1])
    h3, w3 = conv_out_hw(h2, w2, filter_stride[2])
    nel = n_units[2] * h3 * w3             # matches the module's nel (= 256)

    key = jax.random.PRNGKey(0)
    pkey, xkey = jax.random.split(key)
    params = init_params(pkey, in_ch, n_units, filter_size, nel, n_hid, n_actions)
    x = jax.random.normal(xkey, (batch, in_ch, H, W), jnp.float32)

    kparams = prepare_params(params, n_units[2], h3, w3)   # pre-transposed + lane-padded once
    forward = make_forward(in_ch, n_units, filter_size, filter_stride,
                           input_dims, n_hid, n_actions, batch_tile=8)

    out = jax.block_until_ready(forward(kparams, x))
    assert out.shape == (batch, n_actions), out.shape

    ref = jax.block_until_ready(convnet_reference(params, x, filter_stride))
    np.testing.assert_allclose(np.asarray(out), np.asarray(ref),
                               rtol=2e-4, atol=2e-4)

    print("KERNEL_OK")
</pallas_src>

<mosaic_0001>
module attributes {stable_mosaic.version = 11 : i64} {
  func.func @kernel(%arg0: i32, %arg1: memref<1x648x4xf32, #tpu.memory_space<vmem>>, %arg2: memref<36x128xf32, #tpu.memory_space<vmem>>, %arg3: memref<1x128xf32, #tpu.memory_space<vmem>>, %arg4: memref<72x128xf32, #tpu.memory_space<vmem>>, %arg5: memref<1x128xf32, #tpu.memory_space<vmem>>, %arg6: memref<144x128xf32, #tpu.memory_space<vmem>>, %arg7: memref<1x128xf32, #tpu.memory_space<vmem>>, %arg8: memref<256x128xf32, #tpu.memory_space<vmem>>, %arg9: memref<1x128xf32, #tpu.memory_space<vmem>>, %arg10: memref<32x128xf32, #tpu.memory_space<vmem>>, %arg11: memref<1x128xf32, #tpu.memory_space<vmem>>, %arg12: memref<32x128xf32, #tpu.memory_space<vmem>>, %arg13: memref<1x128xf32, #tpu.memory_space<vmem>>, %arg14: memref<1x2x128xf32, #tpu.memory_space<vmem>>, %arg15: memref<648x128xf32, #tpu.memory_space<vmem>>, %arg16: memref<200x128xf32, #tpu.memory_space<vmem>>, %arg17: memref<72x128xf32, #tpu.memory_space<vmem>>) attributes {dimension_semantics = [#tpu.dimension_semantics<parallel>], iteration_bounds = array<i64: 1>, scalar_prefetch = 0 : i64, scratch_operands = 3 : i64, tpu.core_type = #tpu.core_type<tc>, window_params = [{transform_indices = @transform_0, window_bounds = array<i64: 1, 648, 4>}, {pipeline_mode = #tpu.pipeline_mode<synchronous>, transform_indices = @transform_1, window_bounds = array<i64: 36, 128>}, {pipeline_mode = #tpu.pipeline_mode<synchronous>, transform_indices = @transform_2, window_bounds = array<i64: 1, 128>}, {pipeline_mode = #tpu.pipeline_mode<synchronous>, transform_indices = @transform_3, window_bounds = array<i64: 72, 128>}, {pipeline_mode = #tpu.pipeline_mode<synchronous>, transform_indices = @transform_4, window_bounds = array<i64: 1, 128>}, {pipeline_mode = #tpu.pipeline_mode<synchronous>, transform_indices = @transform_5, window_bounds = array<i64: 144, 128>}, {pipeline_mode = #tpu.pipeline_mode<synchronous>, transform_indices = @transform_6, window_bounds = array<i64: 1, 128>}, {pipeline_mode = #tpu.pipeline_mode<synchronous>, transform_indices = @transform_7, window_bounds = array<i64: 256, 128>}, {pipeline_mode = #tpu.pipeline_mode<synchronous>, transform_indices = @transform_8, window_bounds = array<i64: 1, 128>}, {pipeline_mode = #tpu.pipeline_mode<synchronous>, transform_indices = @transform_9, window_bounds = array<i64: 32, 128>}, {pipeline_mode = #tpu.pipeline_mode<synchronous>, transform_indices = @transform_10, window_bounds = array<i64: 1, 128>}, {pipeline_mode = #tpu.pipeline_mode<synchronous>, transform_indices = @transform_11, window_bounds = array<i64: 32, 128>}, {pipeline_mode = #tpu.pipeline_mode<synchronous>, transform_indices = @transform_12, window_bounds = array<i64: 1, 128>}, {transform_indices = @transform_13, window_bounds = array<i64: 1, 2, 128>}]} {
    %c0 = arith.constant 0 : index
    %c0_0 = arith.constant 0 : index
    %0 = vector.load %arg3[%c0, %c0_0] : memref<1x128xf32, #tpu.memory_space<vmem>>, vector<1x128xf32>
    %c0_1 = arith.constant 0 : index
    %c0_2 = arith.constant 0 : index
    %c0_3 = arith.constant 0 : index
    %1 = vector.load %arg1[%c0_1, %c0_2, %c0_3] : memref<1x648x4xf32, #tpu.memory_space<vmem>>, vector<1x128x4xf32>
    %2 = vector.shape_cast %1 : vector<1x128x4xf32> to vector<128x4xf32>
    %c0_4 = arith.constant 0 : index
    %c0_5 = arith.constant 0 : index
    %3 = vector.load %arg2[%c0_4, %c0_5] : memref<36x128xf32, #tpu.memory_space<vmem>>, vector<4x128xf32>
    %cst = arith.constant dense<0.000000e+00> : vector<128x128xf32>
    %4 = tpu.matmul %2, %3, %cst {dimension_numbers = #tpu.dot_dimension_numbers<[1], [0], [0], [1], [0, 0, 1, 1], [], []>} : vector<128x4xf32>, vector<4x128xf32>, vector<128x128xf32> -> vector<128x128xf32>
    %c0_6 = arith.constant 0 : index
    %c1 = arith.constant 1 : index
    %c0_7 = arith.constant 0 : index
    %5 = vector.load %arg1[%c0_6, %c1, %c0_7] : memref<1x648x4xf32, #tpu.memory_space<vmem>>, vector<1x128x4xf32>
    %6 = vector.shape_cast %5 : vector<1x128x4xf32> to vector<128x4xf32>
    %c4 = arith.constant 4 : index
    %c0_8 = arith.constant 0 : index
    %7 = vector.load %arg2[%c4, %c0_8] : memref<36x128xf32, #tpu.memory_space<vmem>>, vector<4x128xf32>
    %cst_9 = arith.constant dense<0.000000e+00> : vector<128x128xf32>
    %8 = tpu.matmul %6, %7, %cst_9 {dimension_numbers = #tpu.dot_dimension_numbers<[1], [0], [0], [1], [0, 0, 1, 1], [], []>} : vector<128x4xf32>, vector<4x128xf32>, vector<128x128xf32> -> vector<128x128xf32>
    %9 = arith.addf %4, %8 : vector<128x128xf32>
    %c0_10 = arith.constant 0 : index
    %c2 = arith.constant 2 : index
    %c0_11 = arith.constant 0 : index
    %10 = vector.load %arg1[%c0_10, %c2, %c0_11] : memref<1x648x4xf32, #tpu.memory_space<vmem>>, vector<1x128x4xf32>
    %11 = vector.shape_cast %10 : vector<1x128x4xf32> to vector<128x4xf32>
    %c8 = arith.constant 8 : index
    %c0_12 = arith.constant 0 : index
    %12 = vector.load %arg2[%c8, %c0_12] : memref<36x128xf32, #tpu.memory_space<vmem>>, vector<4x128xf32>
    %cst_13 = arith.constant dense<0.000000e+00> : vector<128x128xf32>
    %13 = tpu.matmul %11, %12, %cst_13 {dimension_numbers = #tpu.dot_dimension_numbers<[1], [0], [0], [1], [0, 0, 1, 1], [], []>} : vector<128x4xf32>, vector<4x128xf32>, vector<128x128xf32> -> vector<128x128xf32>
    %14 = arith.addf %9, %13 : vector<128x128xf32>
    %c0_14 = arith.constant 0 : index
    %c18 = arith.constant 18 : index
    %c0_15 = arith.constant 0 : index
    %15 = vector.load %arg1[%c0_14, %c18, %c0_15] : memref<1x648x4xf32, #tpu.memory_space<vmem>>, vector<1x128x4xf32>
    %16 = vector.shape_cast %15 : vector<1x128x4xf32> to vector<128x4xf32>
    %c12 = arith.constant 12 : index
    %c0_16 = arith.constant 0 : index
    %17 = vector.load %arg2[%c12, %c0_16] : memref<36x128xf32, #tpu.memory_space<vmem>>, vector<4x128xf32>
    %cst_17 = arith.constant dense<0.000000e+00> : vector<128x128xf32>
    %18 = tpu.matmul %16, %17, %cst_17 {dimension_numbers = #tpu.dot_dimension_numbers<[1], [0], [0], [1], [0, 0, 1, 1], [], []>} : vector<128x4xf32>, vector<4x128xf32>, vector<128x128xf32> -> vector<128x128xf32>
    %19 = arith.addf %14, %18 : vector<128x128xf32>
    %c0_18 = arith.constant 0 : index
    %c19 = arith.constant 19 : index
    %c0_19 = arith.constant 0 : index
    %20 = vector.load %arg1[%c0_18, %c19, %c0_19] : memref<1x648x4xf32, #tpu.memory_space<vmem>>, vector<1x128x4xf32>
    %21 = vector.shape_cast %20 : vector<1x128x4xf32> to vector<128x4xf32>
    %c16 = arith.constant 16 : index
    %c0_20 = arith.constant 0 : index
    %22 = vector.load %arg2[%c16, %c0_20] : memref<36x128xf32, #tpu.memory_space<vmem>>, vector<4x128xf32>
    %cst_21 = arith.constant dense<0.000000e+00> : vector<128x128xf32>
    %23 = tpu.matmul %21, %22, %cst_21 {dimension_numbers = #tpu.dot_dimension_numbers<[1], [0], [0], [1], [0, 0, 1, 1], [], []>} : vector<128x4xf32>, vector<4x128xf32>, vector<128x128xf32> -> vector<128x128xf32>
    %24 = arith.addf %19, %23 : vector<128x128xf32>
    %c0_22 = arith.constant 0 : index
    %c20 = arith.constant 20 : index
    %c0_23 = arith.constant 0 : index
    %25 = vector.load %arg1[%c0_22, %c20, %c0_23] : memref<1x648x4xf32, #tpu.memory_space<vmem>>, vector<1x128x4xf32>
    %26 = vector.shape_cast %25 : vector<1x128x4xf32> to vector<128x4xf32>
    %c20_24 = arith.constant 20 : index
    %c0_25 = arith.constant 0 : index
    %27 = vector.load %arg2[%c20_24, %c0_25] : memref<36x128xf32, #tpu.memory_space<vmem>>, vector<4x128xf32>
    %cst_26 = arith.constant dense<0.000000e+00> : vector<128x128xf32>
    %28 = tpu.matmul %26, %27, %cst_26 {dimension_numbers = #tpu.dot_dimension_numbers<[1], [0], [0], [1], [0, 0, 1, 1], [], []>} : vector<128x4xf32>, vector<4x128xf32>, vector<128x128xf32> -> vector<128x128xf32>
    %29 = arith.addf %24, %28 : vector<128x128xf32>
    %c0_27 = arith.constant 0 : index
    %c36 = arith.constant 36 : index
    %c0_28 = arith.constant 0 : index
    %30 = vector.load %arg1[%c0_27, %c36, %c0_28] : memref<1x648x4xf32, #tpu.memory_space<vmem>>, vector<1x128x4xf32>
    %31 = vector.shape_cast %30 : vector<1x128x4xf32> to vector<128x4xf32>
    %c24 = arith.constant 24 : index
    %c0_29 = arith.constant 0 : index
    %32 = vector.load %arg2[%c24, %c0_29] : memref<36x128xf32, #tpu.memory_space<vmem>>, vector<4x128xf32>
    %cst_30 = arith.constant dense<0.000000e+00> : vector<128x128xf32>
    %33 = tpu.matmul %31, %32, %cst_30 {dimension_numbers = #tpu.dot_dimension_numbers<[1], [0], [0], [1], [0, 0, 1, 1], [], []>} : vector<128x4xf32>, vector<4x128xf32>, vector<128x128xf32> -> vector<128x128xf32>
    %34 = arith.addf %29, %33 : vector<128x128xf32>
    %c0_31 = arith.constant 0 : index
    %c37 = arith.constant 37 : index
    %c0_32 = arith.constant 0 : index
    %35 = vector.load %arg1[%c0_31, %c37, %c0_32] : memref<1x648x4xf32, #tpu.memory_space<vmem>>, vector<1x128x4xf32>
    %36 = vector.shape_cast %35 : vector<1x128x4xf32> to vector<128x4xf32>
    %c28 = arith.constant 28 : index
    %c0_33 = arith.constant 0 : index
    %37 = vector.load %arg2[%c28, %c0_33] : memref<36x128xf32, #tpu.memory_space<vmem>>, vector<4x128xf32>
    %cst_34 = arith.constant dense<0.000000e+00> : vector<128x128xf32>
    %38 = tpu.matmul %36, %37, %cst_34 {dimension_numbers = #tpu.dot_dimension_numbers<[1], [0], [0], [1], [0, 0, 1, 1], [], []>} : vector<128x4xf32>, vector<4x128xf32>, vector<128x128xf32> -> vector<128x128xf32>
    %39 = arith.addf %34, %38 : vector<128x128xf32>
    %c0_35 = arith.constant 0 : index
    %c38 = arith.constant 38 : index
    %c0_36 = arith.constant 0 : index
    %40 = vector.load %arg1[%c0_35, %c38, %c0_36] : memref<1x648x4xf32, #tpu.memory_space<vmem>>, vector<1x128x4xf32>
    %41 = vector.shape_cast %40 : vector<1x128x4xf32> to vector<128x4xf32>
    %c32 = arith.constant 32 : index
    %c0_37 = arith.constant 0 : index
    %42 = vector.load %arg2[%c32, %c0_37] : memref<36x128xf32, #tpu.memory_space<vmem>>, vector<4x128xf32>
    %cst_38 = arith.constant dense<0.000000e+00> : vector<128x128xf32>
    %43 = tpu.matmul %41, %42, %cst_38 {dimension_numbers = #tpu.dot_dimension_numbers<[1], [0], [0], [1], [0, 0, 1, 1], [], []>} : vector<128x4xf32>, vector<4x128xf32>, vector<128x128xf32> -> vector<128x128xf32>
    %44 = arith.addf %39, %43 : vector<128x128xf32>
    %45 = vector.broadcast %0 : vector<1x128xf32> to vector<128x128xf32>
    %46 = arith.addf %44, %45 : vector<128x128xf32>
    %cst_39 = arith.constant 0.000000e+00 : f32
    %47 = vector.broadcast %cst_39 : f32 to vector<128x128xf32>
    %48 = arith.maximumf %46, %47 : vector<128x128xf32>
    %c0_40 = arith.constant 0 : index
    %c0_41 = arith.constant 0 : index
    %49 = vector.load %arg15[%c0_40, %c0_41] : memref<648x128xf32, #tpu.memory_space<vmem>>, vector<128x128xf32>
    tpu.vector_store %arg15[%c0_40, %c0_41], %48 {strides = array<i32>} : memref<648x128xf32, #tpu.memory_space<vmem>>, vector<128x128xf32>,
    %c0_42 = arith.constant 0 : index
    %c128 = arith.constant 128 : index
    %c0_43 = arith.constant 0 : index
    %50 = vector.load %arg1[%c0_42, %c128, %c0_43] : memref<1x648x4xf32, #tpu.memory_space<vmem>>, vector<1x128x4xf32>
    %51 = vector.shape_cast %50 : vector<1x128x4xf32> to vector<128x4xf32>
    %c0_44 = arith.constant 0 : index
    %c0_45 = arith.constant 0 : index
    %52 = vector.load %arg2[%c0_44, %c0_45] : memref<36x128xf32, #tpu.memory_space<vmem>>, vector<4x128xf32>
    %cst_46 = arith.constant dense<0.000000e+00> : vector<128x128xf32>
    %53 = tpu.matmul %51, %52, %cst_46 {dimension_numbers = #tpu.dot_dimension_numbers<[1], [0], [0], [1], [0, 0, 1, 1], [], []>} : vector<128x4xf32>, vector<4x128xf32>, vector<128x128xf32> -> vector<128x128xf32>
    %c0_47 = arith.constant 0 : index
    %c129 = arith.constant 129 : index
    %c0_48 = arith.constant 0 : index
    %54 = vector.load %arg1[%c0_47, %c129, %c0_48] : memref<1x648x4xf32, #tpu.memory_space<vmem>>, vector<1x128x4xf32>
    %55 = vector.shape_cast %54 : vector<1x128x4xf32> to vector<128x4xf32>
    %c4_49 = arith.constant 4 : index
    %c0_50 = arith.constant 0 : index
    %56 = vector.load %arg2[%c4_49, %c0_50] : memref<36x128xf32, #tpu.memory_space<vmem>>, vector<4x128xf32>
    %cst_51 = arith.constant dense<0.000000e+00> : vector<128x128xf32>
    %57 = tpu.matmul %55, %56, %cst_51 {dimension_numbers = #tpu.dot_dimension_numbers<[1], [0], [0], [1], [0, 0, 1, 1], [], []>} : vector<128x4xf32>, vector<4x128xf32>, vector<128x128xf32> -> vector<128x128xf32>
    %58 = arith.addf %53, %57 : vector<128x128xf32>
    %c0_52 = arith.constant 0 : index
    %c130 = arith.constant 130 : index
    %c0_53 = arith.constant 0 : index
    %59 = vector.load %arg1[%c0_52, %c130, %c0_53] : memref<1x648x4xf32, #tpu.memory_space<vmem>>, vector<1x128x4xf32>
    %60 = vector.shape_cast %59 : vector<1x128x4xf32> to vector<128x4xf32>
    %c8_54 = arith.constant 8 : index
    %c0_55 = arith.constant 0 : index
    %61 = vector.load %arg2[%c8_54, %c0_55] : memref<36x128xf32, #tpu.memory_space<vmem>>, vector<4x128xf32>
    %cst_56 = arith.constant dense<0.000000e+00> : vector<128x128xf32>
    %62 = tpu.matmul %60, %61, %cst_56 {dimension_numbers = #tpu.dot_dimension_numbers<[1], [0], [0], [1], [0, 0, 1, 1], [], []>} : vector<128x4xf32>, vector<4x128xf32>, vector<128x128xf32> -> vector<128x128xf32>
    %63 = arith.addf %58, %62 : vector<128x128xf32>
    %c0_57 = arith.constant 0 : index
    %c146 = arith.constant 146 : index
    %c0_58 = arith.constant 0 : index
    %64 = vector.load %arg1[%c0_57, %c146, %c0_58] : memref<1x648x4xf32, #tpu.memory_space<vmem>>, vector<1x128x4xf32>
    %65 = vector.shape_cast %64 : vector<1x128x4xf32> to vector<128x4xf32>
    %c12_59 = arith.constant 12 : index
    %c0_60 = arith.constant 0 : index
    %66 = vector.load %arg2[%c12_59, %c0_60] : memref<36x128xf32, #tpu.memory_space<vmem>>, vector<4x128xf32>
    %cst_61 = arith.constant dense<0.000000e+00> : vector<128x128xf32>
    %67 = tpu.matmul %65, %66, %cst_61 {dimension_numbers = #tpu.dot_dimension_numbers<[1], [0], [0], [1], [0, 0, 1, 1], [], []>} : vector<128x4xf32>, vector<4x128xf32>, vector<128x128xf32> -> vector<128x128xf32>
    %68 = arith.addf %63, %67 : vector<128x128xf32>
    %c0_62 = arith.constant 0 : index
    %c147 = arith.constant 147 : index
    %c0_63 = arith.constant 0 : index
    %69 = vector.load %arg1[%c0_62, %c147, %c0_63] : memref<1x648x4xf32, #tpu.memory_space<vmem>>, vector<1x128x4xf32>
    %70 = vector.shape_cast %69 : vector<1x128x4xf32> to vector<128x4xf32>
    %c16_64 = arith.constant 16 : index
    %c0_65 = arith.constant 0 : index
    %71 = vector.load %arg2[%c16_64, %c0_65] : memref<36x128xf32, #tpu.memory_space<vmem>>, vector<4x128xf32>
    %cst_66 = arith.constant dense<0.000000e+00> : vector<128x128xf32>
    %72 = tpu.matmul %70, %71, %cst_66 {dimension_numbers = #tpu.dot_dimension_numbers<[1], [0], [0], [1], [0, 0, 1, 1], [], []>} : vector<128x4xf32>, vector<4x128xf32>, vector<128x128xf32> -> vector<128x128xf32>
    %73 = arith.addf %68, %72 : vector<128x128xf32>
    %c0_67 = arith.constant 0 : index
    %c148 = arith.constant 148 : index
    %c0_68 = arith.constant 0 : index
    %74 = vector.load %arg1[%c0_67, %c148, %c0_68] : memref<1x648x4xf32, #tpu.memory_space<vmem>>, vector<1x128x4xf32>
    %75 = vector.shape_cast %74 : vector<1x128x4xf32> to vector<128x4xf32>
    %c20_69 = arith.constant 20 : index
    %c0_70 = arith.constant 0 : index
    %76 = vector.load %arg2[%c20_69, %c0_70] : memref<36x128xf32, #tpu.memory_space<vmem>>, vector<4x128xf32>
    %cst_71 = arith.constant dense<0.000000e+00> : vector<128x128xf32>
    %77 = tpu.matmul %75, %76, %cst_71 {dimension_numbers = #tpu.dot_dimension_numbers<[1], [0], [0], [1], [0, 0, 1, 1], [], []>} : vector<128x4xf32>, vector<4x128xf32>, vector<128x128xf32> -> vector<128x128xf32>
    %78 = arith.addf %73, %77 : vector<128x128xf32>
    %c0_72 = arith.constant 0 : index
    %c164 = arith.constant 164 : index
    %c0_73 = arith.constant 0 : index
    %79 = vector.load %arg1[%c0_72, %c164, %c0_73] : memref<1x648x4xf32, #tpu.memory_space<vmem>>, vector<1x128x4xf32>
    %80 = vector.shape_cast %79 : vector<1x128x4xf32> to vector<128x4xf32>
    %c24_74 = arith.constant 24 : index
    %c0_75 = arith.constant 0 : index
    %81 = vector.load %arg2[%c24_74, %c0_75] : memref<36x128xf32, #tpu.memory_space<vmem>>, vector<4x128xf32>
    %cst_76 = arith.constant dense<0.000000e+00> : vector<128x128xf32>
    %82 = tpu.matmul %80, %81, %cst_76 {dimension_numbers = #tpu.dot_dimension_numbers<[1], [0], [0], [1], [0, 0, 1, 1], [], []>} : vector<128x4xf32>, vector<4x128xf32>, vector<128x128xf32> -> vector<128x128xf32>
    %83 = arith.addf %78, %82 : vector<128x128xf32>
    %c0_77 = arith.constant 0 : index
    %c165 = arith.constant 165 : index
    %c0_78 = arith.constant 0 : index
    %84 = vector.load %arg1[%c0_77, %c165, %c0_78] : memref<1x648x4xf32, #tpu.memory_space<vmem>>, vector<1x128x4xf32>
    %85 = vector.shape_cast %84 : vector<1x128x4xf32> to vector<128x4xf32>
    %c28_79 = arith.constant 28 : index
    %c0_80 = arith.constant 0 : index
    %86 = vector.load %arg2[%c28_79, %c0_80] : memref<36x128xf32, #tpu.memory_space<vmem>>, vector<4x128xf32>
    %cst_81 = arith.constant dense<0.000000e+00> : vector<128x128xf32>
    %87 = tpu.matmul %85, %86, %cst_81 {dimension_numbers = #tpu.dot_dimension_numbers<[1], [0], [0], [1], [0, 0, 1, 1], [], []>} : vector<128x4xf32>, vector<4x128xf32>, vector<128x128xf32> -> vector<128x128xf32>
    %88 = arith.addf %83, %87 : vector<128x128xf32>
    %c0_82 = arith.constant 0 : index
    %c166 = arith.constant 166 : index
    %c0_83 = arith.constant 0 : index
    %89 = vector.load %arg1[%c0_82, %c166, %c0_83] : memref<1x648x4xf32, #tpu.memory_space<vmem>>, vector<1x128x4xf32>
    %90 = vector.shape_cast %89 : vector<1x128x4xf32> to vector<128x4xf32>
    %c32_84 = arith.constant 32 : index
    %c0_85 = arith.constant 0 : index
    %91 = vector.load %arg2[%c32_84, %c0_85] : memref<36x128xf32, #tpu.memory_space<vmem>>, vector<4x128xf32>
    %cst_86 = arith.constant dense<0.000000e+00> : vector<128x128xf32>
    %92 = tpu.matmul %90, %91, %cst_86 {dimension_numbers = #tpu.dot_dimension_numbers<[1], [0], [0], [1], [0, 0, 1, 1], [], []>} : vector<128x4xf32>, vector<4x128xf32>, vector<128x128xf32> -> vector<128x128xf32>
    %93 = arith.addf %88, %92 : vector<128x128xf32>
    %94 = vector.broadcast %0 : vector<1x128xf32> to vector<128x128xf32>
    %95 = arith.addf %93, %94 : vector<128x128xf32>
    %cst_87 = arith.constant 0.000000e+00 : f32
    %96 = vector.broadcast %cst_87 : f32 to vector<128x128xf32>
    %97 = arith.maximumf %95, %96 : vector<128x128xf32>
    %c128_88 = arith.constant 128 : index
    %c0_89 = arith.constant 0 : index
    %98 = vector.load %arg15[%c128_88, %c0_89] : memref<648x128xf32, #tpu.memory_space<vmem>>, vector<128x128xf32>
    tpu.vector_store %arg15[%c128_88, %c0_89], %97 {strides = array<i32>} : memref<648x128xf32, #tpu.memory_space<vmem>>, vector<128x128xf32>,
    %c0_90 = arith.constant 0 : index
    %c256 = arith.constant 256 : index
    %c0_91 = arith.constant 0 : index
    %99 = vector.load %arg1[%c0_90, %c256, %c0_91] : memref<1x648x4xf32, #tpu.memory_space<vmem>>, vector<1x128x4xf32>
    %100 = vector.shape_cast %99 : vector<1x128x4xf32> to vector<128x4xf32>
    %c0_92 = arith.constant 0 : index
    %c0_93 = arith.constant 0 : index
    %101 = vector.load %arg2[%c0_92, %c0_93] : memref<36x128xf32, #tpu.memory_space<vmem>>, vector<4x128xf32>
    %cst_94 = arith.constant dense<0.000000e+00> : vector<128x128xf32>
    %102 = tpu.matmul %100, %101, %cst_94 {dimension_numbers = #tpu.dot_dimension_numbers<[1], [0], [0], [1], [0, 0, 1, 1], [], []>} : vector<128x4xf32>, vector<4x128xf32>, vector<128x128xf32> -> vector<128x128xf32>
    %c0_95 = arith.constant 0 : index
    %c257 = arith.constant 257 : index
    %c0_96 = arith.constant 0 : index
    %103 = vector.load %arg1[%c0_95, %c257, %c0_96] : memref<1x648x4xf32, #tpu.memory_space<vmem>>, vector<1x128x4xf32>
    %104 = vector.shape_cast %103 : vector<1x128x4xf32> to vector<128x4xf32>
    %c4_97 = arith.constant 4 : index
    %c0_98 = arith.constant 0 : index
    %105 = vector.load %arg2[%c4_97, %c0_98] : memref<36x128xf32, #tpu.memory_space<vmem>>, vector<4x128xf32>
    %cst_99 = arith.constant dense<0.000000e+00> : vector<128x128xf32>
    %106 = tpu.matmul %104, %105, %cst_99 {dimension_numbers = #tpu.dot_dimension_numbers<[1], [0], [0], [1], [0, 0, 1, 1], [], []>} : vector<128x4xf32>, vector<4x128xf32>, vector<128x128xf32> -> vector<128x128xf32>
    %107 = arith.addf %102, %106 : vector<128x128xf32>
    %c0_100 = arith.constant 0 : index
    %c258 = arith.constant 258 : index
    %c0_101 = arith.constant 0 : index
    %108 = vector.load %arg1[%c0_100, %c258, %c0_101] : memref<1x648x4xf32, #tpu.memory_space<vmem>>, vector<1x128x4xf32>
    %109 = vector.shape_cast %108 : vector<1x128x4xf32> to vector<128x4xf32>
    %c8_102 = arith.constant 8 : index
    %c0_103 = arith.constant 0 : index
    %110 = vector.load %arg2[%c8_102, %c0_103] : memref<36x128xf32, #tpu.memory_space<vmem>>, vector<4x128xf32>
    %cst_104 = arith.constant dense<0.000000e+00> : vector<128x128xf32>
    %111 = tpu.matmul %109, %110, %cst_104 {dimension_numbers = #tpu.dot_dimension_numbers<[1], [0], [0], [1], [0, 0, 1, 1], [], []>} : vector<128x4xf32>, vector<4x128xf32>, vector<128x128xf32> -> vector<128x128xf32>
    %112 = arith.addf %107, %111 : vector<128x128xf32>
    %c0_105 = arith.constant 0 : index
    %c274 = arith.constant 274 : index
    %c0_106 = arith.constant 0 : index
    %113 = vector.load %arg1[%c0_105, %c274, %c0_106] : memref<1x648x4xf32, #tpu.memory_space<vmem>>, vector<1x128x4xf32>
    %114 = vector.shape_cast %113 : vector<1x128x4xf32> to vector<128x4xf32>
    %c12_107 = arith.constant 12 : index
    %c0_108 = arith.constant 0 : index
    %115 = vector.load %arg2[%c12_107, %c0_108] : memref<36x128xf32, #tpu.memory_space<vmem>>, vector<4x128xf32>
    %cst_109 = arith.constant dense<0.000000e+00> : vector<128x128xf32>
    %116 = tpu.matmul %114, %115, %cst_109 {dimension_numbers = #tpu.dot_dimension_numbers<[1], [0], [0], [1], [0, 0, 1, 1], [], []>} : vector<128x4xf32>, vector<4x128xf32>, vector<128x128xf32> -> vector<128x128xf32>
    %117 = arith.addf %112, %116 : vector<128x128xf32>
    %c0_110 = arith.constant 0 : index
    %c275 = arith.constant 275 : index
    %c0_111 = arith.constant 0 : index
    %118 = vector.load %arg1[%c0_110, %c275, %c0_111] : memref<1x648x4xf32, #tpu.memory_space<vmem>>, vector<1x128x4xf32>
    %119 = vector.shape_cast %118 : vector<1x128x4xf32> to vector<128x4xf32>
    %c16_112 = arith.constant 16 : index
    %c0_113 = arith.constant 0 : index
    %120 = vector.load %arg2[%c16_112, %c0_113] : memref<36x128xf32, #tpu.memory_space<vmem>>, vector<4x128xf32>
    %cst_114 = arith.constant dense<0.000000e+00> : vector<128x128xf32>
    %121 = tpu.matmul %119, %120, %cst_114 {dimension_numbers = #tpu.dot_dimension_numbers<[1], [0], [0], [1], [0, 0, 1, 1], [], []>} : vector<128x4xf32>, vector<4x128xf32>, vector<128x128xf32> -> vector<128x128xf32>
    %122 = arith.addf %117, %121 : vector<128x128xf32>
    %c0_115 = arith.constant 0 : index
    %c276 = arith.constant 276 : index
    %c0_116 = arith.constant 0 : index
    %123 = vector.load %arg1[%c0_115, %c276, %c0_116] : memref<1x648x4xf32, #tpu.memory_space<vmem>>, vector<1x128x4xf32>
    %124 = vector.shape_cast %123 : vector<1x128x4xf32> to vector<128x4xf32>
    %c20_117 = arith.constant 20 : index
    %c0_118 = arith.constant 0 : index
    %125 = vector.load %arg2[%c20_117, %c0_118] : memref<36x128xf32, #tpu.memory_space<vmem>>, vector<4x128xf32>
    %cst_119 = arith.constant dense<0.000000e+00> : vector<128x128xf32>
    %126 = tpu.matmul %124, %125, %cst_119 {dimension_numbers = #tpu.dot_dimension_numbers<[1], [0], [0], [1], [0, 0, 1, 1], [], []>} : vector<128x4xf32>, vector<4x128xf32>, vector<128x128xf32> -> vector<128x128xf32>
    %127 = arith.addf %122, %126 : vector<128x128xf32>
    %c0_120 = arith.constant 0 : index
    %c292 = arith.constant 292 : index
    %c0_121 = arith.constant 0 : index
    %128 = vector.load %arg1[%c0_120, %c292, %c0_121] : memref<1x648x4xf32, #tpu.memory_space<vmem>>, vector<1x128x4xf32>
    %129 = vector.shape_cast %128 : vector<1x128x4xf32> to vector<128x4xf32>
    %c24_122 = arith.constant 24 : index
    %c0_123 = arith.constant 0 : index
    %130 = vector.load %arg2[%c24_122, %c0_123] : memref<36x128xf32, #tpu.memory_space<vmem>>, vector<4x128xf32>
    %cst_124 = arith.constant dense<0.000000e+00> : vector<128x128xf32>
    %131 = tpu.matmul %129, %130, %cst_124 {dimension_numbers = #tpu.dot_dimension_numbers<[1], [0], [0], [1], [0, 0, 1, 1], [], []>} : vector<128x4xf32>, vector<4x128xf32>, vector<128x128xf32> -> vector<128x128xf32>
    %132 = arith.addf %127, %131 : vector<128x128xf32>
    %c0_125 = arith.constant 0 : index
    %c293 = arith.constant 293 : index
    %c0_126 = arith.constant 0 : index
    %133 = vector.load %arg1[%c0_125, %c293, %c0_126] : memref<1x648x4xf32, #tpu.memory_space<vmem>>, vector<1x128x4xf32>
    %134 = vector.shape_cast %133 : vector<1x128x4xf32> to vector<128x4xf32>
    %c28_127 = arith.constant 28 : index
    %c0_128 = arith.constant 0 : index
    %135 = vector.load %arg2[%c28_127, %c0_128] : memref<36x128xf32, #tpu.memory_space<vmem>>, vector<4x128xf32>
    %cst_129 = arith.constant dense<0.000000e+00> : vector<128x128xf32>
    %136 = tpu.matmul %134, %135, %cst_129 {dimension_numbers = #tpu.dot_dimension_numbers<[1], [0], [0], [1], [0, 0, 1, 1], [], []>} : vector<128x4xf32>, vector<4x128xf32>, vector<128x128xf32> -> vector<128x128xf32>
    %137 = arith.addf %132, %136 : vector<128x128xf32>
    %c0_130 = arith.constant 0 : index
    %c294 = arith.constant 294 : index
    %c0_131 = arith.constant 0 : index
    %138 = vector.load %arg1[%c0_130, %c294, %c0_131] : memref<1x648x4xf32, #tpu.memory_space<vmem>>, vector<1x128x4xf32>
    %139 = vector.shape_cast %138 : vector<1x128x4xf32> to vector<128x4xf32>
    %c32_132 = arith.constant 32 : index
    %c0_133 = arith.constant 0 : index
    %140 = vector.load %arg2[%c32_132, %c0_133] : memref<36x128xf32, #tpu.memory_space<vmem>>, vector<4x128xf32>
    %cst_134 = arith.constant dense<0.000000e+00> : vector<128x128xf32>
    %141 = tpu.matmul %139, %140, %cst_134 {dimension_numbers = #tpu.dot_dimension_numbers<[1], [0], [0], [1], [0, 0, 1, 1], [], []>} : vector<128x4xf32>, vector<4x128xf32>, vector<128x128xf32> -> vector<128x128xf32>
    %142 = arith.addf %137, %141 : vector<128x128xf32>
    %143 = vector.broadcast %0 : vector<1x128xf32> to vector<128x128xf32>
    %144 = arith.addf %142, %143 : vector<128x128xf32>
    %cst_135 = arith.constant 0.000000e+00 : f32
    %145 = vector.broadcast %cst_135 : f32 to vector<128x128xf32>
    %146 = arith.maximumf %144, %145 : vector<128x128xf32>
    %c256_136 = arith.constant 256 : index
    %c0_137 = arith.constant 0 : index
    %147 = vector.load %arg15[%c256_136, %c0_137] : memref<648x128xf32, #tpu.memory_space<vmem>>, vector<128x128xf32>
    tpu.vector_store %arg15[%c256_136, %c0_137], %146 {strides = array<i32>} : memref<648x128xf32, #tpu.memory_space<vmem>>, vector<128x128xf32>,
    %c0_138 = arith.constant 0 : index
    %c384 = arith.constant 384 : index
    %c0_139 = arith.constant 0 : index
    %148 = vector.load %arg1[%c0_138, %c384, %c0_139] : memref<1x648x4xf32, #tpu.memory_space<vmem>>, vector<1x128x4xf32>
    %149 = vector.shape_cast %148 : vector<1x128x4xf32> to vector<128x4xf32>
    %c0_140 = arith.constant 0 : index
    %c0_141 = arith.constant 0 : index
    %150 = vector.load %arg2[%c0_140, %c0_141] : memref<36x128xf32, #tpu.memory_space<vmem>>, vector<4x128xf32>
    %cst_142 = arith.constant dense<0.000000e+00> : vector<128x128xf32>
    %151 = tpu.matmul %149, %150, %cst_142 {dimension_numbers = #tpu.dot_dimension_numbers<[1], [0], [0], [1], [0, 0, 1, 1], [], []>} : vector<128x4xf32>, vector<4x128xf32>, vector<128x128xf32> -> vector<128x128xf32>
    %c0_143 = arith.constant 0 : index
    %c385 = arith.constant 385 : index
    %c0_144 = arith.constant 0 : index
    %152 = vector.load %arg1[%c0_143, %c385, %c0_144] : memref<1x648x4xf32, #tpu.memory_space<vmem>>, vector<1x128x4xf32>
    %153 = vector.shape_cast %152 : vector<1x128x4xf32> to vector<128x4xf32>
    %c4_145 = arith.constant 4 : index
    %c0_146 = arith.constant 0 : index
    %154 = vector.load %arg2[%c4_145, %c0_146] : memref<36x128xf32, #tpu.memory_space<vmem>>, vector<4x128xf32>
    %cst_147 = arith.constant dense<0.000000e+00> : vector<128x128xf32>
    %155 = tpu.matmul %153, %154, %cst_147 {dimension_numbers = #tpu.dot_dimension_numbers<[1], [0], [0], [1], [0, 0, 1, 1], [], []>} : vector<128x4xf32>, vector<4x128xf32>, vector<128x128xf32> -> vector<128x128xf32>
    %156 = arith.addf %151, %155 : vector<128x128xf32>
    %c0_148 = arith.constant 0 : index
    %c386 = arith.constant 386 : index
    %c0_149 = arith.constant 0 : index
    %157 = vector.load %arg1[%c0_148, %c386, %c0_149] : memref<1x648x4xf32, #tpu.memory_space<vmem>>, vector<1x128x4xf32>
    %158 = vector.shape_cast %157 : vector<1x128x4xf32> to vector<128x4xf32>
    %c8_150 = arith.constant 8 : index
    %c0_151 = arith.constant 0 : index
    %159 = vector.load %arg2[%c8_150, %c0_151] : memref<36x128xf32, #tpu.memory_space<vmem>>, vector<4x128xf32>
    %cst_152 = arith.constant dense<0.000000e+00> : vector<128x128xf32>
    %160 = tpu.matmul %158, %159, %cst_152 {dimension_numbers = #tpu.dot_dimension_numbers<[1], [0], [0], [1], [0, 0, 1, 1], [], []>} : vector<128x4xf32>, vector<4x128xf32>, vector<128x128xf32> -> vector<128x128xf32>
    %161 = arith.addf %156, %160 : vector<128x128xf32>
    %c0_153 = arith.constant 0 : index
    %c402 = arith.constant 402 : index
    %c0_154 = arith.constant 0 : index
    %162 = vector.load %arg1[%c0_153, %c402, %c0_154] : memref<1x648x4xf32, #tpu.memory_space<vmem>>, vector<1x128x4xf32>
    %163 = vector.shape_cast %162 : vector<1x128x4xf32> to vector<128x4xf32>
    %c12_155 = arith.constant 12 : index
    %c0_156 = arith.constant 0 : index
    %164 = vector.load %arg2[%c12_155, %c0_156] : memref<36x128xf32, #tpu.memory_space<vmem>>, vector<4x128xf32>
    %cst_157 = arith.constant dense<0.000000e+00> : vector<128x128xf32>
    %165 = tpu.matmul %163, %164, %cst_157 {dimension_numbers = #tpu.dot_dimension_numbers<[1], [0], [0], [1], [0, 0, 1, 1], [], []>} : vector<128x4xf32>, vector<4x128xf32>, vector<128x128xf32> -> vector<128x128xf32>
    %166 = arith.addf %161, %165 : vector<128x128xf32>
    %c0_158 = arith.constant 0 : index
    %c403 = arith.constant 403 : index
    %c0_159 = arith.constant 0 : index
    %167 = vector.load %arg1[%c0_158, %c403, %c0_159] : memref<1x648x4xf32, #tpu.memory_space<vmem>>, vector<1x128x4xf32>
    %168 = vector.shape_cast %167 : vector<1x128x4xf32> to vector<128x4xf32>
    %c16_160 = arith.constant 16 : index
    %c0_161 = arith.constant 0 : index
    %169 = vector.load %arg2[%c16_160, %c0_161] : memref<36x128xf32, #tpu.memory_space<vmem>>, vector<4x128xf32>
    %cst_162 = arith.constant dense<0.000000e+00> : vector<128x128xf32>
    %170 = tpu.matmul %168, %169, %cst_162 {dimension_numbers = #tpu.dot_dimension_numbers<[1], [0], [0], [1], [0, 0, 1, 1], [], []>} : vector<128x4xf32>, vector<4x128xf32>, vector<128x128xf32> -> vector<128x128xf32>
    %171 = arith.addf %166, %170 : vector<128x128xf32>
    %c0_163 = arith.constant 0 : index
    %c404 = arith.constant 404 : index
    %c0_164 = arith.constant 0 : index
    %172 = vector.load %arg1[%c0_163, %c404, %c0_164] : memref<1x648x4xf32, #tpu.memory_space<vmem>>, vector<1x128x4xf32>
    %173 = vector.shape_cast %172 : vector<1x128x4xf32> to vector<128x4xf32>
    %c20_165 = arith.constant 20 : index
    %c0_166 = arith.constant 0 : index
    %174 = vector.load %arg2[%c20_165, %c0_166] : memref<36x128xf32, #tpu.memory_space<vmem>>, vector<4x128xf32>
    %cst_167 = arith.constant dense<0.000000e+00> : vector<128x128xf32>
    %175 = tpu.matmul %173, %174, %cst_167 {dimension_numbers = #tpu.dot_dimension_numbers<[1], [0], [0], [1], [0, 0, 1, 1], [], []>} : vector<128x4xf32>, vector<4x128xf32>, vector<128x128xf32> -> vector<128x128xf32>
    %176 = arith.addf %171, %175 : vector<128x128xf32>
    %c0_168 = arith.constant 0 : index
    %c420 = arith.constant 420 : index
    %c0_169 = arith.constant 0 : index
    %177 = vector.load %arg1[%c0_168, %c420, %c0_169] : memref<1x648x4xf32, #tpu.memory_space<vmem>>, vector<1x128x4xf32>
    %178 = vector.shape_cast %177 : vector<1x128x4xf32> to vector<128x4xf32>
    %c24_170 = arith.constant 24 : index
    %c0_171 = arith.constant 0 : index
    %179 = vector.load %arg2[%c24_170, %c0_171] : memref<36x128xf32, #tpu.memory_space<vmem>>, vector<4x128xf32>
    %cst_172 = arith.constant dense<0.000000e+00> : vector<128x128xf32>
    %180 = tpu.matmul %178, %179, %cst_172 {dimension_numbers = #tpu.dot_dimension_numbers<[1], [0], [0], [1], [0, 0, 1, 1], [], []>} : vector<128x4xf32>, vector<4x128xf32>, vector<128x128xf32> -> vector<128x128xf32>
    %181 = arith.addf %176, %180 : vector<128x128xf32>
    %c0_173 = arith.constant 0 : index
    %c421 = arith.constant 421 : index
    %c0_174 = arith.constant 0 : index
    %182 = vector.load %arg1[%c0_173, %c421, %c0_174] : memref<1x648x4xf32, #tpu.memory_space<vmem>>, vector<1x128x4xf32>
    %183 = vector.shape_cast %182 : vector<1x128x4xf32> to vector<128x4xf32>
    %c28_175 = arith.constant 28 : index
    %c0_176 = arith.constant 0 : index
    %184 = vector.load %arg2[%c28_175, %c0_176] : memref<36x128xf32, #tpu.memory_space<vmem>>, vector<4x128xf32>
    %cst_177 = arith.constant dense<0.000000e+00> : vector<128x128xf32>
    %185 = tpu.matmul %183, %184, %cst_177 {dimension_numbers = #tpu.dot_dimension_numbers<[1], [0], [0], [1], [0, 0, 1, 1], [], []>} : vector<128x4xf32>, vector<4x128xf32>, vector<128x128xf32> -> vector<128x128xf32>
    %186 = arith.addf %181, %185 : vector<128x128xf32>
    %c0_178 = arith.constant 0 : index
    %c422 = arith.constant 422 : index
    %c0_179 = arith.constant 0 : index
    %187 = vector.load %arg1[%c0_178, %c422, %c0_179] : memref<1x648x4xf32, #tpu.memory_space<vmem>>, vector<1x128x4xf32>
    %188 = vector.shape_cast %187 : vector<1x128x4xf32> to vector<128x4xf32>
    %c32_180 = arith.constant 32 : index
    %c0_181 = arith.constant 0 : index
    %189 = vector.load %arg2[%c32_180, %c0_181] : memref<36x128xf32, #tpu.memory_space<vmem>>, vector<4x128xf32>
    %cst_182 = arith.constant dense<0.000000e+00> : vector<128x128xf32>
    %190 = tpu.matmul %188, %189, %cst_182 {dimension_numbers = #tpu.dot_dimension_numbers<[1], [0], [0], [1], [0, 0, 1, 1], [], []>} : vector<128x4xf32>, vector<4x128xf32>, vector<128x128xf32> -> vector<128x128xf32>
    %191 = arith.addf %186, %190 : vector<128x128xf32>
    %192 = vector.broadcast %0 : vector<1x128xf32> to vector<128x128xf32>
    %193 = arith.addf %191, %192 : vector<128x128xf32>
    %cst_183 = arith.constant 0.000000e+00 : f32
    %194 = vector.broadcast %cst_183 : f32 to vector<128x128xf32>
    %195 = arith.maximumf %193, %194 : vector<128x128xf32>
    %c384_184 = arith.constant 384 : index
    %c0_185 = arith.constant 0 : index
    %196 = vector.load %arg15[%c384_184, %c0_185] : memref<648x128xf32, #tpu.memory_space<vmem>>, vector<128x128xf32>
    tpu.vector_store %arg15[%c384_184, %c0_185], %195 {strides = array<i32>} : memref<648x128xf32, #tpu.memory_space<vmem>>, vector<128x128xf32>,
    %c0_186 = arith.constant 0 : index
    %c512 = arith.constant 512 : index
    %c0_187 = arith.constant 0 : index
    %197 = vector.load %arg1[%c0_186, %c512, %c0_187] : memref<1x648x4xf32, #tpu.memory_space<vmem>>, vector<1x98x4xf32>
    %198 = vector.shape_cast %197 : vector<1x98x4xf32> to vector<98x4xf32>
    %c0_188 = arith.constant 0 : index
    %c0_189 = arith.constant 0 : index
    %199 = vector.load %arg2[%c0_188, %c0_189] : memref<36x128xf32, #tpu.memory_space<vmem>>, vector<4x128xf32>
    %cst_190 = arith.constant dense<0.000000e+00> : vector<98x128xf32>
    %200 = tpu.matmul %198, %199, %cst_190 {dimension_numbers = #tpu.dot_dimension_numbers<[1], [0], [0], [1], [0, 0, 1, 1], [], []>} : vector<98x4xf32>, vector<4x128xf32>, vector<98x128xf32> -> vector<98x128xf32>
    %c0_191 = arith.constant 0 : index
    %c513 = arith.constant 513 : index
    %c0_192 = arith.constant 0 : index
    %201 = vector.load %arg1[%c0_191, %c513, %c0_192] : memref<1x648x4xf32, #tpu.memory_space<vmem>>, vector<1x98x4xf32>
    %202 = vector.shape_cast %201 : vector<1x98x4xf32> to vector<98x4xf32>
    %c4_193 = arith.constant 4 : index
    %c0_194 = arith.constant 0 : index
    %203 = vector.load %arg2[%c4_193, %c0_194] : memref<36x128xf32, #tpu.memory_space<vmem>>, vector<4x128xf32>
    %cst_195 = arith.constant dense<0.000000e+00> : vector<98x128xf32>
    %204 = tpu.matmul %202, %203, %cst_195 {dimension_numbers = #tpu.dot_dimension_numbers<[1], [0], [0], [1], [0, 0, 1, 1], [], []>} : vector<98x4xf32>, vector<4x128xf32>, vector<98x128xf32> -> vector<98x128xf32>
    %205 = arith.addf %200, %204 : vector<98x128xf32>
    %c0_196 = arith.constant 0 : index
    %c514 = arith.constant 514 : index
    %c0_197 = arith.constant 0 : index
    %206 = vector.load %arg1[%c0_196, %c514, %c0_197] : memref<1x648x4xf32, #tpu.memory_space<vmem>>, vector<1x98x4xf32>
    %207 = vector.shape_cast %206 : vector<1x98x4xf32> to vector<98x4xf32>
    %c8_198 = arith.constant 8 : index
    %c0_199 = arith.constant 0 : index
    %208 = vector.load %arg2[%c8_198, %c0_199] : memref<36x128xf32, #tpu.memory_space<vmem>>, vector<4x128xf32>
    %cst_200 = arith.constant dense<0.000000e+00> : vector<98x128xf32>
    %209 = tpu.matmul %207, %208, %cst_200 {dimension_numbers = #tpu.dot_dimension_numbers<[1], [0], [0], [1], [0, 0, 1, 1], [], []>} : vector<98x4xf32>, vector<4x128xf32>, vector<98x128xf32> -> vector<98x128xf32>
    %210 = arith.addf %205, %209 : vector<98x128xf32>
    %c0_201 = arith.constant 0 : index
    %c530 = arith.constant 530 : index
    %c0_202 = arith.constant 0 : index
    %211 = vector.load %arg1[%c0_201, %c530, %c0_202] : memref<1x648x4xf32, #tpu.memory_space<vmem>>, vector<1x98x4xf32>
    %212 = vector.shape_cast %211 : vector<1x98x4xf32> to vector<98x4xf32>
    %c12_203 = arith.constant 12 : index
    %c0_204 = arith.constant 0 : index
    %213 = vector.load %arg2[%c12_203, %c0_204] : memref<36x128xf32, #tpu.memory_space<vmem>>, vector<4x128xf32>
    %cst_205 = arith.constant dense<0.000000e+00> : vector<98x128xf32>
    %214 = tpu.matmul %212, %213, %cst_205 {dimension_numbers = #tpu.dot_dimension_numbers<[1], [0], [0], [1], [0, 0, 1, 1], [], []>} : vector<98x4xf32>, vector<4x128xf32>, vector<98x128xf32> -> vector<98x128xf32>
    %215 = arith.addf %210, %214 : vector<98x128xf32>
    %c0_206 = arith.constant 0 : index
    %c531 = arith.constant 531 : index
    %c0_207 = arith.constant 0 : index
    %216 = vector.load %arg1[%c0_206, %c531, %c0_207] : memref<1x648x4xf32, #tpu.memory_space<vmem>>, vector<1x98x4xf32>
    %217 = vector.shape_cast %216 : vector<1x98x4xf32> to vector<98x4xf32>
    %c16_208 = arith.constant 16 : index
    %c0_209 = arith.constant 0 : index
    %218 = vector.load %arg2[%c16_208, %c0_209] : memref<36x128xf32, #tpu.memory_space<vmem>>, vector<4x128xf32>
    %cst_210 = arith.constant dense<0.000000e+00> : vector<98x128xf32>
    %219 = tpu.matmul %217, %218, %cst_210 {dimension_numbers = #tpu.dot_dimension_numbers<[1], [0], [0], [1], [0, 0, 1, 1], [], []>} : vector<98x4xf32>, vector<4x128xf32>, vector<98x128xf32> -> vector<98x128xf32>
    %220 = arith.addf %215, %219 : vector<98x128xf32>
    %c0_211 = arith.constant 0 : index
    %c532 = arith.constant 532 : index
    %c0_212 = arith.constant 0 : index
    %221 = vector.load %arg1[%c0_211, %c532, %c0_212] : memref<1x648x4xf32, #tpu.memory_space<vmem>>, vector<1x98x4xf32>
    %222 = vector.shape_cast %221 : vector<1x98x4xf32> to vector<98x4xf32>
    %c20_213 = arith.constant 20 : index
    %c0_214 = arith.constant 0 : index
    %223 = vector.load %arg2[%c20_213, %c0_214] : memref<36x128xf32, #tpu.memory_space<vmem>>, vector<4x128xf32>
    %cst_215 = arith.constant dense<0.000000e+00> : vector<98x128xf32>
    %224 = tpu.matmul %222, %223, %cst_215 {dimension_numbers = #tpu.dot_dimension_numbers<[1], [0], [0], [1], [0, 0, 1, 1], [], []>} : vector<98x4xf32>, vector<4x128xf32>, vector<98x128xf32> -> vector<98x128xf32>
    %225 = arith.addf %220, %224 : vector<98x128xf32>
    %c0_216 = arith.constant 0 : index
    %c548 = arith.constant 548 : index
    %c0_217 = arith.constant 0 : index
    %226 = vector.load %arg1[%c0_216, %c548, %c0_217] : memref<1x648x4xf32, #tpu.memory_space<vmem>>, vector<1x98x4xf32>
    %227 = vector.shape_cast %226 : vector<1x98x4xf32> to vector<98x4xf32>
    %c24_218 = arith.constant 24 : index
    %c0_219 = arith.constant 0 : index
    %228 = vector.load %arg2[%c24_218, %c0_219] : memref<36x128xf32, #tpu.memory_space<vmem>>, vector<4x128xf32>
    %cst_220 = arith.constant dense<0.000000e+00> : vector<98x128xf32>
    %229 = tpu.matmul %227, %228, %cst_220 {dimension_numbers = #tpu.dot_dimension_numbers<[1], [0], [0], [1], [0, 0, 1, 1], [], []>} : vector<98x4xf32>, vector<4x128xf32>, vector<98x128xf32> -> vector<98x128xf32>
    %230 = arith.addf %225, %229 : vector<98x128xf32>
    %c0_221 = arith.constant 0 : index
    %c549 = arith.constant 549 : index
    %c0_222 = arith.constant 0 : index
    %231 = vector.load %arg1[%c0_221, %c549, %c0_222] : memref<1x648x4xf32, #tpu.memory_space<vmem>>, vector<1x98x4xf32>
    %232 = vector.shape_cast %231 : vector<1x98x4xf32> to vector<98x4xf32>
    %c28_223 = arith.constant 28 : index
    %c0_224 = arith.constant 0 : index
    %233 = vector.load %arg2[%c28_223, %c0_224] : memref<36x128xf32, #tpu.memory_space<vmem>>, vector<4x128xf32>
    %cst_225 = arith.constant dense<0.000000e+00> : vector<98x128xf32>
    %234 = tpu.matmul %232, %233, %cst_225 {dimension_numbers = #tpu.dot_dimension_numbers<[1], [0], [0], [1], [0, 0, 1, 1], [], []>} : vector<98x4xf32>, vector<4x128xf32>, vector<98x128xf32> -> vector<98x128xf32>
    %235 = arith.addf %230, %234 : vector<98x128xf32>
    %c0_226 = arith.constant 0 : index
    %c550 = arith.constant 550 : index
    %c0_227 = arith.constant 0 : index
    %236 = vector.load %arg1[%c0_226, %c550, %c0_227] : memref<1x648x4xf32, #tpu.memory_space<vmem>>, vector<1x98x4xf32>
    %237 = vector.shape_cast %236 : vector<1x98x4xf32> to vector<98x4xf32>
    %c32_228 = arith.constant 32 : index
    %c0_229 = arith.constant 0 : index
    %238 = vector.load %arg2[%c32_228, %c0_229] : memref<36x128xf32, #tpu.memory_space<vmem>>, vector<4x128xf32>
    %cst_230 = arith.constant dense<0.000000e+00> : vector<98x128xf32>
    %239 = tpu.matmul %237, %238, %cst_230 {dimension_numbers = #tpu.dot_dimension_numbers<[1], [0], [0], [1], [0, 0, 1, 1], [], []>} : vector<98x4xf32>, vector<4x128xf32>, vector<98x128xf32> -> vector<98x128xf32>
    %240 = arith.addf %235, %239 : vector<98x128xf32>
    %241 = vector.broadcast %0 : vector<1x128xf32> to vector<98x128xf32>
    %242 = arith.addf %240, %241 : vector<98x128xf32>
    %cst_231 = arith.constant 0.000000e+00 : f32
    %243 = vector.broadcast %cst_231 : f32 to vector<98x128xf32>
    %244 = arith.maximumf %242, %243 : vector<98x128xf32>
    %c512_232 = arith.constant 512 : index
    %c0_233 = arith.constant 0 : index
    %245 = vector.load %arg15[%c512_232, %c0_233] : memref<648x128xf32, #tpu.memory_space<vmem>>, vector<98x128xf32>
    tpu.vector_store %arg15[%c512_232, %c0_233], %244 {strides = array<i32>} : memref<648x128xf32, #tpu.memory_space<vmem>>, vector<98x128xf32>,
    %cst_234 = arith.constant 0.000000e+00 : f32
    %246 = vector.broadcast %cst_234 : f32 to vector<10x128xf32>
    %cst_235 = arith.constant 0.000000e+00 : f32
    %247 = vector.broadcast %cst_235 : f32 to vector<1x128xf32>
    %c0_236 = arith.constant 0 : index
    %c0_237 = arith.constant 0 : index
    %248 = vector.load %arg16[%c0_236, %c0_237] : memref<200x128xf32, #tpu.memory_space<vmem>>, vector<10x128xf32>
    tpu.vector_store %arg16[%c0_236, %c0_237], %246 {strides = array<i32>} : memref<200x128xf32, #tpu.memory_space<vmem>>, vector<10x128xf32>,
    %c90 = arith.constant 90 : index
    %c0_238 = arith.constant 0 : index
    %249 = vector.load %arg16[%c90, %c0_238] : memref<200x128xf32, #tpu.memory_space<vmem>>, vector<10x128xf32>
    tpu.vector_store %arg16[%c90, %c0_238], %246 {strides = array<i32>} : memref<200x128xf32, #tpu.memory_space<vmem>>, vector<10x128xf32>,
    %c0_239 = arith.constant 0 : index
    %c0_240 = arith.constant 0 : index
    %250 = tpu.strided_load %arg15[%c0_239, %c0_240] {strides = array<i32: 2, 1>} : memref<648x128xf32, #tpu.memory_space<vmem>>, vector<8x128xf32>
    %251 = tpu.concatenate %247, %250, %247 in 0 : vector<1x128xf32>, vector<8x128xf32>, vector<1x128xf32> -> vector<10x128xf32>
    %c10 = arith.constant 10 : index
    %c0_241 = arith.constant 0 : index
    %252 = vector.load %arg16[%c10, %c0_241] : memref<200x128xf32, #tpu.memory_space<vmem>>, vector<10x128xf32>
    tpu.vector_store %arg16[%c10, %c0_241], %251 {strides = array<i32>} : memref<200x128xf32, #tpu.memory_space<vmem>>, vector<10x128xf32>,
    %c36_242 = arith.constant 36 : index
    %c0_243 = arith.constant 0 : index
    %253 = tpu.strided_load %arg15[%c36_242, %c0_243] {strides = array<i32: 2, 1>} : memref<648x128xf32, #tpu.memory_space<vmem>>, vector<8x128xf32>
    %254 = tpu.concatenate %247, %253, %247 in 0 : vector<1x128xf32>, vector<8x128xf32>, vector<1x128xf32> -> vector<10x128xf32>
    %c20_244 = arith.constant 20 : index
    %c0_245 = arith.constant 0 : index
    %255 = vector.load %arg16[%c20_244, %c0_245] : memref<200x128xf32, #tpu.memory_space<vmem>>, vector<10x128xf32>
    tpu.vector_store %arg16[%c20_244, %c0_245], %254 {strides = array<i32>} : memref<200x128xf32, #tpu.memory_space<vmem>>, vector<10x128xf32>,
    %c72 = arith.constant 72 : index
    %c0_246 = arith.constant 0 : index
    %256 = tpu.strided_load %arg15[%c72, %c0_246] {strides = array<i32: 2, 1>} : memref<648x128xf32, #tpu.memory_space<vmem>>, vector<8x128xf32>
    %257 = tpu.concatenate %247, %256, %247 in 0 : vector<1x128xf32>, vector<8x128xf32>, vector<1x128xf32> -> vector<10x128xf32>
    %c30 = arith.constant 30 : index
    %c0_247 = arith.constant 0 : index
    %258 = vector.load %arg16[%c30, %c0_247] : memref<200x128xf32, #tpu.memory_space<vmem>>, vector<10x128xf32>
    tpu.vector_store %arg16[%c30, %c0_247], %257 {strides = array<i32>} : memref<200x128xf32, #tpu.memory_space<vmem>>, vector<10x128xf32>,
    %c108 = arith.constant 108 : index
    %c0_248 = arith.constant 0 : index
    %259 = tpu.strided_load %arg15[%c108, %c0_248] {strides = array<i32: 2, 1>} : memref<648x128xf32, #tpu.memory_space<vmem>>, vector<8x128xf32>
    %260 = tpu.concatenate %247, %259, %247 in 0 : vector<1x128xf32>, vector<8x128xf32>, vector<1x128xf32> -> vector<10x128xf32>
    %c40 = arith.constant 40 : index
    %c0_249 = arith.constant 0 : index
    %261 = vector.load %arg16[%c40, %c0_249] : memref<200x128xf32, #tpu.memory_space<vmem>>, vector<10x128xf32>
    tpu.vector_store %arg16[%c40, %c0_249], %260 {strides = array<i32>} : memref<200x128xf32, #tpu.memory_space<vmem>>, vector<10x128xf32>,
    %c144 = arith.constant 144 : index
    %c0_250 = arith.constant 0 : index
    %262 = tpu.strided_load %arg15[%c144, %c0_250] {strides = array<i32: 2, 1>} : memref<648x128xf32, #tpu.memory_space<vmem>>, vector<8x128xf32>
    %263 = tpu.concatenate %247, %262, %247 in 0 : vector<1x128xf32>, vector<8x128xf32>, vector<1x128xf32> -> vector<10x128xf32>
    %c50 = arith.constant 50 : index
    %c0_251 = arith.constant 0 : index
    %264 = vector.load %arg16[%c50, %c0_251] : memref<200x128xf32, #tpu.memory_space<vmem>>, vector<10x128xf32>
    tpu.vector_store %arg16[%c50, %c0_251], %263 {strides = array<i32>} : memref<200x128xf32, #tpu.memory_space<vmem>>, vector<10x128xf32>,
    %c180 = arith.constant 180 : index
    %c0_252 = arith.constant 0 : index
    %265 = tpu.strided_load %arg15[%c180, %c0_252] {strides = array<i32: 2, 1>} : memref<648x128xf32, #tpu.memory_space<vmem>>, vector<8x128xf32>
    %266 = tpu.concatenate %247, %265, %247 in 0 : vector<1x128xf32>, vector<8x128xf32>, vector<1x128xf32> -> vector<10x128xf32>
    %c60 = arith.constant 60 : index
    %c0_253 = arith.constant 0 : index
    %267 = vector.load %arg16[%c60, %c0_253] : memref<200x128xf32, #tpu.memory_space<vmem>>, vector<10x128xf32>
    tpu.vector_store %arg16[%c60, %c0_253], %266 {strides = array<i32>} : memref<200x128xf32, #tpu.memory_space<vmem>>, vector<10x128xf32>,
    %c216 = arith.constant 216 : index
    %c0_254 = arith.constant 0 : index
    %268 = tpu.strided_load %arg15[%c216, %c0_254] {strides = array<i32: 2, 1>} : memref<648x128xf32, #tpu.memory_space<vmem>>, vector<8x128xf32>
    %269 = tpu.concatenate %247, %268, %247 in 0 : vector<1x128xf32>, vector<8x128xf32>, vector<1x128xf32> -> vector<10x128xf32>
    %c70 = arith.constant 70 : index
    %c0_255 = arith.constant 0 : index
    %270 = vector.load %arg16[%c70, %c0_255] : memref<200x128xf32, #tpu.memory_space<vmem>>, vector<10x128xf32>
    tpu.vector_store %arg16[%c70, %c0_255], %269 {strides = array<i32>} : memref<200x128xf32, #tpu.memory_space<vmem>>, vector<10x128xf32>,
    %c252 = arith.constant 252 : index
    %c0_256 = arith.constant 0 : index
    %271 = tpu.strided_load %arg15[%c252, %c0_256] {strides = array<i32: 2, 1>} : memref<648x128xf32, #tpu.memory_space<vmem>>, vector<8x128xf32>
    %272 = tpu.concatenate %247, %271, %247 in 0 : vector<1x128xf32>, vector<8x128xf32>, vector<1x128xf32> -> vector<10x128xf32>
    %c80 = arith.constant 80 : index
    %c0_257 = arith.constant 0 : index
    %273 = vector.load %arg16[%c80, %c0_257] : memref<200x128xf32, #tpu.memory_space<vmem>>, vector<10x128xf32>
    tpu.vector_store %arg16[%c80, %c0_257], %272 {strides = array<i32>} : memref<200x128xf32, #tpu.memory_space<vmem>>, vector<10x128xf32>,
    %c100 = arith.constant 100 : index
    %c0_258 = arith.constant 0 : index
    %274 = vector.load %arg16[%c100, %c0_258] : memref<200x128xf32, #tpu.memory_space<vmem>>, vector<10x128xf32>
    tpu.vector_store %arg16[%c100, %c0_258], %246 {strides = array<i32>} : memref<200x128xf32, #tpu.memory_space<vmem>>, vector<10x128xf32>,
    %c190 = arith.constant 190 : index
    %c0_259 = arith.constant 0 : index
    %275 = vector.load %arg16[%c190, %c0_259] : memref<200x128xf32, #tpu.memory_space<vmem>>, vector<10x128xf32>
    tpu.vector_store %arg16[%c190, %c0_259], %246 {strides = array<i32>} : memref<200x128xf32, #tpu.memory_space<vmem>>, vector<10x128xf32>,
    %c324 = arith.constant 324 : index
    %c0_260 = arith.constant 0 : index
    %276 = tpu.strided_load %arg15[%c324, %c0_260] {strides = array<i32: 2, 1>} : memref<648x128xf32, #tpu.memory_space<vmem>>, vector<8x128xf32>
    %277 = tpu.concatenate %247, %276, %247 in 0 : vector<1x128xf32>, vector<8x128xf32>, vector<1x128xf32> -> vector<10x128xf32>
    %c110 = arith.constant 110 : index
    %c0_261 = arith.constant 0 : index
    %278 = vector.load %arg16[%c110, %c0_261] : memref<200x128xf32, #tpu.memory_space<vmem>>, vector<10x128xf32>
    tpu.vector_store %arg16[%c110, %c0_261], %277 {strides = array<i32>} : memref<200x128xf32, #tpu.memory_space<vmem>>, vector<10x128xf32>,
    %c360 = arith.constant 360 : index
    %c0_262 = arith.constant 0 : index
    %279 = tpu.strided_load %arg15[%c360, %c0_262] {strides = array<i32: 2, 1>} : memref<648x128xf32, #tpu.memory_space<vmem>>, vector<8x128xf32>
    %280 = tpu.concatenate %247, %279, %247 in 0 : vector<1x128xf32>, vector<8x128xf32>, vector<1x128xf32> -> vector<10x128xf32>
    %c120 = arith.constant 120 : index
    %c0_263 = arith.constant 0 : index
    %281 = vector.load %arg16[%c120, %c0_263] : memref<200x128xf32, #tpu.memory_space<vmem>>, vector<10x128xf32>
    tpu.vector_store %arg16[%c120, %c0_263], %280 {strides = array<i32>} : memref<200x128xf32, #tpu.memory_space<vmem>>, vector<10x128xf32>,
    %c396 = arith.constant 396 : index
    %c0_264 = arith.constant 0 : index
    %282 = tpu.strided_load %arg15[%c396, %c0_264] {strides = array<i32: 2, 1>} : memref<648x128xf32, #tpu.memory_space<vmem>>, vector<8x128xf32>
    %283 = tpu.concatenate %247, %282, %247 in 0 : vector<1x128xf32>, vector<8x128xf32>, vector<1x128xf32> -> vector<10x128xf32>
    %c130_265 = arith.constant 130 : index
    %c0_266 = arith.constant 0 : index
    %284 = vector.load %arg16[%c130_265, %c0_266] : memref<200x128xf32, #tpu.memory_space<vmem>>, vector<10x128xf32>
    tpu.vector_store %arg16[%c130_265, %c0_266], %283 {strides = array<i32>} : memref<200x128xf32, #tpu.memory_space<vmem>>, vector<10x128xf32>,
    %c432 = arith.constant 432 : index
    %c0_267 = arith.constant 0 : index
    %285 = tpu.strided_load %arg15[%c432, %c0_267] {strides = array<i32: 2, 1>} : memref<648x128xf32, #tpu.memory_space<vmem>>, vector<8x128xf32>
    %286 = tpu.concatenate %247, %285, %247 in 0 : vector<1x128xf32>, vector<8x128xf32>, vector<1x128xf32> -> vector<10x128xf32>
    %c140 = arith.constant 140 : index
    %c0_268 = arith.constant 0 : index
    %287 = vector.load %arg16[%c140, %c0_268] : memref<200x128xf32, #tpu.memory_space<vmem>>, vector<10x128xf32>
    tpu.vector_store %arg16[%c140, %c0_268], %286 {strides = array<i32>} : memref<200x128xf32, #tpu.memory_space<vmem>>, vector<10x128xf32>,
    %c468 = arith.constant 468 : index
    %c0_269 = arith.constant 0 : index
    %288 = tpu.strided_load %arg15[%c468, %c0_269] {strides = array<i32: 2, 1>} : memref<648x128xf32, #tpu.memory_space<vmem>>, vector<8x128xf32>
    %289 = tpu.concatenate %247, %288, %247 in 0 : vector<1x128xf32>, vector<8x128xf32>, vector<1x128xf32> -> vector<10x128xf32>
    %c150 = arith.constant 150 : index
    %c0_270 = arith.constant 0 : index
    %290 = vector.load %arg16[%c150, %c0_270] : memref<200x128xf32, #tpu.memory_space<vmem>>, vector<10x128xf32>
    tpu.vector_store %arg16[%c150, %c0_270], %289 {strides = array<i32>} : memref<200x128xf32, #tpu.memory_space<vmem>>, vector<10x128xf32>,
    %c504 = arith.constant 504 : index
    %c0_271 = arith.constant 0 : index
    %291 = tpu.strided_load %arg15[%c504, %c0_271] {strides = array<i32: 2, 1>} : memref<648x128xf32, #tpu.memory_space<vmem>>, vector<8x128xf32>
    %292 = tpu.concatenate %247, %291, %247 in 0 : vector<1x128xf32>, vector<8x128xf32>, vector<1x128xf32> -> vector<10x128xf32>
    %c160 = arith.constant 160 : index
    %c0_272 = arith.constant 0 : index
    %293 = vector.load %arg16[%c160, %c0_272] : memref<200x128xf32, #tpu.memory_space<vmem>>, vector<10x128xf32>
    tpu.vector_store %arg16[%c160, %c0_272], %292 {strides = array<i32>} : memref<200x128xf32, #tpu.memory_space<vmem>>, vector<10x128xf32>,
    %c540 = arith.constant 540 : index
    %c0_273 = arith.constant 0 : index
    %294 = tpu.strided_load %arg15[%c540, %c0_273] {strides = array<i32: 2, 1>} : memref<648x128xf32, #tpu.memory_space<vmem>>, vector<8x128xf32>
    %295 = tpu.concatenate %247, %294, %247 in 0 : vector<1x128xf32>, vector<8x128xf32>, vector<1x128xf32> -> vector<10x128xf32>
    %c170 = arith.constant 170 : index
    %c0_274 = arith.constant 0 : index
    %296 = vector.load %arg16[%c170, %c0_274] : memref<200x128xf32, #tpu.memory_space<vmem>>, vector<10x128xf32>
    tpu.vector_store %arg16[%c170, %c0_274], %295 {strides = array<i32>} : memref<200x128xf32, #tpu.memory_space<vmem>>, vector<10x128xf32>,
    %c576 = arith.constant 576 : index
    %c0_275 = arith.constant 0 : index
    %297 = tpu.strided_load %arg15[%c576, %c0_275] {strides = array<i32: 2, 1>} : memref<648x128xf32, #tpu.memory_space<vmem>>, vector<8x128xf32>
    %298 = tpu.concatenate %247, %297, %247 in 0 : vector<1x128xf32>, vector<8x128xf32>, vector<1x128xf32> -> vector<10x128xf32>
    %c180_276 = arith.constant 180 : index
    %c0_277 = arith.constant 0 : index
    %299 = vector.load %arg16[%c180_276, %c0_277] : memref<200x128xf32, #tpu.memory_space<vmem>>, vector<10x128xf32>
    tpu.vector_store %arg16[%c180_276, %c0_277], %298 {strides = array<i32>} : memref<200x128xf32, #tpu.memory_space<vmem>>, vector<10x128xf32>,
    %c0_278 = arith.constant 0 : index
    %c0_279 = arith.constant 0 : index
    %300 = vector.load %arg5[%c0_278, %c0_279] : memref<1x128xf32, #tpu.memory_space<vmem>>, vector<1x128xf32>
    %c0_280 = arith.constant 0 : index
    %c0_281 = arith.constant 0 : index
    %301 = vector.load %arg16[%c0_280, %c0_281] : memref<200x128xf32, #tpu.memory_space<vmem>>, vector<128x8xf32>
    %c0_282 = arith.constant 0 : index
    %c0_283 = arith.constant 0 : index
    %302 = vector.load %arg4[%c0_282, %c0_283] : memref<72x128xf32, #tpu.memory_space<vmem>>, vector<8x128xf32>
    %cst_284 = arith.constant dense<0.000000e+00> : vector<128x128xf32>
    %303 = tpu.matmul %301, %302, %cst_284 {dimension_numbers = #tpu.dot_dimension_numbers<[1], [0], [0], [1], [0, 0, 1, 1], [], []>} : vector<128x8xf32>, vector<8x128xf32>, vector<128x128xf32> -> vector<128x128xf32>
    %c1_285 = arith.constant 1 : index
    %c0_286 = arith.constant 0 : index
    %304 = vector.load %arg16[%c1_285, %c0_286] : memref<200x128xf32, #tpu.memory_space<vmem>>, vector<128x8xf32>
    %c8_287 = arith.constant 8 : index
    %c0_288 = arith.constant 0 : index
    %305 = vector.load %arg4[%c8_287, %c0_288] : memref<72x128xf32, #tpu.memory_space<vmem>>, vector<8x128xf32>
    %cst_289 = arith.constant dense<0.000000e+00> : vector<128x128xf32>
    %306 = tpu.matmul %304, %305, %cst_289 {dimension_numbers = #tpu.dot_dimension_numbers<[1], [0], [0], [1], [0, 0, 1, 1], [], []>} : vector<128x8xf32>, vector<8x128xf32>, vector<128x128xf32> -> vector<128x128xf32>
    %307 = arith.addf %303, %306 : vector<128x128xf32>
    %c2_290 = arith.constant 2 : index
    %c0_291 = arith.constant 0 : index
    %308 = vector.load %arg16[%c2_290, %c0_291] : memref<200x128xf32, #tpu.memory_space<vmem>>, vector<128x8xf32>
    %c16_292 = arith.constant 16 : index
    %c0_293 = arith.constant 0 : index
    %309 = vector.load %arg4[%c16_292, %c0_293] : memref<72x128xf32, #tpu.memory_space<vmem>>, vector<8x128xf32>
    %cst_294 = arith.constant dense<0.000000e+00> : vector<128x128xf32>
    %310 = tpu.matmul %308, %309, %cst_294 {dimension_numbers = #tpu.dot_dimension_numbers<[1], [0], [0], [1], [0, 0, 1, 1], [], []>} : vector<128x8xf32>, vector<8x128xf32>, vector<128x128xf32> -> vector<128x128xf32>
    %311 = arith.addf %307, %310 : vector<128x128xf32>
    %c10_295 = arith.constant 10 : index
    %c0_296 = arith.constant 0 : index
    %312 = vector.load %arg16[%c10_295, %c0_296] : memref<200x128xf32, #tpu.memory_space<vmem>>, vector<128x8xf32>
    %c24_297 = arith.constant 24 : index
    %c0_298 = arith.constant 0 : index
    %313 = vector.load %arg4[%c24_297, %c0_298] : memref<72x128xf32, #tpu.memory_space<vmem>>, vector<8x128xf32>
    %cst_299 = arith.constant dense<0.000000e+00> : vector<128x128xf32>
    %314 = tpu.matmul %312, %313, %cst_299 {dimension_numbers = #tpu.dot_dimension_numbers<[1], [0], [0], [1], [0, 0, 1, 1], [], []>} : vector<128x8xf32>, vector<8x128xf32>, vector<128x128xf32> -> vector<128x128xf32>
    %315 = arith.addf %311, %314 : vector<128x128xf32>
    %c11 = arith.constant 11 : index
    %c0_300 = arith.constant 0 : index
    %316 = vector.load %arg16[%c11, %c0_300] : memref<200x128xf32, #tpu.memory_space<vmem>>, vector<128x8xf32>
    %c32_301 = arith.constant 32 : index
    %c0_302 = arith.constant 0 : index
    %317 = vector.load %arg4[%c32_301, %c0_302] : memref<72x128xf32, #tpu.memory_space<vmem>>, vector<8x128xf32>
    %cst_303 = arith.constant dense<0.000000e+00> : vector<128x128xf32>
    %318 = tpu.matmul %316, %317, %cst_303 {dimension_numbers = #tpu.dot_dimension_numbers<[1], [0], [0], [1], [0, 0, 1, 1], [], []>} : vector<128x8xf32>, vector<8x128xf32>, vector<128x128xf32> -> vector<128x128xf32>
    %319 = arith.addf %315, %318 : vector<128x128xf32>
    %c12_304 = arith.constant 12 : index
    %c0_305 = arith.constant 0 : index
    %320 = vector.load %arg16[%c12_304, %c0_305] : memref<200x128xf32, #tpu.memory_space<vmem>>, vector<128x8xf32>
    %c40_306 = arith.constant 40 : index
    %c0_307 = arith.constant 0 : index
    %321 = vector.load %arg4[%c40_306, %c0_307] : memref<72x128xf32, #tpu.memory_space<vmem>>, vector<8x128xf32>
    %cst_308 = arith.constant dense<0.000000e+00> : vector<128x128xf32>
    %322 = tpu.matmul %320, %321, %cst_308 {dimension_numbers = #tpu.dot_dimension_numbers<[1], [0], [0], [1], [0, 0, 1, 1], [], []>} : vector<128x8xf32>, vector<8x128xf32>, vector<128x128xf32> -> vector<128x128xf32>
    %323 = arith.addf %319, %322 : vector<128x128xf32>
    %c20_309 = arith.constant 20 : index
    %c0_310 = arith.constant 0 : index
    %324 = vector.load %arg16[%c20_309, %c0_310] : memref<200x128xf32, #tpu.memory_space<vmem>>, vector<128x8xf32>
    %c48 = arith.constant 48 : index
    %c0_311 = arith.constant 0 : index
    %325 = vector.load %arg4[%c48, %c0_311] : memref<72x128xf32, #tpu.memory_space<vmem>>, vector<8x128xf32>
    %cst_312 = arith.constant dense<0.000000e+00> : vector<128x128xf32>
    %326 = tpu.matmul %324, %325, %cst_312 {dimension_numbers = #tpu.dot_dimension_numbers<[1], [0], [0], [1], [0, 0, 1, 1], [], []>} : vector<128x8xf32>, vector<8x128xf32>, vector<128x128xf32> -> vector<128x128xf32>
    %327 = arith.addf %323, %326 : vector<128x128xf32>
    %c21 = arith.constant 21 : index
    %c0_313 = arith.constant 0 : index
    %328 = vector.load %arg16[%c21, %c0_313] : memref<200x128xf32, #tpu.memory_space<vmem>>, vector<128x8xf32>
    %c56 = arith.constant 56 : index
    %c0_314 = arith.constant 0 : index
    %329 = vector.load %arg4[%c56, %c0_314] : memref<72x128xf32, #tpu.memory_space<vmem>>, vector<8x128xf32>
    %cst_315 = arith.constant dense<0.000000e+00> : vector<128x128xf32>
    %330 = tpu.matmul %328, %329, %cst_315 {dimension_numbers = #tpu.dot_dimension_numbers<[1], [0], [0], [1], [0, 0, 1, 1], [], []>} : vector<128x8xf32>, vector<8x128xf32>, vector<128x128xf32> -> vector<128x128xf32>
    %331 = arith.addf %327, %330 : vector<128x128xf32>
    %c22 = arith.constant 22 : index
    %c0_316 = arith.constant 0 : index
    %332 = vector.load %arg16[%c22, %c0_316] : memref<200x128xf32, #tpu.memory_space<vmem>>, vector<128x8xf32>
    %c64 = arith.constant 64 : index
    %c0_317 = arith.constant 0 : index
    %333 = vector.load %arg4[%c64, %c0_317] : memref<72x128xf32, #tpu.memory_space<vmem>>, vector<8x128xf32>
    %cst_318 = arith.constant dense<0.000000e+00> : vector<128x128xf32>
    %334 = tpu.matmul %332, %333, %cst_318 {dimension_numbers = #tpu.dot_dimension_numbers<[1], [0], [0], [1], [0, 0, 1, 1], [], []>} : vector<128x8xf32>, vector<8x128xf32>, vector<128x128xf32> -> vector<128x128xf32>
    %335 = arith.addf %331, %334 : vector<128x128xf32>
    %336 = vector.broadcast %300 : vector<1x128xf32> to vector<128x128xf32>
    %337 = arith.addf %335, %336 : vector<128x128xf32>
    %cst_319 = arith.constant 0.000000e+00 : f32
    %338 = vector.broadcast %cst_319 : f32 to vector<128x128xf32>
    %339 = arith.maximumf %337, %338 : vector<128x128xf32>
    %c0_320 = arith.constant 0 : index
    %c0_321 = arith.constant 0 : index
    %340 = vector.load %arg15[%c0_320, %c0_321] : memref<648x128xf32, #tpu.memory_space<vmem>>, vector<128x128xf32>
    tpu.vector_store %arg15[%c0_320, %c0_321], %339 {strides = array<i32>} : memref<648x128xf32, #tpu.memory_space<vmem>>, vector<128x128xf32>,
    %c128_322 = arith.constant 128 : index
    %c0_323 = arith.constant 0 : index
    %341 = vector.load %arg16[%c128_322, %c0_323] : memref<200x128xf32, #tpu.memory_space<vmem>>, vector<50x8xf32>
    %c0_324 = arith.constant 0 : index
    %c0_325 = arith.constant 0 : index
    %342 = vector.load %arg4[%c0_324, %c0_325] : memref<72x128xf32, #tpu.memory_space<vmem>>, vector<8x128xf32>
    %cst_326 = arith.constant dense<0.000000e+00> : vector<50x128xf32>
    %343 = tpu.matmul %341, %342, %cst_326 {dimension_numbers = #tpu.dot_dimension_numbers<[1], [0], [0], [1], [0, 0, 1, 1], [], []>} : vector<50x8xf32>, vector<8x128xf32>, vector<50x128xf32> -> vector<50x128xf32>
    %c129_327 = arith.constant 129 : index
    %c0_328 = arith.constant 0 : index
    %344 = vector.load %arg16[%c129_327, %c0_328] : memref<200x128xf32, #tpu.memory_space<vmem>>, vector<50x8xf32>
    %c8_329 = arith.constant 8 : index
    %c0_330 = arith.constant 0 : index
    %345 = vector.load %arg4[%c8_329, %c0_330] : memref<72x128xf32, #tpu.memory_space<vmem>>, vector<8x128xf32>
    %cst_331 = arith.constant dense<0.000000e+00> : vector<50x128xf32>
    %346 = tpu.matmul %344, %345, %cst_331 {dimension_numbers = #tpu.dot_dimension_numbers<[1], [0], [0], [1], [0, 0, 1, 1], [], []>} : vector<50x8xf32>, vector<8x128xf32>, vector<50x128xf32> -> vector<50x128xf32>
    %347 = arith.addf %343, %346 : vector<50x128xf32>
    %c130_332 = arith.constant 130 : index
    %c0_333 = arith.constant 0 : index
    %348 = vector.load %arg16[%c130_332, %c0_333] : memref<200x128xf32, #tpu.memory_space<vmem>>, vector<50x8xf32>
    %c16_334 = arith.constant 16 : index
    %c0_335 = arith.constant 0 : index
    %349 = vector.load %arg4[%c16_334, %c0_335] : memref<72x128xf32, #tpu.memory_space<vmem>>, vector<8x128xf32>
    %cst_336 = arith.constant dense<0.000000e+00> : vector<50x128xf32>
    %350 = tpu.matmul %348, %349, %cst_336 {dimension_numbers = #tpu.dot_dimension_numbers<[1], [0], [0], [1], [0, 0, 1, 1], [], []>} : vector<50x8xf32>, vector<8x128xf32>, vector<50x128xf32> -> vector<50x128xf32>
    %351 = arith.addf %347, %350 : vector<50x128xf32>
    %c138 = arith.constant 138 : index
    %c0_337 = arith.constant 0 : index
    %352 = vector.load %arg16[%c138, %c0_337] : memref<200x128xf32, #tpu.memory_space<vmem>>, vector<50x8xf32>
    %c24_338 = arith.constant 24 : index
    %c0_339 = arith.constant 0 : index
    %353 = vector.load %arg4[%c24_338, %c0_339] : memref<72x128xf32, #tpu.memory_space<vmem>>, vector<8x128xf32>
    %cst_340 = arith.constant dense<0.000000e+00> : vector<50x128xf32>
    %354 = tpu.matmul %352, %353, %cst_340 {dimension_numbers = #tpu.dot_dimension_numbers<[1], [0], [0], [1], [0, 0, 1, 1], [], []>} : vector<50x8xf32>, vector<8x128xf32>, vector<50x128xf32> -> vector<50x128xf32>
    %355 = arith.addf %351, %354 : vector<50x128xf32>
    %c139 = arith.constant 139 : index
    %c0_341 = arith.constant 0 : index
    %356 = vector.load %arg16[%c139, %c0_341] : memref<200x128xf32, #tpu.memory_space<vmem>>, vector<50x8xf32>
    %c32_342 = arith.constant 32 : index
    %c0_343 = arith.constant 0 : index
    %357 = vector.load %arg4[%c32_342, %c0_343] : memref<72x128xf32, #tpu.memory_space<vmem>>, vector<8x128xf32>
    %cst_344 = arith.constant dense<0.000000e+00> : vector<50x128xf32>
    %358 = tpu.matmul %356, %357, %cst_344 {dimension_numbers = #tpu.dot_dimension_numbers<[1], [0], [0], [1], [0, 0, 1, 1], [], []>} : vector<50x8xf32>, vector<8x128xf32>, vector<50x128xf32> -> vector<50x128xf32>
    %359 = arith.addf %355, %358 : vector<50x128xf32>
    %c140_345 = arith.constant 140 : index
    %c0_346 = arith.constant 0 : index
    %360 = vector.load %arg16[%c140_345, %c0_346] : memref<200x128xf32, #tpu.memory_space<vmem>>, vector<50x8xf32>
    %c40_347 = arith.constant 40 : index
    %c0_348 = arith.constant 0 : index
    %361 = vector.load %arg4[%c40_347, %c0_348] : memref<72x128xf32, #tpu.memory_space<vmem>>, vector<8x128xf32>
    %cst_349 = arith.constant dense<0.000000e+00> : vector<50x128xf32>
    %362 = tpu.matmul %360, %361, %cst_349 {dimension_numbers = #tpu.dot_dimension_numbers<[1], [0], [0], [1], [0, 0, 1, 1], [], []>} : vector<50x8xf32>, vector<8x128xf32>, vector<50x128xf32> -> vector<50x128xf32>
    %363 = arith.addf %359, %362 : vector<50x128xf32>
    %c148_350 = arith.constant 148 : index
    %c0_351 = arith.constant 0 : index
    %364 = vector.load %arg16[%c148_350, %c0_351] : memref<200x128xf32, #tpu.memory_space<vmem>>, vector<50x8xf32>
    %c48_352 = arith.constant 48 : index
    %c0_353 = arith.constant 0 : index
    %365 = vector.load %arg4[%c48_352, %c0_353] : memref<72x128xf32, #tpu.memory_space<vmem>>, vector<8x128xf32>
    %cst_354 = arith.constant dense<0.000000e+00> : vector<50x128xf32>
    %366 = tpu.matmul %364, %365, %cst_354 {dimension_numbers = #tpu.dot_dimension_numbers<[1], [0], [0], [1], [0, 0, 1, 1], [], []>} : vector<50x8xf32>, vector<8x128xf32>, vector<50x128xf32> -> vector<50x128xf32>
    %367 = arith.addf %363, %366 : vector<50x128xf32>
    %c149 = arith.constant 149 : index
    %c0_355 = arith.constant 0 : index
    %368 = vector.load %arg16[%c149, %c0_355] : memref<200x128xf32, #tpu.memory_space<vmem>>, vector<50x8xf32>
    %c56_356 = arith.constant 56 : index
    %c0_357 = arith.constant 0 : index
    %369 = vector.load %arg4[%c56_356, %c0_357] : memref<72x128xf32, #tpu.memory_space<vmem>>, vector<8x128xf32>
    %cst_358 = arith.constant dense<0.000000e+00> : vector<50x128xf32>
    %370 = tpu.matmul %368, %369, %cst_358 {dimension_numbers = #tpu.dot_dimension_numbers<[1], [0], [0], [1], [0, 0, 1, 1], [], []>} : vector<50x8xf32>, vector<8x128xf32>, vector<50x128xf32> -> vector<50x128xf32>
    %371 = arith.addf %367, %370 : vector<50x128xf32>
    %c150_359 = arith.constant 150 : index
    %c0_360 = arith.constant 0 : index
    %372 = vector.load %arg16[%c150_359, %c0_360] : memref<200x128xf32, #tpu.memory_space<vmem>>, vector<50x8xf32>
    %c64_361 = arith.constant 64 : index
    %c0_362 = arith.constant 0 : index
    %373 = vector.load %arg4[%c64_361, %c0_362] : memref<72x128xf32, #tpu.memory_space<vmem>>, vector<8x128xf32>
    %cst_363 = arith.constant dense<0.000000e+00> : vector<50x128xf32>
    %374 = tpu.matmul %372, %373, %cst_363 {dimension_numbers = #tpu.dot_dimension_numbers<[1], [0], [0], [1], [0, 0, 1, 1], [], []>} : vector<50x8xf32>, vector<8x128xf32>, vector<50x128xf32> -> vector<50x128xf32>
    %375 = arith.addf %371, %374 : vector<50x128xf32>
    %376 = vector.broadcast %300 : vector<1x128xf32> to vector<50x128xf32>
    %377 = arith.addf %375, %376 : vector<50x128xf32>
    %cst_364 = arith.constant 0.000000e+00 : f32
    %378 = vector.broadcast %cst_364 : f32 to vector<50x128xf32>
    %379 = arith.maximumf %377, %378 : vector<50x128xf32>
    %c128_365 = arith.constant 128 : index
    %c0_366 = arith.constant 0 : index
    %380 = vector.load %arg15[%c128_365, %c0_366] : memref<648x128xf32, #tpu.memory_space<vmem>>, vector<50x128xf32>
    tpu.vector_store %arg15[%c128_365, %c0_366], %379 {strides = array<i32>} : memref<648x128xf32, #tpu.memory_space<vmem>>, vector<50x128xf32>,
    %cst_367 = arith.constant 0.000000e+00 : f32
    %381 = vector.broadcast %cst_367 : f32 to vector<6x128xf32>
    %cst_368 = arith.constant 0.000000e+00 : f32
    %382 = vector.broadcast %cst_368 : f32 to vector<1x128xf32>
    %c0_369 = arith.constant 0 : index
    %c0_370 = arith.constant 0 : index
    %383 = vector.load %arg17[%c0_369, %c0_370] : memref<72x128xf32, #tpu.memory_space<vmem>>, vector<6x128xf32>
    tpu.vector_store %arg17[%c0_369, %c0_370], %381 {strides = array<i32>} : memref<72x128xf32, #tpu.memory_space<vmem>>, vector<6x128xf32>,
    %c30_371 = arith.constant 30 : index
    %c0_372 = arith.constant 0 : index
    %384 = vector.load %arg17[%c30_371, %c0_372] : memref<72x128xf32, #tpu.memory_space<vmem>>, vector<6x128xf32>
    tpu.vector_store %arg17[%c30_371, %c0_372], %381 {strides = array<i32>} : memref<72x128xf32, #tpu.memory_space<vmem>>, vector<6x128xf32>,
    %c0_373 = arith.constant 0 : index
    %c0_374 = arith.constant 0 : index
    %385 = tpu.strided_load %arg15[%c0_373, %c0_374] {strides = array<i32: 2, 1>} : memref<648x128xf32, #tpu.memory_space<vmem>>, vector<4x128xf32>
    %386 = tpu.concatenate %382, %385, %382 in 0 : vector<1x128xf32>, vector<4x128xf32>, vector<1x128xf32> -> vector<6x128xf32>
    %c6 = arith.constant 6 : index
    %c0_375 = arith.constant 0 : index
    %387 = vector.load %arg17[%c6, %c0_375] : memref<72x128xf32, #tpu.memory_space<vmem>>, vector<6x128xf32>
    tpu.vector_store %arg17[%c6, %c0_375], %386 {strides = array<i32>} : memref<72x128xf32, #tpu.memory_space<vmem>>, vector<6x128xf32>,
    %c20_376 = arith.constant 20 : index
    %c0_377 = arith.constant 0 : index
    %388 = tpu.strided_load %arg15[%c20_376, %c0_377] {strides = array<i32: 2, 1>} : memref<648x128xf32, #tpu.memory_space<vmem>>, vector<4x128xf32>
    %389 = tpu.concatenate %382, %388, %382 in 0 : vector<1x128xf32>, vector<4x128xf32>, vector<1x128xf32> -> vector<6x128xf32>
    %c12_378 = arith.constant 12 : index
    %c0_379 = arith.constant 0 : index
    %390 = vector.load %arg17[%c12_378, %c0_379] : memref<72x128xf32, #tpu.memory_space<vmem>>, vector<6x128xf32>
    tpu.vector_store %arg17[%c12_378, %c0_379], %389 {strides = array<i32>} : memref<72x128xf32, #tpu.memory_space<vmem>>, vector<6x128xf32>,
    %c40_380 = arith.constant 40 : index
    %c0_381 = arith.constant 0 : index
    %391 = tpu.strided_load %arg15[%c40_380, %c0_381] {strides = array<i32: 2, 1>} : memref<648x128xf32, #tpu.memory_space<vmem>>, vector<4x128xf32>
    %392 = tpu.concatenate %382, %391, %382 in 0 : vector<1x128xf32>, vector<4x128xf32>, vector<1x128xf32> -> vector<6x128xf32>
    %c18_382 = arith.constant 18 : index
    %c0_383 = arith.constant 0 : index
    %393 = vector.load %arg17[%c18_382, %c0_383] : memref<72x128xf32, #tpu.memory_space<vmem>>, vector<6x128xf32>
    tpu.vector_store %arg17[%c18_382, %c0_383], %392 {strides = array<i32>} : memref<72x128xf32, #tpu.memory_space<vmem>>, vector<6x128xf32>,
    %c60_384 = arith.constant 60 : index
    %c0_385 = arith.constant 0 : index
    %394 = tpu.strided_load %arg15[%c60_384, %c0_385] {strides = array<i32: 2, 1>} : memref<648x128xf32, #tpu.memory_space<vmem>>, vector<4x128xf32>
    %395 = tpu.concatenate %382, %394, %382 in 0 : vector<1x128xf32>, vector<4x128xf32>, vector<1x128xf32> -> vector<6x128xf32>
    %c24_386 = arith.constant 24 : index
    %c0_387 = arith.constant 0 : index
    %396 = vector.load %arg17[%c24_386, %c0_387] : memref<72x128xf32, #tpu.memory_space<vmem>>, vector<6x128xf32>
    tpu.vector_store %arg17[%c24_386, %c0_387], %395 {strides = array<i32>} : memref<72x128xf32, #tpu.memory_space<vmem>>, vector<6x128xf32>,
    %c36_388 = arith.constant 36 : index
    %c0_389 = arith.constant 0 : index
    %397 = vector.load %arg17[%c36_388, %c0_389] : memref<72x128xf32, #tpu.memory_space<vmem>>, vector<6x128xf32>
    tpu.vector_store %arg17[%c36_388, %c0_389], %381 {strides = array<i32>} : memref<72x128xf32, #tpu.memory_space<vmem>>, vector<6x128xf32>,
    %c66 = arith.constant 66 : index
    %c0_390 = arith.constant 0 : index
    %398 = vector.load %arg17[%c66, %c0_390] : memref<72x128xf32, #tpu.memory_space<vmem>>, vector<6x128xf32>
    tpu.vector_store %arg17[%c66, %c0_390], %381 {strides = array<i32>} : memref<72x128xf32, #tpu.memory_space<vmem>>, vector<6x128xf32>,
    %c100_391 = arith.constant 100 : index
    %c0_392 = arith.constant 0 : index
    %399 = tpu.strided_load %arg15[%c100_391, %c0_392] {strides = array<i32: 2, 1>} : memref<648x128xf32, #tpu.memory_space<vmem>>, vector<4x128xf32>
    %400 = tpu.concatenate %382, %399, %382 in 0 : vector<1x128xf32>, vector<4x128xf32>, vector<1x128xf32> -> vector<6x128xf32>
    %c42 = arith.constant 42 : index
    %c0_393 = arith.constant 0 : index
    %401 = vector.load %arg17[%c42, %c0_393] : memref<72x128xf32, #tpu.memory_space<vmem>>, vector<6x128xf32>
    tpu.vector_store %arg17[%c42, %c0_393], %400 {strides = array<i32>} : memref<72x128xf32, #tpu.memory_space<vmem>>, vector<6x128xf32>,
    %c120_394 = arith.constant 120 : index
    %c0_395 = arith.constant 0 : index
    %402 = tpu.strided_load %arg15[%c120_394, %c0_395] {strides = array<i32: 2, 1>} : memref<648x128xf32, #tpu.memory_space<vmem>>, vector<4x128xf32>
    %403 = tpu.concatenate %382, %402, %382 in 0 : vector<1x128xf32>, vector<4x128xf32>, vector<1x128xf32> -> vector<6x128xf32>
    %c48_396 = arith.constant 48 : index
    %c0_397 = arith.constant 0 : index
    %404 = vector.load %arg17[%c48_396, %c0_397] : memref<72x128xf32, #tpu.memory_space<vmem>>, vector<6x128xf32>
    tpu.vector_store %arg17[%c48_396, %c0_397], %403 {strides = array<i32>} : memref<72x128xf32, #tpu.memory_space<vmem>>, vector<6x128xf32>,
    %c140_398 = arith.constant 140 : index
    %c0_399 = arith.constant 0 : index
    %405 = tpu.strided_load %arg15[%c140_398, %c0_399] {strides = array<i32: 2, 1>} : memref<648x128xf32, #tpu.memory_space<vmem>>, vector<4x128xf32>
    %406 = tpu.concatenate %382, %405, %382 in 0 : vector<1x128xf32>, vector<4x128xf32>, vector<1x128xf32> -> vector<6x128xf32>
    %c54 = arith.constant 54 : index
    %c0_400 = arith.constant 0 : index
    %407 = vector.load %arg17[%c54, %c0_400] : memref<72x128xf32, #tpu.memory_space<vmem>>, vector<6x128xf32>
    tpu.vector_store %arg17[%c54, %c0_400], %406 {strides = array<i32>} : memref<72x128xf32, #tpu.memory_space<vmem>>, vector<6x128xf32>,
    %c160_401 = arith.constant 160 : index
    %c0_402 = arith.constant 0 : index
    %408 = tpu.strided_load %arg15[%c160_401, %c0_402] {strides = array<i32: 2, 1>} : memref<648x128xf32, #tpu.memory_space<vmem>>, vector<4x128xf32>
    %409 = tpu.concatenate %382, %408, %382 in 0 : vector<1x128xf32>, vector<4x128xf32>, vector<1x128xf32> -> vector<6x128xf32>
    %c60_403 = arith.constant 60 : index
    %c0_404 = arith.constant 0 : index
    %410 = vector.load %arg17[%c60_403, %c0_404] : memref<72x128xf32, #tpu.memory_space<vmem>>, vector<6x128xf32>
    tpu.vector_store %arg17[%c60_403, %c0_404], %409 {strides = array<i32>} : memref<72x128xf32, #tpu.memory_space<vmem>>, vector<6x128xf32>,
    %c0_405 = arith.constant 0 : index
    %c0_406 = arith.constant 0 : index
    %411 = vector.load %arg7[%c0_405, %c0_406] : memref<1x128xf32, #tpu.memory_space<vmem>>, vector<1x128xf32>
    %c0_407 = arith.constant 0 : index
    %c0_408 = arith.constant 0 : index
    %412 = vector.load %arg17[%c0_407, %c0_408] : memref<72x128xf32, #tpu.memory_space<vmem>>, vector<58x16xf32>
    %c0_409 = arith.constant 0 : index
    %c0_410 = arith.constant 0 : index
    %413 = vector.load %arg6[%c0_409, %c0_410] : memref<144x128xf32, #tpu.memory_space<vmem>>, vector<16x128xf32>
    %cst_411 = arith.constant dense<0.000000e+00> : vector<58x128xf32>
    %414 = tpu.matmul %412, %413, %cst_411 {dimension_numbers = #tpu.dot_dimension_numbers<[1], [0], [0], [1], [0, 0, 1, 1], [], []>} : vector<58x16xf32>, vector<16x128xf32>, vector<58x128xf32> -> vector<58x128xf32>
    %c1_412 = arith.constant 1 : index
    %c0_413 = arith.constant 0 : index
    %415 = vector.load %arg17[%c1_412, %c0_413] : memref<72x128xf32, #tpu.memory_space<vmem>>, vector<58x16xf32>
    %c16_414 = arith.constant 16 : index
    %c0_415 = arith.constant 0 : index
    %416 = vector.load %arg6[%c16_414, %c0_415] : memref<144x128xf32, #tpu.memory_space<vmem>>, vector<16x128xf32>
    %cst_416 = arith.constant dense<0.000000e+00> : vector<58x128xf32>
    %417 = tpu.matmul %415, %416, %cst_416 {dimension_numbers = #tpu.dot_dimension_numbers<[1], [0], [0], [1], [0, 0, 1, 1], [], []>} : vector<58x16xf32>, vector<16x128xf32>, vector<58x128xf32> -> vector<58x128xf32>
    %418 = arith.addf %414, %417 : vector<58x128xf32>
    %c2_417 = arith.constant 2 : index
    %c0_418 = arith.constant 0 : index
    %419 = vector.load %arg17[%c2_417, %c0_418] : memref<72x128xf32, #tpu.memory_space<vmem>>, vector<58x16xf32>
    %c32_419 = arith.constant 32 : index
    %c0_420 = arith.constant 0 : index
    %420 = vector.load %arg6[%c32_419, %c0_420] : memref<144x128xf32, #tpu.memory_space<vmem>>, vector<16x128xf32>
    %cst_421 = arith.constant dense<0.000000e+00> : vector<58x128xf32>
    %421 = tpu.matmul %419, %420, %cst_421 {dimension_numbers = #tpu.dot_dimension_numbers<[1], [0], [0], [1], [0, 0, 1, 1], [], []>} : vector<58x16xf32>, vector<16x128xf32>, vector<58x128xf32> -> vector<58x128xf32>
    %422 = arith.addf %418, %421 : vector<58x128xf32>
    %c6_422 = arith.constant 6 : index
    %c0_423 = arith.constant 0 : index
    %423 = vector.load %arg17[%c6_422, %c0_423] : memref<72x128xf32, #tpu.memory_space<vmem>>, vector<58x16xf32>
    %c48_424 = arith.constant 48 : index
    %c0_425 = arith.constant 0 : index
    %424 = vector.load %arg6[%c48_424, %c0_425] : memref<144x128xf32, #tpu.memory_space<vmem>>, vector<16x128xf32>
    %cst_426 = arith.constant dense<0.000000e+00> : vector<58x128xf32>
    %425 = tpu.matmul %423, %424, %cst_426 {dimension_numbers = #tpu.dot_dimension_numbers<[1], [0], [0], [1], [0, 0, 1, 1], [], []>} : vector<58x16xf32>, vector<16x128xf32>, vector<58x128xf32> -> vector<58x128xf32>
    %426 = arith.addf %422, %425 : vector<58x128xf32>
    %c7 = arith.constant 7 : index
    %c0_427 = arith.constant 0 : index
    %427 = vector.load %arg17[%c7, %c0_427] : memref<72x128xf32, #tpu.memory_space<vmem>>, vector<58x16xf32>
    %c64_428 = arith.constant 64 : index
    %c0_429 = arith.constant 0 : index
    %428 = vector.load %arg6[%c64_428, %c0_429] : memref<144x128xf32, #tpu.memory_space<vmem>>, vector<16x128xf32>
    %cst_430 = arith.constant dense<0.000000e+00> : vector<58x128xf32>
    %429 = tpu.matmul %427, %428, %cst_430 {dimension_numbers = #tpu.dot_dimension_numbers<[1], [0], [0], [1], [0, 0, 1, 1], [], []>} : vector<58x16xf32>, vector<16x128xf32>, vector<58x128xf32> -> vector<58x128xf32>
    %430 = arith.addf %426, %429 : vector<58x128xf32>
    %c8_431 = arith.constant 8 : index
    %c0_432 = arith.constant 0 : index
    %431 = vector.load %arg17[%c8_431, %c0_432] : memref<72x128xf32, #tpu.memory_space<vmem>>, vector<58x16xf32>
    %c80_433 = arith.constant 80 : index
    %c0_434 = arith.constant 0 : index
    %432 = vector.load %arg6[%c80_433, %c0_434] : memref<144x128xf32, #tpu.memory_space<vmem>>, vector<16x128xf32>
    %cst_435 = arith.constant dense<0.000000e+00> : vector<58x128xf32>
    %433 = tpu.matmul %431, %432, %cst_435 {dimension_numbers = #tpu.dot_dimension_numbers<[1], [0], [0], [1], [0, 0, 1, 1], [], []>} : vector<58x16xf32>, vector<16x128xf32>, vector<58x128xf32> -> vector<58x128xf32>
    %434 = arith.addf %430, %433 : vector<58x128xf32>
    %c12_436 = arith.constant 12 : index
    %c0_437 = arith.constant 0 : index
    %435 = vector.load %arg17[%c12_436, %c0_437] : memref<72x128xf32, #tpu.memory_space<vmem>>, vector<58x16xf32>
    %c96 = arith.constant 96 : index
    %c0_438 = arith.constant 0 : index
    %436 = vector.load %arg6[%c96, %c0_438] : memref<144x128xf32, #tpu.memory_space<vmem>>, vector<16x128xf32>
    %cst_439 = arith.constant dense<0.000000e+00> : vector<58x128xf32>
    %437 = tpu.matmul %435, %436, %cst_439 {dimension_numbers = #tpu.dot_dimension_numbers<[1], [0], [0], [1], [0, 0, 1, 1], [], []>} : vector<58x16xf32>, vector<16x128xf32>, vector<58x128xf32> -> vector<58x128xf32>
    %438 = arith.addf %434, %437 : vector<58x128xf32>
    %c13 = arith.constant 13 : index
    %c0_440 = arith.constant 0 : index
    %439 = vector.load %arg17[%c13, %c0_440] : memref<72x128xf32, #tpu.memory_space<vmem>>, vector<58x16xf32>
    %c112 = arith.constant 112 : index
    %c0_441 = arith.constant 0 : index
    %440 = vector.load %arg6[%c112, %c0_441] : memref<144x128xf32, #tpu.memory_space<vmem>>, vector<16x128xf32>
    %cst_442 = arith.constant dense<0.000000e+00> : vector<58x128xf32>
    %441 = tpu.matmul %439, %440, %cst_442 {dimension_numbers = #tpu.dot_dimension_numbers<[1], [0], [0], [1], [0, 0, 1, 1], [], []>} : vector<58x16xf32>, vector<16x128xf32>, vector<58x128xf32> -> vector<58x128xf32>
    %442 = arith.addf %438, %441 : vector<58x128xf32>
    %c14 = arith.constant 14 : index
    %c0_443 = arith.constant 0 : index
    %443 = vector.load %arg17[%c14, %c0_443] : memref<72x128xf32, #tpu.memory_space<vmem>>, vector<58x16xf32>
    %c128_444 = arith.constant 128 : index
    %c0_445 = arith.constant 0 : index
    %444 = vector.load %arg6[%c128_444, %c0_445] : memref<144x128xf32, #tpu.memory_space<vmem>>, vector<16x128xf32>
    %cst_446 = arith.constant dense<0.000000e+00> : vector<58x128xf32>
    %445 = tpu.matmul %443, %444, %cst_446 {dimension_numbers = #tpu.dot_dimension_numbers<[1], [0], [0], [1], [0, 0, 1, 1], [], []>} : vector<58x16xf32>, vector<16x128xf32>, vector<58x128xf32> -> vector<58x128xf32>
    %446 = arith.addf %442, %445 : vector<58x128xf32>
    %447 = vector.broadcast %411 : vector<1x128xf32> to vector<58x128xf32>
    %448 = arith.addf %446, %447 : vector<58x128xf32>
    %cst_447 = arith.constant 0.000000e+00 : f32
    %449 = vector.broadcast %cst_447 : f32 to vector<58x128xf32>
    %450 = arith.maximumf %448, %449 : vector<58x128xf32>
    %c0_448 = arith.constant 0 : index
    %c0_449 = arith.constant 0 : index
    %451 = vector.load %arg15[%c0_448, %c0_449] : memref<648x128xf32, #tpu.memory_space<vmem>>, vector<58x128xf32>
    tpu.vector_store %arg15[%c0_448, %c0_449], %450 {strides = array<i32>} : memref<648x128xf32, #tpu.memory_space<vmem>>, vector<58x128xf32>,
    %c0_450 = arith.constant 0 : index
    %c0_451 = arith.constant 0 : index
    %452 = tpu.strided_load %arg15[%c0_450, %c0_451] {strides = array<i32: 36, 1>} : memref<648x128xf32, #tpu.memory_space<vmem>>, vector<2x16xf32>
    %c0_452 = arith.constant 0 : index
    %c0_453 = arith.constant 0 : index
    %453 = vector.load %arg8[%c0_452, %c0_453] : memref<256x128xf32, #tpu.memory_space<vmem>>, vector<16x128xf32>
    %cst_454 = arith.constant dense<0.000000e+00> : vector<2x128xf32>
    %454 = tpu.matmul %452, %453, %cst_454 {dimension_numbers = #tpu.dot_dimension_numbers<[1], [0], [0], [1], [0, 0, 1, 1], [], []>} : vector<2x16xf32>, vector<16x128xf32>, vector<2x128xf32> -> vector<2x128xf32>
    %c1_455 = arith.constant 1 : index
    %c0_456 = arith.constant 0 : index
    %455 = tpu.strided_load %arg15[%c1_455, %c0_456] {strides = array<i32: 36, 1>} : memref<648x128xf32, #tpu.memory_space<vmem>>, vector<2x16xf32>
    %c16_457 = arith.constant 16 : index
    %c0_458 = arith.constant 0 : index
    %456 = vector.load %arg8[%c16_457, %c0_458] : memref<256x128xf32, #tpu.memory_space<vmem>>, vector<16x128xf32>
    %cst_459 = arith.constant dense<0.000000e+00> : vector<2x128xf32>
    %457 = tpu.matmul %455, %456, %cst_459 {dimension_numbers = #tpu.dot_dimension_numbers<[1], [0], [0], [1], [0, 0, 1, 1], [], []>} : vector<2x16xf32>, vector<16x128xf32>, vector<2x128xf32> -> vector<2x128xf32>
    %c2_460 = arith.constant 2 : index
    %c0_461 = arith.constant 0 : index
    %458 = tpu.strided_load %arg15[%c2_460, %c0_461] {strides = array<i32: 36, 1>} : memref<648x128xf32, #tpu.memory_space<vmem>>, vector<2x16xf32>
    %c32_462 = arith.constant 32 : index
    %c0_463 = arith.constant 0 : index
    %459 = vector.load %arg8[%c32_462, %c0_463] : memref<256x128xf32, #tpu.memory_space<vmem>>, vector<16x128xf32>
    %cst_464 = arith.constant dense<0.000000e+00> : vector<2x128xf32>
    %460 = tpu.matmul %458, %459, %cst_464 {dimension_numbers = #tpu.dot_dimension_numbers<[1], [0], [0], [1], [0, 0, 1, 1], [], []>} : vector<2x16xf32>, vector<16x128xf32>, vector<2x128xf32> -> vector<2x128xf32>
    %c3 = arith.constant 3 : index
    %c0_465 = arith.constant 0 : index
    %461 = tpu.strided_load %arg15[%c3, %c0_465] {strides = array<i32: 36, 1>} : memref<648x128xf32, #tpu.memory_space<vmem>>, vector<2x16xf32>
    %c48_466 = arith.constant 48 : index
    %c0_467 = arith.constant 0 : index
    %462 = vector.load %arg8[%c48_466, %c0_467] : memref<256x128xf32, #tpu.memory_space<vmem>>, vector<16x128xf32>
    %cst_468 = arith.constant dense<0.000000e+00> : vector<2x128xf32>
    %463 = tpu.matmul %461, %462, %cst_468 {dimension_numbers = #tpu.dot_dimension_numbers<[1], [0], [0], [1], [0, 0, 1, 1], [], []>} : vector<2x16xf32>, vector<16x128xf32>, vector<2x128xf32> -> vector<2x128xf32>
    %c6_469 = arith.constant 6 : index
    %c0_470 = arith.constant 0 : index
    %464 = tpu.strided_load %arg15[%c6_469, %c0_470] {strides = array<i32: 36, 1>} : memref<648x128xf32, #tpu.memory_space<vmem>>, vector<2x16xf32>
    %c64_471 = arith.constant 64 : index
    %c0_472 = arith.constant 0 : index
    %465 = vector.load %arg8[%c64_471, %c0_472] : memref<256x128xf32, #tpu.memory_space<vmem>>, vector<16x128xf32>
    %cst_473 = arith.constant dense<0.000000e+00> : vector<2x128xf32>
    %466 = tpu.matmul %464, %465, %cst_473 {dimension_numbers = #tpu.dot_dimension_numbers<[1], [0], [0], [1], [0, 0, 1, 1], [], []>} : vector<2x16xf32>, vector<16x128xf32>, vector<2x128xf32> -> vector<2x128xf32>
    %c7_474 = arith.constant 7 : index
    %c0_475 = arith.constant 0 : index
    %467 = tpu.strided_load %arg15[%c7_474, %c0_475] {strides = array<i32: 36, 1>} : memref<648x128xf32, #tpu.memory_space<vmem>>, vector<2x16xf32>
    %c80_476 = arith.constant 80 : index
    %c0_477 = arith.constant 0 : index
    %468 = vector.load %arg8[%c80_476, %c0_477] : memref<256x128xf32, #tpu.memory_space<vmem>>, vector<16x128xf32>
    %cst_478 = arith.constant dense<0.000000e+00> : vector<2x128xf32>
    %469 = tpu.matmul %467, %468, %cst_478 {dimension_numbers = #tpu.dot_dimension_numbers<[1], [0], [0], [1], [0, 0, 1, 1], [], []>} : vector<2x16xf32>, vector<16x128xf32>, vector<2x128xf32> -> vector<2x128xf32>
    %c8_479 = arith.constant 8 : index
    %c0_480 = arith.constant 0 : index
    %470 = tpu.strided_load %arg15[%c8_479, %c0_480] {strides = array<i32: 36, 1>} : memref<648x128xf32, #tpu.memory_space<vmem>>, vector<2x16xf32>
    %c96_481 = arith.constant 96 : index
    %c0_482 = arith.constant 0 : index
    %471 = vector.load %arg8[%c96_481, %c0_482] : memref<256x128xf32, #tpu.memory_space<vmem>>, vector<16x128xf32>
    %cst_483 = arith.constant dense<0.000000e+00> : vector<2x128xf32>
    %472 = tpu.matmul %470, %471, %cst_483 {dimension_numbers = #tpu.dot_dimension_numbers<[1], [0], [0], [1], [0, 0, 1, 1], [], []>} : vector<2x16xf32>, vector<16x128xf32>, vector<2x128xf32> -> vector<2x128xf32>
    %c9 = arith.constant 9 : index
    %c0_484 = arith.constant 0 : index
    %473 = tpu.strided_load %arg15[%c9, %c0_484] {strides = array<i32: 36, 1>} : memref<648x128xf32, #tpu.memory_space<vmem>>, vector<2x16xf32>
    %c112_485 = arith.constant 112 : index
    %c0_486 = arith.constant 0 : index
    %474 = vector.load %arg8[%c112_485, %c0_486] : memref<256x128xf32, #tpu.memory_space<vmem>>, vector<16x128xf32>
    %cst_487 = arith.constant dense<0.000000e+00> : vector<2x128xf32>
    %475 = tpu.matmul %473, %474, %cst_487 {dimension_numbers = #tpu.dot_dimension_numbers<[1], [0], [0], [1], [0, 0, 1, 1], [], []>} : vector<2x16xf32>, vector<16x128xf32>, vector<2x128xf32> -> vector<2x128xf32>
    %c12_488 = arith.constant 12 : index
    %c0_489 = arith.constant 0 : index
    %476 = tpu.strided_load %arg15[%c12_488, %c0_489] {strides = array<i32: 36, 1>} : memref<648x128xf32, #tpu.memory_space<vmem>>, vector<2x16xf32>
    %c128_490 = arith.constant 128 : index
    %c0_491 = arith.constant 0 : index
    %477 = vector.load %arg8[%c128_490, %c0_491] : memref<256x128xf32, #tpu.memory_space<vmem>>, vector<16x128xf32>
    %cst_492 = arith.constant dense<0.000000e+00> : vector<2x128xf32>
    %478 = tpu.matmul %476, %477, %cst_492 {dimension_numbers = #tpu.dot_dimension_numbers<[1], [0], [0], [1], [0, 0, 1, 1], [], []>} : vector<2x16xf32>, vector<16x128xf32>, vector<2x128xf32> -> vector<2x128xf32>
    %c13_493 = arith.constant 13 : index
    %c0_494 = arith.constant 0 : index
    %479 = tpu.strided_load %arg15[%c13_493, %c0_494] {strides = array<i32: 36, 1>} : memref<648x128xf32, #tpu.memory_space<vmem>>, vector<2x16xf32>
    %c144_495 = arith.constant 144 : index
    %c0_496 = arith.constant 0 : index
    %480 = vector.load %arg8[%c144_495, %c0_496] : memref<256x128xf32, #tpu.memory_space<vmem>>, vector<16x128xf32>
    %cst_497 = arith.constant dense<0.000000e+00> : vector<2x128xf32>
    %481 = tpu.matmul %479, %480, %cst_497 {dimension_numbers = #tpu.dot_dimension_numbers<[1], [0], [0], [1], [0, 0, 1, 1], [], []>} : vector<2x16xf32>, vector<16x128xf32>, vector<2x128xf32> -> vector<2x128xf32>
    %c14_498 = arith.constant 14 : index
    %c0_499 = arith.constant 0 : index
    %482 = tpu.strided_load %arg15[%c14_498, %c0_499] {strides = array<i32: 36, 1>} : memref<648x128xf32, #tpu.memory_space<vmem>>, vector<2x16xf32>
    %c160_500 = arith.constant 160 : index
    %c0_501 = arith.constant 0 : index
    %483 = vector.load %arg8[%c160_500, %c0_501] : memref<256x128xf32, #tpu.memory_space<vmem>>, vector<16x128xf32>
    %cst_502 = arith.constant dense<0.000000e+00> : vector<2x128xf32>
    %484 = tpu.matmul %482, %483, %cst_502 {dimension_numbers = #tpu.dot_dimension_numbers<[1], [0], [0], [1], [0, 0, 1, 1], [], []>} : vector<2x16xf32>, vector<16x128xf32>, vector<2x128xf32> -> vector<2x128xf32>
    %c15 = arith.constant 15 : index
    %c0_503 = arith.constant 0 : index
    %485 = tpu.strided_load %arg15[%c15, %c0_503] {strides = array<i32: 36, 1>} : memref<648x128xf32, #tpu.memory_space<vmem>>, vector<2x16xf32>
    %c176 = arith.constant 176 : index
    %c0_504 = arith.constant 0 : index
    %486 = vector.load %arg8[%c176, %c0_504] : memref<256x128xf32, #tpu.memory_space<vmem>>, vector<16x128xf32>
    %cst_505 = arith.constant dense<0.000000e+00> : vector<2x128xf32>
    %487 = tpu.matmul %485, %486, %cst_505 {dimension_numbers = #tpu.dot_dimension_numbers<[1], [0], [0], [1], [0, 0, 1, 1], [], []>} : vector<2x16xf32>, vector<16x128xf32>, vector<2x128xf32> -> vector<2x128xf32>
    %c18_506 = arith.constant 18 : index
    %c0_507 = arith.constant 0 : index
    %488 = tpu.strided_load %arg15[%c18_506, %c0_507] {strides = array<i32: 36, 1>} : memref<648x128xf32, #tpu.memory_space<vmem>>, vector<2x16xf32>
    %c192 = arith.constant 192 : index
    %c0_508 = arith.constant 0 : index
    %489 = vector.load %arg8[%c192, %c0_508] : memref<256x128xf32, #tpu.memory_space<vmem>>, vector<16x128xf32>
    %cst_509 = arith.constant dense<0.000000e+00> : vector<2x128xf32>
    %490 = tpu.matmul %488, %489, %cst_509 {dimension_numbers = #tpu.dot_dimension_numbers<[1], [0], [0], [1], [0, 0, 1, 1], [], []>} : vector<2x16xf32>, vector<16x128xf32>, vector<2x128xf32> -> vector<2x128xf32>
    %c19_510 = arith.constant 19 : index
    %c0_511 = arith.constant 0 : index
    %491 = tpu.strided_load %arg15[%c19_510, %c0_511] {strides = array<i32: 36, 1>} : memref<648x128xf32, #tpu.memory_space<vmem>>, vector<2x16xf32>
    %c208 = arith.constant 208 : index
    %c0_512 = arith.constant 0 : index
    %492 = vector.load %arg8[%c208, %c0_512] : memref<256x128xf32, #tpu.memory_space<vmem>>, vector<16x128xf32>
    %cst_513 = arith.constant dense<0.000000e+00> : vector<2x128xf32>
    %493 = tpu.matmul %491, %492, %cst_513 {dimension_numbers = #tpu.dot_dimension_numbers<[1], [0], [0], [1], [0, 0, 1, 1], [], []>} : vector<2x16xf32>, vector<16x128xf32>, vector<2x128xf32> -> vector<2x128xf32>
    %c20_514 = arith.constant 20 : index
    %c0_515 = arith.constant 0 : index
    %494 = tpu.strided_load %arg15[%c20_514, %c0_515] {strides = array<i32: 36, 1>} : memref<648x128xf32, #tpu.memory_space<vmem>>, vector<2x16xf32>
    %c224 = arith.constant 224 : index
    %c0_516 = arith.constant 0 : index
    %495 = vector.load %arg8[%c224, %c0_516] : memref<256x128xf32, #tpu.memory_space<vmem>>, vector<16x128xf32>
    %cst_517 = arith.constant dense<0.000000e+00> : vector<2x128xf32>
    %496 = tpu.matmul %494, %495, %cst_517 {dimension_numbers = #tpu.dot_dimension_numbers<[1], [0], [0], [1], [0, 0, 1, 1], [], []>} : vector<2x16xf32>, vector<16x128xf32>, vector<2x128xf32> -> vector<2x128xf32>
    %c21_518 = arith.constant 21 : index
    %c0_519 = arith.constant 0 : index
    %497 = tpu.strided_load %arg15[%c21_518, %c0_519] {strides = array<i32: 36, 1>} : memref<648x128xf32, #tpu.memory_space<vmem>>, vector<2x16xf32>
    %c240 = arith.constant 240 : index
    %c0_520 = arith.constant 0 : index
    %498 = vector.load %arg8[%c240, %c0_520] : memref<256x128xf32, #tpu.memory_space<vmem>>, vector<16x128xf32>
    %cst_521 = arith.constant dense<0.000000e+00> : vector<2x128xf32>
    %499 = tpu.matmul %497, %498, %cst_521 {dimension_numbers = #tpu.dot_dimension_numbers<[1], [0], [0], [1], [0, 0, 1, 1], [], []>} : vector<2x16xf32>, vector<16x128xf32>, vector<2x128xf32> -> vector<2x128xf32>
    %500 = arith.addf %454, %457 : vector<2x128xf32>
    %501 = arith.addf %460, %463 : vector<2x128xf32>
    %502 = arith.addf %466, %469 : vector<2x128xf32>
    %503 = arith.addf %472, %475 : vector<2x128xf32>
    %504 = arith.addf %478, %481 : vector<2x128xf32>
    %505 = arith.addf %484, %487 : vector<2x128xf32>
    %506 = arith.addf %490, %493 : vector<2x128xf32>
    %507 = arith.addf %496, %499 : vector<2x128xf32>
    %508 = arith.addf %500, %501 : vector<2x128xf32>
    %509 = arith.addf %502, %503 : vector<2x128xf32>
    %510 = arith.addf %504, %505 : vector<2x128xf32>
    %511 = arith.addf %506, %507 : vector<2x128xf32>
    %512 = arith.addf %508, %509 : vector<2x128xf32>
    %513 = arith.addf %510, %511 : vector<2x128xf32>
    %514 = arith.addf %512, %513 : vector<2x128xf32>
    %c0_522 = arith.constant 0 : index
    %c0_523 = arith.constant 0 : index
    %515 = vector.load %arg9[%c0_522, %c0_523] : memref<1x128xf32, #tpu.memory_space<vmem>>, vector<1x128xf32>
    %516 = vector.broadcast %515 : vector<1x128xf32> to vector<2x128xf32>
    %517 = arith.addf %514, %516 : vector<2x128xf32>
    %cst_524 = arith.constant 0.000000e+00 : f32
    %518 = vector.broadcast %cst_524 : f32 to vector<2x128xf32>
    %519 = arith.maximumf %517, %518 : vector<2x128xf32>
    %520 = vector.extract_strided_slice %519 {offsets = [0, 0], sizes = [2, 32], strides = [1, 1]} : vector<2x128xf32> to vector<2x32xf32>
    %c0_525 = arith.constant 0 : index
    %c0_526 = arith.constant 0 : index
    %521 = vector.load %arg10[%c0_525, %c0_526] : memref<32x128xf32, #tpu.memory_space<vmem>>, vector<32x128xf32>
    %cst_527 = arith.constant dense<0.000000e+00> : vector<2x128xf32>
    %522 = tpu.matmul %520, %521, %cst_527 {dimension_numbers = #tpu.dot_dimension_numbers<[1], [0], [0], [1], [0, 0, 1, 1], [], []>} : vector<2x32xf32>, vector<32x128xf32>, vector<2x128xf32> -> vector<2x128xf32>
    %c0_528 = arith.constant 0 : index
    %c0_529 = arith.constant 0 : index
    %523 = vector.load %arg11[%c0_528, %c0_529] : memref<1x128xf32, #tpu.memory_space<vmem>>, vector<1x128xf32>
    %524 = vector.broadcast %523 : vector<1x128xf32> to vector<2x128xf32>
    %525 = arith.addf %522, %524 : vector<2x128xf32>
    %cst_530 = arith.constant 0.000000e+00 : f32
    %526 = vector.broadcast %cst_530 : f32 to vector<2x128xf32>
    %527 = arith.maximumf %525, %526 : vector<2x128xf32>
    %528 = vector.extract_strided_slice %527 {offsets = [0, 0], sizes = [2, 32], strides = [1, 1]} : vector<2x128xf32> to vector<2x32xf32>
    %c0_531 = arith.constant 0 : index
    %c0_532 = arith.constant 0 : index
    %529 = vector.load %arg12[%c0_531, %c0_532] : memref<32x128xf32, #tpu.memory_space<vmem>>, vector<32x128xf32>
    %cst_533 = arith.constant dense<0.000000e+00> : vector<2x128xf32>
    %530 = tpu.matmul %528, %529, %cst_533 {dimension_numbers = #tpu.dot_dimension_numbers<[1], [0], [0], [1], [0, 0, 1, 1], [], []>} : vector<2x32xf32>, vector<32x128xf32>, vector<2x128xf32> -> vector<2x128xf32>
    %c0_534 = arith.constant 0 : index
    %c0_535 = arith.constant 0 : index
    %531 = vector.load %arg13[%c0_534, %c0_535] : memref<1x128xf32, #tpu.memory_space<vmem>>, vector<1x128xf32>
    %532 = vector.broadcast %531 : vector<1x128xf32> to vector<2x128xf32>
    %533 = arith.addf %530, %532 : vector<2x128xf32>
    %c0_536 = arith.constant 0 : index
    %c0_537 = arith.constant 0 : index
    %c0_538 = arith.constant 0 : index
    %534 = vector.load %arg14[%c0_536, %c0_537, %c0_538] : memref<1x2x128xf32, #tpu.memory_space<vmem>>, vector<1x2x128xf32>
    %535 = vector.shape_cast %534 : vector<1x2x128xf32> to vector<2x128xf32>
    %536 = vector.shape_cast %533 : vector<2x128xf32> to vector<1x2x128xf32>
    tpu.vector_store %arg14[%c0_536, %c0_537, %c0_538], %536 {strides = array<i32>} : memref<1x2x128xf32, #tpu.memory_space<vmem>>, vector<1x2x128xf32>,
    return
  }
  func.func @transform_0(%arg0: i32) -> (i32, i32, i32) {
    %c0_i32 = arith.constant 0 : i32
    %c0_i32_0 = arith.constant 0 : i32
    %c0_i32_1 = arith.constant 0 : i32
    return %arg0, %c0_i32, %c0_i32_0 : i32, i32, i32
  }
  func.func @transform_1(%arg0: i32) -> (i32, i32) {
    %c0_i32 = arith.constant 0 : i32
    %c0_i32_0 = arith.constant 0 : i32
    %c0_i32_1 = arith.constant 0 : i32
    return %c0_i32, %c0_i32_0 : i32, i32
  }
  func.func @transform_2(%arg0: i32) -> (i32, i32) {
    %c0_i32 = arith.constant 0 : i32
    %c0_i32_0 = arith.constant 0 : i32
    %c0_i32_1 = arith.constant 0 : i32
    return %c0_i32, %c0_i32_0 : i32, i32
  }
  func.func @transform_3(%arg0: i32) -> (i32, i32) {
    %c0_i32 = arith.constant 0 : i32
    %c0_i32_0 = arith.constant 0 : i32
    %c0_i32_1 = arith.constant 0 : i32
    return %c0_i32, %c0_i32_0 : i32, i32
  }
  func.func @transform_4(%arg0: i32) -> (i32, i32) {
    %c0_i32 = arith.constant 0 : i32
    %c0_i32_0 = arith.constant 0 : i32
    %c0_i32_1 = arith.constant 0 : i32
    return %c0_i32, %c0_i32_0 : i32, i32
  }
  func.func @transform_5(%arg0: i32) -> (i32, i32) {
    %c0_i32 = arith.constant 0 : i32
    %c0_i32_0 = arith.constant 0 : i32
    %c0_i32_1 = arith.constant 0 : i32
    return %c0_i32, %c0_i32_0 : i32, i32
  }
  func.func @transform_6(%arg0: i32) -> (i32, i32) {
    %c0_i32 = arith.constant 0 : i32
    %c0_i32_0 = arith.constant 0 : i32
    %c0_i32_1 = arith.constant 0 : i32
    return %c0_i32, %c0_i32_0 : i32, i32
  }
  func.func @transform_7(%arg0: i32) -> (i32, i32) {
    %c0_i32 = arith.constant 0 : i32
    %c0_i32_0 = arith.constant 0 : i32
    %c0_i32_1 = arith.constant 0 : i32
    return %c0_i32, %c0_i32_0 : i32, i32
  }
  func.func @transform_8(%arg0: i32) -> (i32, i32) {
    %c0_i32 = arith.constant 0 : i32
    %c0_i32_0 = arith.constant 0 : i32
    %c0_i32_1 = arith.constant 0 : i32
    return %c0_i32, %c0_i32_0 : i32, i32
  }
  func.func @transform_9(%arg0: i32) -> (i32, i32) {
    %c0_i32 = arith.constant 0 : i32
    %c0_i32_0 = arith.constant 0 : i32
    %c0_i32_1 = arith.constant 0 : i32
    return %c0_i32, %c0_i32_0 : i32, i32
  }
  func.func @transform_10(%arg0: i32) -> (i32, i32) {
    %c0_i32 = arith.constant 0 : i32
    %c0_i32_0 = arith.constant 0 : i32
    %c0_i32_1 = arith.constant 0 : i32
    return %c0_i32, %c0_i32_0 : i32, i32
  }
  func.func @transform_11(%arg0: i32) -> (i32, i32) {
    %c0_i32 = arith.constant 0 : i32
    %c0_i32_0 = arith.constant 0 : i32
    %c0_i32_1 = arith.constant 0 : i32
    return %c0_i32, %c0_i32_0 : i32, i32
  }
  func.func @transform_12(%arg0: i32) -> (i32, i32) {
    %c0_i32 = arith.constant 0 : i32
    %c0_i32_0 = arith.constant 0 : i32
    %c0_i32_1 = arith.constant 0 : i32
    return %c0_i32, %c0_i32_0 : i32, i32
  }
  func.func @transform_13(%arg0: i32) -> (i32, i32, i32) {
    %c0_i32 = arith.constant 0 : i32
    %c0_i32_0 = arith.constant 0 : i32
    %c0_i32_1 = arith.constant 0 : i32
    return %arg0, %c0_i32, %c0_i32_0 : i32, i32, i32
  }
}

</mosaic_0001>

<bundles_post_ra>
// kernel: forward.1
= control target key start
LH: loop header
LB: loop body
LE: loop exit
PB: predicated region body
PF: predicated region fallthrough
CT: control target
= control target key end

     0   :  { %vm129_vm0 = vcmask 1043456   ;;  %vm80_vm1 = vcmask 31744   ;;  %s15229_s0 = inlined_call_operand.vmem [shape: f32[1,648,4], index: 0, kind: input, shape index: {}]   ;;  %s15230_s1 = inlined_call_operand.vmem [shape: f32[36,128], index: 1, kind: input, shape index: {}]   ;;  %s15231_s2 = inlined_call_operand.vmem [shape: f32[1,128], index: 2, kind: input, shape index: {}]   ;;  %s15232_s3 = inlined_call_operand.vmem [shape: f32[72,128], index: 3, kind: input, shape index: {}]   ;;  %s15233_s4 = inlined_call_operand.vmem [shape: f32[1,128], index: 4, kind: input, shape index: {}]   ;;  %s15234_s5 = inlined_call_operand.vmem [shape: f32[144,128], index: 5, kind: input, shape index: {}]   ;;  %s15235_s6 = inlined_call_operand.vmem [shape: f32[1,128], index: 6, kind: input, shape index: {}]   ;;  %s15236_s7 = inlined_call_operand.vmem [shape: f32[256,128], index: 7, kind: input, shape index: {}]   ;;  %s15237_s8 = inlined_call_operand.vmem [shape: f32[1,128], index: 8, kind: input, shape index: {}]   ;;  %s15238_s9 = inlined_call_operand.vmem [shape: f32[32,128], index: 9, kind: input, shape index: {}]   ;;  %s15239_s10 = inlined_call_operand.vmem [shape: f32[1,128], index: 10, kind: input, shape index: {}]   ;;  %s15240_s11 = inlined_call_operand.vmem [shape: f32[32,128], index: 11, kind: input, shape index: {}]   ;;  %s15241_s12 = inlined_call_operand.vmem [shape: f32[1,128], index: 12, kind: input, shape index: {}]   ;;  %s15242_s13 = inlined_call_operand.hbm [shape: f32[1,2,128], index: 13, kind: output, shape index: {}]  }
   0x1   :  { %v79_v0 = vld [vmem:[%s15230_s1 + $0x4] sm:$0xf]  ;;  %v62_v1 = vld [vmem:[%s15230_s1] sm:$0xf]  ;;  %v330_v3 = vld [vmem:[%s15230_s1 + $0x8] sm:$0xf] }
   0x2   :  { %v63_v2 = vld [vmem:[%s15229_s0 + $0x1] sm:$0xff]  ;;  %10129 = vmatpush.msk.msra.mxu0 %vm129_vm0, %v79_v0  ;;  %10146 = vmatpush.msk.msra.mxu1 %vm129_vm0, %v62_v1  ;;  %v479_v4 = vld [vmem:[%s15230_s1 + $0xc] sm:$0xf]  ;;  %v463_v7 = vld [vmem:[%s15229_s0 + $0x12] sm:$0xff] }
   0x3   :  { %v46_v5 = vld [vmem:[%s15229_s0] sm:$0xff]  ;;  %10163 = vmatpush.msk.msra.mxu2 %vm129_vm0, %v330_v3  ;;  %10180 = vmatpush.msk.msra.mxu3 %vm129_vm0, %v479_v4  ;;  %v628_v8 = vld [vmem:[%s15230_s1 + $0x10] sm:$0xf]  ;;  %v777_v10 = vld [vmem:[%s15230_s1 + $0x14] sm:$0xf] }
   0x4   :  { %v314_v6 = vld [vmem:[%s15229_s0 + $0x2] sm:$0xff]  ;;  %10130 = vmatmul.msk.f32.vlgmr.msra.gmra.mxu0 %vm80_vm1, %v63_v2  ;;  %10147 = vmatmul.msk.f32.vlgmr.msra.gmra.mxu1 %vm80_vm1, %v46_v5  ;;  %v315_v12 = vld [vmem:[%s15229_s0 + $0xa] sm:$0xff]  ;;  %v926_v13 = vld [vmem:[%s15230_s1 + $0x18] sm:$0xf] }
   0x5   :  { %10164 = vmatmul.msk.f32.vlgmr.msra.gmra.mxu2 %vm80_vm1, %v314_v6  ;;  %10181 = vmatmul.msk.f32.vlgmr.msra.gmra.mxu3 %vm80_vm1, %v463_v7  ;;  %v64_v9 = vld [vmem:[%s15229_s0 + $0x9] sm:$0xff]  ;;  %v464_v14 = vld [vmem:[%s15229_s0 + $0x1a] sm:$0xff] }
   0x6   :  { %10197 = vmatpush.msk.msrb.mxu0 %vm129_vm0, %v628_v8  ;;  %v47_v11 = vld [vmem:[%s15229_s0 + $0x8] sm:$0xff]  ;;  %10214 = vmatpush.msk.msrb.mxu1 %vm129_vm0, %v777_v10  ;;  %v1075_v15 = vld [vmem:[%s15230_s1 + $0x1c] sm:$0xf] }
   0x7   :  { %10231 = vmatpush.msk.msrb.mxu2 %vm129_vm0, %v926_v13  ;;  %10248 = vmatpush.msk.msrb.mxu3 %vm129_vm0, %v1075_v15 }
   0x8   :  { %18 = vsyncpa [#allocation6], 0  ;;  %v65_v16 = vld [vmem:[%s15229_s0 + $0x11] sm:$0xff]  ;;  %v465_v18 = vld [vmem:[%s15229_s0 + $0x22] sm:$0xff]  ;;  %vm6625_vm2 = vcmask 1040384   ;;  %vm6804_vm3 = vcmask 64512  }
   0x9   :  { %v48_v17 = vld [vmem:[%s15229_s0 + $0x10] sm:$0xff]  ;;  %v66_v19 = vld [vmem:[%s15229_s0 + $0x19] sm:$0xff]  ;;  %v67_v22 = vld [vmem:[%s15229_s0 + $0x21] sm:$0xff]  ;;  %vm8784_vm4 = vcmask 1044480   ;;  %vm8866_vm5 = vcmask 130048   ;;  %vm10056_vm6 = vcmask 261120  }
   0xa   :  { %v49_v20 = vld [vmem:[%s15229_s0 + $0x18] sm:$0xff]  ;;  %v466_v21 = vld [vmem:[%s15229_s0 + $0x2a] sm:$0xff]  ;;  %v50_v23 = vld [vmem:[%s15229_s0 + $0x20] sm:$0xff]  ;;  %s11215_s30 = smov [#allocation5]  }
   0xb   :  { %v467_v24 = vld [vmem:[%s15229_s0 + $0x32] sm:$0xff]  ;;  %v68_v25 = vld [vmem:[%s15229_s0 + $0x29] sm:$0xff]  ;;  %v468_v27 = vld [vmem:[%s15229_s0 + $0x3a] sm:$0xff] }
   0xc   :  { %10131 = vmatmul.msk.f32.gmra.mxu0 %vm80_vm1, %v64_v9  ;;  %10148 = vmatmul.msk.f32.gmra.mxu1 %vm80_vm1, %v47_v11  ;;  %v51_v26 = vld [vmem:[%s15229_s0 + $0x28] sm:$0xff]  ;;  %v69_v28 = vld [vmem:[%s15229_s0 + $0x31] sm:$0xff]  ;;  %v70_v31 = vld [vmem:[%s15229_s0 + $0x39] sm:$0xff] }
   0xd   :  { %10165 = vmatmul.msk.f32.gmra.mxu2 %vm80_vm1, %v315_v12  ;;  %10182 = vmatmul.msk.f32.gmra.mxu3 %vm80_vm1, %v464_v14  ;;  %v52_v29 = vld [vmem:[%s15229_s0 + $0x30] sm:$0xff]  ;;  %v469_v30 = vld [vmem:[%s15229_s0 + $0x42] sm:$0xff]  ;;  %v53_v32 = vld [vmem:[%s15229_s0 + $0x38] sm:$0xff] }
   0xe   :  { %v470_v33 = vld [vmem:[%s15229_s0 + $0x4a] sm:$0xff]  ;;  %v71_v34 = vld [vmem:[%s15229_s0 + $0x41] sm:$0xff]  ;;  %v471_v36 = vld [vmem:[%s15229_s0 + $0x52] sm:$0xff] }
   0xf   :  { %v54_v35 = vld [vmem:[%s15229_s0 + $0x40] sm:$0xff]  ;;  %v72_v37 = vld [vmem:[%s15229_s0 + $0x49] sm:$0xff]  ;;  %v73_v40 = vld [vmem:[%s15229_s0 + $0x51] sm:$0xff] }
  0x10   :  { %v55_v38 = vld [vmem:[%s15229_s0 + $0x48] sm:$0xff]  ;;  %v472_v39 = vld [vmem:[%s15229_s0 + $0x5a] sm:$0xff]  ;;  %v56_v41 = vld [vmem:[%s15229_s0 + $0x50] sm:$0xff] }
  0x11   :  { %v473_v42 = vld [vmem:[%s15229_s0 + $0x62] sm:$0xff]  ;;  %v74_v43 = vld [vmem:[%s15229_s0 + $0x59] sm:$0xff]  ;;  %v474_v45 = vld [vmem:[%s15229_s0 + $0x6a] sm:$0xff] }
  0x12   :  { %v57_v44 = vld [vmem:[%s15229_s0 + $0x58] sm:$0xff]  ;;  %v75_v46 = vld [vmem:[%s15229_s0 + $0x61] sm:$0xff]  ;;  %v76_v50 = vld [vmem:[%s15229_s0 + $0x69] sm:$0xff] }
  0x13   :  { %v58_v47 = vld [vmem:[%s15229_s0 + $0x60] sm:$0xff]  ;;  %v475_v48 = vld [vmem:[%s15229_s0 + $0x72] sm:$0xff]  ;;  %v59_v51 = vld [vmem:[%s15229_s0 + $0x68] sm:$0xff] }
  0x14   :  { %10132 = vmatmul.msk.f32.gmra.mxu0 %vm80_vm1, %v65_v16  ;;  %10149 = vmatmul.msk.f32.gmra.mxu1 %vm80_vm1, %v48_v17  ;;  %v1224_v49 = vld [vmem:[%s15230_s1 + $0x20] sm:$0xf]  ;;  %v77_v53 = vld [vmem:[%s15229_s0 + $0x71] sm:$0xff]  ;;  %v910_v63 = vld [vmem:[%s15229_s0 + $0x24] sm:$0xff] }
  0x15   :  { %10166 = vmatmul.msk.f32.gmra.mxu2 %vm80_vm1, %v463_v7  ;;  %10183 = vmatmul.msk.f32.gmra.mxu3 %vm80_vm1, %v465_v18  ;;  %v476_v52 = vld [vmem:[%s15229_s0 + $0x7a] sm:$0xff]  ;;  %v60_v54 = vld [vmem:[%s15229_s0 + $0x70] sm:$0xff]  ;;  %v11519_v55 = vld [vmem:[%s15229_s0 + $0x82] sm:$0xff] }
  0x16   :  { %10265 = vmatpush.msk.msra.mxu0 %vm129_vm0, %v1224_v49  ;;  %v78_v56 = vld [vmem:[%s15229_s0 + $0x79] sm:$0xff]  ;;  %v11535_v58 = vld [vmem:[%s15229_s0 + $0x8a] sm:$0xff]  ;;  %v1441_v1 = vld [vmem:[%s15230_s1 + $0x4] sm:$0xf] }
  0x17   :  { %v61_v57 = vld [vmem:[%s15229_s0 + $0x78] sm:$0xff]  ;;  %v1059_v0 = vld [vmem:[%s15229_s0 + $0x25] sm:$0xff]  ;;  %10282 = vmatpush.msk.msra.mxu1 %vm129_vm0, %v1441_v1  ;;  %v1060_v11 = vld [vmem:[%s15229_s0 + $0x2d] sm:$0xff] }
  0x18   :  { %v612_v61 = vld [vmem:[%s15229_s0 + $0x13] sm:$0xff]  ;;  %v613_v8 = vld [vmem:[%s15229_s0 + $0x1b] sm:$0xff] }
  0x19   :  { %v761_v62 = vld [vmem:[%s15229_s0 + $0x14] sm:$0xff]  ;;  %v762_v9 = vld [vmem:[%s15229_s0 + $0x1c] sm:$0xff]  ;;  %v911_v10 = vld [vmem:[%s15229_s0 + $0x2c] sm:$0xff] }
  0x1a   :  { %v1424_v13 = vld [vmem:[%s15230_s1] sm:$0xf] }
  0x1b   :  { %10299 = vmatpush.msk.msra.mxu2 %vm129_vm0, %v1424_v13  ;;  %v918_v13 = vld [vmem:[%s15229_s0 + $0x64] sm:$0xff] }
  0x1c   :  { %10133 = vmatmul.msk.f32.gmra.mxu0 %vm80_vm1, %v66_v19  ;;  %10150 = vmatmul.msk.f32.gmra.mxu1 %vm80_vm1, %v49_v20 }
  0x1d   :  { %10167 = vmatmul.msk.f32.gmra.mxu2 %vm80_vm1, %v464_v14  ;;  %10184 = vmatmul.msk.f32.gmra.mxu3 %vm80_vm1, %v466_v21  ;;  %v1690_v14 = vld [vmem:[%s15230_s1 + $0x8] sm:$0xf] }
  0x1e   :  { %10316 = vmatpush.msk.msra.mxu3 %vm129_vm0, %v1690_v14  ;;  %v1067_v14 = vld [vmem:[%s15229_s0 + $0x65] sm:$0xff] }
  0x24   :  { %10134 = vmatmul.msk.f32.gmra.mxu0 %vm80_vm1, %v67_v22  ;;  %10151 = vmatmul.msk.f32.gmra.mxu1 %vm80_vm1, %v50_v23  ;;  %v912_v22 = vld [vmem:[%s15229_s0 + $0x34] sm:$0xff] }
  0x25   :  { %10168 = vmatmul.msk.f32.gmra.mxu2 %vm80_vm1, %v465_v18  ;;  %10185 = vmatmul.msk.f32.gmra.mxu3 %vm80_vm1, %v467_v24  ;;  %v1061_v23 = vld [vmem:[%s15229_s0 + $0x35] sm:$0xff] }
  0x2c   :  { %10135 = vmatmul.msk.f32.gmra.mxu0 %vm80_vm1, %v68_v25  ;;  %10152 = vmatmul.msk.f32.gmra.mxu1 %vm80_vm1, %v51_v26 }
  0x2d   :  { %10169 = vmatmul.msk.f32.gmra.mxu2 %vm80_vm1, %v466_v21  ;;  %10186 = vmatmul.msk.f32.gmra.mxu3 %vm80_vm1, %v468_v27  ;;  %v614_v21 = vld [vmem:[%s15229_s0 + $0x23] sm:$0xff] }
  0x34   :  { %10136 = vmatmul.msk.f32.gmra.mxu0 %vm80_vm1, %v69_v28  ;;  %10153 = vmatmul.msk.f32.gmra.mxu1 %vm80_vm1, %v52_v29  ;;  %v615_v29 = vld [vmem:[%s15229_s0 + $0x2b] sm:$0xff] }
  0x35   :  { %10170 = vmatmul.msk.f32.gmra.mxu2 %vm80_vm1, %v467_v24  ;;  %10187 = vmatmul.msk.f32.gmra.mxu3 %vm80_vm1, %v469_v30 }
  0x3c   :  { %10137 = vmatmul.msk.f32.gmra.mxu0 %vm80_vm1, %v70_v31  ;;  %10154 = vmatmul.msk.f32.gmra.mxu1 %vm80_vm1, %v53_v32  ;;  %v1062_v31 = vld [vmem:[%s15229_s0 + $0x3d] sm:$0xff] }
  0x3d   :  { %10171 = vmatmul.msk.f32.gmra.mxu2 %vm80_vm1, %v468_v27  ;;  %10188 = vmatmul.msk.f32.gmra.mxu3 %vm80_vm1, %v470_v33 }
  0x44   :  { %10138 = vmatmul.msk.f32.gmra.mxu0 %vm80_vm1, %v71_v34  ;;  %10155 = vmatmul.msk.f32.gmra.mxu1 %vm80_vm1, %v54_v35 }
  0x45   :  { %10172 = vmatmul.msk.f32.gmra.mxu2 %vm80_vm1, %v469_v30  ;;  %10189 = vmatmul.msk.f32.gmra.mxu3 %vm80_vm1, %v471_v36  ;;  %v913_v30 = vld [vmem:[%s15229_s0 + $0x3c] sm:$0xff] }
  0x4c   :  { %10139 = vmatmul.msk.f32.gmra.mxu0 %vm80_vm1, %v72_v37  ;;  %10156 = vmatmul.msk.f32.gmra.mxu1 %vm80_vm1, %v55_v38  ;;  %v914_v37 = vld [vmem:[%s15229_s0 + $0x44] sm:$0xff] }
  0x4d   :  { %10173 = vmatmul.msk.f32.gmra.mxu2 %vm80_vm1, %v470_v33  ;;  %10190 = vmatmul.msk.f32.gmra.mxu3 %vm80_vm1, %v472_v39  ;;  %v1063_v38 = vld [vmem:[%s15229_s0 + $0x45] sm:$0xff] }
  0x54   :  { %10140 = vmatmul.msk.f32.gmra.mxu0 %vm80_vm1, %v73_v40  ;;  %10157 = vmatmul.msk.f32.gmra.mxu1 %vm80_vm1, %v56_v41 }
  0x55   :  { %10174 = vmatmul.msk.f32.gmra.mxu2 %vm80_vm1, %v471_v36  ;;  %10191 = vmatmul.msk.f32.gmra.mxu3 %vm80_vm1, %v473_v42  ;;  %v616_v36 = vld [vmem:[%s15229_s0 + $0x33] sm:$0xff] }
  0x5c   :  { %10141 = vmatmul.msk.f32.gmra.mxu0 %vm80_vm1, %v74_v43  ;;  %10158 = vmatmul.msk.f32.gmra.mxu1 %vm80_vm1, %v57_v44 }
  0x5d   :  { %10175 = vmatmul.msk.f32.gmra.mxu2 %vm80_vm1, %v472_v39  ;;  %10192 = vmatmul.msk.f32.gmra.mxu3 %vm80_vm1, %v474_v45 }
  0x64   :  { %10142 = vmatmul.msk.f32.gmra.mxu0 %vm80_vm1, %v75_v46  ;;  %10159 = vmatmul.msk.f32.gmra.mxu1 %vm80_vm1, %v58_v47  ;;  %v915_v46 = vld [vmem:[%s15229_s0 + $0x4c] sm:$0xff] }
  0x65   :  { %10176 = vmatmul.msk.f32.gmra.mxu2 %vm80_vm1, %v473_v42  ;;  %10193 = vmatmul.msk.f32.gmra.mxu3 %vm80_vm1, %v475_v48  ;;  %v1064_v47 = vld [vmem:[%s15229_s0 + $0x4d] sm:$0xff] }
  0x6c   :  { %10143 = vmatmul.msk.f32.gmra.mxu0 %vm80_vm1, %v76_v50  ;;  %10160 = vmatmul.msk.f32.gmra.mxu1 %vm80_vm1, %v59_v51 }
  0x6d   :  { %10177 = vmatmul.msk.f32.gmra.mxu2 %vm80_vm1, %v474_v45  ;;  %10194 = vmatmul.msk.f32.gmra.mxu3 %vm80_vm1, %v476_v52  ;;  %v617_v45 = vld [vmem:[%s15229_s0 + $0x3b] sm:$0xff] }
  0x74   :  { %10144 = vmatmul.msk.f32.gmra.mxu0 %vm80_vm1, %v77_v53  ;;  %10161 = vmatmul.msk.f32.gmra.mxu1 %vm80_vm1, %v60_v54 }
  0x75   :  { %10178 = vmatmul.msk.f32.gmra.mxu2 %vm80_vm1, %v475_v48  ;;  %10195 = vmatmul.msk.f32.gmra.mxu3 %vm80_vm1, %v11519_v55 }
  0x7c   :  { %10145 = vmatmul.msk.f32.gmra.mxu0 %vm80_vm1, %v78_v56  ;;  %10162 = vmatmul.msk.f32.gmra.mxu1 %vm80_vm1, %v61_v57  ;;  %v618_v56 = vld [vmem:[%s15229_s0 + $0x43] sm:$0xff]  ;;  %v916_v57 = vld [vmem:[%s15229_s0 + $0x54] sm:$0xff] }
  0x7d   :  { %10179 = vmatmul.msk.f32.gmra.mxu2 %vm80_vm1, %v476_v52  ;;  %10196 = vmatmul.msk.f32.gmra.mxu3 %vm80_vm1, %v11535_v58 }
  0x81   :  { %v150_v59 = vpop.f32.mrf.mxu0  ;;  %v266_v60 = vpop.f32.mrf.mxu1 }
  0x82   :  { %v267_v2 = vadd.f32 %v266_v60, %v150_v59  ;;  %v1065_v59 = vld [vmem:[%s15229_s0 + $0x55] sm:$0xff] }
  0x84   :  { %10198 = vmatmul.msk.f32.vlgmr.msrb.gmra.mxu0 %vm80_vm1, %v612_v61  ;;  %10215 = vmatmul.msk.f32.vlgmr.msrb.gmra.mxu1 %vm80_vm1, %v761_v62 }
  0x85   :  { %10232 = vmatmul.msk.f32.vlgmr.msrb.gmra.mxu2 %vm80_vm1, %v910_v63  ;;  %10249 = vmatmul.msk.f32.vlgmr.msrb.gmra.mxu3 %vm80_vm1, %v1059_v0 }
  0x88   :  { %v399_v3 = vpop.f32.mrf.mxu2  ;;  %v548_v4 = vpop.f32.mrf.mxu3 }
  0x89   :  { %v447_v5 = vadd.f32 %v399_v3, %v267_v2  ;;  %v153_v6 = vpop.f32.mrf.mxu0  ;;  %v269_v7 = vpop.f32.mrf.mxu1  ;;  %v619_v3 = vld [vmem:[%s15229_s0 + $0x4b] sm:$0xff] }
  0x8a   :  { %v270_v15 = vadd.f32 %v269_v7, %v153_v6 }
  0x8b   :  { %v11574_v12 = vadd.f32 %v548_v4, %v447_v5  ;;  %v917_v4 = vld [vmem:[%s15229_s0 + $0x5c] sm:$0xff] }
  0x8c   :  { %10199 = vmatmul.msk.f32.gmra.mxu0 %vm80_vm1, %v613_v8  ;;  %10216 = vmatmul.msk.f32.gmra.mxu1 %vm80_vm1, %v762_v9  ;;  %v1066_v5 = vld [vmem:[%s15229_s0 + $0x5d] sm:$0xff] }
  0x8d   :  { %10233 = vmatmul.msk.f32.gmra.mxu2 %vm80_vm1, %v911_v10  ;;  %10250 = vmatmul.msk.f32.gmra.mxu3 %vm80_vm1, %v1060_v11  ;;  %v620_v11 = vld [vmem:[%s15229_s0 + $0x53] sm:$0xff] }
  0x90   :  { %v402_v16 = vpop.f32.mrf.mxu2  ;;  %v551_v17 = vpop.f32.mrf.mxu3 }
  0x91   :  { %v448_v18 = vadd.f32 %v402_v16, %v270_v15  ;;  %v156_v19 = vpop.f32.mrf.mxu0  ;;  %v272_v20 = vpop.f32.mrf.mxu1 }
  0x92   :  { %v621_v19 = vld [vmem:[%s15229_s0 + $0x5b] sm:$0xff]  ;;  %v919_v20 = vld [vmem:[%s15229_s0 + $0x6c] sm:$0xff] }
  0x93   :  { %v11597_v24 = vadd.f32 %v551_v17, %v448_v18 }
  0x94   :  { %10200 = vmatmul.msk.f32.gmra.mxu0 %vm80_vm1, %v614_v21  ;;  %10217 = vmatmul.msk.f32.gmra.mxu1 %vm80_vm1, %v910_v63  ;;  %v1068_v21 = vld [vmem:[%s15229_s0 + $0x6d] sm:$0xff] }
  0x95   :  { %10234 = vmatmul.msk.f32.gmra.mxu2 %vm80_vm1, %v912_v22  ;;  %10251 = vmatmul.msk.f32.gmra.mxu3 %vm80_vm1, %v1061_v23 }
  0x98   :  { %v405_v25 = vpop.f32.mrf.mxu2  ;;  %v554_v26 = vpop.f32.mrf.mxu3 }
  0x99   :  { %v159_v27 = vpop.f32.mrf.mxu0  ;;  %v275_v28 = vpop.f32.mrf.mxu1 }
  0x9c   :  { %10201 = vmatmul.msk.f32.gmra.mxu0 %vm80_vm1, %v615_v29  ;;  %10218 = vmatmul.msk.f32.gmra.mxu1 %vm80_vm1, %v911_v10  ;;  %v622_v29 = vld [vmem:[%s15229_s0 + $0x63] sm:$0xff] }
  0x9d   :  { %10235 = vmatmul.msk.f32.gmra.mxu2 %vm80_vm1, %v913_v30  ;;  %10252 = vmatmul.msk.f32.gmra.mxu3 %vm80_vm1, %v1062_v31  ;;  %v1069_v31 = vld [vmem:[%s15229_s0 + $0x75] sm:$0xff] }
  0xa0   :  { %v408_v32 = vpop.f32.mrf.mxu2  ;;  %v557_v33 = vpop.f32.mrf.mxu3 }
  0xa1   :  { %v162_v34 = vpop.f32.mrf.mxu0  ;;  %v278_v35 = vpop.f32.mrf.mxu1 }
  0xa2   :  { %v279_v39 = vadd.f32 %v278_v35, %v162_v34 }
  0xa4   :  { %10202 = vmatmul.msk.f32.gmra.mxu0 %vm80_vm1, %v616_v36  ;;  %10219 = vmatmul.msk.f32.gmra.mxu1 %vm80_vm1, %v912_v22 }
  0xa5   :  { %10236 = vmatmul.msk.f32.gmra.mxu2 %vm80_vm1, %v914_v37  ;;  %10253 = vmatmul.msk.f32.gmra.mxu3 %vm80_vm1, %v1063_v38 }
  0xa8   :  { %v411_v40 = vpop.f32.mrf.mxu2  ;;  %v560_v41 = vpop.f32.mrf.mxu3 }
  0xa9   :  { %v451_v42 = vadd.f32 %v411_v40, %v279_v39  ;;  %v165_v43 = vpop.f32.mrf.mxu0  ;;  %v281_v44 = vpop.f32.mrf.mxu1  ;;  %v623_v39 = vld [vmem:[%s15229_s0 + $0x6b] sm:$0xff]  ;;  %v921_v40 = vld [vmem:[%s15229_s0 + $0x7c] sm:$0xff] }
  0xaa   :  { %v282_v49 = vadd.f32 %v281_v44, %v165_v43 }
  0xab   :  { %v11638_v48 = vadd.f32 %v560_v41, %v451_v42  ;;  %v1070_v41 = vld [vmem:[%s15229_s0 + $0x7d] sm:$0xff] }
  0xac   :  { %10203 = vmatmul.msk.f32.gmra.mxu0 %vm80_vm1, %v617_v45  ;;  %10220 = vmatmul.msk.f32.gmra.mxu1 %vm80_vm1, %v913_v30  ;;  %v920_v30 = vld [vmem:[%s15229_s0 + $0x74] sm:$0xff] }
  0xad   :  { %10237 = vmatmul.msk.f32.gmra.mxu2 %vm80_vm1, %v915_v46  ;;  %10254 = vmatmul.msk.f32.gmra.mxu3 %vm80_vm1, %v1064_v47  ;;  %v624_v47 = vld [vmem:[%s15229_s0 + $0x73] sm:$0xff] }
  0xb0   :  { %v414_v50 = vpop.f32.mrf.mxu2  ;;  %v563_v51 = vpop.f32.mrf.mxu3 }
  0xb1   :  { %v452_v52 = vadd.f32 %v414_v50, %v282_v49  ;;  %v168_v53 = vpop.f32.mrf.mxu0  ;;  %v284_v54 = vpop.f32.mrf.mxu1  ;;  %v922_v49 = vld [vmem:[%s15229_s0 + $0x84] sm:$0xff] }
  0xb2   :  { %v285_v61 = vadd.f32 %v284_v54, %v168_v53  ;;  %v1071_v50 = vld [vmem:[%s15229_s0 + $0x85] sm:$0xff] }
  0xb3   :  { %v11653_v60 = vadd.f32 %v563_v51, %v452_v52  ;;  %v1839_v51 = vld [vmem:[%s15230_s1 + $0xc] sm:$0xf] }
  0xb4   :  { %10204 = vmatmul.msk.f32.gmra.mxu0 %vm80_vm1, %v618_v56  ;;  %10221 = vmatmul.msk.f32.gmra.mxu1 %vm80_vm1, %v914_v37 }
  0xb5   :  { %10238 = vmatmul.msk.f32.gmra.mxu2 %vm80_vm1, %v916_v57  ;;  %10255 = vmatmul.msk.f32.gmra.mxu3 %vm80_vm1, %v1065_v59  ;;  %v923_v59 = vld [vmem:[%s15229_s0 + $0x8c] sm:$0xff] }
  0xb6   :  { %10333 = vmatpush.msk.msrb.mxu0 %vm129_vm0, %v1839_v51 }
  0xb8   :  { %v417_v62 = vpop.f32.mrf.mxu2  ;;  %v566_v63 = vpop.f32.mrf.mxu3 }
  0xb9   :  { %v453_v0 = vadd.f32 %v417_v62, %v285_v61  ;;  %v171_v1 = vpop.f32.mrf.mxu0  ;;  %v287_v2 = vpop.f32.mrf.mxu1  ;;  %v1072_v61 = vld [vmem:[%s15229_s0 + $0x8d] sm:$0xff] }
  0xbb   :  { %v11668_v6 = vadd.f32 %v566_v63, %v453_v0 }
  0xbc   :  { %10205 = vmatmul.msk.f32.gmra.mxu0 %vm80_vm1, %v619_v3  ;;  %10222 = vmatmul.msk.f32.gmra.mxu1 %vm80_vm1, %v915_v46 }
  0xbd   :  { %10239 = vmatmul.msk.f32.gmra.mxu2 %vm80_vm1, %v917_v4  ;;  %10256 = vmatmul.msk.f32.gmra.mxu3 %vm80_vm1, %v1066_v5  ;;  %v11766_v5 = vld [vmem:[%s15229_s0 + $0x94] sm:$0xff] }
  0xc0   :  { %v420_v7 = vpop.f32.mrf.mxu2  ;;  %v569_v8 = vpop.f32.mrf.mxu3 }
  0xc1   :  { %v174_v9 = vpop.f32.mrf.mxu0  ;;  %v290_v10 = vpop.f32.mrf.mxu1  ;;  %v1073_v7 = vld [vmem:[%s15229_s0 + $0x95] sm:$0xff] }
  0xc4   :  { %10206 = vmatmul.msk.f32.gmra.mxu0 %vm80_vm1, %v620_v11  ;;  %10223 = vmatmul.msk.f32.gmra.mxu1 %vm80_vm1, %v916_v57  ;;  %v625_v57 = vld [vmem:[%s15229_s0 + $0x7b] sm:$0xff] }
  0xc5   :  { %10240 = vmatmul.msk.f32.gmra.mxu2 %vm80_vm1, %v918_v13  ;;  %10257 = vmatmul.msk.f32.gmra.mxu3 %vm80_vm1, %v1067_v14 }
  0xc8   :  { %v423_v15 = vpop.f32.mrf.mxu2  ;;  %v572_v16 = vpop.f32.mrf.mxu3 }
  0xc9   :  { %v177_v17 = vpop.f32.mrf.mxu0  ;;  %v293_v18 = vpop.f32.mrf.mxu1  ;;  %v627_v16 = vld [vmem:[%s15229_s0 + $0x8b] sm:$0xff] }
  0xca   :  { %v294_v22 = vadd.f32 %v293_v18, %v177_v17  ;;  %v11784_v17 = vld [vmem:[%s15229_s0 + $0x9c] sm:$0xff] }
  0xcb   :  { %v1074_v18 = vld [vmem:[%s15229_s0 + $0x9d] sm:$0xff] }
  0xcc   :  { %10207 = vmatmul.msk.f32.gmra.mxu0 %vm80_vm1, %v621_v19  ;;  %10224 = vmatmul.msk.f32.gmra.mxu1 %vm80_vm1, %v917_v4  ;;  %v626_v4 = vld [vmem:[%s15229_s0 + $0x83] sm:$0xff] }
  0xcd   :  { %10241 = vmatmul.msk.f32.gmra.mxu2 %vm80_vm1, %v919_v20  ;;  %10258 = vmatmul.msk.f32.gmra.mxu3 %vm80_vm1, %v1068_v21 }
  0xd0   :  { %v426_v23 = vpop.f32.mrf.mxu2  ;;  %v575_v25 = vpop.f32.mrf.mxu3 }
  0xd1   :  { %v456_v26 = vadd.f32 %v426_v23, %v294_v22  ;;  %v180_v27 = vpop.f32.mrf.mxu0  ;;  %v296_v28 = vpop.f32.mrf.mxu1 }
  0xd2   :  { %v297_v33 = vadd.f32 %v296_v28, %v180_v27  ;;  %v1208_v27 = vld [vmem:[%s15229_s0 + $0x26] sm:$0xff] }
  0xd3   :  { %v11709_v32 = vadd.f32 %v575_v25, %v456_v26  ;;  %v1425_v28 = vld [vmem:[%s15229_s0 + $0x81] sm:$0xff] }
  0xd4   :  { %10208 = vmatmul.msk.f32.gmra.mxu0 %vm80_vm1, %v622_v29  ;;  %10225 = vmatmul.msk.f32.gmra.mxu1 %vm80_vm1, %v918_v13 }
  0xd5   :  { %10242 = vmatmul.msk.f32.gmra.mxu2 %vm80_vm1, %v920_v30  ;;  %10259 = vmatmul.msk.f32.gmra.mxu3 %vm80_vm1, %v1069_v31 }
  0xd8   :  { %v429_v34 = vpop.f32.mrf.mxu2  ;;  %v578_v35 = vpop.f32.mrf.mxu3 }
  0xd9   :  { %v457_v36 = vadd.f32 %v429_v34, %v297_v33  ;;  %v183_v37 = vpop.f32.mrf.mxu0  ;;  %v299_v38 = vpop.f32.mrf.mxu1  ;;  %v1988_v34 = vld [vmem:[%s15230_s1 + $0x10] sm:$0xf] }
  0xda   :  { %10350 = vmatpush.msk.msrb.mxu1 %vm129_vm0, %v1988_v34 }
  0xdb   :  { %v11724_v42 = vadd.f32 %v578_v35, %v457_v36 }
  0xdc   :  { %10209 = vmatmul.msk.f32.gmra.mxu0 %vm80_vm1, %v623_v39  ;;  %10226 = vmatmul.msk.f32.gmra.mxu1 %vm80_vm1, %v919_v20  ;;  %v1209_v39 = vld [vmem:[%s15229_s0 + $0x2e] sm:$0xff] }
  0xdd   :  { %10243 = vmatmul.msk.f32.gmra.mxu2 %vm80_vm1, %v921_v40  ;;  %10260 = vmatmul.msk.f32.gmra.mxu3 %vm80_vm1, %v1070_v41 }
  0xe0   :  { %v432_v43 = vpop.f32.mrf.mxu2  ;;  %v581_v44 = vpop.f32.mrf.mxu3 }
  0xe1   :  { %v186_v45 = vpop.f32.mrf.mxu0  ;;  %v302_v46 = vpop.f32.mrf.mxu1  ;;  %v2137_v44 = vld [vmem:[%s15230_s1 + $0x14] sm:$0xf] }
  0xe2   :  { %v2286_v46 = vld [vmem:[%s15230_s1 + $0x18] sm:$0xf]  ;;  %10367 = vmatpush.msk.msrb.mxu2 %vm129_vm0, %v2137_v44 }
  0xe3   :  { %10384 = vmatpush.msk.msrb.mxu3 %vm129_vm0, %v2286_v46 }
  0xe4   :  { %10210 = vmatmul.msk.f32.gmra.mxu0 %vm80_vm1, %v624_v47  ;;  %10227 = vmatmul.msk.f32.gmra.mxu1 %vm80_vm1, %v920_v30  ;;  %v1408_v30 = vld [vmem:[%s15229_s0 + $0x80] sm:$0xff] }
  0xe5   :  { %10244 = vmatmul.msk.f32.gmra.mxu2 %vm80_vm1, %v922_v49  ;;  %10261 = vmatmul.msk.f32.gmra.mxu3 %vm80_vm1, %v1071_v50 }
  0xe8   :  { %v435_v52 = vpop.f32.mrf.mxu2  ;;  %v584_v53 = vpop.f32.mrf.mxu3 }
  0xe9   :  { %v189_v54 = vpop.f32.mrf.mxu0  ;;  %v305_v56 = vpop.f32.mrf.mxu1  ;;  %v1210_v52 = vld [vmem:[%s15229_s0 + $0x36] sm:$0xff] }
  0xea   :  { %v306_v62 = vadd.f32 %v305_v56, %v189_v54  ;;  %v1427_v53 = vld [vmem:[%s15229_s0 + $0x91] sm:$0xff] }
  0xeb   :  { %v11854_v54 = vld [vmem:[%s15229_s0 + $0x92] sm:$0xff] }
  0xec   :  { %10211 = vmatmul.msk.f32.gmra.mxu0 %vm80_vm1, %v625_v57  ;;  %10228 = vmatmul.msk.f32.gmra.mxu1 %vm80_vm1, %v921_v40  ;;  %v1426_v40 = vld [vmem:[%s15229_s0 + $0x89] sm:$0xff] }
  0xed   :  { %10245 = vmatmul.msk.f32.gmra.mxu2 %vm80_vm1, %v923_v59  ;;  %10262 = vmatmul.msk.f32.gmra.mxu3 %vm80_vm1, %v1072_v61 }
  0xf0   :  { %v438_v63 = vpop.f32.mrf.mxu2  ;;  %v587_v0 = vpop.f32.mrf.mxu3 }
  0xf1   :  { %v460_v1 = vadd.f32 %v438_v63, %v306_v62  ;;  %v192_v2 = vpop.f32.mrf.mxu0  ;;  %v308_v3 = vpop.f32.mrf.mxu1  ;;  %v1211_v63 = vld [vmem:[%s15229_s0 + $0x3e] sm:$0xff] }
  0xf2   :  { %v309_v9 = vadd.f32 %v308_v3, %v192_v2  ;;  %v11875_v2 = vld [vmem:[%s15229_s0 + $0x9a] sm:$0xff] }
  0xf3   :  { %v11771_v8 = vadd.f32 %v587_v0, %v460_v1  ;;  %v1428_v0 = vld [vmem:[%s15229_s0 + $0x99] sm:$0xff] }
  0xf4   :  { %10212 = vmatmul.msk.f32.gmra.mxu0 %vm80_vm1, %v626_v4  ;;  %10229 = vmatmul.msk.f32.gmra.mxu1 %vm80_vm1, %v922_v49  ;;  %v1411_v1 = vld [vmem:[%s15229_s0 + $0x98] sm:$0xff] }
  0xf5   :  { %10246 = vmatmul.msk.f32.gmra.mxu2 %vm80_vm1, %v11766_v5  ;;  %10263 = vmatmul.msk.f32.gmra.mxu3 %vm80_vm1, %v1073_v7 }
  0xf8   :  { %v441_v10 = vpop.f32.mrf.mxu2  ;;  %v590_v11 = vpop.f32.mrf.mxu3 }
  0xf9   :  { %v461_v13 = vadd.f32 %v441_v10, %v309_v9  ;;  %v195_v14 = vpop.f32.mrf.mxu0  ;;  %v311_v15 = vpop.f32.mrf.mxu1  ;;  %v1212_v10 = vld [vmem:[%s15229_s0 + $0x46] sm:$0xff] }
  0xfa   :  { %v312_v20 = vadd.f32 %v311_v15, %v195_v14  ;;  %v1412_v14 = vld [vmem:[%s15229_s0 + $0xa0] sm:$0xff] }
  0xfb   :  { %v11789_v19 = vadd.f32 %v590_v11, %v461_v13  ;;  %v1429_v11 = vld [vmem:[%s15229_s0 + $0xa1] sm:$0xff] }
  0xfc   :  { %10213 = vmatmul.msk.f32.gmra.mxu0 %vm80_vm1, %v627_v16  ;;  %10230 = vmatmul.msk.f32.gmra.mxu1 %vm80_vm1, %v923_v59  ;;  %v11895_v15 = vld [vmem:[%s15229_s0 + $0xa2] sm:$0xff] }
  0xfd   :  { %10247 = vmatmul.msk.f32.gmra.mxu2 %vm80_vm1, %v11784_v17  ;;  %10264 = vmatmul.msk.f32.gmra.mxu3 %vm80_vm1, %v1074_v18 }
 0x100   :  { %v444_v21 = vpop.f32.mrf.mxu2  ;;  %v593_v22 = vpop.f32.mrf.mxu3 }
 0x101   :  { %v462_v23 = vadd.f32 %v444_v21, %v312_v20  ;;  %v697_v25 = vpop.f32.mrf.mxu0  ;;  %v846_v26 = vpop.f32.mrf.mxu1 }
 0x102   :  { %v745_v29 = vadd.f32 %v697_v25, %v11574_v12  ;;  %v1430_v25 = vld [vmem:[%s15229_s0 + $0xa9] sm:$0xff] }
 0x103   :  { %v11806_v31 = vadd.f32 %v593_v22, %v462_v23  ;;  %v1213_v23 = vld [vmem:[%s15229_s0 + $0x4e] sm:$0xff] }
 0x104   :  { %v894_v33 = vadd.f32 %v846_v26, %v745_v29  ;;  %10266 = vmatmul.msk.f32.vlgmr.msra.gmra.mxu0 %vm80_vm1, %v1208_v27  ;;  %10283 = vmatmul.msk.f32.vlgmr.msra.gmra.mxu1 %vm80_vm1, %v1425_v28  ;;  %v1413_v27 = vld [vmem:[%s15229_s0 + $0xa8] sm:$0xff] }
 0x105   :  { %10300 = vmatmul.msk.f32.vlgmr.msra.gmra.mxu2 %vm80_vm1, %v1408_v30  ;;  %10317 = vmatmul.msk.f32.vlgmr.msra.gmra.mxu3 %vm80_vm1, %v11519_v55  ;;  %v1409_v55 = vld [vmem:[%s15229_s0 + $0x88] sm:$0xff] }
 0x106   :  { %v11915_v28 = vld [vmem:[%s15229_s0 + $0xaa] sm:$0xff] }
 0x108   :  { %v995_v12 = vpop.f32.mrf.mxu2  ;;  %v1144_v35 = vpop.f32.mrf.mxu3 }
 0x109   :  { %v1043_v36 = vadd.f32 %v995_v12, %v894_v33  ;;  %v700_v37 = vpop.f32.mrf.mxu0  ;;  %v849_v38 = vpop.f32.mrf.mxu1 }
 0x10a   :  { %v746_v41 = vadd.f32 %v700_v37, %v11597_v24  ;;  %v1431_v37 = vld [vmem:[%s15229_s0 + $0xb1] sm:$0xff] }
 0x10b   :  { %v11827_v43 = vadd.f32 %v1144_v35, %v1043_v36  ;;  %v1214_v36 = vld [vmem:[%s15229_s0 + $0x56] sm:$0xff] }
 0x10c   :  { %v895_v45 = vadd.f32 %v849_v38, %v746_v41  ;;  %10267 = vmatmul.msk.f32.gmra.mxu0 %vm80_vm1, %v1209_v39  ;;  %10284 = vmatmul.msk.f32.gmra.mxu1 %vm80_vm1, %v1426_v40  ;;  %v1414_v39 = vld [vmem:[%s15229_s0 + $0xb0] sm:$0xff] }
 0x10d   :  { %10301 = vmatmul.msk.f32.gmra.mxu2 %vm80_vm1, %v1409_v55  ;;  %10318 = vmatmul.msk.f32.gmra.mxu3 %vm80_vm1, %v11535_v58  ;;  %v1410_v58 = vld [vmem:[%s15229_s0 + $0x90] sm:$0xff] }
 0x10e   :  { %v11937_v40 = vld [vmem:[%s15229_s0 + $0xb2] sm:$0xff] }
 0x110   :  { %v998_v24 = vpop.f32.mrf.mxu2  ;;  %v1147_v47 = vpop.f32.mrf.mxu3 }
 0x111   :  { %v1044_v49 = vadd.f32 %v998_v24, %v895_v45  ;;  %v703_v50 = vpop.f32.mrf.mxu0  ;;  %v852_v51 = vpop.f32.mrf.mxu1 }
 0x112   :  { %v1415_v50 = vld [vmem:[%s15229_s0 + $0xb8] sm:$0xff] }
 0x113   :  { %v11856_v56 = vadd.f32 %v1147_v47, %v1044_v49  ;;  %v1215_v47 = vld [vmem:[%s15229_s0 + $0x5e] sm:$0xff] }
 0x114   :  { %10268 = vmatmul.msk.f32.gmra.mxu0 %vm80_vm1, %v1210_v52  ;;  %10285 = vmatmul.msk.f32.gmra.mxu1 %vm80_vm1, %v1427_v53  ;;  %v1432_v49 = vld [vmem:[%s15229_s0 + $0xb9] sm:$0xff] }
 0x115   :  { %10302 = vmatmul.msk.f32.gmra.mxu2 %vm80_vm1, %v1410_v58  ;;  %10319 = vmatmul.msk.f32.gmra.mxu3 %vm80_vm1, %v11854_v54  ;;  %v11958_v51 = vld [vmem:[%s15229_s0 + $0xba] sm:$0xff] }
 0x118   :  { %v1001_v57 = vpop.f32.mrf.mxu2  ;;  %v1150_v59 = vpop.f32.mrf.mxu3 }
 0x119   :  { %v706_v61 = vpop.f32.mrf.mxu0  ;;  %v855_v62 = vpop.f32.mrf.mxu1 }
 0x11a   :  { %v1216_v61 = vld [vmem:[%s15229_s0 + $0x66] sm:$0xff] }
 0x11b   :  { %v1433_v62 = vld [vmem:[%s15229_s0 + $0xc1] sm:$0xff] }
 0x11c   :  { %10269 = vmatmul.msk.f32.gmra.mxu0 %vm80_vm1, %v1211_v63  ;;  %10286 = vmatmul.msk.f32.gmra.mxu1 %vm80_vm1, %v1428_v0  ;;  %v1416_v63 = vld [vmem:[%s15229_s0 + $0xc0] sm:$0xff] }
 0x11d   :  { %10303 = vmatmul.msk.f32.gmra.mxu2 %vm80_vm1, %v1411_v1  ;;  %10320 = vmatmul.msk.f32.gmra.mxu3 %vm80_vm1, %v11875_v2  ;;  %v11979_v0 = vld [vmem:[%s15229_s0 + $0xc2] sm:$0xff] }
 0x120   :  { %v1004_v3 = vpop.f32.mrf.mxu2  ;;  %v1153_v4 = vpop.f32.mrf.mxu3 }
 0x121   :  { %v709_v7 = vpop.f32.mrf.mxu0  ;;  %v858_v9 = vpop.f32.mrf.mxu1 }
 0x122   :  { %v749_v13 = vadd.f32 %v709_v7, %v11638_v48 }
 0x124   :  { %v898_v16 = vadd.f32 %v858_v9, %v749_v13  ;;  %10270 = vmatmul.msk.f32.gmra.mxu0 %vm80_vm1, %v1212_v10  ;;  %10287 = vmatmul.msk.f32.gmra.mxu1 %vm80_vm1, %v1429_v11  ;;  %v1217_v9 = vld [vmem:[%s15229_s0 + $0x6e] sm:$0xff] }
 0x125   :  { %10304 = vmatmul.msk.f32.gmra.mxu2 %vm80_vm1, %v1412_v14  ;;  %10321 = vmatmul.msk.f32.gmra.mxu3 %vm80_vm1, %v11895_v15  ;;  %v1434_v10 = vld [vmem:[%s15229_s0 + $0xc9] sm:$0xff] }
 0x126   :  { %v1417_v13 = vld [vmem:[%s15229_s0 + $0xc8] sm:$0xff] }
 0x127   :  { %v11999_v14 = vld [vmem:[%s15229_s0 + $0xca] sm:$0xff] }
 0x128   :  { %v1007_v48 = vpop.f32.mrf.mxu2  ;;  %v1156_v18 = vpop.f32.mrf.mxu3 }
 0x129   :  { %v1047_v20 = vadd.f32 %v1007_v48, %v898_v16  ;;  %v712_v21 = vpop.f32.mrf.mxu0  ;;  %v861_v22 = vpop.f32.mrf.mxu1 }
 0x12a   :  { %v750_v26 = vadd.f32 %v712_v21, %v11653_v60 }
 0x12b   :  { %v11917_v29 = vadd.f32 %v1156_v18, %v1047_v20 }
 0x12c   :  { %v899_v30 = vadd.f32 %v861_v22, %v750_v26  ;;  %10271 = vmatmul.msk.f32.gmra.mxu0 %vm80_vm1, %v1213_v23  ;;  %10288 = vmatmul.msk.f32.gmra.mxu1 %vm80_vm1, %v1430_v25  ;;  %v1218_v22 = vld [vmem:[%s15229_s0 + $0x76] sm:$0xff] }
 0x12d   :  { %10305 = vmatmul.msk.f32.gmra.mxu2 %vm80_vm1, %v1413_v27  ;;  %10322 = vmatmul.msk.f32.gmra.mxu3 %vm80_vm1, %v11915_v28  ;;  %v1435_v23 = vld [vmem:[%s15229_s0 + $0xd1] sm:$0xff] }
 0x12e   :  { %v1418_v26 = vld [vmem:[%s15229_s0 + $0xd0] sm:$0xff] }
 0x12f   :  { %v12019_v27 = vld [vmem:[%s15229_s0 + $0xd2] sm:$0xff] }
 0x130   :  { %v1010_v60 = vpop.f32.mrf.mxu2  ;;  %v1159_v33 = vpop.f32.mrf.mxu3 }
 0x131   :  { %v1048_v34 = vadd.f32 %v1010_v60, %v899_v30  ;;  %v715_v12 = vpop.f32.mrf.mxu0  ;;  %v864_v35 = vpop.f32.mrf.mxu1 }
 0x132   :  { %v751_v38 = vadd.f32 %v715_v12, %v11668_v6 }
 0x133   :  { %v11939_v41 = vadd.f32 %v1159_v33, %v1048_v34 }
 0x134   :  { %v900_v55 = vadd.f32 %v864_v35, %v751_v38  ;;  %10272 = vmatmul.msk.f32.gmra.mxu0 %vm80_vm1, %v1214_v36  ;;  %10289 = vmatmul.msk.f32.gmra.mxu1 %vm80_vm1, %v1431_v37  ;;  %v1219_v36 = vld [vmem:[%s15229_s0 + $0x7e] sm:$0xff] }
 0x135   :  { %10306 = vmatmul.msk.f32.gmra.mxu2 %vm80_vm1, %v1414_v39  ;;  %10323 = vmatmul.msk.f32.gmra.mxu3 %vm80_vm1, %v11937_v40  ;;  %v1436_v37 = vld [vmem:[%s15229_s0 + $0xd9] sm:$0xff] }
 0x136   :  { %v1419_v38 = vld [vmem:[%s15229_s0 + $0xd8] sm:$0xff] }
 0x137   :  { %v12040_v39 = vld [vmem:[%s15229_s0 + $0xda] sm:$0xff] }
 0x138   :  { %v1013_v6 = vpop.f32.mrf.mxu2  ;;  %v1162_v44 = vpop.f32.mrf.mxu3 }
 0x139   :  { %v1049_v45 = vadd.f32 %v1013_v6, %v900_v55  ;;  %v718_v46 = vpop.f32.mrf.mxu0  ;;  %v867_v24 = vpop.f32.mrf.mxu1 }
 0x13a   :  { %v1220_v24 = vld [vmem:[%s15229_s0 + $0x86] sm:$0xff] }
 0x13b   :  { %v11960_v52 = vadd.f32 %v1162_v44, %v1049_v45 }
 0x13c   :  { %10273 = vmatmul.msk.f32.gmra.mxu0 %vm80_vm1, %v1215_v47  ;;  %10290 = vmatmul.msk.f32.gmra.mxu1 %vm80_vm1, %v1432_v49  ;;  %v1437_v47 = vld [vmem:[%s15229_s0 + $0xe1] sm:$0xff] }
 0x13d   :  { %10307 = vmatmul.msk.f32.gmra.mxu2 %vm80_vm1, %v1415_v50  ;;  %10324 = vmatmul.msk.f32.gmra.mxu3 %vm80_vm1, %v11958_v51  ;;  %v1420_v49 = vld [vmem:[%s15229_s0 + $0xe0] sm:$0xff] }
 0x13e   :  { %v12061_v50 = vld [vmem:[%s15229_s0 + $0xe2] sm:$0xff] }
 0x140   :  { %v1016_v53 = vpop.f32.mrf.mxu2  ;;  %v1165_v58 = vpop.f32.mrf.mxu3 }
 0x141   :  { %v721_v57 = vpop.f32.mrf.mxu0  ;;  %v870_v59 = vpop.f32.mrf.mxu1 }
 0x142   :  { %v2435_v57 = vld [vmem:[%s15230_s1 + $0x1c] sm:$0xf] }
 0x143   :  { %10401 = vmatpush.msk.msra.mxu0 %vm129_vm0, %v2435_v57 }
 0x144   :  { %10274 = vmatmul.msk.f32.gmra.mxu0 %vm80_vm1, %v1216_v61  ;;  %10291 = vmatmul.msk.f32.gmra.mxu1 %vm80_vm1, %v1433_v62  ;;  %v1221_v62 = vld [vmem:[%s15229_s0 + $0x8e] sm:$0xff] }
 0x145   :  { %10308 = vmatmul.msk.f32.gmra.mxu2 %vm80_vm1, %v1416_v63  ;;  %10325 = vmatmul.msk.f32.gmra.mxu3 %vm80_vm1, %v11979_v0  ;;  %v1438_v63 = vld [vmem:[%s15229_s0 + $0xe9] sm:$0xff] }
 0x148   :  { %v1019_v1 = vpop.f32.mrf.mxu2  ;;  %v1168_v3 = vpop.f32.mrf.mxu3 }
 0x149   :  { %v724_v4 = vpop.f32.mrf.mxu0  ;;  %v873_v7 = vpop.f32.mrf.mxu1  ;;  %v1421_v3 = vld [vmem:[%s15229_s0 + $0xe8] sm:$0xff] }
 0x14a   :  { %v754_v11 = vadd.f32 %v724_v4, %v11709_v32  ;;  %v12085_v4 = vld [vmem:[%s15229_s0 + $0xea] sm:$0xff] }
 0x14c   :  { %v903_v16 = vadd.f32 %v873_v7, %v754_v11  ;;  %10275 = vmatmul.msk.f32.gmra.mxu0 %vm80_vm1, %v1217_v9  ;;  %10292 = vmatmul.msk.f32.gmra.mxu1 %vm80_vm1, %v1434_v10 }
 0x14d   :  { %10309 = vmatmul.msk.f32.gmra.mxu2 %vm80_vm1, %v1417_v13  ;;  %10326 = vmatmul.msk.f32.gmra.mxu3 %vm80_vm1, %v11999_v14 }
 0x150   :  { %v1022_v32 = vpop.f32.mrf.mxu2  ;;  %v1171_v48 = vpop.f32.mrf.mxu3 }
 0x151   :  { %v1052_v18 = vadd.f32 %v1022_v32, %v903_v16  ;;  %v727_v20 = vpop.f32.mrf.mxu0  ;;  %v876_v21 = vpop.f32.mrf.mxu1  ;;  %v1222_v16 = vld [vmem:[%s15229_s0 + $0x96] sm:$0xff] }
 0x152   :  { %v755_v25 = vadd.f32 %v727_v20, %v11724_v42  ;;  %v1439_v32 = vld [vmem:[%s15229_s0 + $0xf1] sm:$0xff] }
 0x153   :  { %v12021_v30 = vadd.f32 %v1171_v48, %v1052_v18  ;;  %v1422_v18 = vld [vmem:[%s15229_s0 + $0xf0] sm:$0xff] }
 0x154   :  { %v904_v60 = vadd.f32 %v876_v21, %v755_v25  ;;  %10276 = vmatmul.msk.f32.gmra.mxu0 %vm80_vm1, %v1218_v22  ;;  %10293 = vmatmul.msk.f32.gmra.mxu1 %vm80_vm1, %v1435_v23  ;;  %v12105_v20 = vld [vmem:[%s15229_s0 + $0xf2] sm:$0xff] }
 0x155   :  { %10310 = vmatmul.msk.f32.gmra.mxu2 %vm80_vm1, %v1418_v26  ;;  %10327 = vmatmul.msk.f32.gmra.mxu3 %vm80_vm1, %v12019_v27 }
 0x158   :  { %v1025_v42 = vpop.f32.mrf.mxu2  ;;  %v1174_v33 = vpop.f32.mrf.mxu3 }
 0x159   :  { %v1053_v34 = vadd.f32 %v1025_v42, %v904_v60  ;;  %v730_v12 = vpop.f32.mrf.mxu0  ;;  %v879_v35 = vpop.f32.mrf.mxu1  ;;  %v1223_v42 = vld [vmem:[%s15229_s0 + $0x9e] sm:$0xff] }
 0x15a   :  { %v1423_v12 = vld [vmem:[%s15229_s0 + $0xf8] sm:$0xff] }
 0x15b   :  { %v12042_v55 = vadd.f32 %v1174_v33, %v1053_v34  ;;  %v1440_v33 = vld [vmem:[%s15229_s0 + $0xf9] sm:$0xff] }
 0x15c   :  { %10277 = vmatmul.msk.f32.gmra.mxu0 %vm80_vm1, %v1219_v36  ;;  %10294 = vmatmul.msk.f32.gmra.mxu1 %vm80_vm1, %v1436_v37  ;;  %v12127_v35 = vld [vmem:[%s15229_s0 + $0xfa] sm:$0xff] }
 0x15d   :  { %10311 = vmatmul.msk.f32.gmra.mxu2 %vm80_vm1, %v1419_v38  ;;  %10328 = vmatmul.msk.f32.gmra.mxu3 %vm80_vm1, %v12040_v39  ;;  %v11214_v38 = vmov 0.0  }
 0x15e   :  { %6617 = vst [vmem:[#allocation3] sm:$0xff] %v11214_v38 }
 0x15f   :  { %6618 = vst [vmem:[#allocation3 + $0x8] sm:$0x3] %v11214_v38 }
 0x160   :  { %v1028_v6 = vpop.f32.mrf.mxu2  ;;  %v1177_v44 = vpop.f32.mrf.mxu3  ;;  %6619 = vst [vmem:[#allocation3 + $0x5a] sm:$0xff] %v11214_v38 }
 0x161   :  { %v733_v45 = vpop.f32.mrf.mxu0  ;;  %v882_v46 = vpop.f32.mrf.mxu1  ;;  %6620 = vst [vmem:[#allocation3 + $0x62] sm:$0x3] %v11214_v38  ;;  %v12139_v44 = vld [vmem:[%s15231_s2] ss:$0 sm:$0xff] }
 0x162   :  { %6693 = vst [vmem:[#allocation3 + $0x64] sm:$0xff] %v11214_v38 }
 0x163   :  { %6694 = vst [vmem:[#allocation3 + $0x6c] sm:$0x3] %v11214_v38 }
 0x164   :  { %10278 = vmatmul.msk.f32.gmra.mxu0 %vm80_vm1, %v1220_v24  ;;  %10295 = vmatmul.msk.f32.gmra.mxu1 %vm80_vm1, %v1437_v47  ;;  %v1972_v47 = vld [vmem:[%s15229_s0 + $0x93] sm:$0xff]  ;;  %6695 = vst [vmem:[#allocation3 + $0xbe] sm:$0xff] %v11214_v38 }
 0x165   :  { %10312 = vmatmul.msk.f32.gmra.mxu2 %vm80_vm1, %v1420_v49  ;;  %10329 = vmatmul.msk.f32.gmra.mxu3 %vm80_vm1, %v12061_v50  ;;  %6696 = vst [vmem:[#allocation3 + $0xc6] sm:$0x3] %v11214_v38 }
 0x166   :  { %8777 = vst [vmem:[#allocation4] sm:$0x3f] %v11214_v38 }
 0x167   :  { %8778 = vst [vmem:[#allocation4 + $0x1e] sm:$0x3f] %v11214_v38 }
 0x168   :  { %v1031_v53 = vpop.f32.mrf.mxu2  ;;  %v1180_v58 = vpop.f32.mrf.mxu3  ;;  %8811 = vst [vmem:[#allocation4 + $0x24] sm:$0x3f] %v11214_v38 }
 0x169   :  { %v736_v59 = vpop.f32.mrf.mxu0  ;;  %v885_v61 = vpop.f32.mrf.mxu1  ;;  %v2270_v53 = vld [vmem:[%s15229_s0 + $0xa4] sm:$0xff]  ;;  %8812 = vst [vmem:[#allocation4 + $0x42] sm:$0x3f] %v11214_v38 }
 0x16a   :  { %v758_v1 = vadd.f32 %v736_v59, %v11771_v8 }
 0x16c   :  { %v907_v7 = vadd.f32 %v885_v61, %v758_v1  ;;  %10279 = vmatmul.msk.f32.gmra.mxu0 %vm80_vm1, %v1221_v62  ;;  %10296 = vmatmul.msk.f32.gmra.mxu1 %vm80_vm1, %v1438_v63  ;;  %v2584_v62 = vld [vmem:[%s15230_s1 + $0x20] sm:$0xf] }
 0x16d   :  { %10313 = vmatmul.msk.f32.gmra.mxu2 %vm80_vm1, %v1421_v3  ;;  %10330 = vmatmul.msk.f32.gmra.mxu3 %vm80_vm1, %v12085_v4 }
 0x16e   :  { %10418 = vmatpush.msk.msra.mxu1 %vm129_vm0, %v2584_v62 }
 0x170   :  { %v1034_v8 = vpop.f32.mrf.mxu2  ;;  %v1183_v9 = vpop.f32.mrf.mxu3 }
 0x171   :  { %v1056_v10 = vadd.f32 %v1034_v8, %v907_v7  ;;  %v739_v11 = vpop.f32.mrf.mxu0  ;;  %v888_v13 = vpop.f32.mrf.mxu1  ;;  %v2271_v7 = vld [vmem:[%s15229_s0 + $0xac] sm:$0xff] }
 0x172   :  { %v759_v48 = vadd.f32 %v739_v11, %v11789_v19  ;;  %v2781_v11 = vld [vmem:[%s15230_s1] sm:$0xf] }
 0x173   :  { %v12107_v21 = vadd.f32 %v1183_v9, %v1056_v10  ;;  %10452 = vmatpush.msk.msra.mxu3 %vm129_vm0, %v2781_v11 }
 0x174   :  { %v908_v22 = vadd.f32 %v888_v13, %v759_v48  ;;  %10280 = vmatmul.msk.f32.gmra.mxu0 %vm80_vm1, %v1222_v16  ;;  %10297 = vmatmul.msk.f32.gmra.mxu1 %vm80_vm1, %v1439_v32 }
 0x175   :  { %10314 = vmatmul.msk.f32.gmra.mxu2 %vm80_vm1, %v1422_v18  ;;  %10331 = vmatmul.msk.f32.gmra.mxu3 %vm80_vm1, %v12105_v20 }
 0x178   :  { %v1037_v19 = vpop.f32.mrf.mxu2  ;;  %v1186_v23 = vpop.f32.mrf.mxu3 }
 0x179   :  { %v1057_v25 = vadd.f32 %v1037_v19, %v908_v22  ;;  %v742_v26 = vpop.f32.mrf.mxu0  ;;  %v891_v60 = vpop.f32.mrf.mxu1 }
 0x17a   :  { %v760_v34 = vadd.f32 %v742_v26, %v11806_v31  ;;  %v1975_v26 = vld [vmem:[%s15229_s0 + $0xab] sm:$0xff] }
 0x17b   :  { %v12129_v36 = vadd.f32 %v1186_v23, %v1057_v25 }
 0x17c   :  { %v909_v37 = vadd.f32 %v891_v60, %v760_v34  ;;  %10281 = vmatmul.msk.f32.gmra.mxu0 %vm80_vm1, %v1223_v42  ;;  %10298 = vmatmul.msk.f32.gmra.mxu1 %vm80_vm1, %v1440_v33 }
 0x17d   :  { %10315 = vmatmul.msk.f32.gmra.mxu2 %vm80_vm1, %v1423_v12  ;;  %10332 = vmatmul.msk.f32.gmra.mxu3 %vm80_vm1, %v12127_v35 }
 0x180   :  { %v1040_v31 = vpop.f32.mrf.mxu2  ;;  %v1189_v6 = vpop.f32.mrf.mxu3 }
 0x181   :  { %v1058_v45 = vadd.f32 %v1040_v31, %v909_v37  ;;  %v1293_v46 = vpop.f32.mrf.mxu0  ;;  %v1510_v24 = vpop.f32.mrf.mxu1 }
 0x182   :  { %v1341_v49 = vadd.f32 %v1293_v46, %v11827_v43 }
 0x183   :  { %v12148_v58 = vadd.f32 %v1189_v6, %v1058_v45  ;;  %v1976_v6 = vld [vmem:[%s15229_s0 + $0xb3] sm:$0xff] }
 0x184   :  { %v1360_v57 = vadd.f32 %v12139_v44, %v1341_v49  ;;  %10334 = vmatmul.msk.f32.vlgmr.msrb.gmra.mxu0 %vm80_vm1, %v11854_v54  ;;  %10351 = vmatmul.msk.f32.vlgmr.msrb.gmra.mxu1 %vm80_vm1, %v1972_v47  ;;  %v2798_v54 = vld [vmem:[%s15230_s1 + $0x4] sm:$0xf] }
 0x185   :  { %10368 = vmatmul.msk.f32.vlgmr.msrb.gmra.mxu2 %vm80_vm1, %v11766_v5  ;;  %10385 = vmatmul.msk.f32.vlgmr.msrb.gmra.mxu3 %vm80_vm1, %v2270_v53  ;;  %v1973_v5 = vld [vmem:[%s15229_s0 + $0x9b] sm:$0xff] }
 0x186   :  { %v1376_v43 = vmax.f32 %v1360_v57, 0.0  ;;  %10435 = vmatpush.msk.msra.mxu2 %vm129_vm0, %v2798_v54 }
 0x188   :  { %1392 = vst [vmem:[#allocation2] sm:$0xff] %v1376_v43  ;;  %v1626_v59 = vpop.f32.mrf.mxu2  ;;  %v1759_v61 = vpop.f32.mrf.mxu3  ;;  %v1977_v43 = vld [vmem:[%s15229_s0 + $0xbb] sm:$0xff] }
 0x189   :  { %v1296_v63 = vpop.f32.mrf.mxu0  ;;  %v1513_v1 = vpop.f32.mrf.mxu1 }
 0x18a   :  { %v1342_v3 = vadd.f32 %v1296_v63, %v11856_v56 }
 0x18c   :  { %v1361_v8 = vadd.f32 %v12139_v44, %v1342_v3  ;;  %10335 = vmatmul.msk.f32.gmra.mxu0 %vm80_vm1, %v11875_v2  ;;  %10352 = vmatmul.msk.f32.gmra.mxu1 %vm80_vm1, %v1973_v5  ;;  %v1974_v2 = vld [vmem:[%s15229_s0 + $0xa3] sm:$0xff] }
 0x18d   :  { %10369 = vmatmul.msk.f32.gmra.mxu2 %vm80_vm1, %v11784_v17  ;;  %10386 = vmatmul.msk.f32.gmra.mxu3 %vm80_vm1, %v2271_v7  ;;  %v2272_v17 = vld [vmem:[%s15229_s0 + $0xb4] sm:$0xff]  ;;  %v1978_v5 = vld [vmem:[%s15229_s0 + $0xc3] sm:$0xff] }
 0x18e   :  { %v1377_v9 = vmax.f32 %v1361_v8, 0.0 }
 0x190   :  { %1393 = vst [vmem:[#allocation2 + $0x8] sm:$0xff] %v1377_v9  ;;  %v1629_v10 = vpop.f32.mrf.mxu2  ;;  %v1762_v56 = vpop.f32.mrf.mxu3 }
 0x191   :  { %v1299_v13 = vpop.f32.mrf.mxu0  ;;  %v1516_v16 = vpop.f32.mrf.mxu1 }
 0x192   :  { %v1979_v13 = vld [vmem:[%s15229_s0 + $0xcb] sm:$0xff] }
 0x194   :  { %10336 = vmatmul.msk.f32.gmra.mxu0 %vm80_vm1, %v11895_v15  ;;  %10353 = vmatmul.msk.f32.gmra.mxu1 %vm80_vm1, %v1974_v2  ;;  %v2273_v15 = vld [vmem:[%s15229_s0 + $0xbc] sm:$0xff] }
 0x195   :  { %10370 = vmatmul.msk.f32.gmra.mxu2 %vm80_vm1, %v2270_v53  ;;  %10387 = vmatmul.msk.f32.gmra.mxu3 %vm80_vm1, %v2272_v17 }
 0x197   :  { %v6621_v32 = vld [vmem:[#allocation2] ss:$2 sm:$0xff] }
 0x198   :  { %v1632_v48 = vpop.f32.mrf.mxu2  ;;  %v1765_v18 = vpop.f32.mrf.mxu3  ;;  %v6623_v22 = vrot.slane %v6621_v32, 7 }
 0x199   :  { %v1633_v19 = vadd.f32 %v1632_v48, %v1516_v16  ;;  %v1302_v23 = vpop.f32.mrf.mxu0  ;;  %v1519_v25 = vpop.f32.mrf.mxu1 }
 0x19a   :  { %v6626_v60 = vsel %vm6625_vm2, 0.0, %v6623_v22  ;;  %v6627_v42 = vsel %vm6625_vm2, %v6623_v22, 0.0  ;;  %v1980_v23 = vld [vmem:[%s15229_s0 + $0xd3] sm:$0xff] }
 0x19b   :  { %v12202_v33 = vadd.f32 %v1765_v18, %v1633_v19  ;;  %6628 = vst [vmem:[#allocation3 + $0xa] sm:$0xff] %v6626_v60 }
 0x19c   :  { %10337 = vmatmul.msk.f32.gmra.mxu0 %vm80_vm1, %v11915_v28  ;;  %10354 = vmatmul.msk.f32.gmra.mxu1 %vm80_vm1, %v1975_v26  ;;  %6629 = vst [vmem:[#allocation3 + $0x12] sm:$0x3] %v6627_v42  ;;  %v2274_v28 = vld [vmem:[%s15229_s0 + $0xc4] sm:$0xff] }
 0x19d   :  { %10371 = vmatmul.msk.f32.gmra.mxu2 %vm80_vm1, %v2271_v7  ;;  %10388 = vmatmul.msk.f32.gmra.mxu3 %vm80_vm1, %v2273_v15 }
 0x1a0   :  { %v1635_v34 = vpop.f32.mrf.mxu2  ;;  %v1768_v12 = vpop.f32.mrf.mxu3 }
 0x1a1   :  { %v1636_v37 = vadd.f32 %v1635_v34, %v1519_v25  ;;  %v1305_v38 = vpop.f32.mrf.mxu0  ;;  %v1522_v31 = vpop.f32.mrf.mxu1 }
 0x1a2   :  { %v1345_v45 = vadd.f32 %v1305_v38, %v11917_v29  ;;  %v1981_v38 = vld [vmem:[%s15229_s0 + $0xdb] sm:$0xff] }
 0x1a3   :  { %v12216_v46 = vadd.f32 %v1768_v12, %v1636_v37 }
 0x1a4   :  { %v1364_v24 = vadd.f32 %v12139_v44, %v1345_v45  ;;  %10338 = vmatmul.msk.f32.gmra.mxu0 %vm80_vm1, %v11937_v40  ;;  %10355 = vmatmul.msk.f32.gmra.mxu1 %vm80_vm1, %v1976_v6  ;;  %v2275_v40 = vld [vmem:[%s15229_s0 + $0xcc] sm:$0xff] }
 0x1a5   :  { %10372 = vmatmul.msk.f32.gmra.mxu2 %vm80_vm1, %v2272_v17  ;;  %10389 = vmatmul.msk.f32.gmra.mxu3 %vm80_vm1, %v2274_v28 }
 0x1a6   :  { %v1380_v47 = vmax.f32 %v1364_v24, 0.0 }
 0x1a8   :  { %1396 = vst [vmem:[#allocation2 + $0x20] sm:$0xff] %v1380_v47  ;;  %v1638_v29 = vpop.f32.mrf.mxu2  ;;  %v1771_v49 = vpop.f32.mrf.mxu3 }
 0x1a9   :  { %v1308_v53 = vpop.f32.mrf.mxu0  ;;  %v1525_v57 = vpop.f32.mrf.mxu1  ;;  %v1982_v49 = vld [vmem:[%s15229_s0 + $0xe3] sm:$0xff] }
 0x1aa   :  { %v1346_v59 = vadd.f32 %v1308_v53, %v11939_v41 }
 0x1ac   :  { %v1365_v61 = vadd.f32 %v12139_v44, %v1346_v59  ;;  %10339 = vmatmul.msk.f32.gmra.mxu0 %vm80_vm1, %v11958_v51  ;;  %10356 = vmatmul.msk.f32.gmra.mxu1 %vm80_vm1, %v1977_v43  ;;  %v2276_v51 = vld [vmem:[%s15229_s0 + $0xd4] sm:$0xff] }
 0x1ad   :  { %10373 = vmatmul.msk.f32.gmra.mxu2 %vm80_vm1, %v2273_v15  ;;  %10390 = vmatmul.msk.f32.gmra.mxu3 %vm80_vm1, %v2275_v40 }
 0x1ae   :  { %v1381_v62 = vmax.f32 %v1365_v61, 0.0 }
 0x1b0   :  { %1397 = vst [vmem:[#allocation2 + $0x28] sm:$0xff] %v1381_v62  ;;  %v1641_v54 = vpop.f32.mrf.mxu2  ;;  %v1774_v63 = vpop.f32.mrf.mxu3  ;;  %v1983_v62 = vld [vmem:[%s15229_s0 + $0xeb] sm:$0xff] }
 0x1b1   :  { %v1311_v41 = vpop.f32.mrf.mxu0  ;;  %v1528_v1 = vpop.f32.mrf.mxu1 }
 0x1b2   :  { %v1347_v3 = vadd.f32 %v1311_v41, %v11960_v52 }
 0x1b4   :  { %v1366_v7 = vadd.f32 %v12139_v44, %v1347_v3  ;;  %10340 = vmatmul.msk.f32.gmra.mxu0 %vm80_vm1, %v11979_v0  ;;  %10357 = vmatmul.msk.f32.gmra.mxu1 %vm80_vm1, %v1978_v5  ;;  %v2277_v0 = vld [vmem:[%s15229_s0 + $0xdc] sm:$0xff] }
 0x1b5   :  { %10374 = vmatmul.msk.f32.gmra.mxu2 %vm80_vm1, %v2274_v28  ;;  %10391 = vmatmul.msk.f32.gmra.mxu3 %vm80_vm1, %v2276_v51 }
 0x1b6   :  { %v1382_v8 = vmax.f32 %v1366_v7, 0.0  ;;  %v1984_v7 = vld [vmem:[%s15229_s0 + $0xf3] sm:$0xff] }
 0x1b8   :  { %1398 = vst [vmem:[#allocation2 + $0x30] sm:$0xff] %v1382_v8  ;;  %v1644_v9 = vpop.f32.mrf.mxu2  ;;  %v1777_v10 = vpop.f32.mrf.mxu3 }
 0x1b9   :  { %v1645_v52 = vadd.f32 %v1644_v9, %v1528_v1  ;;  %v1314_v56 = vpop.f32.mrf.mxu0  ;;  %v1531_v11 = vpop.f32.mrf.mxu1 }
 0x1bb   :  { %v12256_v16 = vadd.f32 %v1777_v10, %v1645_v52  ;;  %v3047_v52 = vld [vmem:[%s15230_s1 + $0x8] sm:$0xf] }
 0x1bc   :  { %10341 = vmatmul.msk.f32.gmra.mxu0 %vm80_vm1, %v11999_v14  ;;  %10358 = vmatmul.msk.f32.gmra.mxu1 %vm80_vm1, %v1979_v13  ;;  %v2278_v14 = vld [vmem:[%s15229_s0 + $0xe4] sm:$0xff] }
 0x1bd   :  { %10375 = vmatmul.msk.f32.gmra.mxu2 %vm80_vm1, %v2275_v40  ;;  %10392 = vmatmul.msk.f32.gmra.mxu3 %vm80_vm1, %v2277_v0 }
 0x1be   :  { %10469 = vmatpush.msk.msrb.mxu0 %vm129_vm0, %v3047_v52 }
 0x1bf   :  { %v6631_v2 = vld [vmem:[#allocation2 + $0x24] ss:$2 sm:$0xff] }
 0x1c0   :  { %v1647_v17 = vpop.f32.mrf.mxu2  ;;  %v1780_v32 = vpop.f32.mrf.mxu3  ;;  %v6633_v48 = vrot.slane %v6631_v2, 7 }
 0x1c1   :  { %v1648_v18 = vadd.f32 %v1647_v17, %v1531_v11  ;;  %v1317_v22 = vpop.f32.mrf.mxu0  ;;  %v1534_v19 = vpop.f32.mrf.mxu1 }
 0x1c2   :  { %v6635_v25 = vsel %vm6625_vm2, 0.0, %v6633_v48  ;;  %v6636_v26 = vsel %vm6625_vm2, %v6633_v48, 0.0 }
 0x1c3   :  { %v12271_v15 = vadd.f32 %v1780_v32, %v1648_v18  ;;  %6637 = vst [vmem:[#allocation3 + $0x14] sm:$0xff] %v6635_v25  ;;  %v2283_v32 = vld [vmem:[%s15229_s0 + $0x10c] sm:$0xff]  ;;  %v12354_v25 = vld [vmem:[%s15229_s0 + $0x102] sm:$0xff] }
 0x1c4   :  { %10342 = vmatmul.msk.f32.gmra.mxu0 %vm80_vm1, %v12019_v27  ;;  %10359 = vmatmul.msk.f32.gmra.mxu1 %vm80_vm1, %v1980_v23  ;;  %6638 = vst [vmem:[#allocation3 + $0x1c] sm:$0x3] %v6636_v26  ;;  %v2279_v27 = vld [vmem:[%s15229_s0 + $0xec] sm:$0xff] }
 0x1c5   :  { %10376 = vmatmul.msk.f32.gmra.mxu2 %vm80_vm1, %v2276_v51  ;;  %10393 = vmatmul.msk.f32.gmra.mxu3 %vm80_vm1, %v2278_v14 }
 0x1c8   :  { %v1650_v60 = vpop.f32.mrf.mxu2  ;;  %v1783_v42 = vpop.f32.mrf.mxu3 }
 0x1c9   :  { %v1651_v34 = vadd.f32 %v1650_v60, %v1534_v19  ;;  %v1320_v12 = vpop.f32.mrf.mxu0  ;;  %v1537_v37 = vpop.f32.mrf.mxu1  ;;  %v12363_v60 = vld [vmem:[%s15229_s0 + $0x114] sm:$0xff] }
 0x1ca   :  { %v1350_v31 = vadd.f32 %v1320_v12, %v12021_v30 }
 0x1cb   :  { %v12285_v6 = vadd.f32 %v1783_v42, %v1651_v34 }
 0x1cc   :  { %v1369_v45 = vadd.f32 %v12139_v44, %v1350_v31  ;;  %10343 = vmatmul.msk.f32.gmra.mxu0 %vm80_vm1, %v12040_v39  ;;  %10360 = vmatmul.msk.f32.gmra.mxu1 %vm80_vm1, %v1981_v38  ;;  %v2280_v39 = vld [vmem:[%s15229_s0 + $0xf4] sm:$0xff]  ;;  %v12375_v31 = vld [vmem:[%s15229_s0 + $0x10a] sm:$0xff] }
 0x1cd   :  { %10377 = vmatmul.msk.f32.gmra.mxu2 %vm80_vm1, %v2277_v0  ;;  %10394 = vmatmul.msk.f32.gmra.mxu3 %vm80_vm1, %v2279_v27 }
 0x1ce   :  { %v1385_v28 = vmax.f32 %v1369_v45, 0.0 }
 0x1d0   :  { %1401 = vst [vmem:[#allocation2 + $0x48] sm:$0xff] %v1385_v28  ;;  %v1653_v30 = vpop.f32.mrf.mxu2  ;;  %v1786_v24 = vpop.f32.mrf.mxu3  ;;  %v12384_v28 = vld [vmem:[%s15229_s0 + $0x11c] sm:$0xff] }
 0x1d1   :  { %v1323_v47 = vpop.f32.mrf.mxu0  ;;  %v1540_v29 = vpop.f32.mrf.mxu1 }
 0x1d2   :  { %v1351_v53 = vadd.f32 %v1323_v47, %v12042_v55 }
 0x1d4   :  { %v1370_v57 = vadd.f32 %v12139_v44, %v1351_v53  ;;  %10344 = vmatmul.msk.f32.gmra.mxu0 %vm80_vm1, %v12061_v50  ;;  %10361 = vmatmul.msk.f32.gmra.mxu1 %vm80_vm1, %v1982_v49  ;;  %v2281_v50 = vld [vmem:[%s15229_s0 + $0xfc] sm:$0xff] }
 0x1d5   :  { %10378 = vmatmul.msk.f32.gmra.mxu2 %vm80_vm1, %v2278_v14  ;;  %10395 = vmatmul.msk.f32.gmra.mxu3 %vm80_vm1, %v2280_v39 }
 0x1d6   :  { %v1386_v43 = vmax.f32 %v1370_v57, 0.0  ;;  %v2782_v57 = vld [vmem:[%s15229_s0 + $0x101] sm:$0xff] }
 0x1d8   :  { %1402 = vst [vmem:[#allocation2 + $0x50] sm:$0xff] %v1386_v43  ;;  %v1656_v59 = vpop.f32.mrf.mxu2  ;;  %v1789_v40 = vpop.f32.mrf.mxu3  ;;  %v2765_v43 = vld [vmem:[%s15229_s0 + $0x100] sm:$0xff] }
 0x1d9   :  { %v1326_v55 = vpop.f32.mrf.mxu0  ;;  %v1543_v61 = vpop.f32.mrf.mxu1  ;;  %v3196_v40 = vld [vmem:[%s15230_s1 + $0xc] sm:$0xf] }
 0x1da   :  { %10486 = vmatpush.msk.msrb.mxu1 %vm129_vm0, %v3196_v40  ;;  %v2770_v40 = vld [vmem:[%s15229_s0 + $0x128] sm:$0xff] }
 0x1dc   :  { %10345 = vmatmul.msk.f32.gmra.mxu0 %vm80_vm1, %v12085_v4  ;;  %10362 = vmatmul.msk.f32.gmra.mxu1 %vm80_vm1, %v1983_v62  ;;  %v2282_v4 = vld [vmem:[%s15229_s0 + $0x104] sm:$0xff] }
 0x1dd   :  { %10379 = vmatmul.msk.f32.gmra.mxu2 %vm80_vm1, %v2279_v27  ;;  %10396 = vmatmul.msk.f32.gmra.mxu3 %vm80_vm1, %v2281_v50  ;;  %v1987_v27 = vld [vmem:[%s15229_s0 + $0x10b] sm:$0xff] }
 0x1df   :  { %v6640_v54 = vld [vmem:[#allocation2 + $0x48] ss:$2 sm:$0xff] }
 0x1e0   :  { %v1659_v63 = vpop.f32.mrf.mxu2  ;;  %v1792_v41 = vpop.f32.mrf.mxu3  ;;  %v6642_v1 = vrot.slane %v6640_v54, 7 }
 0x1e1   :  { %v1660_v5 = vadd.f32 %v1659_v63, %v1543_v61  ;;  %v1329_v3 = vpop.f32.mrf.mxu0  ;;  %v1546_v51 = vpop.f32.mrf.mxu1 }
 0x1e2   :  { %v6644_v8 = vsel %vm6625_vm2, 0.0, %v6642_v1  ;;  %v6645_v9 = vsel %vm6625_vm2, %v6642_v1, 0.0  ;;  %v2420_v1 = vld [vmem:[%s15229_s0 + $0xad] sm:$0xff] }
 0x1e3   :  { %v12325_v10 = vadd.f32 %v1792_v41, %v1660_v5  ;;  %6646 = vst [vmem:[#allocation3 + $0x1e] sm:$0xff] %v6644_v8  ;;  %v2569_v5 = vld [vmem:[%s15229_s0 + $0xae] sm:$0xff] }
 0x1e4   :  { %10346 = vmatmul.msk.f32.gmra.mxu0 %vm80_vm1, %v12105_v20  ;;  %10363 = vmatmul.msk.f32.gmra.mxu1 %vm80_vm1, %v1984_v7  ;;  %6647 = vst [vmem:[#allocation3 + $0x26] sm:$0x3] %v6645_v9  ;;  %v1985_v20 = vld [vmem:[%s15229_s0 + $0xfb] sm:$0xff]  ;;  %v3494_v3 = vld [vmem:[%s15230_s1 + $0x14] sm:$0xf]  ;;  %v2766_v7 = vld [vmem:[%s15229_s0 + $0x108] sm:$0xff] }
 0x1e5   :  { %10380 = vmatmul.msk.f32.gmra.mxu2 %vm80_vm1, %v2280_v39  ;;  %10397 = vmatmul.msk.f32.gmra.mxu3 %vm80_vm1, %v2282_v4  ;;  %v2568_v39 = vld [vmem:[%s15229_s0 + $0xa6] sm:$0xff] }
 0x1e6   :  { %10520 = vmatpush.msk.msrb.mxu3 %vm129_vm0, %v3494_v3 }
 0x1e8   :  { %v1662_v56 = vpop.f32.mrf.mxu2  ;;  %v1795_v11 = vpop.f32.mrf.mxu3 }
 0x1e9   :  { %v1663_v13 = vadd.f32 %v1662_v56, %v1546_v51  ;;  %v1332_v0 = vpop.f32.mrf.mxu0  ;;  %v1549_v2 = vpop.f32.mrf.mxu1  ;;  %v2783_v51 = vld [vmem:[%s15229_s0 + $0x109] sm:$0xff] }
 0x1ea   :  { %v1354_v17 = vadd.f32 %v1332_v0, %v12107_v21  ;;  %v2570_v0 = vld [vmem:[%s15229_s0 + $0xb6] sm:$0xff] }
 0x1eb   :  { %v12343_v48 = vadd.f32 %v1795_v11, %v1663_v13  ;;  %v2421_v13 = vld [vmem:[%s15229_s0 + $0xb5] sm:$0xff] }
 0x1ec   :  { %v1373_v18 = vadd.f32 %v12139_v44, %v1354_v17  ;;  %10347 = vmatmul.msk.f32.gmra.mxu0 %vm80_vm1, %v12127_v35  ;;  %10364 = vmatmul.msk.f32.gmra.mxu1 %vm80_vm1, %v1985_v20  ;;  %v1986_v35 = vld [vmem:[%s15229_s0 + $0x103] sm:$0xff]  ;;  %v2784_v20 = vld [vmem:[%s15229_s0 + $0x111] sm:$0xff] }
 0x1ed   :  { %10381 = vmatmul.msk.f32.gmra.mxu2 %vm80_vm1, %v2281_v50  ;;  %10398 = vmatmul.msk.f32.gmra.mxu3 %vm80_vm1, %v2283_v32  ;;  %v3345_v50 = vld [vmem:[%s15230_s1 + $0x10] sm:$0xf] }
 0x1ee   :  { %v1389_v22 = vmax.f32 %v1373_v18, 0.0  ;;  %10503 = vmatpush.msk.msrb.mxu2 %vm129_vm0, %v3345_v50  ;;  %v2767_v17 = vld [vmem:[%s15229_s0 + $0x110] sm:$0xff] }
 0x1f0   :  { %1405 = vst [vmem:[#allocation2 + $0x68] sm:$0xff] %v1389_v22  ;;  %v1665_v21 = vpop.f32.mrf.mxu2  ;;  %v1798_v19 = vpop.f32.mrf.mxu3 }
 0x1f1   :  { %v1335_v23 = vpop.f32.mrf.mxu0  ;;  %v1552_v14 = vpop.f32.mrf.mxu1 }
 0x1f2   :  { %v1355_v26 = vadd.f32 %v1335_v23, %v12129_v36  ;;  %v2422_v23 = vld [vmem:[%s15229_s0 + $0xbd] sm:$0xff] }
 0x1f3   :  { %v2571_v14 = vld [vmem:[%s15229_s0 + $0xbe] sm:$0xff] }
 0x1f4   :  { %v1374_v42 = vadd.f32 %v12139_v44, %v1355_v26  ;;  %10348 = vmatmul.msk.f32.gmra.mxu0 %vm80_vm1, %v12354_v25  ;;  %10365 = vmatmul.msk.f32.gmra.mxu1 %vm80_vm1, %v1986_v35  ;;  %v2785_v26 = vld [vmem:[%s15229_s0 + $0x119] sm:$0xff] }
 0x1f5   :  { %10382 = vmatmul.msk.f32.gmra.mxu2 %vm80_vm1, %v2282_v4  ;;  %10399 = vmatmul.msk.f32.gmra.mxu3 %vm80_vm1, %v12363_v60 }
 0x1f6   :  { %v1390_v34 = vmax.f32 %v1374_v42, 0.0  ;;  %v2768_v42 = vld [vmem:[%s15229_s0 + $0x118] sm:$0xff] }
 0x1f8   :  { %1406 = vst [vmem:[#allocation2 + $0x70] sm:$0xff] %v1390_v34  ;;  %v1668_v36 = vpop.f32.mrf.mxu2  ;;  %v1801_v12 = vpop.f32.mrf.mxu3 }
 0x1f9   :  { %v1338_v37 = vpop.f32.mrf.mxu0  ;;  %v1555_v38 = vpop.f32.mrf.mxu1 }
 0x1fa   :  { %v1356_v45 = vadd.f32 %v1338_v37, %v12148_v58 }
 0x1fc   :  { %v1375_v30 = vadd.f32 %v12139_v44, %v1356_v45  ;;  %10349 = vmatmul.msk.f32.gmra.mxu0 %vm80_vm1, %v12375_v31  ;;  %10366 = vmatmul.msk.f32.gmra.mxu1 %vm80_vm1, %v1987_v27  ;;  %v2419_v44 = vld [vmem:[%s15229_s0 + $0xa5] sm:$0xff] }
 0x1fd   :  { %10383 = vmatmul.msk.f32.gmra.mxu2 %vm80_vm1, %v2283_v32  ;;  %10400 = vmatmul.msk.f32.gmra.mxu3 %vm80_vm1, %v12384_v28  ;;  %v2423_v45 = vld [vmem:[%s15229_s0 + $0xc5] sm:$0xff] }
 0x1fe   :  { %v1391_v24 = vmax.f32 %v1375_v30, 0.0  ;;  %v2572_v30 = vld [vmem:[%s15229_s0 + $0xc6] sm:$0xff] }
 0x200   :  { %1407 = vst [vmem:[#allocation2 + $0x78] sm:$0xff] %v1391_v24  ;;  %v1671_v58 = vpop.f32.mrf.mxu2  ;;  %v1804_v47 = vpop.f32.mrf.mxu3  ;;  %v2786_v24 = vld [vmem:[%s15229_s0 + $0x121] sm:$0xff] }
 0x201   :  { %v1672_v29 = vadd.f32 %v1671_v58, %v1555_v38  ;;  %v1908_v49 = vpop.f32.mrf.mxu0  ;;  %v2057_v53 = vpop.f32.mrf.mxu1  ;;  %v2769_v58 = vld [vmem:[%s15229_s0 + $0x120] sm:$0xff] }
 0x203   :  { %v12405_v59 = vadd.f32 %v1804_v47, %v1672_v29 }
 0x204   :  { %10402 = vmatmul.msk.f32.vlgmr.msra.gmra.mxu0 %vm80_vm1, %v2419_v44  ;;  %10419 = vmatmul.msk.f32.vlgmr.msra.gmra.mxu1 %vm80_vm1, %v2568_v39  ;;  %v2424_v39 = vld [vmem:[%s15229_s0 + $0xcd] sm:$0xff] }
 0x205   :  { %10436 = vmatmul.msk.f32.vlgmr.msra.gmra.mxu2 %vm80_vm1, %v2782_v57  ;;  %10453 = vmatmul.msk.f32.vlgmr.msra.gmra.mxu3 %vm80_vm1, %v2765_v43  ;;  %v2573_v57 = vld [vmem:[%s15229_s0 + $0xce] sm:$0xff] }
 0x206   :  { %v2787_v43 = vld [vmem:[%s15229_s0 + $0x129] sm:$0xff] }
 0x207   :  { %v6649_v55 = vld [vmem:[#allocation2 + $0x6c] ss:$2 sm:$0xff] }
 0x208   :  { %v2206_v61 = vpop.f32.mrf.mxu2  ;;  %v2355_v62 = vpop.f32.mrf.mxu3  ;;  %v6651_v54 = vrot.slane %v6649_v55, 7 }
 0x209   :  { %v1911_v63 = vpop.f32.mrf.mxu0  ;;  %v2060_v41 = vpop.f32.mrf.mxu1 }
 0x20a   :  { %v6653_v4 = vsel %vm6625_vm2, 0.0, %v6651_v54  ;;  %v6654_v8 = vsel %vm6625_vm2, %v6651_v54, 0.0  ;;  %v2425_v54 = vld [vmem:[%s15229_s0 + $0xd5] sm:$0xff] }
 0x20b   :  { %6655 = vst [vmem:[#allocation3 + $0x28] sm:$0xff] %v6653_v4  ;;  %v2574_v63 = vld [vmem:[%s15229_s0 + $0xd6] sm:$0xff] }
 0x20c   :  { %10403 = vmatmul.msk.f32.gmra.mxu0 %vm80_vm1, %v2420_v1  ;;  %10420 = vmatmul.msk.f32.gmra.mxu1 %vm80_vm1, %v2569_v5  ;;  %6656 = vst [vmem:[#allocation3 + $0x30] sm:$0x3] %v6654_v8  ;;  %v2788_v1 = vld [vmem:[%s15229_s0 + $0x131] sm:$0xff] }
 0x20d   :  { %10437 = vmatmul.msk.f32.gmra.mxu2 %vm80_vm1, %v2783_v51  ;;  %10454 = vmatmul.msk.f32.gmra.mxu3 %vm80_vm1, %v2766_v7  ;;  %v2771_v5 = vld [vmem:[%s15229_s0 + $0x130] sm:$0xff] }
 0x210   :  { %v2209_v9 = vpop.f32.mrf.mxu2  ;;  %v2358_v52 = vpop.f32.mrf.mxu3 }
 0x211   :  { %v1914_v56 = vpop.f32.mrf.mxu0  ;;  %v2063_v11 = vpop.f32.mrf.mxu1  ;;  %v2426_v9 = vld [vmem:[%s15229_s0 + $0xdd] sm:$0xff] }
 0x212   :  { %v1958_v2 = vadd.f32 %v1914_v56, %v12202_v33  ;;  %v2575_v52 = vld [vmem:[%s15229_s0 + $0xde] sm:$0xff] }
 0x214   :  { %v2107_v32 = vadd.f32 %v2063_v11, %v1958_v2  ;;  %10404 = vmatmul.msk.f32.gmra.mxu0 %vm80_vm1, %v2421_v13  ;;  %10421 = vmatmul.msk.f32.gmra.mxu1 %vm80_vm1, %v2570_v0  ;;  %v2789_v11 = vld [vmem:[%s15229_s0 + $0x139] sm:$0xff] }
 0x215   :  { %10438 = vmatmul.msk.f32.gmra.mxu2 %vm80_vm1, %v2784_v20  ;;  %10455 = vmatmul.msk.f32.gmra.mxu3 %vm80_vm1, %v2767_v17  ;;  %v2772_v13 = vld [vmem:[%s15229_s0 + $0x138] sm:$0xff] }
 0x218   :  { %v2212_v18 = vpop.f32.mrf.mxu2  ;;  %v2361_v22 = vpop.f32.mrf.mxu3 }
 0x219   :  { %v2256_v33 = vadd.f32 %v2212_v18, %v2107_v32  ;;  %v1917_v21 = vpop.f32.mrf.mxu0  ;;  %v2066_v19 = vpop.f32.mrf.mxu1 }
 0x21a   :  { %v1959_v35 = vadd.f32 %v1917_v21, %v12216_v46 }
 0x21b   :  { %v12471_v34 = vadd.f32 %v2361_v22, %v2256_v33  ;;  %v2427_v22 = vld [vmem:[%s15229_s0 + $0xe5] sm:$0xff] }
 0x21c   :  { %v2108_v36 = vadd.f32 %v2066_v19, %v1959_v35  ;;  %10405 = vmatmul.msk.f32.gmra.mxu0 %vm80_vm1, %v2422_v23  ;;  %10422 = vmatmul.msk.f32.gmra.mxu1 %vm80_vm1, %v2571_v14  ;;  %v2576_v33 = vld [vmem:[%s15229_s0 + $0xe6] sm:$0xff] }
 0x21d   :  { %10439 = vmatmul.msk.f32.gmra.mxu2 %vm80_vm1, %v2785_v26  ;;  %10456 = vmatmul.msk.f32.gmra.mxu3 %vm80_vm1, %v2768_v42  ;;  %v2790_v19 = vld [vmem:[%s15229_s0 + $0x141] sm:$0xff] }
 0x21e   :  { %v2773_v23 = vld [vmem:[%s15229_s0 + $0x140] sm:$0xff] }
 0x220   :  { %v2215_v46 = vpop.f32.mrf.mxu2  ;;  %v2364_v12 = vpop.f32.mrf.mxu3 }
 0x221   :  { %v2257_v37 = vadd.f32 %v2215_v46, %v2108_v36  ;;  %v1920_v38 = vpop.f32.mrf.mxu0  ;;  %v2069_v27 = vpop.f32.mrf.mxu1 }
 0x222   :  { %v2791_v38 = vld [vmem:[%s15229_s0 + $0x149] sm:$0xff] }
 0x223   :  { %v12489_v47 = vadd.f32 %v2364_v12, %v2257_v37  ;;  %v2428_v12 = vld [vmem:[%s15229_s0 + $0xed] sm:$0xff] }
 0x224   :  { %10406 = vmatmul.msk.f32.gmra.mxu0 %vm80_vm1, %v2423_v45  ;;  %10423 = vmatmul.msk.f32.gmra.mxu1 %vm80_vm1, %v2572_v30  ;;  %v2577_v37 = vld [vmem:[%s15229_s0 + $0xee] sm:$0xff] }
 0x225   :  { %10440 = vmatmul.msk.f32.gmra.mxu2 %vm80_vm1, %v2786_v24  ;;  %10457 = vmatmul.msk.f32.gmra.mxu3 %vm80_vm1, %v2769_v58  ;;  %v2774_v27 = vld [vmem:[%s15229_s0 + $0x148] sm:$0xff] }
 0x228   :  { %v2218_v29 = vpop.f32.mrf.mxu2  ;;  %v2367_v49 = vpop.f32.mrf.mxu3 }
 0x229   :  { %v1923_v53 = vpop.f32.mrf.mxu0  ;;  %v2072_v44 = vpop.f32.mrf.mxu1  ;;  %v2429_v49 = vld [vmem:[%s15229_s0 + $0xf5] sm:$0xff] }
 0x22a   :  { %v2578_v53 = vld [vmem:[%s15229_s0 + $0xf6] sm:$0xff] }
 0x22b   :  { %v2792_v44 = vld [vmem:[%s15229_s0 + $0x151] sm:$0xff] }
 0x22c   :  { %10407 = vmatmul.msk.f32.gmra.mxu0 %vm80_vm1, %v2424_v39  ;;  %10424 = vmatmul.msk.f32.gmra.mxu1 %vm80_vm1, %v2573_v57  ;;  %v2775_v39 = vld [vmem:[%s15229_s0 + $0x150] sm:$0xff] }
 0x22d   :  { %10441 = vmatmul.msk.f32.gmra.mxu2 %vm80_vm1, %v2787_v43  ;;  %10458 = vmatmul.msk.f32.gmra.mxu3 %vm80_vm1, %v2770_v40 }
 0x230   :  { %v2221_v55 = vpop.f32.mrf.mxu2  ;;  %v2370_v61 = vpop.f32.mrf.mxu3 }
 0x231   :  { %v1926_v62 = vpop.f32.mrf.mxu0  ;;  %v2075_v50 = vpop.f32.mrf.mxu1  ;;  %v2430_v61 = vld [vmem:[%s15229_s0 + $0xfd] sm:$0xff] }
 0x232   :  { %v1962_v41 = vadd.f32 %v1926_v62, %v12256_v16  ;;  %v2579_v62 = vld [vmem:[%s15229_s0 + $0xfe] sm:$0xff] }
 0x234   :  { %v2111_v3 = vadd.f32 %v2075_v50, %v1962_v41  ;;  %10408 = vmatmul.msk.f32.gmra.mxu0 %vm80_vm1, %v2425_v54  ;;  %10425 = vmatmul.msk.f32.gmra.mxu1 %vm80_vm1, %v2574_v63  ;;  %v2793_v54 = vld [vmem:[%s15229_s0 + $0x159] sm:$0xff] }
 0x235   :  { %10442 = vmatmul.msk.f32.gmra.mxu2 %vm80_vm1, %v2788_v1  ;;  %10459 = vmatmul.msk.f32.gmra.mxu3 %vm80_vm1, %v2771_v5  ;;  %v2776_v63 = vld [vmem:[%s15229_s0 + $0x158] sm:$0xff] }
 0x238   :  { %v2224_v51 = vpop.f32.mrf.mxu2  ;;  %v2373_v7 = vpop.f32.mrf.mxu3 }
 0x239   :  { %v2260_v16 = vadd.f32 %v2224_v51, %v2111_v3  ;;  %v1929_v4 = vpop.f32.mrf.mxu0  ;;  %v2078_v8 = vpop.f32.mrf.mxu1 }
 0x23a   :  { %v1963_v56 = vadd.f32 %v1929_v4, %v12271_v15 }
 0x23b   :  { %v12541_v0 = vadd.f32 %v2373_v7, %v2260_v16  ;;  %v2431_v7 = vld [vmem:[%s15229_s0 + $0x105] sm:$0xff] }
 0x23c   :  { %v2112_v2 = vadd.f32 %v2078_v8, %v1963_v56  ;;  %10409 = vmatmul.msk.f32.gmra.mxu0 %vm80_vm1, %v2426_v9  ;;  %10426 = vmatmul.msk.f32.gmra.mxu1 %vm80_vm1, %v2575_v52  ;;  %v2580_v16 = vld [vmem:[%s15229_s0 + $0x106] sm:$0xff] }
 0x23d   :  { %10443 = vmatmul.msk.f32.gmra.mxu2 %vm80_vm1, %v2789_v11  ;;  %10460 = vmatmul.msk.f32.gmra.mxu3 %vm80_vm1, %v2772_v13  ;;  %v2794_v8 = vld [vmem:[%s15229_s0 + $0x161] sm:$0xff] }
 0x23e   :  { %v2777_v9 = vld [vmem:[%s15229_s0 + $0x160] sm:$0xff] }
 0x240   :  { %v2227_v15 = vpop.f32.mrf.mxu2  ;;  %v2376_v20 = vpop.f32.mrf.mxu3 }
 0x241   :  { %v2261_v17 = vadd.f32 %v2227_v15, %v2112_v2  ;;  %v1932_v32 = vpop.f32.mrf.mxu0  ;;  %v2081_v18 = vpop.f32.mrf.mxu1 }
 0x242   :  { %v1964_v21 = vadd.f32 %v1932_v32, %v12285_v6  ;;  %v2581_v32 = vld [vmem:[%s15229_s0 + $0x10e] sm:$0xff] }
 0x243   :  { %v12560_v14 = vadd.f32 %v2376_v20, %v2261_v17  ;;  %v2432_v17 = vld [vmem:[%s15229_s0 + $0x10d] sm:$0xff] }
 0x244   :  { %v2113_v35 = vadd.f32 %v2081_v18, %v1964_v21  ;;  %10410 = vmatmul.msk.f32.gmra.mxu0 %vm80_vm1, %v2427_v22  ;;  %10427 = vmatmul.msk.f32.gmra.mxu1 %vm80_vm1, %v2576_v33  ;;  %v2795_v18 = vld [vmem:[%s15229_s0 + $0x169] sm:$0xff] }
 0x245   :  { %10444 = vmatmul.msk.f32.gmra.mxu2 %vm80_vm1, %v2790_v19  ;;  %10461 = vmatmul.msk.f32.gmra.mxu3 %vm80_vm1, %v2773_v23  ;;  %v2778_v22 = vld [vmem:[%s15229_s0 + $0x168] sm:$0xff] }
 0x248   :  { %v2230_v6 = vpop.f32.mrf.mxu2  ;;  %v2379_v26 = vpop.f32.mrf.mxu3 }
 0x249   :  { %v2262_v42 = vadd.f32 %v2230_v6, %v2113_v35  ;;  %v1935_v36 = vpop.f32.mrf.mxu0  ;;  %v2084_v46 = vpop.f32.mrf.mxu1  ;;  %v2433_v6 = vld [vmem:[%s15229_s0 + $0x115] sm:$0xff] }
 0x24a   :  { %v2779_v36 = vld [vmem:[%s15229_s0 + $0x170] sm:$0xff] }
 0x24b   :  { %v12578_v45 = vadd.f32 %v2379_v26, %v2262_v42  ;;  %v2582_v26 = vld [vmem:[%s15229_s0 + $0x116] sm:$0xff] }
 0x24c   :  { %10411 = vmatmul.msk.f32.gmra.mxu0 %vm80_vm1, %v2428_v12  ;;  %10428 = vmatmul.msk.f32.gmra.mxu1 %vm80_vm1, %v2577_v37  ;;  %v2796_v42 = vld [vmem:[%s15229_s0 + $0x171] sm:$0xff] }
 0x24d   :  { %10445 = vmatmul.msk.f32.gmra.mxu2 %vm80_vm1, %v2791_v38  ;;  %10462 = vmatmul.msk.f32.gmra.mxu3 %vm80_vm1, %v2774_v27  ;;  %v2434_v27 = vld [vmem:[%s15229_s0 + $0x11d] sm:$0xff] }
 0x250   :  { %v2233_v30 = vpop.f32.mrf.mxu2  ;;  %v2382_v24 = vpop.f32.mrf.mxu3 }
 0x251   :  { %v1938_v58 = vpop.f32.mrf.mxu0  ;;  %v2087_v29 = vpop.f32.mrf.mxu1  ;;  %v2583_v30 = vld [vmem:[%s15229_s0 + $0x11e] sm:$0xff] }
 0x252   :  { %v2797_v58 = vld [vmem:[%s15229_s0 + $0x179] sm:$0xff] }
 0x253   :  { %v2780_v29 = vld [vmem:[%s15229_s0 + $0x178] sm:$0xff] }
 0x254   :  { %10412 = vmatmul.msk.f32.gmra.mxu0 %vm80_vm1, %v2429_v49  ;;  %10429 = vmatmul.msk.f32.gmra.mxu1 %vm80_vm1, %v2578_v53 }
 0x255   :  { %10446 = vmatmul.msk.f32.gmra.mxu2 %vm80_vm1, %v2792_v44  ;;  %10463 = vmatmul.msk.f32.gmra.mxu3 %vm80_vm1, %v2775_v39 }
 0x258   :  { %v2236_v57 = vpop.f32.mrf.mxu2  ;;  %v2385_v43 = vpop.f32.mrf.mxu3 }
 0x259   :  { %v1941_v40 = vpop.f32.mrf.mxu0  ;;  %v2090_v55 = vpop.f32.mrf.mxu1  ;;  %v3180_v43 = vld [vmem:[%s15229_s0 + $0x112] sm:$0xff] }
 0x25a   :  { %v1967_v50 = vadd.f32 %v1941_v40, %v12325_v10  ;;  %v3329_v40 = vld [vmem:[%s15229_s0 + $0x113] sm:$0xff] }
 0x25c   :  { %v2116_v41 = vadd.f32 %v2090_v55, %v1967_v50  ;;  %10413 = vmatmul.msk.f32.gmra.mxu0 %vm80_vm1, %v2430_v61  ;;  %10430 = vmatmul.msk.f32.gmra.mxu1 %vm80_vm1, %v2579_v62  ;;  %v3181_v50 = vld [vmem:[%s15229_s0 + $0x11a] sm:$0xff] }
 0x25d   :  { %10447 = vmatmul.msk.f32.gmra.mxu2 %vm80_vm1, %v2793_v54  ;;  %10464 = vmatmul.msk.f32.gmra.mxu3 %vm80_vm1, %v2776_v63 }
 0x260   :  { %v2239_v1 = vpop.f32.mrf.mxu2  ;;  %v2388_v5 = vpop.f32.mrf.mxu3 }
 0x261   :  { %v2265_v10 = vadd.f32 %v2239_v1, %v2116_v41  ;;  %v1944_v3 = vpop.f32.mrf.mxu0  ;;  %v2093_v51 = vpop.f32.mrf.mxu1  ;;  %v3941_v1 = vld [vmem:[%s15230_s1 + $0x20] sm:$0xf] }
 0x262   :  { %v1968_v4 = vadd.f32 %v1944_v3, %v12343_v48  ;;  %v3643_v48 = vld [vmem:[%s15230_s1 + $0x18] sm:$0xf]  ;;  %10571 = vmatpush.msk.msra.mxu2 %vm129_vm0, %v3941_v1 }
 0x263   :  { %v12630_v52 = vadd.f32 %v2388_v5, %v2265_v10  ;;  %10537 = vmatpush.msk.msra.mxu0 %vm129_vm0, %v3643_v48  ;;  %v3330_v5 = vld [vmem:[%s15229_s0 + $0x11b] sm:$0xff] }
 0x264   :  { %v2117_v56 = vadd.f32 %v2093_v51, %v1968_v4  ;;  %10414 = vmatmul.msk.f32.gmra.mxu0 %vm80_vm1, %v2431_v7  ;;  %10431 = vmatmul.msk.f32.gmra.mxu1 %vm80_vm1, %v2580_v16  ;;  %v3182_v4 = vld [vmem:[%s15229_s0 + $0x122] sm:$0xff] }
 0x265   :  { %10448 = vmatmul.msk.f32.gmra.mxu2 %vm80_vm1, %v2794_v8  ;;  %10465 = vmatmul.msk.f32.gmra.mxu3 %vm80_vm1, %v2777_v9 }
 0x268   :  { %v2242_v11 = vpop.f32.mrf.mxu2  ;;  %v2391_v13 = vpop.f32.mrf.mxu3 }
 0x269   :  { %v2266_v2 = vadd.f32 %v2242_v11, %v2117_v56  ;;  %v1947_v15 = vpop.f32.mrf.mxu0  ;;  %v2096_v20 = vpop.f32.mrf.mxu1 }
 0x26a   :  { %v3183_v20 = vld [vmem:[%s15229_s0 + $0x12a] sm:$0xff] }
 0x26b   :  { %v12652_v33 = vadd.f32 %v2391_v13, %v2266_v2 }
 0x26c   :  { %10415 = vmatmul.msk.f32.gmra.mxu0 %vm80_vm1, %v2432_v17  ;;  %10432 = vmatmul.msk.f32.gmra.mxu1 %vm80_vm1, %v2581_v32  ;;  %v3332_v32 = vld [vmem:[%s15229_s0 + $0x12b] sm:$0xff] }
 0x26d   :  { %10449 = vmatmul.msk.f32.gmra.mxu2 %vm80_vm1, %v2795_v18  ;;  %10466 = vmatmul.msk.f32.gmra.mxu3 %vm80_vm1, %v2778_v22  ;;  %v12766_v18 = vld [vmem:[%s15229_s0 + $0x12c] sm:$0xff] }
 0x270   :  { %v2245_v21 = vpop.f32.mrf.mxu2  ;;  %v2394_v19 = vpop.f32.mrf.mxu3 }
 0x271   :  { %v1950_v23 = vpop.f32.mrf.mxu0  ;;  %v2099_v35 = vpop.f32.mrf.mxu1 }
 0x274   :  { %10416 = vmatmul.msk.f32.gmra.mxu0 %vm80_vm1, %v2433_v6  ;;  %10433 = vmatmul.msk.f32.gmra.mxu1 %vm80_vm1, %v2582_v26  ;;  %v3184_v26 = vld [vmem:[%s15229_s0 + $0x132] sm:$0xff] }
 0x275   :  { %10450 = vmatmul.msk.f32.gmra.mxu2 %vm80_vm1, %v2796_v42  ;;  %10467 = vmatmul.msk.f32.gmra.mxu3 %vm80_vm1, %v2779_v36  ;;  %v3333_v42 = vld [vmem:[%s15229_s0 + $0x133] sm:$0xff] }
 0x276   :  { %v12783_v36 = vld [vmem:[%s15229_s0 + $0x134] sm:$0xff] }
 0x278   :  { %v2248_v46 = vpop.f32.mrf.mxu2  ;;  %v2397_v12 = vpop.f32.mrf.mxu3 }
 0x279   :  { %v1953_v37 = vpop.f32.mrf.mxu0  ;;  %v2102_v38 = vpop.f32.mrf.mxu1 }
 0x27a   :  { %v1971_v24 = vadd.f32 %v1953_v37, %v12405_v59 }
 0x27c   :  { %v2120_v49 = vadd.f32 %v2102_v38, %v1971_v24  ;;  %10417 = vmatmul.msk.f32.gmra.mxu0 %vm80_vm1, %v2434_v27  ;;  %10434 = vmatmul.msk.f32.gmra.mxu1 %vm80_vm1, %v2583_v30  ;;  %v3185_v30 = vld [vmem:[%s15229_s0 + $0x13a] sm:$0xff] }
 0x27d   :  { %10451 = vmatmul.msk.f32.gmra.mxu2 %vm80_vm1, %v2797_v58  ;;  %10468 = vmatmul.msk.f32.gmra.mxu3 %vm80_vm1, %v2780_v29  ;;  %v3334_v24 = vld [vmem:[%s15229_s0 + $0x13b] sm:$0xff] }
 0x27e   :  { %v12799_v58 = vld [vmem:[%s15229_s0 + $0x13c] sm:$0xff] }
 0x280   :  { %v2251_v53 = vpop.f32.mrf.mxu2  ;;  %v2400_v44 = vpop.f32.mrf.mxu3 }
 0x281   :  { %v2269_v59 = vadd.f32 %v2251_v53, %v2120_v49  ;;  %v2504_v39 = vpop.f32.mrf.mxu0  ;;  %v2653_v57 = vpop.f32.mrf.mxu1 }
 0x283   :  { %v12697_v55 = vadd.f32 %v2400_v44, %v2269_v59 }
 0x284   :  { %10470 = vmatmul.msk.f32.vlgmr.msrb.gmra.mxu0 %vm80_vm1, %v12354_v25  ;;  %10487 = vmatmul.msk.f32.vlgmr.msrb.gmra.mxu1 %vm80_vm1, %v3180_v43  ;;  %v3792_v25 = vld [vmem:[%s15230_s1 + $0x1c] sm:$0xf] }
 0x285   :  { %10504 = vmatmul.msk.f32.vlgmr.msrb.gmra.mxu2 %vm80_vm1, %v3329_v40  ;;  %10521 = vmatmul.msk.f32.vlgmr.msrb.gmra.mxu3 %vm80_vm1, %v12363_v60  ;;  %v4155_v60 = vld [vmem:[%s15230_s1 + $0x4] sm:$0xf] }
 0x286   :  { %10554 = vmatpush.msk.msra.mxu1 %vm129_vm0, %v3792_v25  ;;  %10588 = vmatpush.msk.msra.mxu3 %vm129_vm0, %v4155_v60 }
 0x288   :  { %v2867_v61 = vpop.f32.mrf.mxu2  ;;  %v2983_v62 = vpop.f32.mrf.mxu3 }
 0x289   :  { %v12708_v54 = vadd.f32 %v2983_v62, %v2867_v61  ;;  %v2507_v63 = vpop.f32.mrf.mxu0  ;;  %v2656_v41 = vpop.f32.mrf.mxu1  ;;  %v3335_v61 = vld [vmem:[%s15229_s0 + $0x143] sm:$0xff] }
 0x28a   :  { %v12818_v62 = vld [vmem:[%s15229_s0 + $0x144] sm:$0xff] }
 0x28c   :  { %10471 = vmatmul.msk.f32.gmra.mxu0 %vm80_vm1, %v12375_v31  ;;  %10488 = vmatmul.msk.f32.gmra.mxu1 %vm80_vm1, %v3181_v50  ;;  %v3331_v31 = vld [vmem:[%s15229_s0 + $0x123] sm:$0xff] }
 0x28d   :  { %10505 = vmatmul.msk.f32.gmra.mxu2 %vm80_vm1, %v3330_v5  ;;  %10522 = vmatmul.msk.f32.gmra.mxu3 %vm80_vm1, %v12384_v28  ;;  %v12743_v28 = vld [vmem:[%s15229_s0 + $0x124] sm:$0xff] }
 0x28e   :  { %v3187_v5 = vld [vmem:[%s15229_s0 + $0x14a] sm:$0xff] }
 0x290   :  { %v2870_v10 = vpop.f32.mrf.mxu2  ;;  %v2986_v3 = vpop.f32.mrf.mxu3 }
 0x291   :  { %v12731_v51 = vadd.f32 %v2986_v3, %v2870_v10  ;;  %v2510_v7 = vpop.f32.mrf.mxu0  ;;  %v2659_v16 = vpop.f32.mrf.mxu1  ;;  %v3336_v3 = vld [vmem:[%s15229_s0 + $0x14b] sm:$0xff] }
 0x292   :  { %v2554_v8 = vadd.f32 %v2510_v7, %v12471_v34  ;;  %v12753_v34 = vld [vmem:[%s15231_s2] ss:$0 sm:$0xff]  ;;  %v12836_v7 = vld [vmem:[%s15229_s0 + $0x14c] sm:$0xff] }
 0x294   :  { %v2703_v9 = vadd.f32 %v2659_v16, %v2554_v8  ;;  %10472 = vmatmul.msk.f32.gmra.mxu0 %vm80_vm1, %v3180_v43  ;;  %10489 = vmatmul.msk.f32.gmra.mxu1 %vm80_vm1, %v3182_v4  ;;  %v3186_v43 = vld [vmem:[%s15229_s0 + $0x142] sm:$0xff] }
 0x295   :  { %10506 = vmatmul.msk.f32.gmra.mxu2 %vm80_vm1, %v3331_v31  ;;  %10523 = vmatmul.msk.f32.gmra.mxu3 %vm80_vm1, %v12743_v28 }
 0x296   :  { %v2719_v56 = vadd.f32 %v12753_v34, %v2703_v9 }
 0x298   :  { %v2735_v48 = vmax.f32 %v2719_v56, 0.0  ;;  %v2873_v11 = vpop.f32.mrf.mxu2  ;;  %v2989_v13 = vpop.f32.mrf.mxu3 }
 0x299   :  { %v2513_v2 = vpop.f32.mrf.mxu0  ;;  %v2662_v15 = vpop.f32.mrf.mxu1  ;;  %v3337_v13 = vld [vmem:[%s15229_s0 + $0x153] sm:$0xff] }
 0x29a   :  { %2751 = vst [vmem:[#allocation2 + $0x90] sm:$0xff] %v2735_v48  ;;  %v2555_v17 = vadd.f32 %v2513_v2, %v12489_v47  ;;  %v3188_v48 = vld [vmem:[%s15229_s0 + $0x152] sm:$0xff] }
 0x29b   :  { %v12854_v2 = vld [vmem:[%s15229_s0 + $0x154] sm:$0xff] }
 0x29c   :  { %v2704_v22 = vadd.f32 %v2662_v15, %v2555_v17  ;;  %10473 = vmatmul.msk.f32.gmra.mxu0 %vm80_vm1, %v3181_v50  ;;  %10490 = vmatmul.msk.f32.gmra.mxu1 %vm80_vm1, %v3183_v20 }
 0x29d   :  { %10507 = vmatmul.msk.f32.gmra.mxu2 %vm80_vm1, %v3332_v32  ;;  %10524 = vmatmul.msk.f32.gmra.mxu3 %vm80_vm1, %v12766_v18 }
 0x29e   :  { %v2720_v47 = vadd.f32 %v12753_v34, %v2704_v22 }
 0x2a0   :  { %v2736_v21 = vmax.f32 %v2720_v47, 0.0  ;;  %v2876_v19 = vpop.f32.mrf.mxu2  ;;  %v2992_v23 = vpop.f32.mrf.mxu3 }
 0x2a1   :  { %v2516_v35 = vpop.f32.mrf.mxu0  ;;  %v2665_v6 = vpop.f32.mrf.mxu1  ;;  %v3189_v19 = vld [vmem:[%s15229_s0 + $0x15a] sm:$0xff] }
 0x2a2   :  { %2752 = vst [vmem:[#allocation2 + $0x98] sm:$0xff] %v2736_v21  ;;  %v3338_v23 = vld [vmem:[%s15229_s0 + $0x15b] sm:$0xff] }
 0x2a3   :  { %v12873_v35 = vld [vmem:[%s15229_s0 + $0x15c] sm:$0xff] }
 0x2a4   :  { %10474 = vmatmul.msk.f32.gmra.mxu0 %vm80_vm1, %v3182_v4  ;;  %10491 = vmatmul.msk.f32.gmra.mxu1 %vm80_vm1, %v3184_v26 }
 0x2a5   :  { %10508 = vmatmul.msk.f32.gmra.mxu2 %vm80_vm1, %v3333_v42  ;;  %10525 = vmatmul.msk.f32.gmra.mxu3 %vm80_vm1, %v12783_v36 }
 0x2a8   :  { %v2879_v46 = vpop.f32.mrf.mxu2  ;;  %v2995_v12 = vpop.f32.mrf.mxu3 }
 0x2a9   :  { %v6658_v37 = vld [vmem:[#allocation2 + $0x90] ss:$2 sm:$0xff]  ;;  %v2519_v38 = vpop.f32.mrf.mxu0  ;;  %v2668_v27 = vpop.f32.mrf.mxu1 }
 0x2aa   :  { %v6660_v29 = vrot.slane %v6658_v37, 7  ;;  %v3190_v38 = vld [vmem:[%s15229_s0 + $0x162] sm:$0xff] }
 0x2ac   :  { %10475 = vmatmul.msk.f32.gmra.mxu0 %vm80_vm1, %v3183_v20  ;;  %10492 = vmatmul.msk.f32.gmra.mxu1 %vm80_vm1, %v3185_v30  ;;  %v6662_v49 = vsel %vm6625_vm2, 0.0, %v6660_v29  ;;  %v6663_v53 = vsel %vm6625_vm2, %v6660_v29, 0.0 }
 0x2ad   :  { %10509 = vmatmul.msk.f32.gmra.mxu2 %vm80_vm1, %v3334_v24  ;;  %10526 = vmatmul.msk.f32.gmra.mxu3 %vm80_vm1, %v12799_v58  ;;  %6664 = vst [vmem:[#allocation3 + $0x32] sm:$0xff] %v6662_v49  ;;  %v12891_v24 = vld [vmem:[%s15229_s0 + $0x164] sm:$0xff] }
 0x2ae   :  { %6665 = vst [vmem:[#allocation3 + $0x3a] sm:$0x3] %v6663_v53 }
 0x2b0   :  { %v2882_v44 = vpop.f32.mrf.mxu2  ;;  %v2998_v59 = vpop.f32.mrf.mxu3 }
 0x2b1   :  { %v2522_v39 = vpop.f32.mrf.mxu0  ;;  %v2671_v57 = vpop.f32.mrf.mxu1 }
 0x2b2   :  { %v2558_v40 = vadd.f32 %v2522_v39, %v12541_v0 }
 0x2b4   :  { %v2707_v50 = vadd.f32 %v2671_v57, %v2558_v40  ;;  %10476 = vmatmul.msk.f32.gmra.mxu0 %vm80_vm1, %v3184_v26  ;;  %10493 = vmatmul.msk.f32.gmra.mxu1 %vm80_vm1, %v3186_v43 }
 0x2b5   :  { %10510 = vmatmul.msk.f32.gmra.mxu2 %vm80_vm1, %v3335_v61  ;;  %10527 = vmatmul.msk.f32.gmra.mxu3 %vm80_vm1, %v12818_v62  ;;  %v3340_v61 = vld [vmem:[%s15229_s0 + $0x16b] sm:$0xff] }
 0x2b6   :  { %v2723_v0 = vadd.f32 %v12753_v34, %v2707_v50  ;;  %v12912_v50 = vld [vmem:[%s15229_s0 + $0x16c] sm:$0xff] }
 0x2b8   :  { %v2739_v63 = vmax.f32 %v2723_v0, 0.0  ;;  %v2885_v41 = vpop.f32.mrf.mxu2  ;;  %v3001_v25 = vpop.f32.mrf.mxu3 }
 0x2b9   :  { %v2525_v1 = vpop.f32.mrf.mxu0  ;;  %v2674_v60 = vpop.f32.mrf.mxu1 }
 0x2ba   :  { %2755 = vst [vmem:[#allocation2 + $0xb0] sm:$0xff] %v2739_v63  ;;  %v2559_v10 = vadd.f32 %v2525_v1, %v12560_v14 }
 0x2bc   :  { %v2708_v16 = vadd.f32 %v2674_v60, %v2559_v10  ;;  %10477 = vmatmul.msk.f32.gmra.mxu0 %vm80_vm1, %v3185_v30  ;;  %10494 = vmatmul.msk.f32.gmra.mxu1 %vm80_vm1, %v3187_v5  ;;  %v3339_v30 = vld [vmem:[%s15229_s0 + $0x163] sm:$0xff] }
 0x2bd   :  { %10511 = vmatmul.msk.f32.gmra.mxu2 %vm80_vm1, %v3336_v3  ;;  %10528 = vmatmul.msk.f32.gmra.mxu3 %vm80_vm1, %v12836_v7  ;;  %v3341_v3 = vld [vmem:[%s15229_s0 + $0x173] sm:$0xff] }
 0x2be   :  { %v2724_v14 = vadd.f32 %v12753_v34, %v2708_v16  ;;  %v12930_v16 = vld [vmem:[%s15229_s0 + $0x174] sm:$0xff] }
 0x2c0   :  { %v2740_v4 = vmax.f32 %v2724_v14, 0.0  ;;  %v2888_v8 = vpop.f32.mrf.mxu2  ;;  %v3004_v31 = vpop.f32.mrf.mxu3 }
 0x2c1   :  { %v2528_v9 = vpop.f32.mrf.mxu0  ;;  %v2677_v56 = vpop.f32.mrf.mxu1 }
 0x2c2   :  { %2756 = vst [vmem:[#allocation2 + $0xb8] sm:$0xff] %v2740_v4  ;;  %v2560_v11 = vadd.f32 %v2528_v9, %v12578_v45 }
 0x2c4   :  { %v2709_v15 = vadd.f32 %v2677_v56, %v2560_v11  ;;  %10478 = vmatmul.msk.f32.gmra.mxu0 %vm80_vm1, %v3186_v43  ;;  %10495 = vmatmul.msk.f32.gmra.mxu1 %vm80_vm1, %v3188_v48  ;;  %v3191_v43 = vld [vmem:[%s15229_s0 + $0x16a] sm:$0xff]  ;;  %v3193_v11 = vld [vmem:[%s15229_s0 + $0x17a] sm:$0xff] }
 0x2c5   :  { %10512 = vmatmul.msk.f32.gmra.mxu2 %vm80_vm1, %v3337_v13  ;;  %10529 = vmatmul.msk.f32.gmra.mxu3 %vm80_vm1, %v12854_v2  ;;  %v3342_v13 = vld [vmem:[%s15229_s0 + $0x17b] sm:$0xff] }
 0x2c6   :  { %v2725_v45 = vadd.f32 %v12753_v34, %v2709_v15  ;;  %v12951_v15 = vld [vmem:[%s15229_s0 + $0x17c] sm:$0xff] }
 0x2c8   :  { %v2741_v20 = vmax.f32 %v2725_v45, 0.0  ;;  %v2891_v17 = vpop.f32.mrf.mxu2  ;;  %v3007_v32 = vpop.f32.mrf.mxu3 }
 0x2c9   :  { %v12862_v22 = vadd.f32 %v3007_v32, %v2891_v17  ;;  %v2531_v47 = vpop.f32.mrf.mxu0  ;;  %v2680_v21 = vpop.f32.mrf.mxu1 }
 0x2ca   :  { %2757 = vst [vmem:[#allocation2 + $0xc0] sm:$0xff] %v2741_v20 }
 0x2cc   :  { %10479 = vmatmul.msk.f32.gmra.mxu0 %vm80_vm1, %v3187_v5  ;;  %10496 = vmatmul.msk.f32.gmra.mxu1 %vm80_vm1, %v3189_v19  ;;  %v3192_v5 = vld [vmem:[%s15229_s0 + $0x172] sm:$0xff] }
 0x2cd   :  { %10513 = vmatmul.msk.f32.gmra.mxu2 %vm80_vm1, %v3338_v23  ;;  %10530 = vmatmul.msk.f32.gmra.mxu3 %vm80_vm1, %v12873_v35 }
 0x2d0   :  { %v2894_v6 = vpop.f32.mrf.mxu2  ;;  %v3010_v26 = vpop.f32.mrf.mxu3 }
 0x2d1   :  { %v6667_v42 = vld [vmem:[#allocation2 + $0xb4] ss:$2 sm:$0xff]  ;;  %v12880_v46 = vadd.f32 %v3010_v26, %v2894_v6  ;;  %v2534_v12 = vpop.f32.mrf.mxu0  ;;  %v2683_v37 = vpop.f32.mrf.mxu1  ;;  %v3343_v6 = vld [vmem:[%s15229_s0 + $0x183] sm:$0xff] }
 0x2d2   :  { %v6669_v27 = vrot.slane %v6667_v42, 7  ;;  %v12971_v26 = vld [vmem:[%s15229_s0 + $0x184] sm:$0xff] }
 0x2d4   :  { %10480 = vmatmul.msk.f32.gmra.mxu0 %vm80_vm1, %v3188_v48  ;;  %10497 = vmatmul.msk.f32.gmra.mxu1 %vm80_vm1, %v3190_v38  ;;  %v6671_v29 = vsel %vm6625_vm2, 0.0, %v6669_v27  ;;  %v6672_v49 = vsel %vm6625_vm2, %v6669_v27, 0.0 }
 0x2d5   :  { %10514 = vmatmul.msk.f32.gmra.mxu2 %vm80_vm1, %v3339_v30  ;;  %10531 = vmatmul.msk.f32.gmra.mxu3 %vm80_vm1, %v12891_v24  ;;  %6673 = vst [vmem:[#allocation3 + $0x3c] sm:$0xff] %v6671_v29 }
 0x2d6   :  { %6674 = vst [vmem:[#allocation3 + $0x44] sm:$0x3] %v6672_v49  ;;  %v12986_v49 = vld [vmem:[%s15229_s0 + $0x18a] sm:$0xff] }
 0x2d8   :  { %v2897_v53 = vpop.f32.mrf.mxu2  ;;  %v3013_v44 = vpop.f32.mrf.mxu3 }
 0x2d9   :  { %v12900_v59 = vadd.f32 %v3013_v44, %v2897_v53  ;;  %v2537_v39 = vpop.f32.mrf.mxu0  ;;  %v2686_v57 = vpop.f32.mrf.mxu1  ;;  %v3344_v44 = vld [vmem:[%s15229_s0 + $0x18b] sm:$0xff] }
 0x2da   :  { %v2563_v40 = vadd.f32 %v2537_v39, %v12630_v52  ;;  %v12995_v39 = vld [vmem:[%s15229_s0 + $0x18c] sm:$0xff] }
 0x2dc   :  { %v2712_v0 = vadd.f32 %v2686_v57, %v2563_v40  ;;  %10481 = vmatmul.msk.f32.gmra.mxu0 %vm80_vm1, %v3189_v19  ;;  %10498 = vmatmul.msk.f32.gmra.mxu1 %vm80_vm1, %v3191_v43  ;;  %v12963_v19 = vld [vmem:[%s15229_s0 + $0x182] sm:$0xff] }
 0x2dd   :  { %10515 = vmatmul.msk.f32.gmra.mxu2 %vm80_vm1, %v3340_v61  ;;  %10532 = vmatmul.msk.f32.gmra.mxu3 %vm80_vm1, %v12912_v50 }
 0x2de   :  { %v2728_v52 = vadd.f32 %v12753_v34, %v2712_v0 }
 0x2e0   :  { %v2744_v63 = vmax.f32 %v2728_v52, 0.0  ;;  %v2900_v41 = vpop.f32.mrf.mxu2  ;;  %v3016_v25 = vpop.f32.mrf.mxu3 }
 0x2e1   :  { %v2540_v1 = vpop.f32.mrf.mxu0  ;;  %v2689_v60 = vpop.f32.mrf.mxu1  ;;  %v3925_v25 = vld [vmem:[%s15229_s0 + $0x126] sm:$0xff] }
 0x2e2   :  { %2760 = vst [vmem:[#allocation2 + $0xd8] sm:$0xff] %v2744_v63  ;;  %v2564_v10 = vadd.f32 %v2540_v1, %v12652_v33  ;;  %v4138_v33 = vld [vmem:[%s15230_s1] sm:$0xf]  ;;  %v3776_v63 = vld [vmem:[%s15229_s0 + $0x125] sm:$0xff] }
 0x2e3   :  { %10605 = vmatpush.msk.msrb.mxu0 %vm129_vm0, %v4138_v33  ;;  %v4139_v1 = vld [vmem:[%s15229_s0 + $0x181] sm:$0xff] }
 0x2e4   :  { %v2713_v14 = vadd.f32 %v2689_v60, %v2564_v10  ;;  %10482 = vmatmul.msk.f32.gmra.mxu0 %vm80_vm1, %v3190_v38  ;;  %10499 = vmatmul.msk.f32.gmra.mxu1 %vm80_vm1, %v3192_v5 }
 0x2e5   :  { %10516 = vmatmul.msk.f32.gmra.mxu2 %vm80_vm1, %v3341_v3  ;;  %10533 = vmatmul.msk.f32.gmra.mxu3 %vm80_vm1, %v12930_v16 }
 0x2e6   :  { %v2729_v4 = vadd.f32 %v12753_v34, %v2713_v14 }
 0x2e8   :  { %v2745_v8 = vmax.f32 %v2729_v4, 0.0  ;;  %v2903_v31 = vpop.f32.mrf.mxu2  ;;  %v3019_v9 = vpop.f32.mrf.mxu3 }
 0x2e9   :  { %v2543_v56 = vpop.f32.mrf.mxu0  ;;  %v2692_v48 = vpop.f32.mrf.mxu1  ;;  %v4140_v31 = vld [vmem:[%s15229_s0 + $0x189] sm:$0xff] }
 0x2ea   :  { %2761 = vst [vmem:[#allocation2 + $0xe0] sm:$0xff] %v2745_v8  ;;  %v3926_v8 = vld [vmem:[%s15229_s0 + $0x12e] sm:$0xff] }
 0x2eb   :  { %v4553_v56 = vld [vmem:[%s15230_s1 + $0xc] sm:$0xf] }
 0x2ec   :  { %10483 = vmatmul.msk.f32.gmra.mxu0 %vm80_vm1, %v3191_v43  ;;  %10500 = vmatmul.msk.f32.gmra.mxu1 %vm80_vm1, %v3193_v11 }
 0x2ed   :  { %10517 = vmatmul.msk.f32.gmra.mxu2 %vm80_vm1, %v3342_v13  ;;  %10534 = vmatmul.msk.f32.gmra.mxu3 %vm80_vm1, %v12951_v15 }
 0x2ee   :  { %10639 = vmatpush.msk.msrb.mxu2 %vm129_vm0, %v4553_v56 }
 0x2f0   :  { %v2906_v45 = vpop.f32.mrf.mxu2  ;;  %v3022_v20 = vpop.f32.mrf.mxu3 }
 0x2f1   :  { %v6676_v17 = vld [vmem:[#allocation2 + $0xd8] ss:$2 sm:$0xff]  ;;  %v12958_v32 = vadd.f32 %v3022_v20, %v2906_v45  ;;  %v2546_v47 = vpop.f32.mrf.mxu0  ;;  %v2695_v21 = vpop.f32.mrf.mxu1 }
 0x2f2   :  { %v6678_v23 = vrot.slane %v6676_v17, 7  ;;  %v3927_v47 = vld [vmem:[%s15229_s0 + $0x136] sm:$0xff] }
 0x2f3   :  { %v4141_v21 = vld [vmem:[%s15229_s0 + $0x191] sm:$0xff] }
 0x2f4   :  { %10484 = vmatmul.msk.f32.gmra.mxu0 %vm80_vm1, %v3192_v5  ;;  %10501 = vmatmul.msk.f32.gmra.mxu1 %vm80_vm1, %v12963_v19  ;;  %v6680_v42 = vsel %vm6625_vm2, 0.0, %v6678_v23  ;;  %v6681_v12 = vsel %vm6625_vm2, %v6678_v23, 0.0  ;;  %v4404_v5 = vld [vmem:[%s15230_s1 + $0x8] sm:$0xf] }
 0x2f5   :  { %10518 = vmatmul.msk.f32.gmra.mxu2 %vm80_vm1, %v3343_v6  ;;  %10535 = vmatmul.msk.f32.gmra.mxu3 %vm80_vm1, %v12971_v26  ;;  %6682 = vst [vmem:[#allocation3 + $0x46] sm:$0xff] %v6680_v42 }
 0x2f6   :  { %6683 = vst [vmem:[#allocation3 + $0x4e] sm:$0x3] %v6681_v12  ;;  %10622 = vmatpush.msk.msrb.mxu1 %vm129_vm0, %v4404_v5 }
 0x2f8   :  { %v2909_v37 = vpop.f32.mrf.mxu2  ;;  %v3025_v38 = vpop.f32.mrf.mxu3 }
 0x2f9   :  { %v12981_v27 = vadd.f32 %v3025_v38, %v2909_v37  ;;  %v2549_v30 = vpop.f32.mrf.mxu0  ;;  %v2698_v29 = vpop.f32.mrf.mxu1  ;;  %v3779_v38 = vld [vmem:[%s15229_s0 + $0x13d] sm:$0xff] }
 0x2fa   :  { %v2567_v53 = vadd.f32 %v2549_v30, %v12697_v55  ;;  %v3928_v30 = vld [vmem:[%s15229_s0 + $0x13e] sm:$0xff] }
 0x2fc   :  { %v2716_v57 = vadd.f32 %v2698_v29, %v2567_v53  ;;  %10485 = vmatmul.msk.f32.gmra.mxu0 %vm80_vm1, %v3193_v11  ;;  %10502 = vmatmul.msk.f32.gmra.mxu1 %vm80_vm1, %v12986_v49 }
 0x2fd   :  { %10519 = vmatmul.msk.f32.gmra.mxu2 %vm80_vm1, %v3344_v44  ;;  %10536 = vmatmul.msk.f32.gmra.mxu3 %vm80_vm1, %v12995_v39 }
 0x2fe   :  { %v2732_v55 = vadd.f32 %v12753_v34, %v2716_v57 }
 0x300   :  { %v2748_v43 = vmax.f32 %v2732_v55, 0.0  ;;  %v2912_v40 = vpop.f32.mrf.mxu2  ;;  %v3028_v61 = vpop.f32.mrf.mxu3  ;;  %v3780_v55 = vld [vmem:[%s15229_s0 + $0x145] sm:$0xff] }
 0x301   :  { %v3116_v0 = vpop.f32.mrf.mxu0  ;;  %v3265_v52 = vpop.f32.mrf.mxu1 }
 0x302   :  { %2764 = vst [vmem:[#allocation2 + $0xf8] sm:$0xff] %v2748_v43  ;;  %v3164_v41 = vadd.f32 %v3116_v0, %v12708_v54  ;;  %v3929_v43 = vld [vmem:[%s15229_s0 + $0x146] sm:$0xff] }
 0x304   :  { %v3313_v60 = vadd.f32 %v3265_v52, %v3164_v41  ;;  %10538 = vmatmul.msk.f32.vlgmr.msra.gmra.mxu0 %vm80_vm1, %v12743_v28  ;;  %10555 = vmatmul.msk.f32.vlgmr.msra.gmra.mxu1 %vm80_vm1, %v3776_v63  ;;  %v3777_v28 = vld [vmem:[%s15229_s0 + $0x12d] sm:$0xff] }
 0x305   :  { %10572 = vmatmul.msk.f32.vlgmr.msra.gmra.mxu2 %vm80_vm1, %v3925_v25  ;;  %10589 = vmatmul.msk.f32.vlgmr.msra.gmra.mxu3 %vm80_vm1, %v4139_v1  ;;  %v3781_v63 = vld [vmem:[%s15229_s0 + $0x14d] sm:$0xff] }
 0x306   :  { %v3930_v41 = vld [vmem:[%s15229_s0 + $0x14e] sm:$0xff] }
 0x308   :  { %v3414_v54 = vpop.f32.mrf.mxu2  ;;  %v3563_v10 = vpop.f32.mrf.mxu3 }
 0x309   :  { %v3462_v3 = vadd.f32 %v3414_v54, %v3313_v60  ;;  %v3119_v14 = vpop.f32.mrf.mxu0  ;;  %v3268_v33 = vpop.f32.mrf.mxu1  ;;  %v3782_v54 = vld [vmem:[%s15229_s0 + $0x155] sm:$0xff] }
 0x30a   :  { %v3165_v4 = vadd.f32 %v3119_v14, %v12731_v51  ;;  %v4702_v51 = vld [vmem:[%s15230_s1 + $0x10] sm:$0xf] }
 0x30b   :  { %v13033_v9 = vadd.f32 %v3563_v10, %v3462_v3  ;;  %10656 = vmatpush.msk.msrb.mxu3 %vm129_vm0, %v4702_v51  ;;  %v3931_v10 = vld [vmem:[%s15229_s0 + $0x156] sm:$0xff] }
 0x30c   :  { %v3314_v48 = vadd.f32 %v3268_v33, %v3165_v4  ;;  %10539 = vmatmul.msk.f32.gmra.mxu0 %vm80_vm1, %v12766_v18  ;;  %10556 = vmatmul.msk.f32.gmra.mxu1 %vm80_vm1, %v3777_v28  ;;  %v3778_v18 = vld [vmem:[%s15229_s0 + $0x135] sm:$0xff]  ;;  %v3783_v4 = vld [vmem:[%s15229_s0 + $0x15d] sm:$0xff] }
 0x30d   :  { %10573 = vmatmul.msk.f32.gmra.mxu2 %vm80_vm1, %v3926_v8  ;;  %10590 = vmatmul.msk.f32.gmra.mxu3 %vm80_vm1, %v4140_v31  ;;  %v3932_v8 = vld [vmem:[%s15229_s0 + $0x15e] sm:$0xff] }
 0x310   :  { %v3417_v11 = vpop.f32.mrf.mxu2  ;;  %v3566_v13 = vpop.f32.mrf.mxu3 }
 0x311   :  { %v3463_v45 = vadd.f32 %v3417_v11, %v3314_v48  ;;  %v3122_v20 = vpop.f32.mrf.mxu0  ;;  %v3271_v17 = vpop.f32.mrf.mxu1  ;;  %v3784_v11 = vld [vmem:[%s15229_s0 + $0x165] sm:$0xff] }
 0x313   :  { %v13057_v23 = vadd.f32 %v3566_v13, %v3463_v45  ;;  %v4147_v45 = vld [vmem:[%s15229_s0 + $0x1c1] sm:$0xff] }
 0x314   :  { %10540 = vmatmul.msk.f32.gmra.mxu0 %vm80_vm1, %v12783_v36  ;;  %10557 = vmatmul.msk.f32.gmra.mxu1 %vm80_vm1, %v3778_v18  ;;  %v4142_v36 = vld [vmem:[%s15229_s0 + $0x199] sm:$0xff] }
 0x315   :  { %10574 = vmatmul.msk.f32.gmra.mxu2 %vm80_vm1, %v3927_v47  ;;  %10591 = vmatmul.msk.f32.gmra.mxu3 %vm80_vm1, %v4141_v21 }
 0x318   :  { %v3420_v6 = vpop.f32.mrf.mxu2  ;;  %v3569_v42 = vpop.f32.mrf.mxu3 }
 0x319   :  { %v3125_v12 = vpop.f32.mrf.mxu0  ;;  %v3274_v37 = vpop.f32.mrf.mxu1  ;;  %v3785_v6 = vld [vmem:[%s15229_s0 + $0x16d] sm:$0xff] }
 0x31a   :  { %v4148_v12 = vld [vmem:[%s15229_s0 + $0x1c9] sm:$0xff] }
 0x31c   :  { %10541 = vmatmul.msk.f32.gmra.mxu0 %vm80_vm1, %v12799_v58  ;;  %10558 = vmatmul.msk.f32.gmra.mxu1 %vm80_vm1, %v3779_v38  ;;  %v4143_v58 = vld [vmem:[%s15229_s0 + $0x1a1] sm:$0xff] }
 0x31d   :  { %10575 = vmatmul.msk.f32.gmra.mxu2 %vm80_vm1, %v3928_v30  ;;  %10592 = vmatmul.msk.f32.gmra.mxu3 %vm80_vm1, %v4142_v36 }
 0x320   :  { %v3423_v29 = vpop.f32.mrf.mxu2  ;;  %v3572_v53 = vpop.f32.mrf.mxu3 }
 0x321   :  { %v3128_v44 = vpop.f32.mrf.mxu0  ;;  %v3277_v57 = vpop.f32.mrf.mxu1 }
 0x322   :  { %v3786_v44 = vld [vmem:[%s15229_s0 + $0x175] sm:$0xff] }
 0x324   :  { %10542 = vmatmul.msk.f32.gmra.mxu0 %vm80_vm1, %v12818_v62  ;;  %10559 = vmatmul.msk.f32.gmra.mxu1 %vm80_vm1, %v3780_v55  ;;  %v4144_v62 = vld [vmem:[%s15229_s0 + $0x1a9] sm:$0xff]  ;;  %v4149_v55 = vld [vmem:[%s15229_s0 + $0x1d1] sm:$0xff] }
 0x325   :  { %10576 = vmatmul.msk.f32.gmra.mxu2 %vm80_vm1, %v3929_v43  ;;  %10593 = vmatmul.msk.f32.gmra.mxu3 %vm80_vm1, %v4143_v58 }
 0x328   :  { %v3426_v40 = vpop.f32.mrf.mxu2  ;;  %v3575_v61 = vpop.f32.mrf.mxu3 }
 0x329   :  { %v3131_v0 = vpop.f32.mrf.mxu0  ;;  %v3280_v52 = vpop.f32.mrf.mxu1 }
 0x32c   :  { %10543 = vmatmul.msk.f32.gmra.mxu0 %vm80_vm1, %v12836_v7  ;;  %10560 = vmatmul.msk.f32.gmra.mxu1 %vm80_vm1, %v3781_v63  ;;  %v4145_v7 = vld [vmem:[%s15229_s0 + $0x1b1] sm:$0xff]  ;;  %v3787_v63 = vld [vmem:[%s15229_s0 + $0x17d] sm:$0xff] }
 0x32d   :  { %10577 = vmatmul.msk.f32.gmra.mxu2 %vm80_vm1, %v3930_v41  ;;  %10594 = vmatmul.msk.f32.gmra.mxu3 %vm80_vm1, %v4144_v62  ;;  %v3936_v41 = vld [vmem:[%s15229_s0 + $0x17e] sm:$0xff] }
 0x330   :  { %v3429_v25 = vpop.f32.mrf.mxu2  ;;  %v3578_v1 = vpop.f32.mrf.mxu3 }
 0x331   :  { %v3134_v60 = vpop.f32.mrf.mxu0  ;;  %v3283_v5 = vpop.f32.mrf.mxu1 }
 0x334   :  { %10544 = vmatmul.msk.f32.gmra.mxu0 %vm80_vm1, %v12854_v2  ;;  %10561 = vmatmul.msk.f32.gmra.mxu1 %vm80_vm1, %v3782_v54  ;;  %v4146_v2 = vld [vmem:[%s15229_s0 + $0x1b9] sm:$0xff]  ;;  %v3788_v54 = vld [vmem:[%s15229_s0 + $0x185] sm:$0xff] }
 0x335   :  { %10578 = vmatmul.msk.f32.gmra.mxu2 %vm80_vm1, %v3931_v10  ;;  %10595 = vmatmul.msk.f32.gmra.mxu3 %vm80_vm1, %v4145_v7  ;;  %v3937_v10 = vld [vmem:[%s15229_s0 + $0x186] sm:$0xff]  ;;  %v4851_v7 = vld [vmem:[%s15230_s1 + $0x14] sm:$0xf] }
 0x336   :  { %10673 = vmatpush.msk.msra.mxu0 %vm129_vm0, %v4851_v7  ;;  %v4124_v7 = vld [vmem:[%s15229_s0 + $0x190] sm:$0xff] }
 0x338   :  { %v3432_v3 = vpop.f32.mrf.mxu2  ;;  %v3581_v14 = vpop.f32.mrf.mxu3 }
 0x339   :  { %v3137_v33 = vpop.f32.mrf.mxu0  ;;  %v3286_v28 = vpop.f32.mrf.mxu1 }
 0x33c   :  { %10545 = vmatmul.msk.f32.gmra.mxu0 %vm80_vm1, %v12873_v35  ;;  %10562 = vmatmul.msk.f32.gmra.mxu1 %vm80_vm1, %v3783_v4  ;;  %v3933_v35 = vld [vmem:[%s15229_s0 + $0x166] sm:$0xff] }
 0x33d   :  { %10579 = vmatmul.msk.f32.gmra.mxu2 %vm80_vm1, %v3932_v8  ;;  %10596 = vmatmul.msk.f32.gmra.mxu3 %vm80_vm1, %v4146_v2  ;;  %v3938_v8 = vld [vmem:[%s15229_s0 + $0x18e] sm:$0xff] }
 0x33e   :  { %v4152_v2 = vld [vmem:[%s15229_s0 + $0x1e9] sm:$0xff] }
 0x340   :  { %v3435_v31 = vpop.f32.mrf.mxu2  ;;  %v3584_v56 = vpop.f32.mrf.mxu3 }
 0x341   :  { %v3140_v48 = vpop.f32.mrf.mxu0  ;;  %v3289_v51 = vpop.f32.mrf.mxu1 }
 0x342   :  { %v3172_v13 = vadd.f32 %v3140_v48, %v12862_v22 }
 0x344   :  { %v3321_v20 = vadd.f32 %v3289_v51, %v3172_v13  ;;  %10546 = vmatmul.msk.f32.gmra.mxu0 %vm80_vm1, %v12891_v24  ;;  %10563 = vmatmul.msk.f32.gmra.mxu1 %vm80_vm1, %v3784_v11  ;;  %v3934_v24 = vld [vmem:[%s15229_s0 + $0x16e] sm:$0xff] }
 0x345   :  { %10580 = vmatmul.msk.f32.gmra.mxu2 %vm80_vm1, %v3933_v35  ;;  %10597 = vmatmul.msk.f32.gmra.mxu3 %vm80_vm1, %v4147_v45  ;;  %v13235_v13 = vld [vmem:[%s15229_s0 + $0x194] sm:$0xff] }
 0x346   :  { %v3939_v45 = vld [vmem:[%s15229_s0 + $0x196] sm:$0xff] }
 0x348   :  { %v3438_v17 = vpop.f32.mrf.mxu2  ;;  %v3587_v22 = vpop.f32.mrf.mxu3 }
 0x349   :  { %v3470_v18 = vadd.f32 %v3438_v17, %v3321_v20  ;;  %v3143_v47 = vpop.f32.mrf.mxu0  ;;  %v3292_v21 = vpop.f32.mrf.mxu1  ;;  %v4153_v20 = vld [vmem:[%s15229_s0 + $0x1f1] sm:$0xff] }
 0x34a   :  { %v3173_v42 = vadd.f32 %v3143_v47, %v12880_v46 }
 0x34b   :  { %v13159_v37 = vadd.f32 %v3587_v22, %v3470_v18 }
 0x34c   :  { %v3322_v38 = vadd.f32 %v3292_v21, %v3173_v42  ;;  %10547 = vmatmul.msk.f32.gmra.mxu0 %vm80_vm1, %v12912_v50  ;;  %10564 = vmatmul.msk.f32.gmra.mxu1 %vm80_vm1, %v3785_v6  ;;  %v3935_v50 = vld [vmem:[%s15229_s0 + $0x176] sm:$0xff] }
 0x34d   :  { %10581 = vmatmul.msk.f32.gmra.mxu2 %vm80_vm1, %v3934_v24  ;;  %10598 = vmatmul.msk.f32.gmra.mxu3 %vm80_vm1, %v4148_v12  ;;  %v13257_v42 = vld [vmem:[%s15229_s0 + $0x19c] sm:$0xff] }
 0x34e   :  { %v3791_v24 = vld [vmem:[%s15229_s0 + $0x19d] sm:$0xff] }
 0x34f   :  { %v3940_v12 = vld [vmem:[%s15229_s0 + $0x19e] sm:$0xff] }
 0x350   :  { %v3441_v46 = vpop.f32.mrf.mxu2  ;;  %v3590_v30 = vpop.f32.mrf.mxu3 }
 0x351   :  { %v3471_v36 = vadd.f32 %v3441_v46, %v3322_v38  ;;  %v3146_v29 = vpop.f32.mrf.mxu0  ;;  %v3295_v53 = vpop.f32.mrf.mxu1  ;;  %v4154_v38 = vld [vmem:[%s15229_s0 + $0x1f9] sm:$0xff] }
 0x352   :  { %v3174_v57 = vadd.f32 %v3146_v29, %v12900_v59 }
 0x353   :  { %v13176_v43 = vadd.f32 %v3590_v30, %v3471_v36 }
 0x354   :  { %v3323_v58 = vadd.f32 %v3295_v53, %v3174_v57  ;;  %10548 = vmatmul.msk.f32.gmra.mxu0 %vm80_vm1, %v12930_v16  ;;  %10565 = vmatmul.msk.f32.gmra.mxu1 %vm80_vm1, %v3786_v44  ;;  %v4150_v16 = vld [vmem:[%s15229_s0 + $0x1d9] sm:$0xff] }
 0x355   :  { %10582 = vmatmul.msk.f32.gmra.mxu2 %vm80_vm1, %v3935_v50  ;;  %10599 = vmatmul.msk.f32.gmra.mxu3 %vm80_vm1, %v4149_v55  ;;  %v4122_v44 = vld [vmem:[%s15229_s0 + $0x180] sm:$0xff]  ;;  %v4537_v57 = vld [vmem:[%s15229_s0 + $0x192] sm:$0xff] }
 0x356   :  { %v4686_v50 = vld [vmem:[%s15229_s0 + $0x193] sm:$0xff] }
 0x358   :  { %v3444_v59 = vpop.f32.mrf.mxu2  ;;  %v3593_v40 = vpop.f32.mrf.mxu3 }
 0x359   :  { %v3472_v61 = vadd.f32 %v3444_v59, %v3323_v58  ;;  %v3149_v0 = vpop.f32.mrf.mxu0  ;;  %v3298_v52 = vpop.f32.mrf.mxu1  ;;  %v5000_v59 = vld [vmem:[%s15230_s1 + $0x18] sm:$0xf] }
 0x35a   :  { %10690 = vmatpush.msk.msra.mxu1 %vm129_vm0, %v5000_v59  ;;  %v4692_v59 = vld [vmem:[%s15229_s0 + $0x1c3] sm:$0xff] }
 0x35b   :  { %v13192_v62 = vadd.f32 %v3593_v40, %v3472_v61 }
 0x35c   :  { %10549 = vmatmul.msk.f32.gmra.mxu0 %vm80_vm1, %v12951_v15  ;;  %10566 = vmatmul.msk.f32.gmra.mxu1 %vm80_vm1, %v3787_v63  ;;  %v4151_v15 = vld [vmem:[%s15229_s0 + $0x1e1] sm:$0xff] }
 0x35d   :  { %10583 = vmatmul.msk.f32.gmra.mxu2 %vm80_vm1, %v3936_v41  ;;  %10600 = vmatmul.msk.f32.gmra.mxu3 %vm80_vm1, %v4150_v16  ;;  %v4538_v63 = vld [vmem:[%s15229_s0 + $0x19a] sm:$0xff] }
 0x35e   :  { %v4687_v41 = vld [vmem:[%s15229_s0 + $0x19b] sm:$0xff] }
 0x360   :  { %v3447_v25 = vpop.f32.mrf.mxu2  ;;  %v3596_v1 = vpop.f32.mrf.mxu3 }
 0x361   :  { %v3152_v60 = vpop.f32.mrf.mxu0  ;;  %v3301_v5 = vpop.f32.mrf.mxu1 }
 0x362   :  { %v5149_v5 = vld [vmem:[%s15230_s1 + $0x1c] sm:$0xf] }
 0x363   :  { %10707 = vmatpush.msk.msra.mxu2 %vm129_vm0, %v5149_v5  ;;  %v4545_v5 = vld [vmem:[%s15229_s0 + $0x1d2] sm:$0xff] }
 0x364   :  { %10550 = vmatmul.msk.f32.gmra.mxu0 %vm80_vm1, %v12971_v26  ;;  %10567 = vmatmul.msk.f32.gmra.mxu1 %vm80_vm1, %v3788_v54  ;;  %v3789_v26 = vld [vmem:[%s15229_s0 + $0x18d] sm:$0xff] }
 0x365   :  { %10584 = vmatmul.msk.f32.gmra.mxu2 %vm80_vm1, %v3937_v10  ;;  %10601 = vmatmul.msk.f32.gmra.mxu3 %vm80_vm1, %v4151_v15 }
 0x368   :  { %v3450_v3 = vpop.f32.mrf.mxu2  ;;  %v3599_v14 = vpop.f32.mrf.mxu3 }
 0x369   :  { %v3155_v33 = vpop.f32.mrf.mxu0  ;;  %v3304_v28 = vpop.f32.mrf.mxu1  ;;  %v4539_v3 = vld [vmem:[%s15229_s0 + $0x1a2] sm:$0xff] }
 0x36a   :  { %v3177_v4 = vadd.f32 %v3155_v33, %v12958_v32  ;;  %v4688_v14 = vld [vmem:[%s15229_s0 + $0x1a3] sm:$0xff]  ;;  %v13332_v33 = vld [vmem:[%s15231_s2] ss:$0 sm:$0xff] }
 0x36c   :  { %v3326_v31 = vadd.f32 %v3304_v28, %v3177_v4  ;;  %10551 = vmatmul.msk.f32.gmra.mxu0 %vm80_vm1, %v12995_v39  ;;  %10568 = vmatmul.msk.f32.gmra.mxu1 %vm80_vm1, %v3789_v26  ;;  %v3790_v39 = vld [vmem:[%s15229_s0 + $0x195] sm:$0xff] }
 0x36d   :  { %10585 = vmatmul.msk.f32.gmra.mxu2 %vm80_vm1, %v3938_v8  ;;  %10602 = vmatmul.msk.f32.gmra.mxu3 %vm80_vm1, %v4152_v2 }
 0x370   :  { %v3453_v56 = vpop.f32.mrf.mxu2  ;;  %v3602_v32 = vpop.f32.mrf.mxu3 }
 0x371   :  { %v3475_v48 = vadd.f32 %v3453_v56, %v3326_v31  ;;  %v3158_v51 = vpop.f32.mrf.mxu0  ;;  %v3307_v11 = vpop.f32.mrf.mxu1  ;;  %v4125_v56 = vld [vmem:[%s15229_s0 + $0x198] sm:$0xff] }
 0x372   :  { %v3178_v35 = vadd.f32 %v3158_v51, %v12981_v27 }
 0x373   :  { %v13247_v17 = vadd.f32 %v3602_v32, %v3475_v48  ;;  %v4540_v32 = vld [vmem:[%s15229_s0 + $0x1aa] sm:$0xff] }
 0x374   :  { %v3327_v22 = vadd.f32 %v3307_v11, %v3178_v35  ;;  %10552 = vmatmul.msk.f32.gmra.mxu0 %vm80_vm1, %v13235_v13  ;;  %10569 = vmatmul.msk.f32.gmra.mxu1 %vm80_vm1, %v3790_v39  ;;  %v4689_v48 = vld [vmem:[%s15229_s0 + $0x1ab] sm:$0xff] }
 0x375   :  { %10586 = vmatmul.msk.f32.gmra.mxu2 %vm80_vm1, %v3939_v45  ;;  %10603 = vmatmul.msk.f32.gmra.mxu3 %vm80_vm1, %v4153_v20 }
 0x378   :  { %v3456_v27 = vpop.f32.mrf.mxu2  ;;  %v3605_v18 = vpop.f32.mrf.mxu3 }
 0x379   :  { %v3476_v47 = vadd.f32 %v3456_v27, %v3327_v22  ;;  %v3161_v21 = vpop.f32.mrf.mxu0  ;;  %v3310_v6 = vpop.f32.mrf.mxu1  ;;  %v4126_v22 = vld [vmem:[%s15229_s0 + $0x1a0] sm:$0xff] }
 0x37a   :  { %v4690_v21 = vld [vmem:[%s15229_s0 + $0x1b3] sm:$0xff] }
 0x37b   :  { %v13268_v46 = vadd.f32 %v3605_v18, %v3476_v47  ;;  %v4541_v47 = vld [vmem:[%s15229_s0 + $0x1b2] sm:$0xff] }
 0x37c   :  { %10553 = vmatmul.msk.f32.gmra.mxu0 %vm80_vm1, %v13257_v42  ;;  %10570 = vmatmul.msk.f32.gmra.mxu1 %vm80_vm1, %v3791_v24 }
 0x37d   :  { %10587 = vmatmul.msk.f32.gmra.mxu2 %vm80_vm1, %v3940_v12  ;;  %10604 = vmatmul.msk.f32.gmra.mxu3 %vm80_vm1, %v4154_v38 }
 0x380   :  { %v3459_v30 = vpop.f32.mrf.mxu2  ;;  %v3608_v36 = vpop.f32.mrf.mxu3 }
 0x381   :  { %v3712_v29 = vpop.f32.mrf.mxu0  ;;  %v3861_v53 = vpop.f32.mrf.mxu1  ;;  %v4127_v30 = vld [vmem:[%s15229_s0 + $0x1a8] sm:$0xff]  ;;  %v4542_v36 = vld [vmem:[%s15229_s0 + $0x1ba] sm:$0xff] }
 0x382   :  { %v3760_v55 = vadd.f32 %v3712_v29, %v13033_v9  ;;  %v4691_v29 = vld [vmem:[%s15229_s0 + $0x1bb] sm:$0xff] }
 0x384   :  { %10606 = vmatmul.msk.f32.vlgmr.msrb.gmra.mxu0 %vm80_vm1, %v4122_v44  ;;  %10623 = vmatmul.msk.f32.vlgmr.msrb.gmra.mxu1 %vm80_vm1, %v12963_v19  ;;  %v3909_v58 = vadd.f32 %v3861_v53, %v3760_v55  ;;  %v4123_v19 = vld [vmem:[%s15229_s0 + $0x188] sm:$0xff]  ;;  %v4128_v55 = vld [vmem:[%s15229_s0 + $0x1b0] sm:$0xff] }
 0x385   :  { %10640 = vmatmul.msk.f32.vlgmr.msrb.gmra.mxu2 %vm80_vm1, %v4537_v57  ;;  %10657 = vmatmul.msk.f32.vlgmr.msrb.gmra.mxu3 %vm80_vm1, %v4686_v50 }
 0x388   :  { %v4010_v40 = vpop.f32.mrf.mxu2  ;;  %v4224_v61 = vpop.f32.mrf.mxu3 }
 0x389   :  { %v4058_v0 = vadd.f32 %v4010_v40, %v3909_v58  ;;  %v3715_v9 = vpop.f32.mrf.mxu0  ;;  %v3864_v52 = vpop.f32.mrf.mxu1  ;;  %v4543_v58 = vld [vmem:[%s15229_s0 + $0x1c2] sm:$0xff] }
 0x38a   :  { %v3761_v25 = vadd.f32 %v3715_v9, %v13057_v23 }
 0x38b   :  { %v4074_v16 = vadd.f32 %v12753_v34, %v4058_v0  ;;  %v5298_v34 = vld [vmem:[%s15230_s1 + $0x20] sm:$0xf] }
 0x38c   :  { %10607 = vmatmul.msk.f32.gmra.mxu0 %vm80_vm1, %v4123_v19  ;;  %10624 = vmatmul.msk.f32.gmra.mxu1 %vm80_vm1, %v12986_v49  ;;  %v3910_v60 = vadd.f32 %v3864_v52, %v3761_v25  ;;  %v4129_v52 = vld [vmem:[%s15229_s0 + $0x1b8] sm:$0xff]  ;;  %v4544_v19 = vld [vmem:[%s15229_s0 + $0x1ca] sm:$0xff] }
 0x38d   :  { %v4090_v1 = vmax.f32 %v4074_v16, 0.0  ;;  %10641 = vmatmul.msk.f32.gmra.mxu2 %vm80_vm1, %v4538_v63  ;;  %10658 = vmatmul.msk.f32.gmra.mxu3 %vm80_vm1, %v4687_v41 }
 0x38e   :  { %10724 = vmatpush.msk.msra.mxu3 %vm129_vm0, %v5298_v34  ;;  %v4694_v34 = vld [vmem:[%s15229_s0 + $0x1d3] sm:$0xff] }
 0x38f   :  { %4106 = vst [vmem:[#allocation2 + $0x100] sm:$0xff] %v4090_v1 }
 0x390   :  { %v4013_v23 = vpop.f32.mrf.mxu2  ;;  %v13316_v54 = vpop.f32.mrf.mxu3 }
 0x391   :  { %v4059_v49 = vadd.f32 %v4013_v23, %v3910_v60  ;;  %v3718_v10 = vpop.f32.mrf.mxu0  ;;  %v3867_v15 = vpop.f32.mrf.mxu1  ;;  %v4130_v60 = vld [vmem:[%s15229_s0 + $0x1c0] sm:$0xff] }
 0x393   :  { %v4075_v28 = vadd.f32 %v13332_v33, %v4059_v49 }
 0x394   :  { %10608 = vmatmul.msk.f32.gmra.mxu0 %vm80_vm1, %v4124_v7  ;;  %10625 = vmatmul.msk.f32.gmra.mxu1 %vm80_vm1, %v4537_v57 }
 0x395   :  { %v4091_v26 = vmax.f32 %v4075_v28, 0.0  ;;  %10642 = vmatmul.msk.f32.gmra.mxu2 %vm80_vm1, %v4539_v3  ;;  %10659 = vmatmul.msk.f32.gmra.mxu3 %vm80_vm1, %v4688_v14  ;;  %v4131_v28 = vld [vmem:[%s15229_s0 + $0x1c8] sm:$0xff] }
 0x397   :  { %4107 = vst [vmem:[#allocation2 + $0x108] sm:$0xff] %v4091_v26  ;;  %v4695_v26 = vld [vmem:[%s15229_s0 + $0x1db] sm:$0xff] }
 0x398   :  { %v4016_v4 = vpop.f32.mrf.mxu2  ;;  %v13339_v8 = vpop.f32.mrf.mxu3 }
 0x399   :  { %v3721_v2 = vpop.f32.mrf.mxu0  ;;  %v3870_v31 = vpop.f32.mrf.mxu1 }
 0x39c   :  { %10609 = vmatmul.msk.f32.gmra.mxu0 %vm80_vm1, %v4125_v56  ;;  %10626 = vmatmul.msk.f32.gmra.mxu1 %vm80_vm1, %v4538_v63  ;;  %v4693_v63 = vld [vmem:[%s15229_s0 + $0x1cb] sm:$0xff] }
 0x39d   :  { %10643 = vmatmul.msk.f32.gmra.mxu2 %vm80_vm1, %v4540_v32  ;;  %10660 = vmatmul.msk.f32.gmra.mxu3 %vm80_vm1, %v4689_v48 }
 0x39e   :  { %v6685_v51 = vld [vmem:[#allocation2 + $0xfc] ss:$2 sm:$0xff] }
 0x39f   :  { %v6687_v11 = vrot.slane %v6685_v51, 7 }
 0x3a0   :  { %v4019_v39 = vpop.f32.mrf.mxu2  ;;  %v13354_v35 = vpop.f32.mrf.mxu3 }
 0x3a1   :  { %v3724_v45 = vpop.f32.mrf.mxu0  ;;  %v3873_v20 = vpop.f32.mrf.mxu1  ;;  %v6689_v27 = vsel %vm6625_vm2, 0.0, %v6687_v11  ;;  %v6690_v18 = vsel %vm6625_vm2, %v6687_v11, 0.0 }
 0x3a2   :  { %6691 = vst [vmem:[#allocation3 + $0x50] sm:$0xff] %v6689_v27  ;;  %v4547_v45 = vld [vmem:[%s15229_s0 + $0x1e2] sm:$0xff] }
 0x3a3   :  { %6692 = vst [vmem:[#allocation3 + $0x58] sm:$0x3] %v6690_v18  ;;  %v4696_v20 = vld [vmem:[%s15229_s0 + $0x1e3] sm:$0xff] }
 0x3a4   :  { %10610 = vmatmul.msk.f32.gmra.mxu0 %vm80_vm1, %v4126_v22  ;;  %10627 = vmatmul.msk.f32.gmra.mxu1 %vm80_vm1, %v4539_v3 }
 0x3a5   :  { %10644 = vmatmul.msk.f32.gmra.mxu2 %vm80_vm1, %v4541_v47  ;;  %10661 = vmatmul.msk.f32.gmra.mxu3 %vm80_vm1, %v4690_v21 }
 0x3a8   :  { %v4022_v6 = vpop.f32.mrf.mxu2  ;;  %v4236_v24 = vpop.f32.mrf.mxu3 }
 0x3a9   :  { %v3727_v12 = vpop.f32.mrf.mxu0  ;;  %v3876_v38 = vpop.f32.mrf.mxu1 }
 0x3ac   :  { %10611 = vmatmul.msk.f32.gmra.mxu0 %vm80_vm1, %v4127_v30  ;;  %10628 = vmatmul.msk.f32.gmra.mxu1 %vm80_vm1, %v4540_v32  ;;  %v4548_v30 = vld [vmem:[%s15229_s0 + $0x1ea] sm:$0xff] }
 0x3ad   :  { %10645 = vmatmul.msk.f32.gmra.mxu2 %vm80_vm1, %v4542_v36  ;;  %10662 = vmatmul.msk.f32.gmra.mxu3 %vm80_vm1, %v4691_v29 }
 0x3b0   :  { %v4025_v53 = vpop.f32.mrf.mxu2  ;;  %v4239_v44 = vpop.f32.mrf.mxu3 }
 0x3b1   :  { %v3730_v57 = vpop.f32.mrf.mxu0  ;;  %v3879_v50 = vpop.f32.mrf.mxu1 }
 0x3b4   :  { %10612 = vmatmul.msk.f32.gmra.mxu0 %vm80_vm1, %v4128_v55  ;;  %10629 = vmatmul.msk.f32.gmra.mxu1 %vm80_vm1, %v4541_v47 }
 0x3b5   :  { %10646 = vmatmul.msk.f32.gmra.mxu2 %vm80_vm1, %v4543_v58  ;;  %10663 = vmatmul.msk.f32.gmra.mxu3 %vm80_vm1, %v4692_v59  ;;  %v4549_v59 = vld [vmem:[%s15229_s0 + $0x1f2] sm:$0xff] }
 0x3b8   :  { %v4028_v40 = vpop.f32.mrf.mxu2  ;;  %v13397_v61 = vpop.f32.mrf.mxu3 }
 0x3b9   :  { %v3733_v0 = vpop.f32.mrf.mxu0  ;;  %v3882_v9 = vpop.f32.mrf.mxu1  ;;  %v4698_v40 = vld [vmem:[%s15229_s0 + $0x1f3] sm:$0xff] }
 0x3bc   :  { %10613 = vmatmul.msk.f32.gmra.mxu0 %vm80_vm1, %v4129_v52  ;;  %10630 = vmatmul.msk.f32.gmra.mxu1 %vm80_vm1, %v4542_v36  ;;  %v4697_v36 = vld [vmem:[%s15229_s0 + $0x1eb] sm:$0xff]  ;;  %v5506_v52 = vld [vmem:[%s15230_s1 + $0x4] sm:$0xf] }
 0x3bd   :  { %10647 = vmatmul.msk.f32.gmra.mxu2 %vm80_vm1, %v4544_v19  ;;  %10664 = vmatmul.msk.f32.gmra.mxu3 %vm80_vm1, %v4693_v63 }
 0x3be   :  { %10741 = vmatpush.msk.msrb.mxu0 %vm129_vm0, %v5506_v52 }
 0x3c0   :  { %v4031_v41 = vpop.f32.mrf.mxu2  ;;  %v13412_v16 = vpop.f32.mrf.mxu3 }
 0x3c1   :  { %v3736_v25 = vpop.f32.mrf.mxu0  ;;  %v3885_v1 = vpop.f32.mrf.mxu1 }
 0x3c2   :  { %v3768_v23 = vadd.f32 %v3736_v25, %v13159_v37  ;;  %v4546_v37 = vld [vmem:[%s15229_s0 + $0x1da] sm:$0xff] }
 0x3c4   :  { %10614 = vmatmul.msk.f32.gmra.mxu0 %vm80_vm1, %v4130_v60  ;;  %10631 = vmatmul.msk.f32.gmra.mxu1 %vm80_vm1, %v4543_v58  ;;  %v3917_v49 = vadd.f32 %v3885_v1, %v3768_v23  ;;  %v4134_v58 = vld [vmem:[%s15229_s0 + $0x1e0] sm:$0xff]  ;;  %v4135_v1 = vld [vmem:[%s15229_s0 + $0x1e8] sm:$0xff] }
 0x3c5   :  { %10648 = vmatmul.msk.f32.gmra.mxu2 %vm80_vm1, %v4545_v5  ;;  %10665 = vmatmul.msk.f32.gmra.mxu3 %vm80_vm1, %v4694_v34  ;;  %v4550_v34 = vld [vmem:[%s15229_s0 + $0x1fa] sm:$0xff] }
 0x3c6   :  { %v4699_v23 = vld [vmem:[%s15229_s0 + $0x1fb] sm:$0xff] }
 0x3c8   :  { %v4034_v10 = vpop.f32.mrf.mxu2  ;;  %v4248_v15 = vpop.f32.mrf.mxu3 }
 0x3c9   :  { %v4066_v7 = vadd.f32 %v4034_v10, %v3917_v49  ;;  %v3739_v3 = vpop.f32.mrf.mxu0  ;;  %v3888_v14 = vpop.f32.mrf.mxu1 }
 0x3ca   :  { %v3769_v2 = vadd.f32 %v3739_v3, %v13176_v43  ;;  %v4132_v43 = vld [vmem:[%s15229_s0 + $0x1d0] sm:$0xff] }
 0x3cb   :  { %v4082_v4 = vadd.f32 %v13332_v33, %v4066_v7 }
 0x3cc   :  { %10615 = vmatmul.msk.f32.gmra.mxu0 %vm80_vm1, %v4131_v28  ;;  %10632 = vmatmul.msk.f32.gmra.mxu1 %vm80_vm1, %v4544_v19  ;;  %v3918_v56 = vadd.f32 %v3888_v14, %v3769_v2 }
 0x3cd   :  { %v4098_v31 = vmax.f32 %v4082_v4, 0.0  ;;  %10649 = vmatmul.msk.f32.gmra.mxu2 %vm80_vm1, %v4546_v37  ;;  %10666 = vmatmul.msk.f32.gmra.mxu3 %vm80_vm1, %v4695_v26  ;;  %v4700_v26 = vld [vmem:[%s15229_s0 + $0x203] sm:$0xff] }
 0x3cf   :  { %4114 = vst [vmem:[#allocation2 + $0x140] sm:$0xff] %v4098_v31 }
 0x3d0   :  { %v4037_v32 = vpop.f32.mrf.mxu2  ;;  %v4251_v48 = vpop.f32.mrf.mxu3 }
 0x3d1   :  { %v4067_v51 = vadd.f32 %v4037_v32, %v3918_v56  ;;  %v3742_v11 = vpop.f32.mrf.mxu0  ;;  %v3891_v39 = vpop.f32.mrf.mxu1 }
 0x3d2   :  { %v3770_v27 = vadd.f32 %v3742_v11, %v13192_v62  ;;  %v4133_v62 = vld [vmem:[%s15229_s0 + $0x1d8] sm:$0xff] }
 0x3d3   :  { %v4083_v22 = vadd.f32 %v13332_v33, %v4067_v51 }
 0x3d4   :  { %10616 = vmatmul.msk.f32.gmra.mxu0 %vm80_vm1, %v4132_v43  ;;  %10633 = vmatmul.msk.f32.gmra.mxu1 %vm80_vm1, %v4545_v5  ;;  %v3919_v47 = vadd.f32 %v3891_v39, %v3770_v27  ;;  %v13535_v43 = vld [vmem:[%s15229_s0 + $0x20a] sm:$0xff] }
 0x3d5   :  { %v4099_v18 = vmax.f32 %v4083_v22, 0.0  ;;  %10650 = vmatmul.msk.f32.gmra.mxu2 %vm80_vm1, %v4547_v45  ;;  %10667 = vmatmul.msk.f32.gmra.mxu3 %vm80_vm1, %v4696_v20 }
 0x3d7   :  { %4115 = vst [vmem:[#allocation2 + $0x148] sm:$0xff] %v4099_v18 }
 0x3d8   :  { %v4040_v21 = vpop.f32.mrf.mxu2  ;;  %v13458_v6 = vpop.f32.mrf.mxu3 }
 0x3d9   :  { %v4068_v24 = vadd.f32 %v4040_v21, %v3919_v47  ;;  %v3745_v12 = vpop.f32.mrf.mxu0  ;;  %v3894_v38 = vpop.f32.mrf.mxu1 }
 0x3da   :  { %v5282_v12 = vld [vmem:[%s15229_s0 + $0x1a6] sm:$0xff]  ;;  %v5492_v38 = vld [vmem:[%s15230_s1] sm:$0xf] }
 0x3db   :  { %v4084_v29 = vadd.f32 %v13332_v33, %v4068_v24  ;;  %v5133_v24 = vld [vmem:[%s15229_s0 + $0x1a5] sm:$0xff]  ;;  %10755 = vmatpush.msk.msrb.mxu1 %vm129_vm0, %v5492_v38 }
 0x3dc   :  { %10617 = vmatmul.msk.f32.gmra.mxu0 %vm80_vm1, %v4133_v62  ;;  %10634 = vmatmul.msk.f32.gmra.mxu1 %vm80_vm1, %v4546_v37  ;;  %v4136_v37 = vld [vmem:[%s15229_s0 + $0x1f0] sm:$0xff] }
 0x3dd   :  { %v4100_v53 = vmax.f32 %v4084_v29, 0.0  ;;  %10651 = vmatmul.msk.f32.gmra.mxu2 %vm80_vm1, %v4548_v30  ;;  %10668 = vmatmul.msk.f32.gmra.mxu3 %vm80_vm1, %v4697_v36 }
 0x3df   :  { %4116 = vst [vmem:[#allocation2 + $0x150] sm:$0xff] %v4100_v53 }
 0x3e0   :  { %v4043_v44 = vpop.f32.mrf.mxu2  ;;  %v13474_v57 = vpop.f32.mrf.mxu3 }
 0x3e1   :  { %v3748_v50 = vpop.f32.mrf.mxu0  ;;  %v3897_v55 = vpop.f32.mrf.mxu1 }
 0x3e4   :  { %10618 = vmatmul.msk.f32.gmra.mxu0 %vm80_vm1, %v4134_v58  ;;  %10635 = vmatmul.msk.f32.gmra.mxu1 %vm80_vm1, %v4547_v45  ;;  %v4701_v45 = vld [vmem:[%s15229_s0 + $0x20b] sm:$0xff] }
 0x3e5   :  { %10652 = vmatmul.msk.f32.gmra.mxu2 %vm80_vm1, %v4549_v59  ;;  %10669 = vmatmul.msk.f32.gmra.mxu3 %vm80_vm1, %v4698_v40  ;;  %v5134_v58 = vld [vmem:[%s15229_s0 + $0x1ad] sm:$0xff] }
 0x3e6   :  { %v6698_v0 = vld [vmem:[#allocation2 + $0x144] ss:$2 sm:$0xff] }
 0x3e7   :  { %v6700_v9 = vrot.slane %v6698_v0, 7  ;;  %v5716_v0 = vld [vmem:[%s15230_s1 + $0x8] sm:$0xf] }
 0x3e8   :  { %v4046_v19 = vpop.f32.mrf.mxu2  ;;  %v13492_v63 = vpop.f32.mrf.mxu3  ;;  %10769 = vmatpush.msk.msrb.mxu2 %vm129_vm0, %v5716_v0  ;;  %v5289_v0 = vld [vmem:[%s15229_s0 + $0x1de] sm:$0xff] }
 0x3e9   :  { %v3751_v41 = vpop.f32.mrf.mxu0  ;;  %v3900_v25 = vpop.f32.mrf.mxu1  ;;  %v6702_v60 = vsel %vm6625_vm2, 0.0, %v6700_v9  ;;  %v6703_v5 = vsel %vm6625_vm2, %v6700_v9, 0.0  ;;  %v5841_v9 = vld [vmem:[%s15230_s1 + $0xc] sm:$0xf] }
 0x3ea   :  { %6704 = vst [vmem:[#allocation3 + $0x6e] sm:$0xff] %v6702_v60  ;;  %v3773_v49 = vadd.f32 %v3751_v41, %v13247_v17  ;;  %v13517_v17 = vld [vmem:[%s15229_s0 + $0x202] sm:$0xff]  ;;  %10783 = vmatpush.msk.msrb.mxu3 %vm129_vm0, %v5841_v9  ;;  %v5135_v60 = vld [vmem:[%s15229_s0 + $0x1b5] sm:$0xff] }
 0x3eb   :  { %6705 = vst [vmem:[#allocation3 + $0x76] sm:$0x3] %v6703_v5  ;;  %v5284_v5 = vld [vmem:[%s15229_s0 + $0x1b6] sm:$0xff] }
 0x3ec   :  { %10619 = vmatmul.msk.f32.gmra.mxu0 %vm80_vm1, %v4135_v1  ;;  %10636 = vmatmul.msk.f32.gmra.mxu1 %vm80_vm1, %v4548_v30  ;;  %v3922_v10 = vadd.f32 %v3900_v25, %v3773_v49  ;;  %v4986_v1 = vld [vmem:[%s15229_s0 + $0x1b4] sm:$0xff] }
 0x3ed   :  { %10653 = vmatmul.msk.f32.gmra.mxu2 %vm80_vm1, %v4550_v34  ;;  %10670 = vmatmul.msk.f32.gmra.mxu3 %vm80_vm1, %v4699_v23 }
 0x3f0   :  { %v4049_v15 = vpop.f32.mrf.mxu2  ;;  %v4263_v7 = vpop.f32.mrf.mxu3 }
 0x3f1   :  { %v4071_v3 = vadd.f32 %v4049_v15, %v3922_v10  ;;  %v3754_v14 = vpop.f32.mrf.mxu0  ;;  %v3903_v28 = vpop.f32.mrf.mxu1 }
 0x3f2   :  { %v3774_v2 = vadd.f32 %v3754_v14, %v13268_v46  ;;  %v4137_v46 = vld [vmem:[%s15229_s0 + $0x1f8] sm:$0xff] }
 0x3f3   :  { %v4087_v4 = vadd.f32 %v13332_v33, %v4071_v3 }
 0x3f4   :  { %10620 = vmatmul.msk.f32.gmra.mxu0 %vm80_vm1, %v4136_v37  ;;  %10637 = vmatmul.msk.f32.gmra.mxu1 %vm80_vm1, %v4549_v59  ;;  %v3923_v56 = vadd.f32 %v3903_v28, %v3774_v2  ;;  %v5283_v59 = vld [vmem:[%s15229_s0 + $0x1ae] sm:$0xff]  ;;  %v4987_v28 = vld [vmem:[%s15229_s0 + $0x1bc] sm:$0xff] }
 0x3f5   :  { %v4103_v31 = vmax.f32 %v4087_v4, 0.0  ;;  %10654 = vmatmul.msk.f32.gmra.mxu2 %vm80_vm1, %v13517_v17  ;;  %10671 = vmatmul.msk.f32.gmra.mxu3 %vm80_vm1, %v4700_v26  ;;  %v5285_v37 = vld [vmem:[%s15229_s0 + $0x1be] sm:$0xff] }
 0x3f7   :  { %4119 = vst [vmem:[#allocation2 + $0x168] sm:$0xff] %v4103_v31 }
 0x3f8   :  { %v4052_v32 = vpop.f32.mrf.mxu2  ;;  %v4266_v48 = vpop.f32.mrf.mxu3 }
 0x3f9   :  { %v4072_v51 = vadd.f32 %v4052_v32, %v3923_v56  ;;  %v3757_v11 = vpop.f32.mrf.mxu0  ;;  %v3906_v39 = vpop.f32.mrf.mxu1 }
 0x3fa   :  { %v4988_v11 = vld [vmem:[%s15229_s0 + $0x1c4] sm:$0xff] }
 0x3fb   :  { %v4088_v20 = vadd.f32 %v13332_v33, %v4072_v51  ;;  %v4984_v33 = vld [vmem:[%s15229_s0 + $0x1a4] sm:$0xff] }
 0x3fc   :  { %10621 = vmatmul.msk.f32.gmra.mxu0 %vm80_vm1, %v4137_v46  ;;  %10638 = vmatmul.msk.f32.gmra.mxu1 %vm80_vm1, %v4550_v34  ;;  %v5286_v39 = vld [vmem:[%s15229_s0 + $0x1c6] sm:$0xff] }
 0x3fd   :  { %v4104_v22 = vmax.f32 %v4088_v20, 0.0  ;;  %10655 = vmatmul.msk.f32.gmra.mxu2 %vm80_vm1, %v13535_v43  ;;  %10672 = vmatmul.msk.f32.gmra.mxu3 %vm80_vm1, %v4701_v45 }
 0x3ff   :  { %4120 = vst [vmem:[#allocation2 + $0x170] sm:$0xff] %v4104_v22 }
 0x400   :  { %v4055_v27 = vpop.f32.mrf.mxu2  ;;  %v13546_v18 = vpop.f32.mrf.mxu3 }
 0x401   :  { %v4340_v47 = vpop.f32.mrf.mxu0  ;;  %v4473_v21 = vpop.f32.mrf.mxu1 }
 0x402   :  { %v4989_v47 = vld [vmem:[%s15229_s0 + $0x1cc] sm:$0xff] }
 0x403   :  { %v5138_v21 = vld [vmem:[%s15229_s0 + $0x1cd] sm:$0xff] }
 0x404   :  { %10674 = vmatmul.msk.f32.vlgmr.msra.gmra.mxu0 %vm80_vm1, %v13235_v13  ;;  %10691 = vmatmul.msk.f32.vlgmr.msra.gmra.mxu1 %vm80_vm1, %v4984_v33  ;;  %v4985_v13 = vld [vmem:[%s15229_s0 + $0x1ac] sm:$0xff] }
 0x405   :  { %10708 = vmatmul.msk.f32.vlgmr.msra.gmra.mxu2 %vm80_vm1, %v5133_v24  ;;  %10725 = vmatmul.msk.f32.vlgmr.msra.gmra.mxu3 %vm80_vm1, %v5282_v12 }
 0x406   :  { %v6707_v62 = vld [vmem:[#allocation2 + $0x168] ss:$2 sm:$0xff] }
 0x407   :  { %v6709_v30 = vrot.slane %v6707_v62, 7 }
 0x408   :  { %v4622_v36 = vpop.f32.mrf.mxu2  ;;  %v4771_v29 = vpop.f32.mrf.mxu3 }
 0x409   :  { %v4343_v53 = vpop.f32.mrf.mxu0  ;;  %v4476_v44 = vpop.f32.mrf.mxu1  ;;  %v6711_v50 = vsel %vm6625_vm2, 0.0, %v6709_v30  ;;  %v6712_v55 = vsel %vm6625_vm2, %v6709_v30, 0.0  ;;  %v4990_v30 = vld [vmem:[%s15229_s0 + $0x1d4] sm:$0xff] }
 0x40a   :  { %6713 = vst [vmem:[#allocation3 + $0x78] sm:$0xff] %v6711_v50  ;;  %v4344_v40 = vadd.f32 %v4343_v53, %v13316_v54  ;;  %v5139_v36 = vld [vmem:[%s15229_s0 + $0x1d5] sm:$0xff] }
 0x40b   :  { %6714 = vst [vmem:[#allocation3 + $0x80] sm:$0x3] %v6712_v55  ;;  %v5288_v29 = vld [vmem:[%s15229_s0 + $0x1d6] sm:$0xff] }
 0x40c   :  { %10675 = vmatmul.msk.f32.gmra.mxu0 %vm80_vm1, %v13257_v42  ;;  %10692 = vmatmul.msk.f32.gmra.mxu1 %vm80_vm1, %v4985_v13  ;;  %v4522_v54 = vadd.f32 %v4476_v44, %v4344_v40  ;;  %v4991_v40 = vld [vmem:[%s15229_s0 + $0x1dc] sm:$0xff] }
 0x40d   :  { %10709 = vmatmul.msk.f32.gmra.mxu2 %vm80_vm1, %v5134_v58  ;;  %10726 = vmatmul.msk.f32.gmra.mxu3 %vm80_vm1, %v5283_v59 }
 0x410   :  { %v4625_v52 = vpop.f32.mrf.mxu2  ;;  %v4774_v19 = vpop.f32.mrf.mxu3 }
 0x411   :  { %v4671_v41 = vadd.f32 %v4625_v52, %v4522_v54  ;;  %v4346_v25 = vpop.f32.mrf.mxu0  ;;  %v4479_v42 = vpop.f32.mrf.mxu1 }
 0x412   :  { %v4347_v23 = vadd.f32 %v4346_v25, %v13339_v8  ;;  %v5136_v8 = vld [vmem:[%s15229_s0 + $0x1bd] sm:$0xff] }
 0x413   :  { %v13600_v34 = vadd.f32 %v4774_v19, %v4671_v41 }
 0x414   :  { %10676 = vmatmul.msk.f32.gmra.mxu0 %vm80_vm1, %v4984_v33  ;;  %10693 = vmatmul.msk.f32.gmra.mxu1 %vm80_vm1, %v4986_v1  ;;  %v4523_v49 = vadd.f32 %v4479_v42, %v4347_v23  ;;  %v5287_v33 = vld [vmem:[%s15229_s0 + $0x1ce] sm:$0xff] }
 0x415   :  { %10710 = vmatmul.msk.f32.gmra.mxu2 %vm80_vm1, %v5135_v60  ;;  %10727 = vmatmul.msk.f32.gmra.mxu3 %vm80_vm1, %v5284_v5  ;;  %v4992_v60 = vld [vmem:[%s15229_s0 + $0x1e4] sm:$0xff] }
 0x416   :  { %v5290_v5 = vld [vmem:[%s15229_s0 + $0x1e6] sm:$0xff] }
 0x418   :  { %v4628_v10 = vpop.f32.mrf.mxu2  ;;  %v4777_v15 = vpop.f32.mrf.mxu3 }
 0x419   :  { %v4672_v7 = vadd.f32 %v4628_v10, %v4523_v49  ;;  %v4349_v3 = vpop.f32.mrf.mxu0  ;;  %v4482_v14 = vpop.f32.mrf.mxu1 }
 0x41a   :  { %v4350_v4 = vadd.f32 %v4349_v3, %v13354_v35  ;;  %v5137_v35 = vld [vmem:[%s15229_s0 + $0x1c5] sm:$0xff] }
 0x41b   :  { %v13616_v26 = vadd.f32 %v4777_v15, %v4672_v7  ;;  %v4993_v3 = vld [vmem:[%s15229_s0 + $0x1ec] sm:$0xff] }
 0x41c   :  { %10677 = vmatmul.msk.f32.gmra.mxu0 %vm80_vm1, %v4985_v13  ;;  %10694 = vmatmul.msk.f32.gmra.mxu1 %vm80_vm1, %v4987_v28  ;;  %v4524_v2 = vadd.f32 %v4482_v14, %v4350_v4  ;;  %v5142_v14 = vld [vmem:[%s15229_s0 + $0x1ed] sm:$0xff] }
 0x41d   :  { %10711 = vmatmul.msk.f32.gmra.mxu2 %vm80_vm1, %v5136_v8  ;;  %10728 = vmatmul.msk.f32.gmra.mxu3 %vm80_vm1, %v5285_v37 }
 0x420   :  { %v4631_v31 = vpop.f32.mrf.mxu2  ;;  %v4780_v56 = vpop.f32.mrf.mxu3 }
 0x421   :  { %v4673_v32 = vadd.f32 %v4631_v31, %v4524_v2  ;;  %v4352_v48 = vpop.f32.mrf.mxu0  ;;  %v4485_v51 = vpop.f32.mrf.mxu1  ;;  %v4994_v31 = vld [vmem:[%s15229_s0 + $0x1f4] sm:$0xff] }
 0x423   :  { %v13632_v46 = vadd.f32 %v4780_v56, %v4673_v32  ;;  %v5143_v56 = vld [vmem:[%s15229_s0 + $0x1f5] sm:$0xff] }
 0x424   :  { %10678 = vmatmul.msk.f32.gmra.mxu0 %vm80_vm1, %v4986_v1  ;;  %10695 = vmatmul.msk.f32.gmra.mxu1 %vm80_vm1, %v4988_v11  ;;  %v5292_v32 = vld [vmem:[%s15229_s0 + $0x1f6] sm:$0xff] }
 0x425   :  { %10712 = vmatmul.msk.f32.gmra.mxu2 %vm80_vm1, %v5137_v35  ;;  %10729 = vmatmul.msk.f32.gmra.mxu3 %vm80_vm1, %v5286_v39 }
 0x428   :  { %v4634_v45 = vpop.f32.mrf.mxu2  ;;  %v4783_v20 = vpop.f32.mrf.mxu3 }
 0x429   :  { %v4355_v22 = vpop.f32.mrf.mxu0  ;;  %v4488_v27 = vpop.f32.mrf.mxu1 }
 0x42a   :  { %v4995_v22 = vld [vmem:[%s15229_s0 + $0x1fc] sm:$0xff] }
 0x42b   :  { %v5293_v27 = vld [vmem:[%s15229_s0 + $0x1fe] sm:$0xff] }
 0x42c   :  { %10679 = vmatmul.msk.f32.gmra.mxu0 %vm80_vm1, %v4987_v28  ;;  %10696 = vmatmul.msk.f32.gmra.mxu1 %vm80_vm1, %v4989_v47  ;;  %v5291_v28 = vld [vmem:[%s15229_s0 + $0x1ee] sm:$0xff] }
 0x42d   :  { %10713 = vmatmul.msk.f32.gmra.mxu2 %vm80_vm1, %v5138_v21  ;;  %10730 = vmatmul.msk.f32.gmra.mxu3 %vm80_vm1, %v5287_v33 }
 0x430   :  { %v4637_v24 = vpop.f32.mrf.mxu2  ;;  %v4786_v12 = vpop.f32.mrf.mxu3 }
 0x431   :  { %v4358_v38 = vpop.f32.mrf.mxu0  ;;  %v4491_v62 = vpop.f32.mrf.mxu1 }
 0x432   :  { %v4359_v53 = vadd.f32 %v4358_v38, %v13397_v61  ;;  %v5140_v61 = vld [vmem:[%s15229_s0 + $0x1dd] sm:$0xff] }
 0x434   :  { %10680 = vmatmul.msk.f32.gmra.mxu0 %vm80_vm1, %v4988_v11  ;;  %10697 = vmatmul.msk.f32.gmra.mxu1 %vm80_vm1, %v4990_v30  ;;  %v4527_v44 = vadd.f32 %v4491_v62, %v4359_v53 }
 0x435   :  { %10714 = vmatmul.msk.f32.gmra.mxu2 %vm80_vm1, %v5139_v36  ;;  %10731 = vmatmul.msk.f32.gmra.mxu3 %vm80_vm1, %v5288_v29  ;;  %v4996_v36 = vld [vmem:[%s15229_s0 + $0x204] sm:$0xff] }
 0x436   :  { %v5294_v29 = vld [vmem:[%s15229_s0 + $0x206] sm:$0xff] }
 0x438   :  { %v4640_v13 = vpop.f32.mrf.mxu2  ;;  %v4789_v50 = vpop.f32.mrf.mxu3 }
 0x439   :  { %v4676_v55 = vadd.f32 %v4640_v13, %v4527_v44  ;;  %v4361_v58 = vpop.f32.mrf.mxu0  ;;  %v4494_v59 = vpop.f32.mrf.mxu1  ;;  %v5966_v13 = vld [vmem:[%s15230_s1 + $0x10] sm:$0xf] }
 0x43a   :  { %v4362_v54 = vadd.f32 %v4361_v58, %v13412_v16  ;;  %v5141_v16 = vld [vmem:[%s15229_s0 + $0x1e5] sm:$0xff]  ;;  %10797 = vmatpush.msk.msra.mxu0 %vm129_vm0, %v5966_v13 }
 0x43b   :  { %v13674_v9 = vadd.f32 %v4789_v50, %v4676_v55 }
 0x43c   :  { %10681 = vmatmul.msk.f32.gmra.mxu0 %vm80_vm1, %v4989_v47  ;;  %10698 = vmatmul.msk.f32.gmra.mxu1 %vm80_vm1, %v4991_v40  ;;  %v4528_v52 = vadd.f32 %v4494_v59, %v4362_v54  ;;  %v5295_v54 = vld [vmem:[%s15229_s0 + $0x20e] sm:$0xff] }
 0x43d   :  { %10715 = vmatmul.msk.f32.gmra.mxu2 %vm80_vm1, %v5140_v61  ;;  %10732 = vmatmul.msk.f32.gmra.mxu3 %vm80_vm1, %v5289_v0  ;;  %v4997_v61 = vld [vmem:[%s15229_s0 + $0x20c] sm:$0xff] }
 0x43e   :  { %v5146_v0 = vld [vmem:[%s15229_s0 + $0x20d] sm:$0xff] }
 0x440   :  { %v4643_v19 = vpop.f32.mrf.mxu2  ;;  %v4792_v41 = vpop.f32.mrf.mxu3 }
 0x441   :  { %v4677_v25 = vadd.f32 %v4643_v19, %v4528_v52  ;;  %v4364_v42 = vpop.f32.mrf.mxu0  ;;  %v4497_v1 = vpop.f32.mrf.mxu1 }
 0x442   :  { %v13777_v1 = vld [vmem:[%s15229_s0 + $0x214] sm:$0xff] }
 0x443   :  { %v13690_v23 = vadd.f32 %v4792_v41, %v4677_v25 }
 0x444   :  { %10682 = vmatmul.msk.f32.gmra.mxu0 %vm80_vm1, %v4990_v30  ;;  %10699 = vmatmul.msk.f32.gmra.mxu1 %vm80_vm1, %v4992_v60 }
 0x445   :  { %10716 = vmatmul.msk.f32.gmra.mxu2 %vm80_vm1, %v5141_v16  ;;  %10733 = vmatmul.msk.f32.gmra.mxu3 %vm80_vm1, %v5290_v5  ;;  %v5296_v16 = vld [vmem:[%s15229_s0 + $0x216] sm:$0xff] }
 0x448   :  { %v4646_v49 = vpop.f32.mrf.mxu2  ;;  %v4795_v10 = vpop.f32.mrf.mxu3 }
 0x449   :  { %v4367_v15 = vpop.f32.mrf.mxu0  ;;  %v4500_v7 = vpop.f32.mrf.mxu1 }
 0x44a   :  { %v13793_v7 = vld [vmem:[%s15229_s0 + $0x21c] sm:$0xff] }
 0x44c   :  { %10683 = vmatmul.msk.f32.gmra.mxu0 %vm80_vm1, %v4991_v40  ;;  %10700 = vmatmul.msk.f32.gmra.mxu1 %vm80_vm1, %v4993_v3 }
 0x44d   :  { %10717 = vmatmul.msk.f32.gmra.mxu2 %vm80_vm1, %v5142_v14  ;;  %10734 = vmatmul.msk.f32.gmra.mxu3 %vm80_vm1, %v5291_v28  ;;  %v5297_v14 = vld [vmem:[%s15229_s0 + $0x21e] sm:$0xff] }
 0x450   :  { %v4649_v8 = vpop.f32.mrf.mxu2  ;;  %v4798_v37 = vpop.f32.mrf.mxu3 }
 0x451   :  { %v4370_v4 = vpop.f32.mrf.mxu0  ;;  %v4503_v2 = vpop.f32.mrf.mxu1 }
 0x452   :  { %v4371_v48 = vadd.f32 %v4370_v4, %v13458_v6  ;;  %v5144_v6 = vld [vmem:[%s15229_s0 + $0x1fd] sm:$0xff] }
 0x454   :  { %10684 = vmatmul.msk.f32.gmra.mxu0 %vm80_vm1, %v4992_v60  ;;  %10701 = vmatmul.msk.f32.gmra.mxu1 %vm80_vm1, %v4994_v31  ;;  %v4531_v51 = vadd.f32 %v4503_v2, %v4371_v48  ;;  %v5147_v60 = vld [vmem:[%s15229_s0 + $0x215] sm:$0xff] }
 0x455   :  { %10718 = vmatmul.msk.f32.gmra.mxu2 %vm80_vm1, %v5143_v56  ;;  %10735 = vmatmul.msk.f32.gmra.mxu3 %vm80_vm1, %v5292_v32  ;;  %v5493_v32 = vld [vmem:[%s15229_s0 + $0x201] sm:$0xff]  ;;  %v5828_v48 = vld [vmem:[%s15229_s0 + $0x212] sm:$0xff] }
 0x458   :  { %v4652_v11 = vpop.f32.mrf.mxu2  ;;  %v4801_v35 = vpop.f32.mrf.mxu3 }
 0x459   :  { %v4680_v39 = vadd.f32 %v4652_v11, %v4531_v51  ;;  %v4373_v45 = vpop.f32.mrf.mxu0  ;;  %v4506_v20 = vpop.f32.mrf.mxu1 }
 0x45a   :  { %v4374_v21 = vadd.f32 %v4373_v45, %v13474_v57  ;;  %v5145_v57 = vld [vmem:[%s15229_s0 + $0x205] sm:$0xff] }
 0x45b   :  { %v13732_v47 = vadd.f32 %v4801_v35, %v4680_v39 }
 0x45c   :  { %10685 = vmatmul.msk.f32.gmra.mxu0 %vm80_vm1, %v4993_v3  ;;  %10702 = vmatmul.msk.f32.gmra.mxu1 %vm80_vm1, %v4995_v22  ;;  %v4532_v33 = vadd.f32 %v4506_v20, %v4374_v21  ;;  %v5148_v3 = vld [vmem:[%s15229_s0 + $0x21d] sm:$0xff]  ;;  %v5494_v20 = vld [vmem:[%s15229_s0 + $0x209] sm:$0xff] }
 0x45d   :  { %10719 = vmatmul.msk.f32.gmra.mxu2 %vm80_vm1, %v5144_v6  ;;  %10736 = vmatmul.msk.f32.gmra.mxu3 %vm80_vm1, %v5293_v27  ;;  %v5829_v6 = vld [vmem:[%s15229_s0 + $0x21a] sm:$0xff] }
 0x45e   :  { %v13838_v27 = vld [vmem:[%s15231_s2] ss:$0 sm:$0xff] }
 0x460   :  { %v4655_v24 = vpop.f32.mrf.mxu2  ;;  %v4804_v12 = vpop.f32.mrf.mxu3 }
 0x461   :  { %v4681_v38 = vadd.f32 %v4655_v24, %v4532_v33  ;;  %v4376_v62 = vpop.f32.mrf.mxu0  ;;  %v4509_v30 = vpop.f32.mrf.mxu1 }
 0x462   :  { %v4377_v44 = vadd.f32 %v4376_v62, %v13492_v63 }
 0x463   :  { %v13748_v53 = vadd.f32 %v4804_v12, %v4681_v38 }
 0x464   :  { %10686 = vmatmul.msk.f32.gmra.mxu0 %vm80_vm1, %v4994_v31  ;;  %10703 = vmatmul.msk.f32.gmra.mxu1 %vm80_vm1, %v4996_v36  ;;  %v4533_v50 = vadd.f32 %v4509_v30, %v4377_v44  ;;  %v5481_v30 = vld [vmem:[%s15229_s0 + $0x210] sm:$0xff] }
 0x465   :  { %10720 = vmatmul.msk.f32.gmra.mxu2 %vm80_vm1, %v5145_v57  ;;  %10737 = vmatmul.msk.f32.gmra.mxu3 %vm80_vm1, %v5294_v29  ;;  %v5830_v57 = vld [vmem:[%s15229_s0 + $0x222] sm:$0xff]  ;;  %v6341_v29 = vld [vmem:[%s15230_s1 + $0x1c] sm:$0xf] }
 0x466   :  { %10839 = vmatpush.msk.msra.mxu3 %vm129_vm0, %v6341_v29  ;;  %v5486_v29 = vld [vmem:[%s15229_s0 + $0x238] sm:$0xff] }
 0x468   :  { %v4658_v55 = vpop.f32.mrf.mxu2  ;;  %v4807_v58 = vpop.f32.mrf.mxu3 }
 0x469   :  { %v4682_v59 = vadd.f32 %v4658_v55, %v4533_v50  ;;  %v4379_v40 = vpop.f32.mrf.mxu0  ;;  %v4512_v63 = vpop.f32.mrf.mxu1 }
 0x46b   :  { %v13768_v52 = vadd.f32 %v4807_v58, %v4682_v59 }
 0x46c   :  { %10687 = vmatmul.msk.f32.gmra.mxu0 %vm80_vm1, %v4995_v22  ;;  %10704 = vmatmul.msk.f32.gmra.mxu1 %vm80_vm1, %v4997_v61  ;;  %v5480_v22 = vld [vmem:[%s15229_s0 + $0x208] sm:$0xff] }
 0x46d   :  { %10721 = vmatmul.msk.f32.gmra.mxu2 %vm80_vm1, %v5146_v0  ;;  %10738 = vmatmul.msk.f32.gmra.mxu3 %vm80_vm1, %v5295_v54  ;;  %v5496_v0 = vld [vmem:[%s15229_s0 + $0x219] sm:$0xff] }
 0x46e   :  { %v5482_v54 = vld [vmem:[%s15229_s0 + $0x218] sm:$0xff] }
 0x470   :  { %v4661_v19 = vpop.f32.mrf.mxu2  ;;  %v4810_v41 = vpop.f32.mrf.mxu3 }
 0x471   :  { %v4382_v25 = vpop.f32.mrf.mxu0  ;;  %v4515_v42 = vpop.f32.mrf.mxu1  ;;  %v5831_v19 = vld [vmem:[%s15229_s0 + $0x22a] sm:$0xff] }
 0x474   :  { %10688 = vmatmul.msk.f32.gmra.mxu0 %vm80_vm1, %v4996_v36  ;;  %10705 = vmatmul.msk.f32.gmra.mxu1 %vm80_vm1, %v13777_v1  ;;  %v6216_v36 = vld [vmem:[%s15230_s1 + $0x18] sm:$0xf] }
 0x475   :  { %10722 = vmatmul.msk.f32.gmra.mxu2 %vm80_vm1, %v5147_v60  ;;  %10739 = vmatmul.msk.f32.gmra.mxu3 %vm80_vm1, %v5296_v16 }
 0x476   :  { %10825 = vmatpush.msk.msra.mxu2 %vm129_vm0, %v6216_v36 }
 0x478   :  { %v4664_v5 = vpop.f32.mrf.mxu2  ;;  %v4813_v49 = vpop.f32.mrf.mxu3 }
 0x479   :  { %v4385_v10 = vpop.f32.mrf.mxu0  ;;  %v4518_v15 = vpop.f32.mrf.mxu1 }
 0x47a   :  { %v4386_v28 = vadd.f32 %v4385_v10, %v13546_v18  ;;  %v5479_v18 = vld [vmem:[%s15229_s0 + $0x200] sm:$0xff] }
 0x47c   :  { %10689 = vmatmul.msk.f32.gmra.mxu0 %vm80_vm1, %v4997_v61  ;;  %10706 = vmatmul.msk.f32.gmra.mxu1 %vm80_vm1, %v13793_v7  ;;  %v4536_v8 = vadd.f32 %v4518_v15, %v4386_v28  ;;  %v5832_v28 = vld [vmem:[%s15229_s0 + $0x232] sm:$0xff] }
 0x47d   :  { %10723 = vmatmul.msk.f32.gmra.mxu2 %vm80_vm1, %v5148_v3  ;;  %10740 = vmatmul.msk.f32.gmra.mxu3 %vm80_vm1, %v5297_v14  ;;  %v5483_v14 = vld [vmem:[%s15229_s0 + $0x220] sm:$0xff] }
 0x480   :  { %v4667_v37 = vpop.f32.mrf.mxu2  ;;  %v4816_v4 = vpop.f32.mrf.mxu3 }
 0x481   :  { %v4685_v2 = vadd.f32 %v4667_v37, %v4536_v8  ;;  %v4920_v31 = vpop.f32.mrf.mxu0  ;;  %v5069_v56 = vpop.f32.mrf.mxu1 }
 0x483   :  { %v13816_v51 = vadd.f32 %v4816_v4, %v4685_v2 }
 0x484   :  { %10742 = vmatmul.msk.f32.vlgmr.msrb.gmra.mxu0 %vm80_vm1, %v5493_v32  ;;  %10756 = vmatmul.msk.f32.vlgmr.msrb.gmra.mxu1 %vm80_vm1, %v5479_v18  ;;  %v5498_v18 = vld [vmem:[%s15229_s0 + $0x229] sm:$0xff] }
 0x485   :  { %10770 = vmatmul.msk.f32.vlgmr.msrb.gmra.mxu2 %vm80_vm1, %v13517_v17  ;;  %10784 = vmatmul.msk.f32.vlgmr.msrb.gmra.mxu3 %vm80_vm1, %v5828_v48 }
 0x488   :  { %v5218_v11 = vpop.f32.mrf.mxu2  ;;  %v5367_v35 = vpop.f32.mrf.mxu3 }
 0x489   :  { %v4923_v39 = vpop.f32.mrf.mxu0  ;;  %v5072_v45 = vpop.f32.mrf.mxu1  ;;  %v5833_v11 = vld [vmem:[%s15229_s0 + $0x23a] sm:$0xff] }
 0x48a   :  { %v4969_v17 = vadd.f32 %v4923_v39, %v13600_v34  ;;  %v5495_v34 = vld [vmem:[%s15229_s0 + $0x211] sm:$0xff] }
 0x48c   :  { %10743 = vmatmul.msk.f32.gmra.mxu0 %vm80_vm1, %v5494_v20  ;;  %10757 = vmatmul.msk.f32.gmra.mxu1 %vm80_vm1, %v5480_v22  ;;  %v5118_v21 = vadd.f32 %v5072_v45, %v4969_v17  ;;  %v5499_v17 = vld [vmem:[%s15229_s0 + $0x231] sm:$0xff] }
 0x48d   :  { %10771 = vmatmul.msk.f32.gmra.mxu2 %vm80_vm1, %v13535_v43  ;;  %10785 = vmatmul.msk.f32.gmra.mxu3 %vm80_vm1, %v5829_v6  ;;  %v6091_v43 = vld [vmem:[%s15230_s1 + $0x14] sm:$0xf] }
 0x48e   :  { %10811 = vmatpush.msk.msra.mxu1 %vm129_vm0, %v6091_v43 }
 0x490   :  { %v5221_v33 = vpop.f32.mrf.mxu2  ;;  %v5370_v24 = vpop.f32.mrf.mxu3 }
 0x491   :  { %v5267_v12 = vadd.f32 %v5221_v33, %v5118_v21  ;;  %v4926_v38 = vpop.f32.mrf.mxu0  ;;  %v5075_v62 = vpop.f32.mrf.mxu1  ;;  %v5485_v21 = vld [vmem:[%s15229_s0 + $0x230] sm:$0xff]  ;;  %v5834_v33 = vld [vmem:[%s15229_s0 + $0x242] sm:$0xff] }
 0x492   :  { %v4970_v13 = vadd.f32 %v4926_v38, %v13616_v26 }
 0x493   :  { %v5416_v44 = vadd.f32 %v5370_v24, %v5267_v12 }
 0x494   :  { %10744 = vmatmul.msk.f32.gmra.mxu0 %vm80_vm1, %v5495_v34  ;;  %10758 = vmatmul.msk.f32.gmra.mxu1 %vm80_vm1, %v5481_v30  ;;  %v5119_v58 = vadd.f32 %v5075_v62, %v4970_v13 }
 0x495   :  { %v5432_v50 = vadd.f32 %v13838_v27, %v5416_v44  ;;  %10772 = vmatmul.msk.f32.gmra.mxu2 %vm80_vm1, %v5828_v48  ;;  %10786 = vmatmul.msk.f32.gmra.mxu3 %vm80_vm1, %v5830_v57  ;;  %v5484_v48 = vld [vmem:[%s15229_s0 + $0x228] sm:$0xff] }
 0x496   :  { %v5835_v44 = vld [vmem:[%s15229_s0 + $0x24a] sm:$0xff] }
 0x497   :  { %v5448_v55 = vmax.f32 %v5432_v50, 0.0 }
 0x498   :  { %v5224_v59 = vpop.f32.mrf.mxu2  ;;  %v5373_v40 = vpop.f32.mrf.mxu3 }
 0x499   :  { %5464 = vst [vmem:[#allocation2 + $0x188] sm:$0xff] %v5448_v55  ;;  %v5268_v63 = vadd.f32 %v5224_v59, %v5119_v58  ;;  %v4929_v61 = vpop.f32.mrf.mxu0  ;;  %v5078_v26 = vpop.f32.mrf.mxu1 }
 0x49a   :  { %v4971_v25 = vadd.f32 %v4929_v61, %v13632_v46  ;;  %v5497_v46 = vld [vmem:[%s15229_s0 + $0x221] sm:$0xff] }
 0x49b   :  { %v5417_v41 = vadd.f32 %v5373_v40, %v5268_v63 }
 0x49c   :  { %10745 = vmatmul.msk.f32.gmra.mxu0 %vm80_vm1, %v5496_v0  ;;  %10759 = vmatmul.msk.f32.gmra.mxu1 %vm80_vm1, %v5482_v54  ;;  %v5120_v16 = vadd.f32 %v5078_v26, %v4971_v25  ;;  %v5487_v54 = vld [vmem:[%s15229_s0 + $0x240] sm:$0xff] }
 0x49d   :  { %v5433_v42 = vadd.f32 %v13838_v27, %v5417_v41  ;;  %10773 = vmatmul.msk.f32.gmra.mxu2 %vm80_vm1, %v5829_v6  ;;  %10787 = vmatmul.msk.f32.gmra.mxu3 %vm80_vm1, %v5831_v19 }
 0x49f   :  { %v5449_v60 = vmax.f32 %v5433_v42, 0.0 }
 0x4a0   :  { %v5227_v5 = vpop.f32.mrf.mxu2  ;;  %v5376_v49 = vpop.f32.mrf.mxu3 }
 0x4a1   :  { %5465 = vst [vmem:[#allocation2 + $0x190] sm:$0xff] %v5449_v60  ;;  %v5269_v10 = vadd.f32 %v5227_v5, %v5120_v16  ;;  %v4932_v15 = vpop.f32.mrf.mxu0  ;;  %v5081_v3 = vpop.f32.mrf.mxu1 }
 0x4a2   :  { %v5488_v15 = vld [vmem:[%s15229_s0 + $0x248] sm:$0xff]  ;;  %v5837_v3 = vld [vmem:[%s15229_s0 + $0x25a] sm:$0xff] }
 0x4a3   :  { %v5418_v8 = vadd.f32 %v5376_v49, %v5269_v10  ;;  %v5502_v10 = vld [vmem:[%s15229_s0 + $0x249] sm:$0xff] }
 0x4a4   :  { %10746 = vmatmul.msk.f32.gmra.mxu0 %vm80_vm1, %v5497_v46  ;;  %10760 = vmatmul.msk.f32.gmra.mxu1 %vm80_vm1, %v5483_v14 }
 0x4a5   :  { %v5434_v37 = vadd.f32 %v13838_v27, %v5418_v8  ;;  %10774 = vmatmul.msk.f32.gmra.mxu2 %vm80_vm1, %v5830_v57  ;;  %10788 = vmatmul.msk.f32.gmra.mxu3 %vm80_vm1, %v5832_v28  ;;  %v5500_v57 = vld [vmem:[%s15229_s0 + $0x239] sm:$0xff] }
 0x4a7   :  { %v5450_v4 = vmax.f32 %v5434_v37, 0.0 }
 0x4a8   :  { %v5230_v2 = vpop.f32.mrf.mxu2  ;;  %v5379_v31 = vpop.f32.mrf.mxu3 }
 0x4a9   :  { %5466 = vst [vmem:[#allocation2 + $0x198] sm:$0xff] %v5450_v4  ;;  %v4935_v56 = vpop.f32.mrf.mxu0  ;;  %v5084_v32 = vpop.f32.mrf.mxu1  ;;  %v5503_v2 = vld [vmem:[%s15229_s0 + $0x251] sm:$0xff] }
 0x4aa   :  { %v5489_v31 = vld [vmem:[%s15229_s0 + $0x250] sm:$0xff]  ;;  %v5838_v56 = vld [vmem:[%s15229_s0 + $0x262] sm:$0xff] }
 0x4ac   :  { %10747 = vmatmul.msk.f32.gmra.mxu0 %vm80_vm1, %v5498_v18  ;;  %10761 = vmatmul.msk.f32.gmra.mxu1 %vm80_vm1, %v5484_v48 }
 0x4ad   :  { %10775 = vmatmul.msk.f32.gmra.mxu2 %vm80_vm1, %v5831_v19  ;;  %10789 = vmatmul.msk.f32.gmra.mxu3 %vm80_vm1, %v5833_v11  ;;  %v5836_v19 = vld [vmem:[%s15229_s0 + $0x252] sm:$0xff] }
 0x4b0   :  { %v6716_v35 = vld [vmem:[#allocation2 + $0x18c] ss:$2 sm:$0xff]  ;;  %v5233_v39 = vpop.f32.mrf.mxu2  ;;  %v5382_v45 = vpop.f32.mrf.mxu3 }
 0x4b1   :  { %v6718_v20 = vrot.slane %v6716_v35, 7  ;;  %v4938_v22 = vpop.f32.mrf.mxu0  ;;  %v5087_v6 = vpop.f32.mrf.mxu1 }
 0x4b2   :  { %v4974_v24 = vadd.f32 %v4938_v22, %v13674_v9  ;;  %v5504_v22 = vld [vmem:[%s15229_s0 + $0x259] sm:$0xff] }
 0x4b3   :  { %v6720_v34 = vsel %vm6625_vm2, 0.0, %v6718_v20  ;;  %v6721_v12 = vsel %vm6625_vm2, %v6718_v20, 0.0 }
 0x4b4   :  { %10748 = vmatmul.msk.f32.gmra.mxu0 %vm80_vm1, %v5499_v17  ;;  %10762 = vmatmul.msk.f32.gmra.mxu1 %vm80_vm1, %v5485_v21  ;;  %6722 = vst [vmem:[#allocation3 + $0x82] sm:$0xff] %v6720_v34  ;;  %v5123_v38 = vadd.f32 %v5087_v6, %v4974_v24  ;;  %v5490_v6 = vld [vmem:[%s15229_s0 + $0x258] sm:$0xff]  ;;  %v6466_v17 = vld [vmem:[%s15230_s1 + $0x20] sm:$0xf]  ;;  %v5839_v21 = vld [vmem:[%s15229_s0 + $0x26a] sm:$0xff] }
 0x4b5   :  { %10776 = vmatmul.msk.f32.gmra.mxu2 %vm80_vm1, %v5832_v28  ;;  %10790 = vmatmul.msk.f32.gmra.mxu3 %vm80_vm1, %v5834_v33  ;;  %6723 = vst [vmem:[#allocation3 + $0x8a] sm:$0x3] %v6721_v12 }
 0x4b6   :  { %10853 = vmatpush.msk.msrb.mxu0 %vm129_vm0, %v6466_v17 }
 0x4b8   :  { %v5236_v62 = vpop.f32.mrf.mxu2  ;;  %v5385_v30 = vpop.f32.mrf.mxu3 }
 0x4b9   :  { %v5272_v43 = vadd.f32 %v5236_v62, %v5123_v38  ;;  %v4941_v36 = vpop.f32.mrf.mxu0  ;;  %v5090_v9 = vpop.f32.mrf.mxu1 }
 0x4ba   :  { %v4975_v50 = vadd.f32 %v4941_v36, %v13690_v23  ;;  %v5501_v23 = vld [vmem:[%s15229_s0 + $0x241] sm:$0xff] }
 0x4bb   :  { %v5421_v13 = vadd.f32 %v5385_v30, %v5272_v43 }
 0x4bc   :  { %10749 = vmatmul.msk.f32.gmra.mxu0 %vm80_vm1, %v5500_v57  ;;  %10763 = vmatmul.msk.f32.gmra.mxu1 %vm80_vm1, %v5486_v29  ;;  %v5124_v59 = vadd.f32 %v5090_v9, %v4975_v50  ;;  %v5491_v57 = vld [vmem:[%s15229_s0 + $0x260] sm:$0x3]  ;;  %v5715_v29 = vld [vmem:[%s15229_s0 + $0x262] sm:$0x3] }
 0x4bd   :  { %v5437_v55 = vadd.f32 %v13838_v27, %v5421_v13  ;;  %10777 = vmatmul.msk.f32.gmra.mxu2 %vm80_vm1, %v5833_v11  ;;  %10791 = vmatmul.msk.f32.gmra.mxu3 %vm80_vm1, %v5835_v44 }
 0x4bf   :  { %v5453_v58 = vmax.f32 %v5437_v55, 0.0 }
 0x4c0   :  { %v5239_v40 = vpop.f32.mrf.mxu2  ;;  %v5388_v63 = vpop.f32.mrf.mxu3 }
 0x4c1   :  { %5469 = vst [vmem:[#allocation2 + $0x1b0] sm:$0xff] %v5453_v58  ;;  %v5273_v61 = vadd.f32 %v5239_v40, %v5124_v59  ;;  %v4944_v26 = vpop.f32.mrf.mxu0  ;;  %v5093_v0 = vpop.f32.mrf.mxu1 }
 0x4c3   :  { %v5422_v41 = vadd.f32 %v5388_v63, %v5273_v61 }
 0x4c4   :  { %10750 = vmatmul.msk.f32.gmra.mxu0 %vm80_vm1, %v5501_v23  ;;  %10764 = vmatmul.msk.f32.gmra.mxu1 %vm80_vm1, %v5487_v54  ;;  %v6203_v23 = vld [vmem:[%s15229_s0 + $0x224] sm:$0xff] }
 0x4c5   :  { %v5438_v25 = vadd.f32 %v13838_v27, %v5422_v41  ;;  %10778 = vmatmul.msk.f32.gmra.mxu2 %vm80_vm1, %v5834_v33  ;;  %10792 = vmatmul.msk.f32.gmra.mxu3 %vm80_vm1, %v5836_v19  ;;  %v6328_v54 = vld [vmem:[%s15229_s0 + $0x225] sm:$0xff] }
 0x4c6   :  { %v6803_v41 = vld [vmem:[%s15232_s3 + $0x8] sm:$0xff] }
 0x4c7   :  { %v5454_v42 = vmax.f32 %v5438_v25, 0.0  ;;  %6868 = vmatpush.msrb.mxu1 %v6803_v41 }
 0x4c8   :  { %v5242_v60 = vpop.f32.mrf.mxu2  ;;  %v5391_v16 = vpop.f32.mrf.mxu3 }
 0x4c9   :  { %5470 = vst [vmem:[#allocation2 + $0x1b8] sm:$0xff] %v5454_v42  ;;  %v4947_v5 = vpop.f32.mrf.mxu0  ;;  %v5096_v49 = vpop.f32.mrf.mxu1 }
 0x4cc   :  { %10751 = vmatmul.msk.f32.gmra.mxu0 %vm80_vm1, %v5502_v10  ;;  %10765 = vmatmul.msk.f32.gmra.mxu1 %vm80_vm1, %v5488_v15  ;;  %v5954_v10 = vld [vmem:[%s15229_s0 + $0x21b] sm:$0xff]  ;;  %v6329_v15 = vld [vmem:[%s15229_s0 + $0x22d] sm:$0xff] }
 0x4cd   :  { %10779 = vmatmul.msk.f32.gmra.mxu2 %vm80_vm1, %v5835_v44  ;;  %10793 = vmatmul.msk.f32.gmra.mxu3 %vm80_vm1, %v5837_v3  ;;  %v5840_v44 = vld [vmem:[%s15229_s0 + $0x272] sm:$0x3] }
 0x4d0   :  { %v6725_v46 = vld [vmem:[#allocation2 + $0x1b0] ss:$2 sm:$0xff]  ;;  %v5245_v14 = vpop.f32.mrf.mxu2  ;;  %v5394_v28 = vpop.f32.mrf.mxu3 }
 0x4d1   :  { %v6727_v8 = vrot.slane %v6725_v46, 7  ;;  %v4950_v37 = vpop.f32.mrf.mxu0  ;;  %v5099_v4 = vpop.f32.mrf.mxu1  ;;  %v7047_v46 = vld [vmem:[%s15232_s3 + $0x10] sm:$0xff] }
 0x4d2   :  { %v4978_v32 = vadd.f32 %v4950_v37, %v13732_v47  ;;  %7111 = vmatpush.msrb.mxu3 %v7047_v46 }
 0x4d3   :  { %v6729_v18 = vsel %vm6625_vm2, 0.0, %v6727_v8  ;;  %v6730_v48 = vsel %vm6625_vm2, %v6727_v8, 0.0 }
 0x4d4   :  { %10752 = vmatmul.msk.f32.gmra.mxu0 %vm80_vm1, %v5503_v2  ;;  %10766 = vmatmul.msk.f32.gmra.mxu1 %vm80_vm1, %v5489_v31  ;;  %6731 = vst [vmem:[#allocation3 + $0x8c] sm:$0xff] %v6729_v18  ;;  %v5127_v11 = vadd.f32 %v5099_v4, %v4978_v32  ;;  %v5955_v31 = vld [vmem:[%s15229_s0 + $0x223] sm:$0xff] }
 0x4d5   :  { %10780 = vmatmul.msk.f32.gmra.mxu2 %vm80_vm1, %v5836_v19  ;;  %10794 = vmatmul.msk.f32.gmra.mxu3 %vm80_vm1, %v5838_v56  ;;  %6732 = vst [vmem:[#allocation3 + $0x94] sm:$0x3] %v6730_v48  ;;  %v6330_v56 = vld [vmem:[%s15229_s0 + $0x235] sm:$0xff] }
 0x4d8   :  { %v5248_v35 = vpop.f32.mrf.mxu2  ;;  %v5397_v39 = vpop.f32.mrf.mxu3 }
 0x4d9   :  { %v5276_v45 = vadd.f32 %v5248_v35, %v5127_v11  ;;  %v4953_v20 = vpop.f32.mrf.mxu0  ;;  %v5102_v47 = vpop.f32.mrf.mxu1 }
 0x4da   :  { %v4979_v24 = vadd.f32 %v4953_v20, %v13748_v53  ;;  %v5505_v53 = vld [vmem:[%s15229_s0 + $0x261] sm:$0x3] }
 0x4db   :  { %v5425_v33 = vadd.f32 %v5397_v39, %v5276_v45 }
 0x4dc   :  { %10753 = vmatmul.msk.f32.gmra.mxu0 %vm80_vm1, %v5504_v22  ;;  %10767 = vmatmul.msk.f32.gmra.mxu1 %vm80_vm1, %v5490_v6  ;;  %v5128_v38 = vadd.f32 %v5102_v47, %v4979_v24  ;;  %v5956_v47 = vld [vmem:[%s15229_s0 + $0x22b] sm:$0xff]  ;;  %v6206_v22 = vld [vmem:[%s15229_s0 + $0x23c] sm:$0xff] }
 0x4dd   :  { %v5441_v34 = vadd.f32 %v13838_v27, %v5425_v33  ;;  %10781 = vmatmul.msk.f32.gmra.mxu2 %vm80_vm1, %v5837_v3  ;;  %10795 = vmatmul.msk.f32.gmra.mxu3 %vm80_vm1, %v5839_v21  ;;  %v6786_v3 = vld [vmem:[%s15232_s3] sm:$0xff] }
 0x4de   :  { %6981 = vmatpush.msrb.mxu2 %v6786_v3  ;;  %v6331_v6 = vld [vmem:[%s15229_s0 + $0x23d] sm:$0xff] }
 0x4df   :  { %v5457_v12 = vmax.f32 %v5441_v34, 0.0 }
 0x4e0   :  { %v5251_v62 = vpop.f32.mrf.mxu2  ;;  %v5400_v30 = vpop.f32.mrf.mxu3 }
 0x4e1   :  { %5473 = vst [vmem:[#allocation2 + $0x1d0] sm:$0xff] %v5457_v12  ;;  %v5277_v43 = vadd.f32 %v5251_v62, %v5128_v38  ;;  %v4956_v36 = vpop.f32.mrf.mxu0  ;;  %v5105_v9 = vpop.f32.mrf.mxu1 }
 0x4e2   :  { %v4980_v50 = vadd.f32 %v4956_v36, %v13768_v52  ;;  %v5953_v52 = vld [vmem:[%s15229_s0 + $0x213] sm:$0xff]  ;;  %v6332_v36 = vld [vmem:[%s15229_s0 + $0x245] sm:$0xff] }
 0x4e3   :  { %v5426_v13 = vadd.f32 %v5400_v30, %v5277_v43  ;;  %v5957_v43 = vld [vmem:[%s15229_s0 + $0x233] sm:$0xff] }
 0x4e4   :  { %10754 = vmatmul.msk.f32.gmra.mxu0 %vm80_vm1, %v5505_v53  ;;  %10768 = vmatmul.msk.f32.gmra.mxu1 %vm80_vm1, %v5491_v57  ;;  %v5129_v59 = vadd.f32 %v5105_v9, %v4980_v50  ;;  %v6208_v50 = vld [vmem:[%s15229_s0 + $0x24c] sm:$0xff] }
 0x4e5   :  { %v5442_v55 = vadd.f32 %v13838_v27, %v5426_v13  ;;  %10782 = vmatmul.msk.f32.gmra.mxu2 %vm80_vm1, %v5715_v29  ;;  %10796 = vmatmul.msk.f32.gmra.mxu3 %vm80_vm1, %v5840_v44  ;;  %v5958_v13 = vld [vmem:[%s15229_s0 + $0x23b] sm:$0xff] }
 0x4e7   :  { %v5458_v58 = vmax.f32 %v5442_v55, 0.0  ;;  %v6333_v55 = vld [vmem:[%s15229_s0 + $0x24d] sm:$0xff] }
 0x4e8   :  { %v5254_v40 = vpop.f32.mrf.mxu2  ;;  %v5403_v63 = vpop.f32.mrf.mxu3 }
 0x4e9   :  { %5474 = vst [vmem:[#allocation2 + $0x1d8] sm:$0xff] %v5458_v58  ;;  %v5278_v61 = vadd.f32 %v5254_v40, %v5129_v59  ;;  %v4959_v26 = vpop.f32.mrf.mxu0  ;;  %v5108_v0 = vpop.f32.mrf.mxu1 }
 0x4ea   :  { %v6209_v26 = vld [vmem:[%s15229_s0 + $0x254] sm:$0xff] }
 0x4eb   :  { %v5427_v19 = vadd.f32 %v5403_v63, %v5278_v61  ;;  %v5959_v61 = vld [vmem:[%s15229_s0 + $0x243] sm:$0xff]  ;;  %v6334_v0 = vld [vmem:[%s15229_s0 + $0x255] sm:$0xff] }
 0x4ec   :  { %10798 = vmatmul.msk.f32.vlgmr.msra.gmra.mxu0 %vm80_vm1, %v5953_v52  ;;  %10812 = vmatmul.msk.f32.vlgmr.msra.gmra.mxu1 %vm80_vm1, %v13777_v1  ;;  %v6204_v1 = vld [vmem:[%s15229_s0 + $0x22c] sm:$0xff] }
 0x4ed   :  { %v5443_v25 = vadd.f32 %v13838_v27, %v5427_v19  ;;  %10826 = vmatmul.msk.f32.vlgmr.msra.gmra.mxu2 %vm80_vm1, %v6203_v23  ;;  %10840 = vmatmul.msk.f32.vlgmr.msra.gmra.mxu3 %vm80_vm1, %v6328_v54 }
 0x4ef   :  { %v5459_v42 = vmax.f32 %v5443_v25, 0.0 }
 0x4f0   :  { %v5257_v60 = vpop.f32.mrf.mxu2  ;;  %v5406_v16 = vpop.f32.mrf.mxu3 }
 0x4f1   :  { %5475 = vst [vmem:[#allocation2 + $0x1e0] sm:$0xff] %v5459_v42  ;;  %v4962_v5 = vpop.f32.mrf.mxu0  ;;  %v5111_v49 = vpop.f32.mrf.mxu1  ;;  %v5960_v42 = vld [vmem:[%s15229_s0 + $0x24b] sm:$0xff]  ;;  %v6210_v60 = vld [vmem:[%s15229_s0 + $0x25c] sm:$0xff] }
 0x4f2   :  { %v6335_v16 = vld [vmem:[%s15229_s0 + $0x25d] sm:$0xff] }
 0x4f4   :  { %10799 = vmatmul.msk.f32.gmra.mxu0 %vm80_vm1, %v5954_v10  ;;  %10813 = vmatmul.msk.f32.gmra.mxu1 %vm80_vm1, %v13793_v7  ;;  %v6205_v7 = vld [vmem:[%s15229_s0 + $0x234] sm:$0xff] }
 0x4f5   :  { %10827 = vmatmul.msk.f32.gmra.mxu2 %vm80_vm1, %v6204_v1  ;;  %10841 = vmatmul.msk.f32.gmra.mxu3 %vm80_vm1, %v6329_v15 }
 0x4f8   :  { %v6734_v14 = vld [vmem:[#allocation2 + $0x1d4] ss:$2 sm:$0xff]  ;;  %v5260_v28 = vpop.f32.mrf.mxu2  ;;  %v5409_v8 = vpop.f32.mrf.mxu3 }
 0x4f9   :  { %v6736_v37 = vrot.slane %v6734_v14, 7  ;;  %v4965_v4 = vpop.f32.mrf.mxu0  ;;  %v5114_v2 = vpop.f32.mrf.mxu1  ;;  %v5961_v14 = vld [vmem:[%s15229_s0 + $0x253] sm:$0xff]  ;;  %v6211_v28 = vld [vmem:[%s15229_s0 + $0x264] sm:$0xff] }
 0x4fa   :  { %v4983_v32 = vadd.f32 %v4965_v4, %v13816_v51  ;;  %v6336_v8 = vld [vmem:[%s15229_s0 + $0x265] sm:$0xff] }
 0x4fb   :  { %v6738_v18 = vsel %vm6625_vm2, 0.0, %v6736_v37  ;;  %v6739_v48 = vsel %vm6625_vm2, %v6736_v37, 0.0 }
 0x4fc   :  { %10800 = vmatmul.msk.f32.gmra.mxu0 %vm80_vm1, %v5955_v31  ;;  %10814 = vmatmul.msk.f32.gmra.mxu1 %vm80_vm1, %v6203_v23  ;;  %6740 = vst [vmem:[#allocation3 + $0x96] sm:$0xff] %v6738_v18  ;;  %v5132_v11 = vadd.f32 %v5114_v2, %v4983_v32  ;;  %v5962_v18 = vld [vmem:[%s15229_s0 + $0x25b] sm:$0xff] }
 0x4fd   :  { %10828 = vmatmul.msk.f32.gmra.mxu2 %vm80_vm1, %v6205_v7  ;;  %10842 = vmatmul.msk.f32.gmra.mxu3 %vm80_vm1, %v6330_v56  ;;  %6741 = vst [vmem:[#allocation3 + $0x9e] sm:$0x3] %v6739_v48  ;;  %v6212_v48 = vld [vmem:[%s15229_s0 + $0x26c] sm:$0xff] }
 0x500   :  { %v5263_v35 = vpop.f32.mrf.mxu2  ;;  %v5412_v39 = vpop.f32.mrf.mxu3 }
 0x501   :  { %v5281_v45 = vadd.f32 %v5263_v35, %v5132_v11  ;;  %v5566_v20 = vpop.f32.mrf.mxu0  ;;  %v5664_v51 = vpop.f32.mrf.mxu1  ;;  %v6337_v11 = vld [vmem:[%s15229_s0 + $0x26d] sm:$0xff] }
 0x502   :  { %v5665_v24 = vadd.f32 %v5664_v51, %v5566_v20 }
 0x503   :  { %v5430_v17 = vadd.f32 %v5412_v39, %v5281_v45  ;;  %v7193_v39 = vld [vmem:[%s15232_s3 + $0x18] sm:$0xff] }
 0x504   :  { %10801 = vmatmul.msk.f32.gmra.mxu0 %vm80_vm1, %v5956_v47  ;;  %10815 = vmatmul.msk.f32.gmra.mxu1 %vm80_vm1, %v6204_v1 }
 0x505   :  { %v5446_v21 = vadd.f32 %v13838_v27, %v5430_v17  ;;  %10829 = vmatmul.msk.f32.gmra.mxu2 %vm80_vm1, %v6206_v22  ;;  %10843 = vmatmul.msk.f32.gmra.mxu3 %vm80_vm1, %v6331_v6  ;;  %v6207_v27 = vld [vmem:[%s15229_s0 + $0x244] sm:$0xff]  ;;  %v6213_v6 = vld [vmem:[%s15229_s0 + $0x274] sm:$0xff] }
 0x506   :  { %7257 = vmatpush.msra.mxu0 %v7193_v39  ;;  %v6338_v17 = vld [vmem:[%s15229_s0 + $0x275] sm:$0xff]  ;;  %v6456_v39 = vld [vmem:[%s15229_s0 + $0x23e] sm:$0xff] }
 0x507   :  { %v5462_v33 = vmax.f32 %v5446_v21, 0.0 }
 0x508   :  { %v5776_v34 = vpop.f32.mrf.mxu2  ;;  %v5901_v12 = vpop.f32.mrf.mxu3 }
 0x509   :  { %5478 = vst [vmem:[#allocation2 + $0x1f8] sm:$0xff] %v5462_v33  ;;  %v5815_v38 = vadd.f32 %v5776_v34, %v5665_v24  ;;  %v5569_v62 = vpop.f32.mrf.mxu0  ;;  %v5667_v30 = vpop.f32.mrf.mxu1 }
 0x50a   :  { %v6339_v62 = vld [vmem:[%s15229_s0 + $0x27d] sm:$0xff] }
 0x50b   :  { %v14100_v9 = vadd.f32 %v5901_v12, %v5815_v38  ;;  %v5964_v12 = vld [vmem:[%s15229_s0 + $0x26b] sm:$0xff]  ;;  %v6214_v38 = vld [vmem:[%s15229_s0 + $0x27c] sm:$0xff] }
 0x50c   :  { %10802 = vmatmul.msk.f32.gmra.mxu0 %vm80_vm1, %v5957_v43  ;;  %10816 = vmatmul.msk.f32.gmra.mxu1 %vm80_vm1, %v6205_v7 }
 0x50d   :  { %10830 = vmatmul.msk.f32.gmra.mxu2 %vm80_vm1, %v6207_v27  ;;  %10844 = vmatmul.msk.f32.gmra.mxu3 %vm80_vm1, %v6332_v36 }
 0x510   :  { %v5779_v53 = vpop.f32.mrf.mxu2  ;;  %v5904_v57 = vpop.f32.mrf.mxu3 }
 0x511   :  { %v5572_v29 = vpop.f32.mrf.mxu0  ;;  %v5670_v44 = vpop.f32.mrf.mxu1 }
 0x512   :  { %v5965_v29 = vld [vmem:[%s15229_s0 + $0x273] sm:$0x3] }
 0x513   :  { %v6090_v44 = vld [vmem:[%s15229_s0 + $0x274] sm:$0x3] }
 0x514   :  { %10803 = vmatmul.msk.f32.gmra.mxu0 %vm80_vm1, %v5958_v13  ;;  %10817 = vmatmul.msk.f32.gmra.mxu1 %vm80_vm1, %v6206_v22  ;;  %v5963_v22 = vld [vmem:[%s15229_s0 + $0x263] sm:$0xff] }
 0x515   :  { %10831 = vmatmul.msk.f32.gmra.mxu2 %vm80_vm1, %v6208_v50  ;;  %10845 = vmatmul.msk.f32.gmra.mxu3 %vm80_vm1, %v6333_v55  ;;  %v6215_v13 = vld [vmem:[%s15229_s0 + $0x284] sm:$0x3] }
 0x518   :  { %v5782_v58 = vpop.f32.mrf.mxu2  ;;  %v5907_v59 = vpop.f32.mrf.mxu3 }
 0x519   :  { %v5575_v40 = vpop.f32.mrf.mxu0  ;;  %v5673_v63 = vpop.f32.mrf.mxu1 }
 0x51a   :  { %v5674_v52 = vadd.f32 %v5673_v63, %v5575_v40 }
 0x51c   :  { %10804 = vmatmul.msk.f32.gmra.mxu0 %vm80_vm1, %v5959_v61  ;;  %10818 = vmatmul.msk.f32.gmra.mxu1 %vm80_vm1, %v6207_v27 }
 0x51d   :  { %10832 = vmatmul.msk.f32.gmra.mxu2 %vm80_vm1, %v6209_v26  ;;  %10846 = vmatmul.msk.f32.gmra.mxu3 %vm80_vm1, %v6334_v0  ;;  %v6453_v0 = vld [vmem:[%s15229_s0 + $0x226] sm:$0xff] }
 0x520   :  { %v5785_v23 = vpop.f32.mrf.mxu2  ;;  %v5910_v54 = vpop.f32.mrf.mxu3 }
 0x521   :  { %v5818_v19 = vadd.f32 %v5785_v23, %v5674_v52  ;;  %v5578_v41 = vpop.f32.mrf.mxu0  ;;  %v5676_v25 = vpop.f32.mrf.mxu1  ;;  %v6787_v52 = vld [vmem:[#allocation3 + $0x1] sm:$0xff] }
 0x522   :  { %v5677_v49 = vadd.f32 %v5676_v25, %v5578_v41  ;;  %v7031_v23 = vld [vmem:[#allocation3 + $0x2] sm:$0xff] }
 0x523   :  { %v14141_v5 = vadd.f32 %v5910_v54, %v5818_v19  ;;  %v14234_v19 = vld [vmem:[%s15232_s3 + $0x20] sm:$0xff]  ;;  %v14236_v41 = vld [vmem:[#allocation3] sm:$0xff] }
 0x524   :  { %10805 = vmatmul.msk.f32.gmra.mxu0 %vm80_vm1, %v5960_v42  ;;  %10819 = vmatmul.msk.f32.gmra.mxu1 %vm80_vm1, %v6208_v50  ;;  %v6340_v50 = vld [vmem:[%s15229_s0 + $0x285] sm:$0x3] }
 0x525   :  { %10833 = vmatmul.msk.f32.gmra.mxu2 %vm80_vm1, %v6210_v60  ;;  %10847 = vmatmul.msk.f32.gmra.mxu3 %vm80_vm1, %v6335_v16 }
 0x526   :  { %7403 = vmatpush.msra.mxu1 %v14234_v19 }
 0x528   :  { %v5788_v10 = vpop.f32.mrf.mxu2  ;;  %v5913_v1 = vpop.f32.mrf.mxu3 }
 0x529   :  { %v5819_v15 = vadd.f32 %v5788_v10, %v5677_v49  ;;  %v5581_v3 = vpop.f32.mrf.mxu0  ;;  %v5679_v46 = vpop.f32.mrf.mxu1  ;;  %v6454_v49 = vld [vmem:[%s15229_s0 + $0x22e] sm:$0xff] }
 0x52a   :  { %v5680_v4 = vadd.f32 %v5679_v46, %v5581_v3  ;;  %v6788_v10 = vld [vmem:[#allocation3 + $0x9] sm:$0xff] }
 0x52b   :  { %v14156_v37 = vadd.f32 %v5913_v1, %v5819_v15  ;;  %v7485_v1 = vld [vmem:[%s15232_s3 + $0x28] sm:$0xff]  ;;  %v6771_v15 = vld [vmem:[#allocation3 + $0x8] sm:$0xff] }
 0x52c   :  { %10806 = vmatmul.msk.f32.gmra.mxu0 %vm80_vm1, %v5961_v14  ;;  %10820 = vmatmul.msk.f32.gmra.mxu1 %vm80_vm1, %v6209_v26  ;;  %v7631_v3 = vld [vmem:[%s15232_s3 + $0x30] sm:$0xff] }
 0x52d   :  { %10834 = vmatmul.msk.f32.gmra.mxu2 %vm80_vm1, %v6211_v28  ;;  %10848 = vmatmul.msk.f32.gmra.mxu3 %vm80_vm1, %v6336_v8  ;;  %v14254_v46 = vld [vmem:[#allocation3 + $0xa] sm:$0xff] }
 0x52e   :  { %7549 = vmatpush.msra.mxu2 %v7485_v1  ;;  %7695 = vmatpush.msra.mxu3 %v7631_v3  ;;  %v6794_v1 = vld [vmem:[#allocation3 + $0x39] sm:$0xff] }
 0x52f   :  { %v6777_v3 = vld [vmem:[#allocation3 + $0x38] sm:$0xff] }
 0x530   :  { %v5791_v2 = vpop.f32.mrf.mxu2  ;;  %v5916_v31 = vpop.f32.mrf.mxu3 }
 0x531   :  { %v5820_v7 = vadd.f32 %v5791_v2, %v5680_v4  ;;  %v5584_v56 = vpop.f32.mrf.mxu0  ;;  %v5682_v32 = vpop.f32.mrf.mxu1  ;;  %v6455_v2 = vld [vmem:[%s15229_s0 + $0x236] sm:$0xff] }
 0x532   :  { %v14263_v56 = vld [vmem:[#allocation3 + $0x12] sm:$0xff] }
 0x533   :  { %v14171_v35 = vadd.f32 %v5916_v31, %v5820_v7  ;;  %v6789_v31 = vld [vmem:[#allocation3 + $0x11] sm:$0xff] }
 0x534   :  { %10807 = vmatmul.msk.f32.gmra.mxu0 %vm80_vm1, %v5962_v18  ;;  %10821 = vmatmul.msk.f32.gmra.mxu1 %vm80_vm1, %v6210_v60  ;;  %v6772_v7 = vld [vmem:[#allocation3 + $0x10] sm:$0xff] }
 0x535   :  { %10835 = vmatmul.msk.f32.gmra.mxu2 %vm80_vm1, %v6212_v48  ;;  %10849 = vmatmul.msk.f32.gmra.mxu3 %vm80_vm1, %v6337_v11 }
 0x538   :  { %v5794_v45 = vpop.f32.mrf.mxu2  ;;  %v5919_v20 = vpop.f32.mrf.mxu3 }
 0x539   :  { %v5587_v51 = vpop.f32.mrf.mxu0  ;;  %v5685_v47 = vpop.f32.mrf.mxu1  ;;  %v6790_v20 = vld [vmem:[#allocation3 + $0x19] sm:$0xff] }
 0x53a   :  { %v6773_v47 = vld [vmem:[#allocation3 + $0x18] sm:$0xff] }
 0x53c   :  { %10808 = vmatmul.msk.f32.gmra.mxu0 %vm80_vm1, %v5963_v22  ;;  %10822 = vmatmul.msk.f32.gmra.mxu1 %vm80_vm1, %v6211_v28  ;;  %v14274_v22 = vld [vmem:[#allocation3 + $0x1a] sm:$0xff] }
 0x53d   :  { %10836 = vmatmul.msk.f32.gmra.mxu2 %vm80_vm1, %v6213_v6  ;;  %10850 = vmatmul.msk.f32.gmra.mxu3 %vm80_vm1, %v6338_v17 }
 0x540   :  { %v5797_v21 = vpop.f32.mrf.mxu2  ;;  %v5922_v33 = vpop.f32.mrf.mxu3 }
 0x541   :  { %v5590_v24 = vpop.f32.mrf.mxu0  ;;  %v5688_v34 = vpop.f32.mrf.mxu1 }
 0x542   :  { %v5689_v30 = vadd.f32 %v5688_v34, %v5590_v24 }
 0x544   :  { %10809 = vmatmul.msk.f32.gmra.mxu0 %vm80_vm1, %v5964_v12  ;;  %10823 = vmatmul.msk.f32.gmra.mxu1 %vm80_vm1, %v6212_v48  ;;  %v6791_v12 = vld [vmem:[#allocation3 + $0x21] sm:$0xff] }
 0x545   :  { %10837 = vmatmul.msk.f32.gmra.mxu2 %vm80_vm1, %v6214_v38  ;;  %10851 = vmatmul.msk.f32.gmra.mxu3 %vm80_vm1, %v6339_v62  ;;  %v6774_v38 = vld [vmem:[#allocation3 + $0x20] sm:$0xff] }
 0x546   :  { %v14286_v62 = vld [vmem:[#allocation3 + $0x22] sm:$0xff] }
 0x548   :  { %v5800_v43 = vpop.f32.mrf.mxu2  ;;  %v5925_v27 = vpop.f32.mrf.mxu3 }
 0x549   :  { %v5823_v36 = vadd.f32 %v5800_v43, %v5689_v30  ;;  %v5593_v53 = vpop.f32.mrf.mxu0  ;;  %v5691_v57 = vpop.f32.mrf.mxu1 }
 0x54a   :  { %v5692_v58 = vadd.f32 %v5691_v57, %v5593_v53  ;;  %v6458_v53 = vld [vmem:[%s15229_s0 + $0x24e] sm:$0xff] }
 0x54b   :  { %v14218_v55 = vadd.f32 %v5925_v27, %v5823_v36  ;;  %v6792_v57 = vld [vmem:[#allocation3 + $0x29] sm:$0xff] }
 0x54c   :  { %10810 = vmatmul.msk.f32.gmra.mxu0 %vm80_vm1, %v5965_v29  ;;  %10824 = vmatmul.msk.f32.gmra.mxu1 %vm80_vm1, %v6090_v44  ;;  %v14296_v29 = vld [vmem:[#allocation3 + $0x2a] sm:$0xff] }
 0x54d   :  { %10838 = vmatmul.msk.f32.gmra.mxu2 %vm80_vm1, %v6215_v13  ;;  %10852 = vmatmul.msk.f32.gmra.mxu3 %vm80_vm1, %v6340_v50  ;;  %v11177_v44 = vld [vmem:[#allocation3 + $0x28] sm:$0xff] }
 0x550   :  { %v5803_v59 = vpop.f32.mrf.mxu2  ;;  %v5928_v40 = vpop.f32.mrf.mxu3 }
 0x551   :  { %v5824_v63 = vadd.f32 %v5803_v59, %v5692_v58  ;;  %v5596_v61 = vpop.f32.mrf.mxu0  ;;  %v5694_v26 = vpop.f32.mrf.mxu1 }
 0x552   :  { %v6793_v61 = vld [vmem:[#allocation3 + $0x31] sm:$0xff] }
 0x553   :  { %v14227_v54 = vadd.f32 %v5928_v40, %v5824_v63  ;;  %v6459_v40 = vld [vmem:[%s15229_s0 + $0x256] sm:$0xff] }
 0x554   :  { %10854 = vmatmul.msk.f32.vlgmr.msrb.gmra.mxu0 %vm80_vm1, %v6453_v0  ;;  %10867 = vmatmul.msk.f32.vlgmr.msrb.gmra.mxu1 %vm6804_vm3, %v6787_v52  ;;  %v6776_v0 = vld [vmem:[#allocation3 + $0x30] sm:$0xff] }
 0x555   :  { %10883 = vmatmul.msk.f32.vlgmr.msrb.gmra.mxu2 %vm6804_vm3, %v14236_v41  ;;  %10899 = vmatmul.msk.f32.vlgmr.msrb.gmra.mxu3 %vm6804_vm3, %v7031_v23  ;;  %v14308_v52 = vld [vmem:[#allocation3 + $0x32] sm:$0xff] }
 0x558   :  { %v5806_v25 = vpop.f32.mrf.mxu2  ;;  %v5931_v42 = vpop.f32.mrf.mxu3 }
 0x559   :  { %v5599_v60 = vpop.f32.mrf.mxu0  ;;  %v5697_v16 = vpop.f32.mrf.mxu1 }
 0x55c   :  { %10855 = vmatmul.msk.f32.gmra.mxu0 %vm80_vm1, %v6454_v49  ;;  %10868 = vmatmul.msk.f32.gmra.mxu1 %vm6804_vm3, %v6788_v10 }
 0x55d   :  { %10884 = vmatmul.msk.f32.gmra.mxu2 %vm6804_vm3, %v6771_v15  ;;  %10900 = vmatmul.msk.f32.gmra.mxu3 %vm6804_vm3, %v14254_v46 }
 0x560   :  { %v5809_v14 = vpop.f32.mrf.mxu2  ;;  %v5934_v28 = vpop.f32.mrf.mxu3 }
 0x561   :  { %v5602_v8 = vpop.f32.mrf.mxu0  ;;  %v5700_v4 = vpop.f32.mrf.mxu1  ;;  %v14320_v14 = vld [vmem:[#allocation3 + $0x3a] sm:$0xff] }
 0x564   :  { %10856 = vmatmul.msk.f32.gmra.mxu0 %vm80_vm1, %v6455_v2  ;;  %10869 = vmatmul.msk.f32.gmra.mxu1 %vm6804_vm3, %v6789_v31  ;;  %v6461_v31 = vld [vmem:[%s15229_s0 + $0x266] sm:$0xff] }
 0x565   :  { %10885 = vmatmul.msk.f32.gmra.mxu2 %vm6804_vm3, %v6772_v7  ;;  %10901 = vmatmul.msk.f32.gmra.mxu3 %vm6804_vm3, %v14263_v56 }
 0x568   :  { %v5812_v32 = vpop.f32.mrf.mxu2  ;;  %v5937_v18 = vpop.f32.mrf.mxu3 }
 0x569   :  { %v6026_v48 = vpop.f32.mrf.mxu0  ;;  %v6151_v11 = vpop.f32.mrf.mxu1  ;;  %v6795_v18 = vld [vmem:[#allocation3 + $0x41] sm:$0xff] }
 0x56a   :  { %v6065_v45 = vadd.f32 %v6026_v48, %v14100_v9  ;;  %v6457_v9 = vld [vmem:[%s15229_s0 + $0x246] sm:$0xff] }
 0x56c   :  { %v6190_v51 = vadd.f32 %v6151_v11, %v6065_v45  ;;  %10857 = vmatmul.msk.f32.gmra.mxu0 %vm80_vm1, %v6456_v39  ;;  %10870 = vmatmul.msk.f32.gmra.mxu1 %vm6804_vm3, %v6790_v20  ;;  %v6778_v11 = vld [vmem:[#allocation3 + $0x40] sm:$0xff] }
 0x56d   :  { %10886 = vmatmul.msk.f32.gmra.mxu2 %vm6804_vm3, %v6773_v47  ;;  %10902 = vmatmul.msk.f32.gmra.mxu3 %vm6804_vm3, %v14274_v22  ;;  %v14333_v39 = vld [vmem:[#allocation3 + $0x42] sm:$0xff] }
 0x570   :  { %v6276_v6 = vpop.f32.mrf.mxu2  ;;  %v6401_v17 = vpop.f32.mrf.mxu3 }
 0x571   :  { %v6315_v21 = vadd.f32 %v6276_v6, %v6190_v51  ;;  %v6029_v33 = vpop.f32.mrf.mxu0  ;;  %v6154_v24 = vpop.f32.mrf.mxu1  ;;  %v6462_v6 = vld [vmem:[%s15229_s0 + $0x26e] sm:$0xff] }
 0x572   :  { %v6779_v33 = vld [vmem:[#allocation3 + $0x48] sm:$0xff] }
 0x573   :  { %v14282_v34 = vadd.f32 %v6401_v17, %v6315_v21  ;;  %v6796_v21 = vld [vmem:[#allocation3 + $0x49] sm:$0xff] }
 0x574   :  { %10858 = vmatmul.msk.f32.gmra.mxu0 %vm80_vm1, %v6457_v9  ;;  %10871 = vmatmul.msk.f32.gmra.mxu1 %vm6804_vm3, %v6791_v12  ;;  %v14345_v24 = vld [vmem:[#allocation3 + $0x4a] sm:$0xff] }
 0x575   :  { %10887 = vmatmul.msk.f32.gmra.mxu2 %vm6804_vm3, %v6774_v38  ;;  %10903 = vmatmul.msk.f32.gmra.mxu3 %vm6804_vm3, %v14286_v62  ;;  %v14353_v9 = vld [vmem:[%s15232_s3 + $0x38] sm:$0xff] }
 0x576   :  { %7841 = vmatpush.msrb.mxu0 %v14353_v9 }
 0x578   :  { %v6279_v30 = vpop.f32.mrf.mxu2  ;;  %v6404_v43 = vpop.f32.mrf.mxu3 }
 0x579   :  { %v6032_v27 = vpop.f32.mrf.mxu0  ;;  %v6157_v36 = vpop.f32.mrf.mxu1 }
 0x57a   :  { %v6463_v27 = vld [vmem:[%s15229_s0 + $0x276] sm:$0xff] }
 0x57b   :  { %v6797_v36 = vld [vmem:[#allocation3 + $0x51] sm:$0xff] }
 0x57c   :  { %10859 = vmatmul.msk.f32.gmra.mxu0 %vm80_vm1, %v6458_v53  ;;  %10872 = vmatmul.msk.f32.gmra.mxu1 %vm6804_vm3, %v6792_v57  ;;  %v14361_v53 = vld [vmem:[#allocation3 + $0x52] sm:$0xff] }
 0x57d   :  { %10888 = vmatmul.msk.f32.gmra.mxu2 %vm6804_vm3, %v11177_v44  ;;  %10904 = vmatmul.msk.f32.gmra.mxu3 %vm6804_vm3, %v14296_v29  ;;  %v11179_v57 = vld [vmem:[#allocation3 + $0x50] sm:$0xff] }
 0x580   :  { %v6282_v13 = vpop.f32.mrf.mxu2  ;;  %v6407_v50 = vpop.f32.mrf.mxu3 }
 0x581   :  { %v6035_v58 = vpop.f32.mrf.mxu0  ;;  %v6160_v59 = vpop.f32.mrf.mxu1 }
 0x582   :  { %v6068_v63 = vadd.f32 %v6035_v58, %v14141_v5  ;;  %v6460_v5 = vld [vmem:[%s15229_s0 + $0x25e] sm:$0xff] }
 0x584   :  { %v6193_v26 = vadd.f32 %v6160_v59, %v6068_v63  ;;  %10860 = vmatmul.msk.f32.gmra.mxu0 %vm80_vm1, %v6459_v40  ;;  %10873 = vmatmul.msk.f32.gmra.mxu1 %vm6804_vm3, %v6793_v61  ;;  %v6464_v59 = vld [vmem:[%s15229_s0 + $0x27e] sm:$0xff] }
 0x585   :  { %10889 = vmatmul.msk.f32.gmra.mxu2 %vm6804_vm3, %v6776_v0  ;;  %10905 = vmatmul.msk.f32.gmra.mxu3 %vm6804_vm3, %v14308_v52  ;;  %v6798_v63 = vld [vmem:[#allocation3 + $0x59] sm:$0xff] }
 0x588   :  { %v6285_v23 = vpop.f32.mrf.mxu2  ;;  %v6410_v25 = vpop.f32.mrf.mxu3 }
 0x589   :  { %v6318_v42 = vadd.f32 %v6285_v23, %v6193_v26  ;;  %v6038_v60 = vpop.f32.mrf.mxu0  ;;  %v6163_v16 = vpop.f32.mrf.mxu1  ;;  %v6781_v26 = vld [vmem:[#allocation3 + $0x58] sm:$0xff] }
 0x58a   :  { %v6069_v49 = vadd.f32 %v6038_v60, %v14156_v37 }
 0x58b   :  { %v14316_v10 = vadd.f32 %v6410_v25, %v6318_v42 }
 0x58c   :  { %v6194_v15 = vadd.f32 %v6163_v16, %v6069_v49  ;;  %10861 = vmatmul.msk.f32.gmra.mxu0 %vm80_vm1, %v6460_v5  ;;  %10874 = vmatmul.msk.f32.gmra.mxu1 %vm6804_vm3, %v6794_v1  ;;  %v6799_v16 = vld [vmem:[#allocation3 + $0x61] sm:$0xff] }
 0x58d   :  { %10890 = vmatmul.msk.f32.gmra.mxu2 %vm6804_vm3, %v6777_v3  ;;  %10906 = vmatmul.msk.f32.gmra.mxu3 %vm6804_vm3, %v14320_v14  ;;  %v6782_v49 = vld [vmem:[#allocation3 + $0x60] sm:$0xff] }
 0x58e   :  { %v14379_v1 = vld [vmem:[#allocation3 + $0x62] sm:$0xff] }
 0x590   :  { %v6288_v28 = vpop.f32.mrf.mxu2  ;;  %v6413_v8 = vpop.f32.mrf.mxu3 }
 0x591   :  { %v6319_v4 = vadd.f32 %v6288_v28, %v6194_v15  ;;  %v6041_v37 = vpop.f32.mrf.mxu0  ;;  %v6166_v2 = vpop.f32.mrf.mxu1 }
 0x592   :  { %v6070_v7 = vadd.f32 %v6041_v37, %v14171_v35 }
 0x593   :  { %v14329_v32 = vadd.f32 %v6413_v8, %v6319_v4 }
 0x594   :  { %v6195_v48 = vadd.f32 %v6166_v2, %v6070_v7  ;;  %10862 = vmatmul.msk.f32.gmra.mxu0 %vm80_vm1, %v6461_v31  ;;  %10875 = vmatmul.msk.f32.gmra.mxu1 %vm6804_vm3, %v6795_v18  ;;  %v6800_v31 = vld [vmem:[#allocation3 + $0x69] sm:$0xff] }
 0x595   :  { %10891 = vmatmul.msk.f32.gmra.mxu2 %vm6804_vm3, %v6778_v11  ;;  %10907 = vmatmul.msk.f32.gmra.mxu3 %vm6804_vm3, %v14333_v39  ;;  %v6783_v7 = vld [vmem:[#allocation3 + $0x68] sm:$0xff] }
 0x596   :  { %v14391_v18 = vld [vmem:[#allocation3 + $0x6a] sm:$0xff] }
 0x598   :  { %v6291_v45 = vpop.f32.mrf.mxu2  ;;  %v6416_v20 = vpop.f32.mrf.mxu3 }
 0x599   :  { %v6320_v51 = vadd.f32 %v6291_v45, %v6195_v48  ;;  %v6044_v35 = vpop.f32.mrf.mxu0  ;;  %v6169_v47 = vpop.f32.mrf.mxu1 }
 0x59a   :  { %v6784_v35 = vld [vmem:[#allocation3 + $0x70] sm:$0xff] }
 0x59b   :  { %v14341_v17 = vadd.f32 %v6416_v20, %v6320_v51  ;;  %v6801_v51 = vld [vmem:[#allocation3 + $0x71] sm:$0xff] }
 0x59c   :  { %10863 = vmatmul.msk.f32.gmra.mxu0 %vm80_vm1, %v6462_v6  ;;  %10876 = vmatmul.msk.f32.gmra.mxu1 %vm6804_vm3, %v6796_v21  ;;  %v14400_v47 = vld [vmem:[#allocation3 + $0x72] sm:$0xff] }
 0x59d   :  { %10892 = vmatmul.msk.f32.gmra.mxu2 %vm6804_vm3, %v6779_v33  ;;  %10908 = vmatmul.msk.f32.gmra.mxu3 %vm6804_vm3, %v14345_v24  ;;  %v6802_v33 = vld [vmem:[#allocation3 + $0x79] sm:$0xff] }
 0x5a0   :  { %v6294_v12 = vpop.f32.mrf.mxu2  ;;  %v6419_v38 = vpop.f32.mrf.mxu3 }
 0x5a1   :  { %v6047_v30 = vpop.f32.mrf.mxu0  ;;  %v6172_v43 = vpop.f32.mrf.mxu1  ;;  %v14408_v12 = vld [vmem:[#allocation3 + $0x7a] sm:$0xff] }
 0x5a2   :  { %v11180_v38 = vld [vmem:[#allocation3 + $0x78] sm:$0xff] }
 0x5a4   :  { %10864 = vmatmul.msk.f32.gmra.mxu0 %vm80_vm1, %v6463_v27  ;;  %10877 = vmatmul.msk.f32.gmra.mxu1 %vm6804_vm3, %v6797_v36 }
 0x5a5   :  { %10893 = vmatmul.msk.f32.gmra.mxu2 %vm6804_vm3, %v11179_v57  ;;  %10909 = vmatmul.msk.f32.gmra.mxu3 %vm6804_vm3, %v14361_v53  ;;  %v7323_v57 = vld [vmem:[#allocation3 + $0xb] sm:$0xff] }
 0x5a8   :  { %v6297_v44 = vpop.f32.mrf.mxu2  ;;  %v6422_v13 = vpop.f32.mrf.mxu3 }
 0x5a9   :  { %v6050_v50 = vpop.f32.mrf.mxu0  ;;  %v6175_v58 = vpop.f32.mrf.mxu1  ;;  %v14419_v44 = vld [vmem:[%s15231_s2] ss:$0 sm:$0xff]  ;;  %v7469_v13 = vld [vmem:[#allocation3 + $0xc] sm:$0xff] }
 0x5aa   :  { %v6073_v40 = vadd.f32 %v6050_v50, %v14218_v55  ;;  %v6465_v55 = vld [vmem:[%s15229_s0 + $0x286] sm:$0x3]  ;;  %v11182_v50 = vld [vmem:[#allocation3 + $0x14] sm:$0xff]  ;;  %s10118_s0 = sshll.u32 %s11215_s30, 4  ;;  %s10119_s0 = int_to_ptr.vmem [resolvable:$true] %s10118_s0 }
 0x5ac   :  { %v6198_v61 = vadd.f32 %v6175_v58, %v6073_v40  ;;  %10865 = vmatmul.msk.f32.gmra.mxu0 %vm80_vm1, %v6464_v59  ;;  %10878 = vmatmul.msk.f32.gmra.mxu1 %vm6804_vm3, %v6798_v63  ;;  %v14430_v40 = vld [vmem:[%s15232_s3 + $0x40] sm:$0xff] }
 0x5ad   :  { %10894 = vmatmul.msk.f32.gmra.mxu2 %vm6804_vm3, %v6781_v26  ;;  %10910 = vmatmul.msk.f32.gmra.mxu3 %vm6804_vm3, %v14236_v41 }
 0x5ae   :  { %7987 = vmatpush.msrb.mxu1 %v14430_v40 }
 0x5b0   :  { %v6300_v0 = vpop.f32.mrf.mxu2  ;;  %v6425_v23 = vpop.f32.mrf.mxu3 }
 0x5b1   :  { %v6323_v25 = vadd.f32 %v6300_v0, %v6198_v61  ;;  %v6053_v42 = vpop.f32.mrf.mxu0  ;;  %v6178_v60 = vpop.f32.mrf.mxu1 }
 0x5b2   :  { %v6074_v5 = vadd.f32 %v6053_v42, %v14227_v54 }
 0x5b3   :  { %v14381_v15 = vadd.f32 %v6425_v23, %v6323_v25  ;;  %v7324_v23 = vld [vmem:[#allocation3 + $0x13] sm:$0xff]  ;;  %v7616_v25 = vld [vmem:[#allocation3 + $0x1c] sm:$0xff] }
 0x5b4   :  { %v6199_v3 = vadd.f32 %v6178_v60, %v6074_v5  ;;  %10866 = vmatmul.msk.f32.gmra.mxu0 %vm80_vm1, %v6465_v55  ;;  %10879 = vmatmul.msk.f32.gmra.mxu1 %vm6804_vm3, %v6799_v16 }
 0x5b5   :  { %10895 = vmatmul.msk.f32.gmra.mxu2 %vm6804_vm3, %v6782_v49  ;;  %10911 = vmatmul.msk.f32.gmra.mxu3 %vm6804_vm3, %v14379_v1 }
 0x5b8   :  { %v6303_v28 = vpop.f32.mrf.mxu2  ;;  %v6428_v8 = vpop.f32.mrf.mxu3 }
 0x5b9   :  { %v6324_v4 = vadd.f32 %v6303_v28, %v6199_v3  ;;  %v6056_v37 = vpop.f32.mrf.mxu0  ;;  %v6181_v54 = vpop.f32.mrf.mxu1  ;;  %v7325_v28 = vld [vmem:[#allocation3 + $0x1b] sm:$0xff] }
 0x5ba   :  { %v8111_v37 = vld [vmem:[%s15232_s3] sm:$0xff] }
 0x5bb   :  { %v14388_v2 = vadd.f32 %v6428_v8, %v6324_v4  ;;  %8215 = vmatpush.msrb.mxu3 %v8111_v37 }
 0x5bc   :  { %10880 = vmatmul.msk.f32.gmra.mxu1 %vm6804_vm3, %v6800_v31  ;;  %10915 = vmatmul.msk.f32.vlgmr.msra.gmra.mxu0 %vm6804_vm3, %v14254_v46 }
 0x5bd   :  { %10896 = vmatmul.msk.f32.gmra.mxu2 %vm6804_vm3, %v6783_v7  ;;  %10912 = vmatmul.msk.f32.gmra.mxu3 %vm6804_vm3, %v14391_v18 }
 0x5be   :  { %8430 = vmatpush.msra.mxu0 %v14234_v19 }
 0x5c0   :  { %v6306_v48 = vpop.f32.mrf.mxu2  ;;  %v6431_v11 = vpop.f32.mrf.mxu3 }
 0x5c1   :  { %v6059_v45 = vpop.f32.mrf.mxu0  ;;  %v6184_v20 = vpop.f32.mrf.mxu1  ;;  %v7326_v11 = vld [vmem:[#allocation3 + $0x23] sm:$0xff] }
 0x5c2   :  { %v7618_v20 = vld [vmem:[#allocation3 + $0x2c] sm:$0xff] }
 0x5c4   :  { %10881 = vmatmul.msk.f32.gmra.mxu1 %vm6804_vm3, %v6801_v51  ;;  %10916 = vmatmul.msk.f32.gmra.mxu0 %vm6804_vm3, %v14263_v56 }
 0x5c5   :  { %10897 = vmatmul.msk.f32.gmra.mxu2 %vm6804_vm3, %v6784_v35  ;;  %10913 = vmatmul.msk.f32.gmra.mxu3 %vm6804_vm3, %v14400_v47 }
 0x5c8   :  { %v6309_v46 = vpop.f32.mrf.mxu2  ;;  %v6434_v19 = vpop.f32.mrf.mxu3 }
 0x5c9   :  { %v6062_v6 = vpop.f32.mrf.mxu0  ;;  %v6187_v21 = vpop.f32.mrf.mxu1 }
 0x5cc   :  { %10882 = vmatmul.msk.f32.gmra.mxu1 %vm6804_vm3, %v6802_v33  ;;  %10917 = vmatmul.msk.f32.gmra.mxu0 %vm6804_vm3, %v14274_v22 }
 0x5cd   :  { %10898 = vmatmul.msk.f32.gmra.mxu2 %vm6804_vm3, %v11180_v38  ;;  %10914 = vmatmul.msk.f32.gmra.mxu3 %vm6804_vm3, %v14408_v12  ;;  %v7327_v38 = vld [vmem:[#allocation3 + $0x2b] sm:$0xff] }
 0x5d0   :  { %v6312_v56 = vpop.f32.mrf.mxu2  ;;  %v6437_v30 = vpop.f32.mrf.mxu3 }
 0x5d1   :  { %v6526_v43 = vpop.f32.mrf.mxu0  ;;  %v6870_v27 = vpop.f32.mrf.mxu1  ;;  %v7619_v56 = vld [vmem:[#allocation3 + $0x34] sm:$0xff] }
 0x5d2   :  { %v6565_v36 = vadd.f32 %v6526_v43, %v14282_v34 }
 0x5d4   :  { %v6578_v22 = vadd.f32 %v14419_v44, %v6565_v36  ;;  %10918 = vmatmul.msk.f32.gmra.mxu0 %vm6804_vm3, %v14286_v62  ;;  %10931 = vmatmul.msk.f32.vlgmr.msra.gmra.mxu1 %vm6804_vm3, %v7323_v57  ;;  %v8119_v62 = vld [vmem:[%s15232_s3 + $0x8] sm:$0xff] }
 0x5d5   :  { %10947 = vmatmul.msk.f32.vlgmr.msra.gmra.mxu2 %vm6804_vm3, %v7469_v13  ;;  %10963 = vmatmul.msk.f32.vlgmr.msra.gmra.mxu3 %vm6804_vm3, %v11182_v50 }
 0x5d6   :  { %v6591_v34 = vmax.f32 %v6578_v22, 0.0  ;;  %8156 = vmatpush.msrb.mxu2 %v8119_v62  ;;  %8652 = vmatpush.msra.mxu1 %v14353_v9  ;;  %v7328_v22 = vld [vmem:[#allocation3 + $0x33] sm:$0xff] }
 0x5d8   :  { %6604 = vst [vmem:[#allocation2 + $0x200] sm:$0xff] %v6591_v34  ;;  %v6983_v58 = vpop.f32.mrf.mxu2  ;;  %v7113_v59 = vpop.f32.mrf.mxu3 }
 0x5d9   :  { %v6984_v63 = vadd.f32 %v6983_v58, %v6870_v27  ;;  %v6529_v61 = vpop.f32.mrf.mxu0  ;;  %v6873_v26 = vpop.f32.mrf.mxu1 }
 0x5da   :  { %v7329_v61 = vld [vmem:[#allocation3 + $0x3b] sm:$0xff] }
 0x5db   :  { %v14437_v0 = vadd.f32 %v7113_v59, %v6984_v63 }
 0x5dc   :  { %10919 = vmatmul.msk.f32.gmra.mxu0 %vm6804_vm3, %v14296_v29  ;;  %10932 = vmatmul.msk.f32.gmra.mxu1 %vm6804_vm3, %v7324_v23  ;;  %v7617_v29 = vld [vmem:[#allocation3 + $0x24] sm:$0xff] }
 0x5dd   :  { %10948 = vmatmul.msk.f32.gmra.mxu2 %vm6804_vm3, %v11182_v50  ;;  %10964 = vmatmul.msk.f32.gmra.mxu3 %vm6804_vm3, %v7616_v25 }
 0x5df   :  { %v6743_v42 = vld [vmem:[#allocation2 + $0x1f8] ss:$2 sm:$0xff] }
 0x5e0   :  { %v6745_v60 = vrot.slane %v6743_v42, 7  ;;  %v6986_v55 = vpop.f32.mrf.mxu2  ;;  %v7116_v16 = vpop.f32.mrf.mxu3 }
 0x5e1   :  { %v6532_v5 = vpop.f32.mrf.mxu0  ;;  %v6876_v49 = vpop.f32.mrf.mxu1 }
 0x5e2   :  { %v14445_v9 = vsel %vm6625_vm2, 0.0, %v6745_v60  ;;  %v6748_v3 = vsel %vm6625_vm2, %v6745_v60, 0.0 }
 0x5e3   :  { %6749 = vst [vmem:[#allocation3 + $0xa0] sm:$0xff] %v14445_v9 }
 0x5e4   :  { %10920 = vmatmul.msk.f32.gmra.mxu0 %vm6804_vm3, %v14308_v52  ;;  %10933 = vmatmul.msk.f32.gmra.mxu1 %vm6804_vm3, %v7325_v28  ;;  %6750 = vst [vmem:[#allocation3 + $0xa8] sm:$0x3] %v6748_v3 }
 0x5e5   :  { %10949 = vmatmul.msk.f32.gmra.mxu2 %vm6804_vm3, %v7616_v25  ;;  %10965 = vmatmul.msk.f32.gmra.mxu3 %vm6804_vm3, %v7617_v29 }
 0x5e8   :  { %v6989_v8 = vpop.f32.mrf.mxu2  ;;  %v7119_v4 = vpop.f32.mrf.mxu3 }
 0x5e9   :  { %v6990_v54 = vadd.f32 %v6989_v8, %v6876_v49  ;;  %v6535_v31 = vpop.f32.mrf.mxu0  ;;  %v6879_v7 = vpop.f32.mrf.mxu1  ;;  %v7330_v49 = vld [vmem:[#allocation3 + $0x43] sm:$0xff] }
 0x5ea   :  { %v6568_v52 = vadd.f32 %v6535_v31, %v14316_v10  ;;  %v7331_v31 = vld [vmem:[#allocation3 + $0x4b] sm:$0xff] }
 0x5eb   :  { %v14458_v48 = vadd.f32 %v7119_v4, %v6990_v54 }
 0x5ec   :  { %v6581_v45 = vadd.f32 %v14419_v44, %v6568_v52  ;;  %10921 = vmatmul.msk.f32.gmra.mxu0 %vm6804_vm3, %v14320_v14  ;;  %10934 = vmatmul.msk.f32.gmra.mxu1 %vm6804_vm3, %v7326_v11  ;;  %v7623_v52 = vld [vmem:[#allocation3 + $0x54] sm:$0xff] }
 0x5ed   :  { %10950 = vmatmul.msk.f32.gmra.mxu2 %vm6804_vm3, %v7617_v29  ;;  %10966 = vmatmul.msk.f32.gmra.mxu3 %vm6804_vm3, %v7618_v20 }
 0x5ee   :  { %v6594_v51 = vmax.f32 %v6581_v45, 0.0 }
 0x5f0   :  { %6607 = vst [vmem:[#allocation2 + $0x218] sm:$0xff] %v6594_v51  ;;  %v6992_v35 = vpop.f32.mrf.mxu2  ;;  %v7122_v46 = vpop.f32.mrf.mxu3 }
 0x5f1   :  { %v6993_v10 = vadd.f32 %v6992_v35, %v6879_v7  ;;  %v6538_v19 = vpop.f32.mrf.mxu0  ;;  %v6882_v6 = vpop.f32.mrf.mxu1 }
 0x5f2   :  { %v6569_v21 = vadd.f32 %v6538_v19, %v14329_v32 }
 0x5f3   :  { %v14467_v33 = vadd.f32 %v7122_v46, %v6993_v10  ;;  %v7624_v10 = vld [vmem:[#allocation3 + $0x5c] sm:$0xff] }
 0x5f4   :  { %v6582_v14 = vadd.f32 %v14419_v44, %v6569_v21  ;;  %10922 = vmatmul.msk.f32.gmra.mxu0 %vm6804_vm3, %v14333_v39  ;;  %10935 = vmatmul.msk.f32.gmra.mxu1 %vm6804_vm3, %v7327_v38  ;;  %v11183_v39 = vld [vmem:[#allocation3 + $0x3c] sm:$0xff] }
 0x5f5   :  { %10951 = vmatmul.msk.f32.gmra.mxu2 %vm6804_vm3, %v7618_v20  ;;  %10967 = vmatmul.msk.f32.gmra.mxu3 %vm6804_vm3, %v7619_v56 }
 0x5f6   :  { %v6595_v30 = vmax.f32 %v6582_v14, 0.0 }
 0x5f8   :  { %6608 = vst [vmem:[#allocation2 + $0x220] sm:$0xff] %v6595_v30  ;;  %v6995_v43 = vpop.f32.mrf.mxu2  ;;  %v7125_v27 = vpop.f32.mrf.mxu3 }
 0x5f9   :  { %v6541_v32 = vpop.f32.mrf.mxu0  ;;  %v6885_v36 = vpop.f32.mrf.mxu1  ;;  %v7333_v43 = vld [vmem:[#allocation3 + $0x5b] sm:$0xff] }
 0x5fa   :  { %v6570_v57 = vadd.f32 %v6541_v32, %v14341_v17 }
 0x5fc   :  { %v6583_v13 = vadd.f32 %v14419_v44, %v6570_v57  ;;  %10923 = vmatmul.msk.f32.gmra.mxu0 %vm6804_vm3, %v14345_v24  ;;  %10936 = vmatmul.msk.f32.gmra.mxu1 %vm6804_vm3, %v7328_v22  ;;  %v7621_v24 = vld [vmem:[#allocation3 + $0x44] sm:$0xff] }
 0x5fd   :  { %10952 = vmatmul.msk.f32.gmra.mxu2 %vm6804_vm3, %v7619_v56  ;;  %10968 = vmatmul.msk.f32.gmra.mxu3 %vm6804_vm3, %v11183_v39 }
 0x5fe   :  { %v6596_v50 = vmax.f32 %v6583_v13, 0.0 }
 0x600   :  { %6609 = vst [vmem:[#allocation2 + $0x228] sm:$0xff] %v6596_v50  ;;  %v6998_v34 = vpop.f32.mrf.mxu2  ;;  %v7128_v58 = vpop.f32.mrf.mxu3 }
 0x601   :  { %v6999_v59 = vadd.f32 %v6998_v34, %v6885_v36  ;;  %v6544_v62 = vpop.f32.mrf.mxu0  ;;  %v6888_v17 = vpop.f32.mrf.mxu1 }
 0x603   :  { %v14482_v63 = vadd.f32 %v7128_v58, %v6999_v59  ;;  %v7626_v58 = vld [vmem:[#allocation3 + $0x6c] sm:$0xff] }
 0x604   :  { %10924 = vmatmul.msk.f32.gmra.mxu0 %vm6804_vm3, %v14361_v53  ;;  %10937 = vmatmul.msk.f32.gmra.mxu1 %vm6804_vm3, %v7329_v61  ;;  %v7622_v53 = vld [vmem:[#allocation3 + $0x4c] sm:$0xff] }
 0x605   :  { %10953 = vmatmul.msk.f32.gmra.mxu2 %vm6804_vm3, %v11183_v39  ;;  %10969 = vmatmul.msk.f32.gmra.mxu3 %vm6804_vm3, %v7621_v24  ;;  %v7334_v39 = vld [vmem:[#allocation3 + $0x63] sm:$0xff] }
 0x607   :  { %v6752_v26 = vld [vmem:[#allocation2 + $0x21c] ss:$2 sm:$0xff] }
 0x608   :  { %v6754_v23 = vrot.slane %v6752_v26, 7  ;;  %v7001_v25 = vpop.f32.mrf.mxu2  ;;  %v7131_v42 = vpop.f32.mrf.mxu3  ;;  %v14538_v26 = vld [vmem:[#allocation3 + $0x82] sm:$0xff] }
 0x609   :  { %v6547_v60 = vpop.f32.mrf.mxu0  ;;  %v6891_v55 = vpop.f32.mrf.mxu1 }
 0x60a   :  { %v14490_v16 = vsel %vm6625_vm2, 0.0, %v6754_v23  ;;  %v6757_v5 = vsel %vm6625_vm2, %v6754_v23, 0.0 }
 0x60b   :  { %6758 = vst [vmem:[#allocation3 + $0xaa] sm:$0xff] %v14490_v16 }
 0x60c   :  { %10925 = vmatmul.msk.f32.gmra.mxu0 %vm6804_vm3, %v14236_v41  ;;  %10938 = vmatmul.msk.f32.gmra.mxu1 %vm6804_vm3, %v7330_v49  ;;  %6759 = vst [vmem:[#allocation3 + $0xb2] sm:$0x3] %v6757_v5  ;;  %v7336_v5 = vld [vmem:[#allocation3 + $0x73] sm:$0xff] }
 0x60d   :  { %10954 = vmatmul.msk.f32.gmra.mxu2 %vm6804_vm3, %v7621_v24  ;;  %10970 = vmatmul.msk.f32.gmra.mxu3 %vm6804_vm3, %v7622_v53  ;;  %v7335_v24 = vld [vmem:[#allocation3 + $0x6b] sm:$0xff]  ;;  %v7761_v49 = vld [vmem:[#allocation3 + $0x15] sm:$0xff] }
 0x610   :  { %v7004_v3 = vpop.f32.mrf.mxu2  ;;  %v7134_v28 = vpop.f32.mrf.mxu3 }
 0x611   :  { %v7005_v29 = vadd.f32 %v7004_v3, %v6891_v55  ;;  %v6550_v8 = vpop.f32.mrf.mxu0  ;;  %v6894_v4 = vpop.f32.mrf.mxu1 }
 0x612   :  { %v6573_v37 = vadd.f32 %v6550_v8, %v14381_v15 }
 0x613   :  { %v14500_v54 = vadd.f32 %v7134_v28, %v7005_v29 }
 0x614   :  { %v6586_v7 = vadd.f32 %v14419_v44, %v6573_v37  ;;  %10926 = vmatmul.msk.f32.gmra.mxu0 %vm6804_vm3, %v14379_v1  ;;  %10939 = vmatmul.msk.f32.gmra.mxu1 %vm6804_vm3, %v7331_v31  ;;  %v7332_v1 = vld [vmem:[#allocation3 + $0x53] sm:$0xff]  ;;  %v7337_v31 = vld [vmem:[#allocation3 + $0x7b] sm:$0xff] }
 0x615   :  { %10955 = vmatmul.msk.f32.gmra.mxu2 %vm6804_vm3, %v7622_v53  ;;  %10971 = vmatmul.msk.f32.gmra.mxu3 %vm6804_vm3, %v7623_v52  ;;  %v7628_v53 = vld [vmem:[#allocation3 + $0x7c] sm:$0xff] }
 0x616   :  { %v6599_v11 = vmax.f32 %v6586_v7, 0.0  ;;  %v7762_v7 = vld [vmem:[#allocation3 + $0x1d] sm:$0xff] }
 0x618   :  { %6612 = vst [vmem:[#allocation2 + $0x240] sm:$0xff] %v6599_v11  ;;  %v7007_v45 = vpop.f32.mrf.mxu2  ;;  %v7137_v20 = vpop.f32.mrf.mxu3 }
 0x619   :  { %v7008_v15 = vadd.f32 %v7007_v45, %v6894_v4  ;;  %v6553_v51 = vpop.f32.mrf.mxu0  ;;  %v6897_v35 = vpop.f32.mrf.mxu1 }
 0x61a   :  { %v6574_v46 = vadd.f32 %v6553_v51, %v14388_v2 }
 0x61b   :  { %v14509_v19 = vadd.f32 %v7137_v20, %v7008_v15 }
 0x61c   :  { %v6587_v6 = vadd.f32 %v14419_v44, %v6574_v46  ;;  %10927 = vmatmul.msk.f32.gmra.mxu0 %vm6804_vm3, %v14391_v18  ;;  %10940 = vmatmul.msk.f32.gmra.mxu1 %vm6804_vm3, %v7332_v1  ;;  %v7763_v46 = vld [vmem:[#allocation3 + $0x25] sm:$0xff] }
 0x61d   :  { %10956 = vmatmul.msk.f32.gmra.mxu2 %vm6804_vm3, %v7623_v52  ;;  %10972 = vmatmul.msk.f32.gmra.mxu3 %vm6804_vm3, %v7624_v10  ;;  %v7629_v52 = vld [vmem:[#allocation3 + $0x84] sm:$0xff] }
 0x61e   :  { %v6600_v21 = vmax.f32 %v6587_v6, 0.0 }
 0x620   :  { %6613 = vst [vmem:[#allocation2 + $0x248] sm:$0xff] %v6600_v21  ;;  %v7010_v38 = vpop.f32.mrf.mxu2  ;;  %v7140_v14 = vpop.f32.mrf.mxu3 }
 0x621   :  { %v7011_v2 = vadd.f32 %v7010_v38, %v6897_v35  ;;  %v6556_v56 = vpop.f32.mrf.mxu0  ;;  %v6900_v30 = vpop.f32.mrf.mxu1  ;;  %v7338_v35 = vld [vmem:[#allocation3 + $0x83] sm:$0xff] }
 0x622   :  { %v7764_v56 = vld [vmem:[#allocation3 + $0x2d] sm:$0xff] }
 0x623   :  { %v14517_v27 = vadd.f32 %v7140_v14, %v7011_v2 }
 0x624   :  { %10928 = vmatmul.msk.f32.gmra.mxu0 %vm6804_vm3, %v14400_v47  ;;  %10941 = vmatmul.msk.f32.gmra.mxu1 %vm6804_vm3, %v7333_v43  ;;  %v8112_v43 = vld [vmem:[#allocation3 + $0x81] sm:$0xff] }
 0x625   :  { %10957 = vmatmul.msk.f32.gmra.mxu2 %vm6804_vm3, %v7624_v10  ;;  %10973 = vmatmul.msk.f32.gmra.mxu3 %vm6804_vm3, %v14236_v41  ;;  %v14563_v10 = vld [vmem:[#allocation3 + $0x8c] sm:$0xff] }
 0x627   :  { %v6761_v18 = vld [vmem:[#allocation2 + $0x240] ss:$2 sm:$0xff] }
 0x628   :  { %v6763_v44 = vrot.slane %v6761_v18, 7  ;;  %v7013_v32 = vpop.f32.mrf.mxu2  ;;  %v7143_v36 = vpop.f32.mrf.mxu3  ;;  %v8104_v18 = vld [vmem:[#allocation3 + $0x80] sm:$0xff] }
 0x629   :  { %v7014_v57 = vadd.f32 %v7013_v32, %v6900_v30  ;;  %v6559_v22 = vpop.f32.mrf.mxu0  ;;  %v6903_v13 = vpop.f32.mrf.mxu1  ;;  %v7907_v30 = vld [vmem:[#allocation3 + $0x16] sm:$0xff] }
 0x62a   :  { %v14526_v50 = vsel %vm6625_vm2, 0.0, %v6763_v44  ;;  %v6766_v47 = vsel %vm6625_vm2, %v6763_v44, 0.0  ;;  %v8245_v22 = vld [vmem:[%s15232_s3 + $0x10] sm:$0xff] }
 0x62b   :  { %v14529_v34 = vadd.f32 %v7143_v36, %v7014_v57  ;;  %6767 = vst [vmem:[#allocation3 + $0xb4] sm:$0xff] %v14526_v50  ;;  %8282 = vmatpush.msra.mxu2 %v8245_v22 }
 0x62c   :  { %10929 = vmatmul.msk.f32.gmra.mxu0 %vm6804_vm3, %v14408_v12  ;;  %10942 = vmatmul.msk.f32.gmra.mxu1 %vm6804_vm3, %v7334_v39  ;;  %6768 = vst [vmem:[#allocation3 + $0xbc] sm:$0x3] %v6766_v47  ;;  %v7627_v12 = vld [vmem:[#allocation3 + $0x74] sm:$0xff] }
 0x62d   :  { %10958 = vmatmul.msk.f32.gmra.mxu2 %vm6804_vm3, %v14236_v41  ;;  %10974 = vmatmul.msk.f32.gmra.mxu3 %vm6804_vm3, %v7626_v58 }
 0x630   :  { %v7016_v59 = vpop.f32.mrf.mxu2  ;;  %v7146_v62 = vpop.f32.mrf.mxu3 }
 0x631   :  { %v6562_v17 = vpop.f32.mrf.mxu0  ;;  %v6906_v61 = vpop.f32.mrf.mxu1  ;;  %v7765_v59 = vld [vmem:[#allocation3 + $0x35] sm:$0xff]  ;;  %v7908_v62 = vld [vmem:[#allocation3 + $0x1e] sm:$0xff] }
 0x632   :  { %v8113_v17 = vld [vmem:[#allocation3 + $0x89] sm:$0xff] }
 0x634   :  { %10930 = vmatmul.msk.f32.gmra.mxu0 %vm6804_vm3, %v14538_v26  ;;  %10943 = vmatmul.msk.f32.gmra.mxu1 %vm6804_vm3, %v7335_v24 }
 0x635   :  { %10959 = vmatmul.msk.f32.gmra.mxu2 %vm6804_vm3, %v7626_v58  ;;  %10975 = vmatmul.msk.f32.gmra.mxu3 %vm6804_vm3, %v7627_v12  ;;  %v8319_v58 = vld [vmem:[%s15232_s3 + $0x18] sm:$0xff] }
 0x636   :  { %8356 = vmatpush.msra.mxu3 %v8319_v58 }
 0x638   :  { %v7019_v41 = vpop.f32.mrf.mxu2  ;;  %v7149_v23 = vpop.f32.mrf.mxu3 }
 0x639   :  { %v7020_v25 = vadd.f32 %v7019_v41, %v6906_v61  ;;  %v6909_v42 = vpop.f32.mrf.mxu1  ;;  %v7259_v60 = vpop.f32.mrf.mxu0  ;;  %v8105_v61 = vld [vmem:[#allocation3 + $0x88] sm:$0xff] }
 0x63a   :  { %v7307_v44 = vadd.f32 %v7259_v60, %v14437_v0  ;;  %v8114_v60 = vld [vmem:[#allocation3 + $0x91] sm:$0xff] }
 0x63b   :  { %v14545_v55 = vadd.f32 %v7149_v23, %v7020_v25  ;;  %v7766_v25 = vld [vmem:[#allocation3 + $0x3d] sm:$0xff] }
 0x63c   :  { %10944 = vmatmul.msk.f32.gmra.mxu1 %vm6804_vm3, %v7336_v5  ;;  %10979 = vmatmul.msk.f32.vlgmr.msrb.gmra.mxu0 %vm6804_vm3, %v7761_v49  ;;  %v8106_v5 = vld [vmem:[#allocation3 + $0x90] sm:$0xff] }
 0x63d   :  { %10960 = vmatmul.msk.f32.gmra.mxu2 %vm6804_vm3, %v7627_v12  ;;  %10976 = vmatmul.msk.f32.gmra.mxu3 %vm6804_vm3, %v7628_v53 }
 0x63e   :  { %8726 = vmatpush.msrb.mxu0 %v14430_v40 }
 0x640   :  { %v7022_v3 = vpop.f32.mrf.mxu2  ;;  %v7152_v28 = vpop.f32.mrf.mxu3 }
 0x641   :  { %v7023_v29 = vadd.f32 %v7022_v3, %v6909_v42  ;;  %v6912_v8 = vpop.f32.mrf.mxu1  ;;  %v7262_v4 = vpop.f32.mrf.mxu0  ;;  %v7909_v42 = vld [vmem:[#allocation3 + $0x26] sm:$0xff] }
 0x643   :  { %v14552_v37 = vadd.f32 %v7152_v28, %v7023_v29 }
 0x644   :  { %10945 = vmatmul.msk.f32.gmra.mxu1 %vm6804_vm3, %v7337_v31  ;;  %10980 = vmatmul.msk.f32.gmra.mxu0 %vm6804_vm3, %v7762_v7  ;;  %v7767_v7 = vld [vmem:[#allocation3 + $0x45] sm:$0xff] }
 0x645   :  { %10961 = vmatmul.msk.f32.gmra.mxu2 %vm6804_vm3, %v7628_v53  ;;  %10977 = vmatmul.msk.f32.gmra.mxu3 %vm6804_vm3, %v7629_v52 }
 0x648   :  { %v7025_v11 = vpop.f32.mrf.mxu2  ;;  %v7155_v40 = vpop.f32.mrf.mxu3 }
 0x649   :  { %v7026_v45 = vadd.f32 %v7025_v11, %v6912_v8  ;;  %v6915_v20 = vpop.f32.mrf.mxu1  ;;  %v7265_v15 = vpop.f32.mrf.mxu0  ;;  %v8115_v11 = vld [vmem:[#allocation3 + $0x99] sm:$0xff] }
 0x64a   :  { %v7309_v49 = vadd.f32 %v7265_v15, %v14458_v48  ;;  %v8107_v48 = vld [vmem:[#allocation3 + $0x98] sm:$0xff] }
 0x64b   :  { %v14558_v51 = vadd.f32 %v7155_v40, %v7026_v45 }
 0x64c   :  { %10946 = vmatmul.msk.f32.gmra.mxu1 %vm6804_vm3, %v7338_v35  ;;  %10981 = vmatmul.msk.f32.gmra.mxu0 %vm6804_vm3, %v7763_v46 }
 0x64d   :  { %10962 = vmatmul.msk.f32.gmra.mxu2 %vm6804_vm3, %v7629_v52  ;;  %10978 = vmatmul.msk.f32.gmra.mxu3 %vm6804_vm3, %v14563_v10  ;;  %v7910_v52 = vld [vmem:[#allocation3 + $0x2e] sm:$0xff] }
 0x650   :  { %v7028_v1 = vpop.f32.mrf.mxu2  ;;  %v7158_v6 = vpop.f32.mrf.mxu3 }
 0x651   :  { %v7029_v21 = vadd.f32 %v7028_v1, %v6915_v20  ;;  %v7268_v38 = vpop.f32.mrf.mxu0  ;;  %v7405_v14 = vpop.f32.mrf.mxu1 }
 0x652   :  { %v7453_v32 = vadd.f32 %v7405_v14, %v7307_v44  ;;  %v7310_v40 = vadd.f32 %v7268_v38, %v14467_v33  ;;  %v7911_v14 = vld [vmem:[#allocation3 + $0x36] sm:$0xff]  ;;  %v7912_v44 = vld [vmem:[#allocation3 + $0x3e] sm:$0xff] }
 0x653   :  { %v14567_v2 = vadd.f32 %v7158_v6, %v7029_v21  ;;  %v7768_v21 = vld [vmem:[#allocation3 + $0x4d] sm:$0xff] }
 0x654   :  { %10982 = vmatmul.msk.f32.gmra.mxu0 %vm6804_vm3, %v7764_v56  ;;  %10995 = vmatmul.msk.f32.vlgmr.msrb.gmra.mxu1 %vm6804_vm3, %v7907_v30  ;;  %v8116_v56 = vld [vmem:[#allocation3 + $0xa1] sm:$0xff] }
 0x655   :  { %11011 = vmatmul.msk.f32.vlgmr.msrb.gmra.mxu2 %vm6804_vm3, %v8112_v43  ;;  %11018 = vmatmul.msk.f32.vlgmr.msrb.gmra.mxu3 %vm6804_vm3, %v8104_v18  ;;  %v7769_v18 = vld [vmem:[#allocation3 + $0x55] sm:$0xff] }
 0x658   :  { %v7551_v36 = vpop.f32.mrf.mxu2  ;;  %v7697_v57 = vpop.f32.mrf.mxu3 }
 0x659   :  { %v7599_v13 = vadd.f32 %v7551_v36, %v7453_v32  ;;  %v7271_v39 = vpop.f32.mrf.mxu0  ;;  %v7408_v47 = vpop.f32.mrf.mxu1  ;;  %v8117_v32 = vld [vmem:[#allocation3 + $0xa9] sm:$0xff] }
 0x65a   :  { %v8109_v36 = vld [vmem:[#allocation3 + $0xa8] sm:$0xff] }
 0x65b   :  { %v14580_v0 = vadd.f32 %v7697_v57, %v7599_v13 }
 0x65c   :  { %10983 = vmatmul.msk.f32.gmra.mxu0 %vm6804_vm3, %v7765_v59  ;;  %10996 = vmatmul.msk.f32.gmra.mxu1 %vm6804_vm3, %v7908_v62  ;;  %v7770_v59 = vld [vmem:[#allocation3 + $0x5d] sm:$0xff] }
 0x65d   :  { %11012 = vmatmul.msk.f32.gmra.mxu2 %vm6804_vm3, %v8113_v17  ;;  %11019 = vmatmul.msk.f32.gmra.mxu3 %vm6804_vm3, %v8105_v61  ;;  %v7913_v17 = vld [vmem:[#allocation3 + $0x46] sm:$0xff]  ;;  %v8118_v61 = vld [vmem:[#allocation3 + $0xb1] sm:$0x3] }
 0x660   :  { %v7554_v24 = vpop.f32.mrf.mxu2  ;;  %v7700_v12 = vpop.f32.mrf.mxu3 }
 0x661   :  { %v7274_v41 = vpop.f32.mrf.mxu0  ;;  %v7411_v23 = vpop.f32.mrf.mxu1 }
 0x662   :  { %v7455_v53 = vadd.f32 %v7411_v23, %v7309_v49  ;;  %v7312_v57 = vadd.f32 %v7274_v41, %v14482_v63  ;;  %v8110_v63 = vld [vmem:[#allocation3 + $0xb0] sm:$0x3] }
 0x664   :  { %10984 = vmatmul.msk.f32.gmra.mxu0 %vm6804_vm3, %v7766_v25  ;;  %10997 = vmatmul.msk.f32.gmra.mxu1 %vm6804_vm3, %v7909_v42  ;;  %v7771_v25 = vld [vmem:[#allocation3 + $0x65] sm:$0xff]  ;;  %v7914_v42 = vld [vmem:[#allocation3 + $0x4e] sm:$0xff] }
 0x665   :  { %11013 = vmatmul.msk.f32.gmra.mxu2 %vm6804_vm3, %v8114_v60  ;;  %11020 = vmatmul.msk.f32.gmra.mxu3 %vm6804_vm3, %v8106_v5  ;;  %v8312_v60 = vld [vmem:[#allocation3 + $0x8a] sm:$0xff] }
 0x668   :  { %v7557_v3 = vpop.f32.mrf.mxu2  ;;  %v7703_v28 = vpop.f32.mrf.mxu3 }
 0x669   :  { %v7601_v29 = vadd.f32 %v7557_v3, %v7455_v53  ;;  %v7277_v8 = vpop.f32.mrf.mxu0  ;;  %v7414_v4 = vpop.f32.mrf.mxu1 }
 0x66a   :  { %v7456_v45 = vadd.f32 %v7414_v4, %v7310_v40  ;;  %v7915_v4 = vld [vmem:[#allocation3 + $0x56] sm:$0xff] }
 0x66b   :  { %v14591_v31 = vadd.f32 %v7703_v28, %v7601_v29 }
 0x66c   :  { %10985 = vmatmul.msk.f32.gmra.mxu0 %vm6804_vm3, %v7767_v7  ;;  %10998 = vmatmul.msk.f32.gmra.mxu1 %vm6804_vm3, %v7910_v52  ;;  %v7772_v52 = vld [vmem:[#allocation3 + $0x6d] sm:$0xff] }
 0x66d   :  { %11014 = vmatmul.msk.f32.gmra.mxu2 %vm6804_vm3, %v8115_v11  ;;  %11021 = vmatmul.msk.f32.gmra.mxu3 %vm6804_vm3, %v8107_v48  ;;  %v8467_v11 = vld [vmem:[%s15232_s3 + $0x28] sm:$0xff] }
 0x66e   :  { %8504 = vmatpush.msrb.mxu2 %v8467_v11  ;;  %v8244_v11 = vld [vmem:[#allocation3 + $0xb2] sm:$0x3] }
 0x670   :  { %v7560_v20 = vpop.f32.mrf.mxu2  ;;  %v7706_v15 = vpop.f32.mrf.mxu3 }
 0x671   :  { %v7602_v35 = vadd.f32 %v7560_v20, %v7456_v45  ;;  %v7280_v46 = vpop.f32.mrf.mxu0  ;;  %v7417_v1 = vpop.f32.mrf.mxu1 }
 0x672   :  { %v7314_v5 = vadd.f32 %v7280_v46, %v14500_v54  ;;  %v8541_v54 = vld [vmem:[%s15232_s3 + $0x30] sm:$0xff]  ;;  %v7916_v1 = vld [vmem:[#allocation3 + $0x5e] sm:$0xff] }
 0x673   :  { %v14598_v6 = vadd.f32 %v7706_v15, %v7602_v35  ;;  %8578 = vmatpush.msrb.mxu3 %v8541_v54  ;;  %v8318_v54 = vld [vmem:[#allocation3 + $0xba] sm:$0x3] }
 0x674   :  { %10986 = vmatmul.msk.f32.gmra.mxu0 %vm6804_vm3, %v7768_v21  ;;  %10999 = vmatmul.msk.f32.gmra.mxu1 %vm6804_vm3, %v7911_v14  ;;  %v7773_v14 = vld [vmem:[#allocation3 + $0x75] sm:$0xff] }
 0x675   :  { %11015 = vmatmul.msk.f32.gmra.mxu2 %vm6804_vm3, %v8116_v56  ;;  %11022 = vmatmul.msk.f32.gmra.mxu3 %vm6804_vm3, %v14445_v9 }
 0x678   :  { %v7563_v33 = vpop.f32.mrf.mxu2  ;;  %v7709_v38 = vpop.f32.mrf.mxu3 }
 0x679   :  { %v7283_v30 = vpop.f32.mrf.mxu0  ;;  %v7420_v43 = vpop.f32.mrf.mxu1 }
 0x67a   :  { %v7458_v22 = vadd.f32 %v7420_v43, %v7312_v57  ;;  %v7315_v48 = vadd.f32 %v7283_v30, %v14509_v19  ;;  %v8314_v19 = vld [vmem:[#allocation3 + $0x9a] sm:$0xff] }
 0x67b   :  { %v7774_v57 = vld [vmem:[#allocation3 + $0x7d] sm:$0xff] }
 0x67c   :  { %10987 = vmatmul.msk.f32.gmra.mxu0 %vm6804_vm3, %v7769_v18  ;;  %11000 = vmatmul.msk.f32.gmra.mxu1 %vm6804_vm3, %v7912_v44 }
 0x67d   :  { %11016 = vmatmul.msk.f32.gmra.mxu2 %vm6804_vm3, %v8117_v32  ;;  %11023 = vmatmul.msk.f32.gmra.mxu3 %vm6804_vm3, %v8109_v36  ;;  %v7917_v32 = vld [vmem:[#allocation3 + $0x66] sm:$0xff] }
 0x680   :  { %v7566_v9 = vpop.f32.mrf.mxu2  ;;  %v7712_v13 = vpop.f32.mrf.mxu3 }
 0x681   :  { %v7604_v39 = vadd.f32 %v7566_v9, %v7458_v22  ;;  %v7286_v47 = vpop.f32.mrf.mxu0  ;;  %v7423_v58 = vpop.f32.mrf.mxu1  ;;  %v8315_v22 = vld [vmem:[#allocation3 + $0xa2] sm:$0xff] }
 0x682   :  { %v7316_v56 = vadd.f32 %v7286_v47, %v14517_v27 }
 0x683   :  { %v14610_v62 = vadd.f32 %v7712_v13, %v7604_v39 }
 0x684   :  { %10988 = vmatmul.msk.f32.gmra.mxu0 %vm6804_vm3, %v7770_v59  ;;  %11001 = vmatmul.msk.f32.gmra.mxu1 %vm6804_vm3, %v7913_v17 }
 0x685   :  { %11017 = vmatmul.msk.f32.gmra.mxu2 %vm6804_vm3, %v8118_v61  ;;  %11024 = vmatmul.msk.f32.gmra.mxu3 %vm6804_vm3, %v8110_v63  ;;  %v7775_v61 = vld [vmem:[#allocation3 + $0x85] sm:$0xff]  ;;  %v7918_v63 = vld [vmem:[#allocation3 + $0x6e] sm:$0xff] }
 0x688   :  { %v7569_v24 = vpop.f32.mrf.mxu2  ;;  %v7715_v12 = vpop.f32.mrf.mxu3 }
 0x689   :  { %v7289_v41 = vpop.f32.mrf.mxu0  ;;  %v7426_v23 = vpop.f32.mrf.mxu1 }
 0x68a   :  { %v7460_v49 = vadd.f32 %v7426_v23, %v7314_v5  ;;  %v7317_v27 = vadd.f32 %v7289_v41, %v14529_v34  ;;  %v7776_v23 = vld [vmem:[#allocation3 + $0x8d] sm:$0xff] }
 0x68c   :  { %10989 = vmatmul.msk.f32.gmra.mxu0 %vm6804_vm3, %v7771_v25  ;;  %11002 = vmatmul.msk.f32.gmra.mxu1 %vm6804_vm3, %v7914_v42  ;;  %v7919_v25 = vld [vmem:[#allocation3 + $0x76] sm:$0xff] }
 0x68d   :  { %11025 = vmatmul.msk.f32.vlgmr.msra.gmra.mxu2 %vm6804_vm3, %v14538_v26  ;;  %11032 = vmatmul.msk.f32.vlgmr.msra.gmra.mxu3 %vm6804_vm3, %v8312_v60  ;;  %v8313_v26 = vld [vmem:[#allocation3 + $0x92] sm:$0xff] }
 0x68e   :  { %v8317_v42 = vld [vmem:[#allocation3 + $0xb2] sm:$0xff] }
 0x690   :  { %v7572_v53 = vpop.f32.mrf.mxu2  ;;  %v7718_v3 = vpop.f32.mrf.mxu3 }
 0x691   :  { %v7606_v28 = vadd.f32 %v7572_v53, %v7460_v49  ;;  %v7292_v29 = vpop.f32.mrf.mxu0  ;;  %v7429_v8 = vpop.f32.mrf.mxu1 }
 0x692   :  { %v7461_v40 = vadd.f32 %v7429_v8, %v7315_v48 }
 0x693   :  { %v14622_v7 = vadd.f32 %v7718_v3, %v7606_v28 }
 0x694   :  { %10990 = vmatmul.msk.f32.gmra.mxu0 %vm6804_vm3, %v7772_v52  ;;  %11003 = vmatmul.msk.f32.gmra.mxu1 %vm6804_vm3, %v7915_v4  ;;  %v7920_v4 = vld [vmem:[#allocation3 + $0x7e] sm:$0xff]  ;;  %v8386_v52 = vld [vmem:[#allocation3 + $0x8b] sm:$0xff] }
 0x695   :  { %11026 = vmatmul.msk.f32.gmra.mxu2 %vm6804_vm3, %v8312_v60  ;;  %11033 = vmatmul.msk.f32.gmra.mxu3 %vm6804_vm3, %v8313_v26 }
 0x698   :  { %v7575_v45 = vpop.f32.mrf.mxu2  ;;  %v7721_v20 = vpop.f32.mrf.mxu3 }
 0x699   :  { %v7607_v15 = vadd.f32 %v7575_v45, %v7461_v40  ;;  %v7295_v35 = vpop.f32.mrf.mxu0  ;;  %v7432_v46 = vpop.f32.mrf.mxu1 }
 0x69a   :  { %v7462_v33 = vadd.f32 %v7432_v46, %v7316_v56  ;;  %v7319_v60 = vadd.f32 %v7295_v35, %v14545_v55  ;;  %v7921_v35 = vld [vmem:[#allocation3 + $0x86] sm:$0xff]  ;;  %v8387_v46 = vld [vmem:[#allocation3 + $0x93] sm:$0xff] }
 0x69b   :  { %v14635_v21 = vadd.f32 %v7721_v20, %v7607_v15 }
 0x69c   :  { %10991 = vmatmul.msk.f32.gmra.mxu0 %vm6804_vm3, %v7773_v14  ;;  %11004 = vmatmul.msk.f32.gmra.mxu1 %vm6804_vm3, %v7916_v1  ;;  %v8534_v1 = vld [vmem:[#allocation3 + $0x94] sm:$0xff] }
 0x69d   :  { %11027 = vmatmul.msk.f32.gmra.mxu2 %vm6804_vm3, %v8313_v26  ;;  %11034 = vmatmul.msk.f32.gmra.mxu3 %vm6804_vm3, %v8314_v19 }
 0x6a0   :  { %v7578_v38 = vpop.f32.mrf.mxu2  ;;  %v7724_v30 = vpop.f32.mrf.mxu3 }
 0x6a1   :  { %v7608_v43 = vadd.f32 %v7578_v38, %v7462_v33  ;;  %v7298_v18 = vpop.f32.mrf.mxu0  ;;  %v7435_v44 = vpop.f32.mrf.mxu1 }
 0x6a2   :  { %v7463_v9 = vadd.f32 %v7435_v44, %v7317_v27  ;;  %v8388_v44 = vld [vmem:[#allocation3 + $0x9b] sm:$0xff] }
 0x6a3   :  { %v14642_v36 = vadd.f32 %v7724_v30, %v7608_v43 }
 0x6a4   :  { %10992 = vmatmul.msk.f32.gmra.mxu0 %vm6804_vm3, %v7774_v57  ;;  %11005 = vmatmul.msk.f32.gmra.mxu1 %vm6804_vm3, %v7917_v32 }
 0x6a5   :  { %11028 = vmatmul.msk.f32.gmra.mxu2 %vm6804_vm3, %v8314_v19  ;;  %11035 = vmatmul.msk.f32.gmra.mxu3 %vm6804_vm3, %v8315_v22 }
 0x6a8   :  { %v7581_v13 = vpop.f32.mrf.mxu2  ;;  %v7727_v39 = vpop.f32.mrf.mxu3 }
 0x6a9   :  { %v7609_v47 = vadd.f32 %v7581_v13, %v7463_v9  ;;  %v7301_v58 = vpop.f32.mrf.mxu0  ;;  %v7438_v59 = vpop.f32.mrf.mxu1 }
 0x6aa   :  { %v8536_v59 = vld [vmem:[#allocation3 + $0xa4] sm:$0xff] }
 0x6ab   :  { %v14649_v17 = vadd.f32 %v7727_v39, %v7609_v47  ;;  %v8389_v39 = vld [vmem:[#allocation3 + $0xa3] sm:$0xff]  ;;  %v8608_v47 = vld [vmem:[#allocation3 + $0x95] sm:$0xff] }
 0x6ac   :  { %10993 = vmatmul.msk.f32.gmra.mxu0 %vm6804_vm3, %v7775_v61  ;;  %11006 = vmatmul.msk.f32.gmra.mxu1 %vm6804_vm3, %v7918_v63 }
 0x6ad   :  { %11029 = vmatmul.msk.f32.gmra.mxu2 %vm6804_vm3, %v8315_v22  ;;  %11036 = vmatmul.msk.f32.gmra.mxu3 %vm6804_vm3, %v14490_v16  ;;  %v14695_v22 = vld [vmem:[%s15233_s4] ss:$0 sm:$0xff] }
 0x6b0   :  { %v7584_v34 = vpop.f32.mrf.mxu2  ;;  %v7730_v24 = vpop.f32.mrf.mxu3 }
 0x6b1   :  { %v14656_v12 = vpop.f32.mrf.mxu0  ;;  %v7441_v41 = vpop.f32.mrf.mxu1 }
 0x6b2   :  { %v7465_v5 = vadd.f32 %v7441_v41, %v7319_v60  ;;  %v8390_v41 = vld [vmem:[#allocation3 + $0xab] sm:$0xff]  ;;  %v8855_v60 = vld [vmem:[%s15234_s5 + $0x8] sm:$0xff] }
 0x6b3   :  { %8970 = vmatpush.msra.mxu3 %v8855_v60 }
 0x6b4   :  { %10994 = vmatmul.msk.f32.gmra.mxu0 %vm6804_vm3, %v7776_v23  ;;  %11007 = vmatmul.msk.f32.gmra.mxu1 %vm6804_vm3, %v7919_v25  ;;  %v8609_v23 = vld [vmem:[#allocation3 + $0x9d] sm:$0xff]  ;;  %v8537_v25 = vld [vmem:[#allocation3 + $0xac] sm:$0xff] }
 0x6b5   :  { %11030 = vmatmul.msk.f32.gmra.mxu2 %vm6804_vm3, %v14490_v16  ;;  %11037 = vmatmul.msk.f32.gmra.mxu3 %vm6804_vm3, %v8317_v42  ;;  %v7320_v16 = vadd.f32 %v7298_v18, %v14552_v37  ;;  %v7321_v37 = vadd.f32 %v7301_v58, %v14558_v51  ;;  %v7922_v18 = vld [vmem:[#allocation3 + $0x8e] sm:$0xff]  ;;  %v8535_v51 = vld [vmem:[#allocation3 + $0x9c] sm:$0xff] }
 0x6b6   :  { %v8865_v42 = vld [vmem:[%s15234_s5 + $0x18] sm:$0xff] }
 0x6b7   :  { %8905 = vmatpush.msra.mxu2 %v8865_v42 }
 0x6b8   :  { %v7587_v49 = vpop.f32.mrf.mxu2  ;;  %v7733_v53 = vpop.f32.mrf.mxu3 }
 0x6b9   :  { %v7611_v3 = vadd.f32 %v7587_v49, %v7465_v5  ;;  %v7444_v28 = vpop.f32.mrf.mxu1  ;;  %v7843_v29 = vpop.f32.mrf.mxu0 }
 0x6ba   :  { %v7466_v55 = vadd.f32 %v7444_v28, %v7320_v16  ;;  %v8391_v16 = vld [vmem:[#allocation3 + $0xb3] sm:$0xff] }
 0x6bb   :  { %v14664_v8 = vadd.f32 %v7733_v53, %v7611_v3 }
 0x6bc   :  { %11008 = vmatmul.msk.f32.gmra.mxu1 %vm6804_vm3, %v7920_v4  ;;  %11039 = vmatmul.msk.f32.vlgmr.msra.gmra.mxu0 %vm6804_vm3, %v8386_v52  ;;  %v8854_v4 = vld [vmem:[%s15234_s5] sm:$0xff] }
 0x6bd   :  { %11031 = vmatmul.msk.f32.gmra.mxu2 %vm6804_vm3, %v8244_v11  ;;  %11038 = vmatmul.msk.f32.gmra.mxu3 %vm6804_vm3, %v8318_v54 }
 0x6be   :  { %8971 = vmatpush.msra.mxu3 %v8854_v4 }
 0x6c0   :  { %v7590_v26 = vpop.f32.mrf.mxu2  ;;  %v7736_v48 = vpop.f32.mrf.mxu3 }
 0x6c1   :  { %v7612_v40 = vadd.f32 %v7590_v26, %v7466_v55  ;;  %v7447_v45 = vpop.f32.mrf.mxu1  ;;  %v7846_v20 = vpop.f32.mrf.mxu0  ;;  %v8610_v55 = vld [vmem:[#allocation3 + $0xa5] sm:$0xff] }
 0x6c2   :  { %v7467_v14 = vadd.f32 %v7447_v45, %v7321_v37 }
 0x6c3   :  { %v14671_v15 = vadd.f32 %v7736_v48, %v7612_v40 }
 0x6c4   :  { %11009 = vmatmul.msk.f32.gmra.mxu1 %vm6804_vm3, %v7921_v35  ;;  %11040 = vmatmul.msk.f32.gmra.mxu0 %vm6804_vm3, %v8387_v46 }
 0x6c5   :  { %11046 = vmatmul.msk.f32.vlgmr.msrb.gmra.mxu2 %vm6804_vm3, %v14563_v10  ;;  %11053 = vmatmul.msk.f32.vlgmr.msrb.gmra.mxu3 %vm6804_vm3, %v8534_v1  ;;  %v7891_v10 = vadd.f32 %v7843_v29, %v14580_v0  ;;  %v8864_v29 = vld [vmem:[%s15234_s5 + $0x10] sm:$0xff] }
 0x6c6   :  { %8906 = vmatpush.msra.mxu2 %v8864_v29 }
 0x6c8   :  { %v7593_v19 = vpop.f32.mrf.mxu2  ;;  %v7739_v56 = vpop.f32.mrf.mxu3 }
 0x6c9   :  { %v7613_v33 = vadd.f32 %v7593_v19, %v7467_v14  ;;  %v14679_v38 = vpop.f32.mrf.mxu1  ;;  %v7849_v30 = vpop.f32.mrf.mxu0  ;;  %v8392_v14 = vld [vmem:[#allocation3 + $0xbb] sm:$0x3]  ;;  %v8611_v19 = vld [vmem:[#allocation3 + $0xad] sm:$0xff] }
 0x6ca   :  { %v7893_v49 = vadd.f32 %v7849_v30, %v14591_v31  ;;  %v9006_v30 = vld [vmem:[%s15234_s5 + $0x28] sm:$0xff] }
 0x6cb   :  { %v14681_v43 = vadd.f32 %v7739_v56, %v7613_v33  ;;  %v8539_v33 = vld [vmem:[#allocation3 + $0xbc] sm:$0xff]  ;;  %9045 = vmatpush.msrb.mxu1 %v9006_v30 }
 0x6cc   :  { %11010 = vmatmul.msk.f32.gmra.mxu1 %vm6804_vm3, %v7922_v18  ;;  %11041 = vmatmul.msk.f32.gmra.mxu0 %vm6804_vm3, %v8388_v44  ;;  %v9005_v44 = vld [vmem:[%s15234_s5 + $0x20] sm:$0xff] }
 0x6cd   :  { %11047 = vmatmul.msk.f32.gmra.mxu2 %vm6804_vm3, %v8534_v1  ;;  %11054 = vmatmul.msk.f32.gmra.mxu3 %vm6804_vm3, %v8535_v51 }
 0x6ce   :  { %9046 = vmatpush.msrb.mxu1 %v9005_v44 }
 0x6d0   :  { %v14688_v32 = vpop.f32.mrf.mxu2  ;;  %v14690_v57 = vpop.f32.mrf.mxu3 }
 0x6d1   :  { %v7852_v27 = vpop.f32.mrf.mxu0  ;;  %v7989_v9 = vpop.f32.mrf.mxu1 }
 0x6d2   :  { %v8037_v13 = vadd.f32 %v7989_v9, %v7891_v10  ;;  %v7894_v45 = vadd.f32 %v7852_v27, %v14598_v6  ;;  %v8612_v9 = vld [vmem:[#allocation3 + $0xb5] sm:$0xff] }
 0x6d4   :  { %v8056_v58 = vadd.f32 %v14695_v22, %v8037_v13  ;;  %11042 = vmatmul.msk.f32.gmra.mxu0 %vm6804_vm3, %v8389_v39  ;;  %11060 = vmatmul.msk.f32.vlgmr.msra.gmra.mxu1 %vm6804_vm3, %v8608_v47  ;;  %v8466_v13 = vld [vmem:[#allocation3 + $0xbc] sm:$0x3] }
 0x6d5   :  { %11048 = vmatmul.msk.f32.gmra.mxu2 %vm6804_vm3, %v8535_v51  ;;  %11055 = vmatmul.msk.f32.gmra.mxu3 %vm6804_vm3, %v8536_v59  ;;  %v11186_v39 = vld [vmem:[#allocation3 + $0x96] sm:$0xff] }
 0x6d6   :  { %v8072_v0 = vmax.f32 %v8056_v58, 0.0 }
 0x6d8   :  { %8088 = vst [vmem:[#allocation2] sm:$0xff] %v8072_v0  ;;  %v8158_v61 = vpop.f32.mrf.mxu2  ;;  %v8217_v63 = vpop.f32.mrf.mxu3 }
 0x6d9   :  { %v7855_v34 = vpop.f32.mrf.mxu0  ;;  %v7992_v24 = vpop.f32.mrf.mxu1 }
 0x6dc   :  { %11043 = vmatmul.msk.f32.gmra.mxu0 %vm6804_vm3, %v8390_v41  ;;  %11061 = vmatmul.msk.f32.gmra.mxu1 %vm6804_vm3, %v8609_v23  ;;  %v8613_v41 = vld [vmem:[#allocation3 + $0xbd] sm:$0xff] }
 0x6dd   :  { %11049 = vmatmul.msk.f32.gmra.mxu2 %vm6804_vm3, %v8536_v59  ;;  %11056 = vmatmul.msk.f32.gmra.mxu3 %vm6804_vm3, %v8537_v25  ;;  %v8683_v23 = vld [vmem:[#allocation3 + $0x9e] sm:$0xff] }
 0x6df   :  { %v8779_v5 = vld [vmem:[#allocation2] ss:$2 sm:$0xf] }
 0x6e0   :  { %v8781_v53 = vrot.slane %v8779_v5, 7  ;;  %v14713_v3 = vpop.f32.mrf.mxu2  ;;  %v14715_v28 = vpop.f32.mrf.mxu3 }
 0x6e1   :  { %v7858_v52 = vpop.f32.mrf.mxu0  ;;  %v7995_v11 = vpop.f32.mrf.mxu1 }
 0x6e2   :  { %v8039_v54 = vadd.f32 %v7995_v11, %v7893_v49  ;;  %v8783_v31 = vsel %vm6625_vm2, 0.0, %v8781_v53  ;;  %v7896_v58 = vadd.f32 %v7858_v52, %v14610_v62  ;;  %v8614_v52 = vld [vmem:[#allocation3 + $0xc5] sm:$0x3] }
 0x6e3   :  { %v8785_v26 = vsel %vm8784_vm4, %v8783_v31, 0.0  ;;  %v8684_v11 = vld [vmem:[#allocation3 + $0xa6] sm:$0xff] }
 0x6e4   :  { %v8058_v48 = vadd.f32 %v14695_v22, %v8039_v54  ;;  %11044 = vmatmul.msk.f32.gmra.mxu0 %vm6804_vm3, %v8391_v16  ;;  %11062 = vmatmul.msk.f32.gmra.mxu1 %vm6804_vm3, %v8610_v55  ;;  %8786 = vst [vmem:[#allocation4 + $0x6] sm:$0x3f] %v8785_v26 }
 0x6e5   :  { %11050 = vmatmul.msk.f32.gmra.mxu2 %vm6804_vm3, %v8537_v25  ;;  %11057 = vmatmul.msk.f32.gmra.mxu3 %vm6804_vm3, %v14526_v50 }
 0x6e6   :  { %v8074_v40 = vmax.f32 %v8058_v48, 0.0 }
 0x6e8   :  { %8090 = vst [vmem:[#allocation2 + $0x10] sm:$0xff] %v8074_v40  ;;  %v14732_v20 = vpop.f32.mrf.mxu2  ;;  %v14734_v35 = vpop.f32.mrf.mxu3 }
 0x6e9   :  { %v7861_v46 = vpop.f32.mrf.mxu0  ;;  %v7998_v1 = vpop.f32.mrf.mxu1 }
 0x6ea   :  { %v8040_v37 = vadd.f32 %v7998_v1, %v7894_v45 }
 0x6eb   :  { %v8856_v62 = vld [vmem:[#allocation4 + $0x1] sm:$0xff] }
 0x6ec   :  { %v8059_v56 = vadd.f32 %v14695_v22, %v8040_v37  ;;  %11045 = vmatmul.msk.f32.gmra.mxu0 %vm6804_vm3, %v8392_v14  ;;  %11063 = vmatmul.msk.f32.gmra.mxu1 %vm6804_vm3, %v8611_v19  ;;  %v8846_v5 = vld [vmem:[#allocation4] sm:$0xff] }
 0x6ed   :  { %11051 = vmatmul.msk.f32.gmra.mxu2 %vm6804_vm3, %v14526_v50  ;;  %11058 = vmatmul.msk.f32.gmra.mxu3 %vm6804_vm3, %v8539_v33  ;;  %v8540_v50 = vld [vmem:[#allocation3 + $0xc4] sm:$0x3]  ;;  %v8685_v14 = vld [vmem:[#allocation3 + $0xae] sm:$0xff] }
 0x6ee   :  { %v8075_v6 = vmax.f32 %v8059_v56, 0.0  ;;  %v8997_v19 = vld [vmem:[#allocation4 + $0x2] sm:$0xff] }
 0x6f0   :  { %8091 = vst [vmem:[#allocation2 + $0x18] sm:$0xff] %v8075_v6  ;;  %v14745_v18 = vpop.f32.mrf.mxu2  ;;  %v14750_v27 = vpop.f32.mrf.mxu3 }
 0x6f1   :  { %v7864_v51 = vpop.f32.mrf.mxu0  ;;  %v8001_v10 = vpop.f32.mrf.mxu1 }
 0x6f2   :  { %v7898_v26 = vadd.f32 %v7864_v51, %v14622_v7  ;;  %v9089_v7 = vld [vmem:[%s15234_s5 + $0x38] sm:$0xff]  ;;  %v9088_v51 = vld [vmem:[%s15234_s5 + $0x30] sm:$0xff] }
 0x6f3   :  { %9128 = vmatpush.msra.mxu0 %v9089_v7 }
 0x6f4   :  { %11064 = vmatmul.msk.f32.gmra.mxu1 %vm6804_vm3, %v8612_v9  ;;  %11067 = vmatmul.msk.f32.vlgmr.msrb.gmra.mxu0 %vm6804_vm3, %v11186_v39 }
 0x6f5   :  { %11052 = vmatmul.msk.f32.gmra.mxu2 %vm6804_vm3, %v8466_v13  ;;  %11059 = vmatmul.msk.f32.gmra.mxu3 %vm6804_vm3, %v8540_v50  ;;  %v8686_v13 = vld [vmem:[#allocation3 + $0xb6] sm:$0xff] }
 0x6f6   :  { %9129 = vmatpush.msra.mxu0 %v9088_v51 }
 0x6f7   :  { %v8788_v47 = vld [vmem:[#allocation2 + $0x14] ss:$2 sm:$0xf] }
 0x6f8   :  { %v14757_v59 = vpop.f32.mrf.mxu2  ;;  %v8790_v0 = vrot.slane %v8788_v47, 7  ;;  %v14761_v42 = vpop.f32.mrf.mxu3 }
 0x6f9   :  { %v7867_v61 = vpop.f32.mrf.mxu0  ;;  %v8004_v63 = vpop.f32.mrf.mxu1 }
 0x6fa   :  { %v8042_v34 = vadd.f32 %v8004_v63, %v7896_v58  ;;  %v8792_v24 = vsel %vm6625_vm2, 0.0, %v8790_v0  ;;  %v7899_v30 = vadd.f32 %v7867_v61, %v14635_v21 }
 0x6fb   :  { %v8793_v25 = vsel %vm8784_vm4, %v8792_v24, 0.0 }
 0x6fc   :  { %v8061_v60 = vadd.f32 %v14695_v22, %v8042_v34  ;;  %11065 = vmatmul.msk.f32.gmra.mxu1 %vm6804_vm3, %v8613_v41  ;;  %11068 = vmatmul.msk.f32.gmra.mxu0 %vm6804_vm3, %v8683_v23  ;;  %8794 = vst [vmem:[#allocation4 + $0xc] sm:$0x3f] %v8793_v25  ;;  %v11187_v25 = vld [vmem:[#allocation3] sm:$0xff] }
 0x6fd   :  { %11074 = vmatmul.msk.f32.vlgmr.msra.gmra.mxu2 %vm8866_vm5, %v8856_v62  ;;  %11082 = vmatmul.msk.f32.vlgmr.msra.gmra.mxu3 %vm8866_vm5, %v8846_v5 }
 0x6fe   :  { %v8077_v49 = vmax.f32 %v8061_v60, 0.0 }
 0x700   :  { %8093 = vst [vmem:[#allocation2 + $0x28] sm:$0xff] %v8077_v49  ;;  %v8173_v53 = vpop.f32.mrf.mxu2  ;;  %v8232_v16 = vpop.f32.mrf.mxu3 }
 0x701   :  { %v7870_v29 = vpop.f32.mrf.mxu0  ;;  %v8007_v4 = vpop.f32.mrf.mxu1 }
 0x702   :  { %v7900_v61 = vadd.f32 %v7870_v29, %v14642_v36  ;;  %v8688_v29 = vld [vmem:[#allocation3 + $0xc6] sm:$0x3] }
 0x703   :  { %v8857_v54 = vld [vmem:[#allocation4 + $0x9] sm:$0xff] }
 0x704   :  { %v14768_v31 = vld [vmem:[#allocation4 + $0x8] sm:$0xff]  ;;  %11066 = vmatmul.msk.f32.gmra.mxu1 %vm6804_vm3, %v8614_v52  ;;  %11069 = vmatmul.msk.f32.gmra.mxu0 %vm6804_vm3, %v8684_v11 }
 0x705   :  { %11075 = vmatmul.msk.f32.gmra.mxu2 %vm8866_vm5, %v8857_v54  ;;  %11083 = vmatmul.msk.f32.gmra.mxu3 %vm8866_vm5, %v14768_v31  ;;  %v8998_v21 = vld [vmem:[#allocation4 + $0xa] sm:$0xff] }
 0x707   :  { %v8796_v55 = vld [vmem:[#allocation2 + $0x28] ss:$2 sm:$0xf] }
 0x708   :  { %v8798_v48 = vrot.slane %v8796_v55, 7  ;;  %v8176_v46 = vpop.f32.mrf.mxu2  ;;  %v8235_v44 = vpop.f32.mrf.mxu3 }
 0x709   :  { %v7873_v40 = vpop.f32.mrf.mxu0  ;;  %v8010_v45 = vpop.f32.mrf.mxu1 }
 0x70a   :  { %v8044_v1 = vadd.f32 %v8010_v45, %v7898_v26  ;;  %v8800_v37 = vsel %vm6625_vm2, 0.0, %v8798_v48  ;;  %v7901_v49 = vadd.f32 %v7873_v40, %v14649_v17 }
 0x70b   :  { %v8801_v56 = vsel %vm8784_vm4, %v8800_v37, 0.0  ;;  %v9080_v37 = vld [vmem:[#allocation4 + $0x6] sm:$0xff] }
 0x70c   :  { %v8063_v33 = vadd.f32 %v14695_v22, %v8044_v1  ;;  %11070 = vmatmul.msk.f32.gmra.mxu0 %vm6804_vm3, %v8685_v14  ;;  %11090 = vmatmul.msk.f32.vlgmr.msrb.gmra.mxu1 %vm8866_vm5, %v8997_v19  ;;  %8802 = vst [vmem:[#allocation4 + $0x12] sm:$0x3f] %v8801_v56 }
 0x70e   :  { %v8079_v6 = vmax.f32 %v8063_v33, 0.0 }
 0x710   :  { %8095 = vst [vmem:[#allocation2 + $0x38] sm:$0xff] %v8079_v6  ;;  %v8284_v47 = vpop.f32.mrf.mxu2  ;;  %v8358_v24 = vpop.f32.mrf.mxu3  ;;  %v14819_v6 = vld [vmem:[#allocation4 + $0x20] sm:$0xff] }
 0x711   :  { %v7876_v10 = vpop.f32.mrf.mxu0  ;;  %v8013_v50 = vpop.f32.mrf.mxu1 }
 0x712   :  { %v8045_v9 = vadd.f32 %v8013_v50, %v7899_v30 }
 0x713   :  { %v14788_v39 = vld [vmem:[#allocation4 + $0x10] sm:$0xff] }
 0x714   :  { %v8064_v58 = vadd.f32 %v14695_v22, %v8045_v9  ;;  %11071 = vmatmul.msk.f32.gmra.mxu0 %vm6804_vm3, %v8686_v13  ;;  %11084 = vmatmul.msk.f32.gmra.mxu3 %vm8866_vm5, %v14788_v39  ;;  %v14825_v50 = vld [vmem:[#allocation4 + $0xe] sm:$0xff] }
 0x715   :  { %11091 = vmatmul.msk.f32.gmra.mxu1 %vm8866_vm5, %v8998_v21  ;;  %v8860_v21 = vld [vmem:[#allocation4 + $0x21] sm:$0xff] }
 0x716   :  { %v8080_v0 = vmax.f32 %v8064_v58, 0.0 }
 0x718   :  { %8096 = vst [vmem:[#allocation2 + $0x40] sm:$0xff] %v8080_v0  ;;  %v14798_v60 = vpop.f32.mrf.mxu2  ;;  %v14803_v16 = vpop.f32.mrf.mxu3 }
 0x719   :  { %v7879_v63 = vpop.f32.mrf.mxu0  ;;  %v8016_v34 = vpop.f32.mrf.mxu1 }
 0x71a   :  { %v8046_v41 = vadd.f32 %v8016_v34, %v7900_v61  ;;  %v7903_v19 = vadd.f32 %v7879_v63, %v14664_v8  ;;  %v9001_v61 = vld [vmem:[#allocation4 + $0x22] sm:$0xff] }
 0x71c   :  { %v8065_v23 = vadd.f32 %v14695_v22, %v8046_v41  ;;  %11072 = vmatmul.msk.f32.gmra.mxu0 %vm6804_vm3, %v11187_v25 }
 0x71e   :  { %v8081_v62 = vmax.f32 %v8065_v23, 0.0 }
 0x71f   :  { %v8804_v5 = vld [vmem:[#allocation2 + $0x3c] ss:$2 sm:$0xf] }
 0x720   :  { %v8806_v53 = vrot.slane %v8804_v5, 7  ;;  %8097 = vst [vmem:[#allocation2 + $0x48] sm:$0xff] %v8081_v62  ;;  %v14807_v48 = vpop.f32.mrf.mxu2  ;;  %v14816_v14 = vpop.f32.mrf.mxu3 }
 0x721   :  { %v7882_v4 = vpop.f32.mrf.mxu0  ;;  %v8019_v36 = vpop.f32.mrf.mxu1 }
 0x722   :  { %v8047_v52 = vadd.f32 %v8019_v36, %v7901_v49  ;;  %v8808_v11 = vsel %vm6625_vm2, 0.0, %v8806_v53  ;;  %v7904_v9 = vadd.f32 %v7882_v4, %v14671_v15  ;;  %v7322_v15 = vadd.f32 %v14656_v12, %v14567_v2  ;;  %v14851_v36 = vld [vmem:[#allocation4 + $0x1e] sm:$0xff] }
 0x723   :  { %v8809_v54 = vsel %vm8784_vm4, %v8808_v11, 0.0 }
 0x724   :  { %v8066_v55 = vadd.f32 %v14695_v22, %v8047_v52  ;;  %11073 = vmatmul.msk.f32.gmra.mxu0 %vm6804_vm3, %v8688_v29  ;;  %8810 = vst [vmem:[#allocation4 + $0x18] sm:$0x3f] %v8809_v54  ;;  %v7468_v23 = vadd.f32 %v14679_v38, %v7322_v15 }
 0x726   :  { %v8082_v26 = vmax.f32 %v8066_v55, 0.0  ;;  %v7614_v49 = vadd.f32 %v14688_v32, %v7468_v23  ;;  %v8221_v23 = vadd.f32 %v14715_v28, %v14713_v3 }
 0x728   :  { %8098 = vst [vmem:[#allocation2 + $0x50] sm:$0xff] %v8082_v26  ;;  %v14821_v30 = vpop.f32.mrf.mxu2  ;;  %v14833_v13 = vpop.f32.mrf.mxu3  ;;  %v7760_v2 = vadd.f32 %v14690_v57, %v7614_v49 }
 0x729   :  { %v7885_v17 = vpop.f32.mrf.mxu0  ;;  %v8022_v40 = vpop.f32.mrf.mxu1 }
 0x72a   :  { %v7905_v25 = vadd.f32 %v7885_v17, %v14681_v43  ;;  %v9172_v40 = vld [vmem:[%s15234_s5 + $0x48] sm:$0xff] }
 0x72b   :  { %v8858_v45 = vld [vmem:[#allocation4 + $0x11] sm:$0xff]  ;;  %v8859_v44 = vld [vmem:[#allocation4 + $0x19] sm:$0xff]  ;;  %9211 = vmatpush.msrb.mxu2 %v9172_v40 }
 0x72c   :  { %v14809_v46 = vld [vmem:[#allocation4 + $0x18] sm:$0xff]  ;;  %11076 = vmatmul.msk.f32.gmra.mxu2 %vm8866_vm5, %v8858_v45  ;;  %11098 = vmatmul.msk.f32.vlgmr.msra.gmra.mxu0 %vm8866_vm5, %v9080_v37 }
 0x72d   :  { %v8999_v1 = vld [vmem:[#allocation4 + $0x12] sm:$0xff]  ;;  %11085 = vmatmul.msk.f32.gmra.mxu3 %vm8866_vm5, %v14809_v46  ;;  %v9000_v10 = vld [vmem:[#allocation4 + $0x1a] sm:$0xff] }
 0x72e   :  { %11092 = vmatmul.msk.f32.gmra.mxu1 %vm8866_vm5, %v8999_v1  ;;  %v14836_v34 = vld [vmem:[#allocation4 + $0x16] sm:$0xff] }
 0x730   :  { %v14839_v24 = vpop.f32.mrf.mxu2  ;;  %v14849_v53 = vpop.f32.mrf.mxu3 }
 0x731   :  { %v7888_v56 = vpop.f32.mrf.mxu0  ;;  %v8025_v33 = vpop.f32.mrf.mxu1 }
 0x732   :  { %v8049_v7 = vadd.f32 %v8025_v33, %v7903_v19  ;;  %v7906_v52 = vadd.f32 %v7888_v56, %v7760_v2 }
 0x734   :  { %v8068_v51 = vadd.f32 %v14695_v22, %v8049_v7  ;;  %11077 = vmatmul.msk.f32.gmra.mxu2 %vm8866_vm5, %v8859_v44  ;;  %11099 = vmatmul.msk.f32.gmra.mxu0 %vm8866_vm5, %v14825_v50 }
 0x735   :  { %11086 = vmatmul.msk.f32.gmra.mxu3 %vm8866_vm5, %v14819_v6 }
 0x736   :  { %11093 = vmatmul.msk.f32.gmra.mxu1 %vm8866_vm5, %v9000_v10  ;;  %v8084_v8 = vmax.f32 %v8068_v51, 0.0 }
 0x738   :  { %8100 = vst [vmem:[#allocation2 + $0x60] sm:$0xff] %v8084_v8  ;;  %v8299_v38 = vpop.f32.mrf.mxu2  ;;  %v8373_v45 = vpop.f32.mrf.mxu3 }
 0x739   :  { %v8028_v47 = vpop.f32.mrf.mxu1  ;;  %v8432_v58 = vpop.f32.mrf.mxu0 }
 0x73a   :  { %v8050_v0 = vadd.f32 %v8028_v47, %v7904_v9 }
 0x73c   :  { %v8069_v63 = vadd.f32 %v14695_v22, %v8050_v0  ;;  %11078 = vmatmul.msk.f32.gmra.mxu2 %vm8866_vm5, %v8860_v21  ;;  %11100 = vmatmul.msk.f32.gmra.mxu0 %vm8866_vm5, %v14836_v34 }
 0x73e   :  { %11094 = vmatmul.msk.f32.gmra.mxu1 %vm8866_vm5, %v9001_v61  ;;  %v8085_v41 = vmax.f32 %v8069_v63, 0.0 }
 0x740   :  { %8101 = vst [vmem:[#allocation2 + $0x68] sm:$0xff] %v8085_v41  ;;  %v8302_v37 = vpop.f32.mrf.mxu2  ;;  %v8376_v7 = vpop.f32.mrf.mxu3 }
 0x741   :  { %v8031_v62 = vpop.f32.mrf.mxu1  ;;  %v8435_v5 = vpop.f32.mrf.mxu0 }
 0x742   :  { %v8051_v4 = vadd.f32 %v8031_v62, %v7905_v25  ;;  %v8306_v62 = vadd.f32 %v14798_v60, %v8221_v23  ;;  %v9338_v23 = vld [vmem:[%s15234_s5 + $0x68] sm:$0xff] }
 0x743   :  { %9377 = vmatpush.msra.mxu1 %v9338_v23  ;;  %v9336_v23 = vld [vmem:[#allocation4 + $0x44] sm:$0x3] }
 0x744   :  { %v8070_v29 = vadd.f32 %v14695_v22, %v8051_v4  ;;  %11101 = vmatmul.msk.f32.gmra.mxu0 %vm8866_vm5, %v14851_v36 }
 0x746   :  { %v8086_v12 = vmax.f32 %v8070_v29, 0.0  ;;  %v8380_v29 = vadd.f32 %v14803_v16, %v8306_v62  ;;  %v8227_v16 = vadd.f32 %v14750_v27, %v14745_v18 }
 0x747   :  { %v8814_v43 = vld [vmem:[#allocation2 + $0x64] ss:$2 sm:$0xf] }
 0x748   :  { %8102 = vst [vmem:[#allocation2 + $0x70] sm:$0xff] %v8086_v12  ;;  %v8816_v11 = vrot.slane %v8814_v43, 7  ;;  %v8506_v9 = vpop.f32.mrf.mxu2  ;;  %v8580_v58 = vpop.f32.mrf.mxu3  ;;  %v8224_v12 = vadd.f32 %v14734_v35, %v14732_v20  ;;  %v8454_v38 = vadd.f32 %v8435_v5, %v8380_v29  ;;  %v9171_v43 = vld [vmem:[%s15234_s5 + $0x40] sm:$0xff] }
 0x749   :  { %v8034_v54 = vpop.f32.mrf.mxu1  ;;  %v8438_v32 = vpop.f32.mrf.mxu0  ;;  %9212 = vmatpush.msrb.mxu2 %v9171_v43  ;;  %v9421_v43 = vld [vmem:[%s15234_s5 + $0x78] sm:$0xff] }
 0x74a   :  { %v8052_v55 = vadd.f32 %v8034_v54, %v7906_v52  ;;  %v8818_v26 = vsel %vm6625_vm2, 0.0, %v8816_v11  ;;  %v8307_v3 = vadd.f32 %v14807_v48, %v8224_v12  ;;  %9460 = vmatpush.msrb.mxu0 %v9421_v43 }
 0x74b   :  { %v8819_v17 = vsel %vm8784_vm4, %v8818_v26, 0.0 }
 0x74c   :  { %v8071_v57 = vadd.f32 %v14695_v22, %v8052_v55  ;;  %8820 = vst [vmem:[#allocation4 + $0x2a] sm:$0x3f] %v8819_v17  ;;  %v8381_v54 = vadd.f32 %v14816_v14, %v8307_v3  ;;  %v8308_v17 = vadd.f32 %v14821_v30, %v8227_v16 }
 0x74e   :  { %v8087_v1 = vmax.f32 %v8071_v57, 0.0  ;;  %v8455_v26 = vadd.f32 %v8438_v32, %v8381_v54  ;;  %v8382_v48 = vadd.f32 %v14833_v13, %v8308_v17 }
 0x750   :  { %8103 = vst [vmem:[#allocation2 + $0x78] sm:$0xff] %v8087_v1  ;;  %v8509_v41 = vpop.f32.mrf.mxu2  ;;  %v8583_v49 = vpop.f32.mrf.mxu3 }
 0x751   :  { %v8441_v19 = vpop.f32.mrf.mxu0  ;;  %v8654_v21 = vpop.f32.mrf.mxu1  ;;  %v8528_v28 = vadd.f32 %v8509_v41, %v8454_v38 }
 0x752   :  { %v8456_v18 = vadd.f32 %v8441_v19, %v8382_v48 }
 0x753   :  { %v14863_v56 = vld [vmem:[#allocation4 + $0x28] sm:$0xff]  ;;  %v8602_v55 = vadd.f32 %v8583_v49, %v8528_v28  ;;  %v9504_v49 = vld [vmem:[%s15234_s5 + $0x88] sm:$0xff] }
 0x754   :  { %v14865_v33 = vld [vmem:[#allocation4 + $0x26] sm:$0xff]  ;;  %11087 = vmatmul.msk.f32.gmra.mxu3 %vm8866_vm5, %v14863_v56  ;;  %9543 = vmatpush.msra.mxu2 %v9504_v49 }
 0x755   :  { %11102 = vmatmul.msk.f32.gmra.mxu0 %vm8866_vm5, %v14865_v33 }
 0x757   :  { %v8822_v44 = vld [vmem:[#allocation2 + $0x78] ss:$2 sm:$0xf] }
 0x758   :  { %v8824_v51 = vrot.slane %v8822_v44, 7  ;;  %v8512_v2 = vpop.f32.mrf.mxu2  ;;  %v8586_v11 = vpop.f32.mrf.mxu3  ;;  %v8230_v44 = vadd.f32 %v14761_v42, %v14757_v59  ;;  %v9255_v59 = vld [vmem:[%s15234_s5 + $0x58] sm:$0xff] }
 0x759   :  { %v8444_v10 = vpop.f32.mrf.mxu0  ;;  %v8657_v4 = vpop.f32.mrf.mxu1  ;;  %v8529_v40 = vadd.f32 %v8512_v2, %v8455_v26  ;;  %9294 = vmatpush.msrb.mxu3 %v9255_v59 }
 0x75a   :  { %v8826_v8 = vsel %vm6625_vm2, 0.0, %v8824_v51  ;;  %v8676_v20 = vadd.f32 %v8657_v4, %v8602_v55  ;;  %v8309_v51 = vadd.f32 %v14839_v24, %v8230_v44 }
 0x75b   :  { %v8827_v47 = vsel %vm8784_vm4, %v8826_v8, 0.0  ;;  %v8603_v1 = vadd.f32 %v8586_v11, %v8529_v40 }
 0x75c   :  { %8828 = vst [vmem:[#allocation4 + $0x30] sm:$0x3f] %v8827_v47  ;;  %v8383_v13 = vadd.f32 %v14849_v53, %v8309_v51  ;;  %v9254_v53 = vld [vmem:[%s15234_s5 + $0x50] sm:$0xff]  ;;  %v9329_v51 = vld [vmem:[#allocation4 + $0xc] sm:$0xff] }
 0x75d   :  { %9295 = vmatpush.msrb.mxu3 %v9254_v53 }
 0x760   :  { %v8515_v35 = vpop.f32.mrf.mxu2  ;;  %v8589_v37 = vpop.f32.mrf.mxu3 }
 0x761   :  { %v8447_v0 = vpop.f32.mrf.mxu0  ;;  %v8660_v60 = vpop.f32.mrf.mxu1  ;;  %v8530_v30 = vadd.f32 %v8515_v35, %v8456_v18 }
 0x762   :  { %v8677_v27 = vadd.f32 %v8660_v60, %v8603_v1  ;;  %v8457_v0 = vadd.f32 %v8444_v10, %v8383_v13  ;;  %v9337_v10 = vld [vmem:[%s15234_s5 + $0x60] sm:$0xff] }
 0x763   :  { %v8861_v61 = vld [vmem:[#allocation4 + $0x29] sm:$0xff]  ;;  %v8604_v58 = vadd.f32 %v8589_v37, %v8530_v30  ;;  %9378 = vmatpush.msra.mxu1 %v9337_v10 }
 0x764   :  { %v9002_v63 = vld [vmem:[#allocation4 + $0x2a] sm:$0xff]  ;;  %11079 = vmatmul.msk.f32.gmra.mxu2 %vm8866_vm5, %v8861_v61 }
 0x765   :  { %v14873_v15 = vld [vmem:[#allocation4 + $0x2e] sm:$0xff]  ;;  %11095 = vmatmul.msk.f32.gmra.mxu1 %vm8866_vm5, %v9002_v63 }
 0x766   :  { %11103 = vmatmul.msk.f32.gmra.mxu0 %vm8866_vm5, %v14873_v15  ;;  %v9503_v30 = vld [vmem:[%s15234_s5 + $0x80] sm:$0xff] }
 0x767   :  { %9544 = vmatpush.msra.mxu2 %v9503_v30  ;;  %v9412_v13 = vld [vmem:[#allocation4 + $0xd] sm:$0xff] }
 0x768   :  { %v8518_v9 = vpop.f32.mrf.mxu2  ;;  %v8592_v61 = vpop.f32.mrf.mxu3  ;;  %v9333_v59 = vld [vmem:[#allocation4 + $0x2c] sm:$0xff] }
 0x769   :  { %v8450_v25 = vpop.f32.mrf.mxu0  ;;  %v8663_v14 = vpop.f32.mrf.mxu1  ;;  %v8531_v24 = vadd.f32 %v8518_v9, %v8457_v0  ;;  %v9164_v9 = vld [vmem:[#allocation4 + $0xf] sm:$0xff] }
 0x76a   :  { %v8678_v63 = vadd.f32 %v8663_v14, %v8604_v58  ;;  %v9331_v58 = vld [vmem:[#allocation4 + $0x1c] sm:$0xff] }
 0x76b   :  { %v8605_v4 = vadd.f32 %v8592_v61, %v8531_v24  ;;  %v9413_v0 = vld [vmem:[#allocation4 + $0x15] sm:$0xff]  ;;  %v9332_v61 = vld [vmem:[#allocation4 + $0x24] sm:$0xff]  ;;  %v9416_v24 = vld [vmem:[#allocation4 + $0x2d] sm:$0xff] }
 0x770   :  { %v8521_v62 = vpop.f32.mrf.mxu2  ;;  %v8595_v11 = vpop.f32.mrf.mxu3 }
 0x771   :  { %v8728_v52 = vpop.f32.mrf.mxu0  ;;  %v8666_v42 = vpop.f32.mrf.mxu1 }
 0x772   :  { %v8679_v12 = vadd.f32 %v8666_v42, %v8605_v4  ;;  %v9415_v42 = vld [vmem:[#allocation4 + $0x25] sm:$0xff] }
 0x773   :  { %v9419_v4 = vld [vmem:[#allocation4 + $0x45] sm:$0x3] }
 0x778   :  { %v8524_v26 = vpop.f32.mrf.mxu2  ;;  %v8598_v40 = vpop.f32.mrf.mxu3 }
 0x779   :  { %v8731_v5 = vpop.f32.mrf.mxu0  ;;  %v8669_v60 = vpop.f32.mrf.mxu1 }
 0x77a   :  { %v8750_v45 = vadd.f32 %v8731_v5, %v8676_v20  ;;  %v9502_v60 = vld [vmem:[#allocation4 + $0x46] sm:$0x3] }
 0x77c   :  { %v8757_v57 = vadd.f32 %v14695_v22, %v8750_v45 }
 0x77e   :  { %v8764_v7 = vmax.f32 %v8757_v57, 0.0 }
 0x780   :  { %8771 = vst [vmem:[#allocation2 + $0x88] sm:$0xff] %v8764_v7  ;;  %v8908_v62 = vpop.f32.mrf.mxu2 }
 0x781   :  { %v8734_v32 = vpop.f32.mrf.mxu0  ;;  %v8672_v45 = vpop.f32.mrf.mxu1 }
 0x782   :  { %v8751_v8 = vadd.f32 %v8734_v32, %v8677_v27  ;;  %v9163_v32 = vld [vmem:[#allocation4 + $0x7] sm:$0xff] }
 0x784   :  { %v8758_v47 = vadd.f32 %v14695_v22, %v8751_v8 }
 0x786   :  { %v8765_v21 = vmax.f32 %v8758_v47, 0.0  ;;  %v9330_v47 = vld [vmem:[#allocation4 + $0x14] sm:$0xff] }
 0x788   :  { %8772 = vst [vmem:[#allocation2 + $0x90] sm:$0xff] %v8765_v21  ;;  %v9166_v21 = vld [vmem:[#allocation4 + $0x1f] sm:$0xff] }
 0x789   :  { %v8737_v19 = vpop.f32.mrf.mxu0 }
 0x78a   :  { %v8752_v41 = vadd.f32 %v8737_v19, %v8678_v63  ;;  %v9414_v63 = vld [vmem:[#allocation4 + $0x1d] sm:$0xff] }
 0x78c   :  { %v8759_v25 = vadd.f32 %v14695_v22, %v8752_v41 }
 0x78e   :  { %v8766_v29 = vmax.f32 %v8759_v25, 0.0 }
 0x78f   :  { %v8830_v2 = vld [vmem:[#allocation2 + $0x8c] ss:$2 sm:$0xf] }
 0x790   :  { %8773 = vst [vmem:[#allocation2 + $0x98] sm:$0xff] %v8766_v29  ;;  %v8832_v38 = vrot.slane %v8830_v2, 7  ;;  %v8911_v29 = vpop.f32.mrf.mxu2 }
 0x791   :  { %v8740_v52 = vpop.f32.mrf.mxu0 }
 0x792   :  { %v8753_v3 = vadd.f32 %v8740_v52, %v8679_v12  ;;  %v8834_v28 = vsel %vm6625_vm2, 0.0, %v8832_v38  ;;  %v8973_v38 = vpop.f32.mrf.mxu3  ;;  %v9048_v52 = vpop.f32.mrf.mxu1 }
 0x793   :  { %v8835_v54 = vsel %vm8784_vm4, %v8834_v28, 0.0 }
 0x794   :  { %v8760_v55 = vadd.f32 %v14695_v22, %v8753_v3  ;;  %8836 = vst [vmem:[#allocation4 + $0x36] sm:$0x3f] %v8835_v54  ;;  %v9420_v22 = vld [vmem:[%s15234_s5 + $0x70] sm:$0xff] }
 0x795   :  { %9461 = vmatpush.msrb.mxu0 %v9420_v22 }
 0x796   :  { %v8767_v16 = vmax.f32 %v8760_v55, 0.0 }
 0x798   :  { %8774 = vst [vmem:[#allocation2 + $0xa0] sm:$0xff] %v8767_v16 }
 0x799   :  { %v8743_v20 = vpop.f32.mrf.mxu0 }
 0x79a   :  { %v8976_v3 = vpop.f32.mrf.mxu3  ;;  %v9051_v28 = vpop.f32.mrf.mxu1 }
 0x79b   :  { %v8862_v35 = vld [vmem:[#allocation4 + $0x31] sm:$0xff]  ;;  %v8863_v7 = vld [vmem:[#allocation4 + $0x39] sm:$0x3] }
 0x79c   :  { %v14922_v5 = vld [vmem:[#allocation4 + $0x30] sm:$0xff]  ;;  %11080 = vmatmul.msk.f32.gmra.mxu2 %vm8866_vm5, %v8862_v35  ;;  %v8853_v14 = vld [vmem:[#allocation4 + $0x38] sm:$0x3]  ;;  %v9004_v18 = vld [vmem:[#allocation4 + $0x3a] sm:$0x3] }
 0x79d   :  { %v9003_v17 = vld [vmem:[#allocation4 + $0x32] sm:$0xff]  ;;  %11088 = vmatmul.msk.f32.gmra.mxu3 %vm8866_vm5, %v14922_v5 }
 0x79e   :  { %11096 = vmatmul.msk.f32.gmra.mxu1 %vm8866_vm5, %v9003_v17  ;;  %v9334_v19 = vld [vmem:[#allocation4 + $0x34] sm:$0xff] }
 0x79f   :  { %v8838_v57 = vld [vmem:[#allocation2 + $0xa0] ss:$2 sm:$0xf] }
 0x7a0   :  { %v8840_v48 = vrot.slane %v8838_v57, 7  ;;  %v9611_v57 = vld [vmem:[%s15236_s7 + $0x18] sm:$0xff] }
 0x7a1   :  { %v8746_v1 = vpop.f32.mrf.mxu0  ;;  %9629 = vmatpush.msra.mxu3 %v9611_v57  ;;  %v9672_v57 = vld [vmem:[%s15236_s7 + $0x50] sm:$0xff] }
 0x7a2   :  { %v8842_v37 = vsel %vm6625_vm2, 0.0, %v8840_v48 }
 0x7a3   :  { %v8843_v44 = vsel %vm8784_vm4, %v8842_v37, 0.0 }
 0x7a4   :  { %11081 = vmatmul.msk.f32.gmra.mxu2 %vm8866_vm5, %v8863_v7  ;;  %8844 = vst [vmem:[#allocation4 + $0x3c] sm:$0x3f] %v8843_v44 }
 0x7a5   :  { %11089 = vmatmul.msk.f32.gmra.mxu3 %vm8866_vm5, %v8853_v14 }
 0x7a6   :  { %11097 = vmatmul.msk.f32.gmra.mxu1 %vm8866_vm5, %v9004_v18 }
 0x7a9   :  { %v9131_v43 = vpop.f32.mrf.mxu0 }
 0x7ab   :  { %v14936_v27 = vld [vmem:[#allocation4 + $0x36] sm:$0xff]  ;;  %v9087_v8 = vld [vmem:[#allocation4 + $0x3e] sm:$0x3]  ;;  %v9253_v25 = vld [vmem:[#allocation4 + $0x40] sm:$0x3]  ;;  %v9054_v54 = vpop.f32.mrf.mxu1 }
 0x7ac   :  { %11104 = vmatmul.msk.f32.gmra.mxu0 %vm8866_vm5, %v14936_v27  ;;  %11106 = vmatmul.msk.f32.vlgmr.msrb.gmra.mxu2 %vm8866_vm5, %v9163_v32  ;;  %v9252_v41 = vld [vmem:[#allocation4 + $0x38] sm:$0xff] }
 0x7ad   :  { %11114 = vmatmul.msk.f32.vlgmr.msrb.gmra.mxu3 %vm8866_vm5, %v14768_v31  ;;  %v9165_v31 = vld [vmem:[#allocation4 + $0x17] sm:$0xff]  ;;  %v9170_v53 = vld [vmem:[#allocation4 + $0x3f] sm:$0x3] }
 0x7ae   :  { %11122 = vmatmul.msk.f32.vlgmr.msra.gmra.mxu1 %vm8866_vm5, %v9329_v51  ;;  %v9417_v10 = vld [vmem:[#allocation4 + $0x35] sm:$0xff]  ;;  %v9418_v49 = vld [vmem:[#allocation4 + $0x3d] sm:$0xff] }
 0x7af   :  { %v14988_v2 = vpop.f32.mrf.mxu2 }
 0x7b3   :  { %v15008_v35 = vpop.f32.mrf.mxu1 }
 0x7b4   :  { %11105 = vmatmul.msk.f32.gmra.mxu0 %vm8866_vm5, %v9087_v8  ;;  %11107 = vmatmul.msk.f32.gmra.mxu2 %vm8866_vm5, %v9164_v9  ;;  %v9673_v9 = vld [vmem:[%s15236_s7 + $0x58] sm:$0xff] }
 0x7b5   :  { %11115 = vmatmul.msk.f32.gmra.mxu3 %vm8866_vm5, %v14788_v39  ;;  %v9167_v39 = vld [vmem:[#allocation4 + $0x27] sm:$0xff]  ;;  %9691 = vmatpush.msrb.mxu1 %v9673_v9 }
 0x7b6   :  { %11123 = vmatmul.msk.f32.gmra.mxu1 %vm8866_vm5, %v9330_v47 }
 0x7b7   :  { %v14992_v12 = vpop.f32.mrf.mxu2  ;;  %9692 = vmatpush.msrb.mxu1 %v9672_v57 }
 0x7bb   :  { %v15014_v45 = vpop.f32.mrf.mxu1 }
 0x7bc   :  { %11108 = vmatmul.msk.f32.gmra.mxu2 %vm8866_vm5, %v9165_v31  ;;  %11130 = vmatmul.msk.f32.vlgmr.msrb.gmra.mxu0 %vm8866_vm5, %v9412_v13 }
 0x7bd   :  { %11116 = vmatmul.msk.f32.gmra.mxu3 %vm8866_vm5, %v14809_v46  ;;  %v9168_v46 = vld [vmem:[#allocation4 + $0x2f] sm:$0xff] }
 0x7be   :  { %11124 = vmatmul.msk.f32.gmra.mxu1 %vm8866_vm5, %v9331_v58 }
 0x7c4   :  { %11109 = vmatmul.msk.f32.gmra.mxu2 %vm8866_vm5, %v9166_v21  ;;  %11131 = vmatmul.msk.f32.gmra.mxu0 %vm8866_vm5, %v9413_v0  ;;  %v8974_v21 = vadd.f32 %v8973_v38, %v8908_v62  ;;  %v9610_v0 = vld [vmem:[%s15236_s7 + $0x10] sm:$0xff] }
 0x7c5   :  { %11117 = vmatmul.msk.f32.gmra.mxu3 %vm8866_vm5, %v14819_v6  ;;  %v9169_v6 = vld [vmem:[#allocation4 + $0x37] sm:$0xff] }
 0x7c6   :  { %11125 = vmatmul.msk.f32.gmra.mxu1 %vm8866_vm5, %v9332_v61  ;;  %9630 = vmatpush.msra.mxu3 %v9610_v0 }
 0x7cc   :  { %11110 = vmatmul.msk.f32.gmra.mxu2 %vm8866_vm5, %v9167_v39  ;;  %11132 = vmatmul.msk.f32.gmra.mxu0 %vm8866_vm5, %v9414_v63  ;;  %v9072_v39 = vadd.f32 %v9048_v52, %v8974_v21 }
 0x7cd   :  { %11118 = vmatmul.msk.f32.gmra.mxu3 %vm8866_vm5, %v14863_v56  ;;  %v9335_v56 = vld [vmem:[#allocation4 + $0x3c] sm:$0xff] }
 0x7ce   :  { %11126 = vmatmul.msk.f32.gmra.mxu1 %vm8866_vm5, %v9333_v59  ;;  %v9155_v63 = vadd.f32 %v9131_v43, %v9072_v39 }
 0x7d4   :  { %11111 = vmatmul.msk.f32.gmra.mxu2 %vm8866_vm5, %v9168_v46  ;;  %11133 = vmatmul.msk.f32.gmra.mxu0 %vm8866_vm5, %v9415_v42  ;;  %v8977_v42 = vadd.f32 %v8976_v3, %v8911_v29 }
 0x7d5   :  { %11119 = vmatmul.msk.f32.gmra.mxu3 %vm8866_vm5, %v14922_v5 }
 0x7d6   :  { %11127 = vmatmul.msk.f32.gmra.mxu1 %vm8866_vm5, %v9334_v19 }
 0x7dc   :  { %11112 = vmatmul.msk.f32.gmra.mxu2 %vm8866_vm5, %v9169_v6  ;;  %11134 = vmatmul.msk.f32.gmra.mxu0 %vm8866_vm5, %v9416_v24 }
 0x7dd   :  { %11120 = vmatmul.msk.f32.gmra.mxu3 %vm8866_vm5, %v9252_v41  ;;  %v9073_v41 = vadd.f32 %v9051_v28, %v8977_v42 }
 0x7de   :  { %11128 = vmatmul.msk.f32.gmra.mxu1 %vm8866_vm5, %v9335_v56 }
 0x7e2   :  { %v15023_v37 = vpop.f32.mrf.mxu1 }
 0x7e4   :  { %11113 = vmatmul.msk.f32.gmra.mxu2 %vm8866_vm5, %v9170_v53  ;;  %11135 = vmatmul.msk.f32.gmra.mxu0 %vm8866_vm5, %v9417_v10 }
 0x7e5   :  { %11121 = vmatmul.msk.f32.gmra.mxu3 %vm8866_vm5, %v9253_v25 }
 0x7e6   :  { %11129 = vmatmul.msk.f32.gmra.mxu1 %vm8866_vm5, %v9336_v23 }
 0x7ec   :  { %11136 = vmatmul.msk.f32.gmra.mxu0 %vm8866_vm5, %v9418_v49  ;;  %11138 = vmatmul.msk.f32.vlgmr.msra.gmra.mxu2 %vm8866_vm5, %v14825_v50  ;;  %v14996_v50 = vpop.f32.mrf.mxu2 }
 0x7f4   :  { %11137 = vmatmul.msk.f32.gmra.mxu0 %vm8866_vm5, %v9419_v4  ;;  %11139 = vmatmul.msk.f32.gmra.mxu2 %vm8866_vm5, %v14836_v34  ;;  %v15000_v34 = vpop.f32.mrf.mxu2  ;;  %v15057_v4 = vld [vmem:[%s15235_s6] ss:$0 sm:$0xff] }
 0x7fc   :  { %11140 = vmatmul.msk.f32.gmra.mxu2 %vm8866_vm5, %v14851_v36  ;;  %v9501_v36 = vld [vmem:[#allocation4 + $0x3e] sm:$0xff] }
 0x804   :  { %11141 = vmatmul.msk.f32.gmra.mxu2 %vm8866_vm5, %v14865_v33  ;;  %v9134_v33 = vpop.f32.mrf.mxu0 }
 0x805   :  { %v9156_v23 = vadd.f32 %v9134_v33, %v9073_v41 }
 0x80c   :  { %11142 = vmatmul.msk.f32.gmra.mxu2 %vm8866_vm5, %v14873_v15  ;;  %v8979_v15 = vpop.f32.mrf.mxu3  ;;  %v9137_v55 = vpop.f32.mrf.mxu0 }
 0x80d   :  { %v8980_v53 = vadd.f32 %v8979_v15, %v14988_v2 }
 0x80f   :  { %v9074_v29 = vadd.f32 %v9054_v54, %v8980_v53  ;;  %v9669_v54 = vld [vmem:[%s15236_s7 + $0x48] sm:$0xff] }
 0x810   :  { %9914 = vmatpush.msra.mxu0 %v9669_v54 }
 0x811   :  { %v9157_v28 = vadd.f32 %v9137_v55, %v9074_v29 }
 0x814   :  { %11143 = vmatmul.msk.f32.gmra.mxu2 %vm8866_vm5, %v14936_v27  ;;  %v8982_v26 = vpop.f32.mrf.mxu3  ;;  %v15010_v5 = vpop.f32.mrf.mxu0 }
 0x815   :  { %v8983_v2 = vadd.f32 %v8982_v26, %v14992_v12 }
 0x817   :  { %v9075_v55 = vadd.f32 %v15008_v35, %v8983_v2  ;;  %v9642_v35 = vld [vmem:[%s15236_s7 + $0x38] sm:$0xff] }
 0x818   :  { %9660 = vmatpush.msrb.mxu3 %v9642_v35  ;;  %v9735_v2 = vld [vmem:[%s15236_s7 + $0x98] sm:$0xff] }
 0x819   :  { %9753 = vmatpush.msra.mxu1 %v9735_v2  ;;  %v9637_v2 = vld [vmem:[%s15236_s7 + $0x20] sm:$0xff] }
 0x81b   :  { %v15029_v18 = vpop.f32.mrf.mxu1 }
 0x81c   :  { %11144 = vmatmul.msk.f32.gmra.mxu2 %vm8866_vm5, %v9501_v36  ;;  %v15012_v17 = vpop.f32.mrf.mxu3  ;;  %v15016_v22 = vpop.f32.mrf.mxu0 }
 0x81f   :  { %v15003_v11 = vpop.f32.mrf.mxu2 }
 0x823   :  { %v15037_v30 = vpop.f32.mrf.mxu1 }
 0x824   :  { %11145 = vmatmul.msk.f32.gmra.mxu2 %vm8866_vm5, %v9502_v60  ;;  %v15021_v48 = vpop.f32.mrf.mxu3  ;;  %v15025_v7 = vpop.f32.mrf.mxu0 }
 0x827   :  { %v15006_v16 = vpop.f32.mrf.mxu2 }
 0x82b   :  { %v9380_v13 = vpop.f32.mrf.mxu1 }
 0x82c   :  { %v15027_v14 = vpop.f32.mrf.mxu3  ;;  %v15031_v27 = vpop.f32.mrf.mxu0 }
 0x82f   :  { %v9214_v20 = vpop.f32.mrf.mxu2 }
 0x830   :  { %v9238_v46 = vadd.f32 %v9214_v20, %v9155_v63 }
 0x833   :  { %v9383_v19 = vpop.f32.mrf.mxu1 }
 0x834   :  { %v15033_v32 = vpop.f32.mrf.mxu3  ;;  %v15039_v8 = vpop.f32.mrf.mxu0 }
 0x837   :  { %v9217_v40 = vpop.f32.mrf.mxu2 }
 0x838   :  { %v9239_v10 = vadd.f32 %v9217_v40, %v9156_v23 }
 0x83b   :  { %v9386_v52 = vpop.f32.mrf.mxu1 }
 0x83c   :  { %v9297_v31 = vpop.f32.mrf.mxu3  ;;  %v9463_v58 = vpop.f32.mrf.mxu0 }
 0x83d   :  { %v9321_v56 = vadd.f32 %v9297_v31, %v9238_v46 }
 0x83f   :  { %v9220_v1 = vpop.f32.mrf.mxu2  ;;  %v9404_v25 = vadd.f32 %v9380_v13, %v9321_v56  ;;  %v8986_v13 = vadd.f32 %v15012_v17, %v14996_v50 }
 0x840   :  { %v9240_v60 = vadd.f32 %v9220_v1, %v9157_v28  ;;  %v9158_v1 = vadd.f32 %v15010_v5, %v9075_v55 }
 0x841   :  { %v9487_v49 = vadd.f32 %v9463_v58, %v9404_v25  ;;  %v9076_v46 = vadd.f32 %v15014_v45, %v8986_v13 }
 0x843   :  { %v9389_v58 = vpop.f32.mrf.mxu1  ;;  %v9159_v17 = vadd.f32 %v15016_v22, %v9076_v46 }
 0x844   :  { %v9300_v59 = vpop.f32.mrf.mxu3  ;;  %v9466_v6 = vpop.f32.mrf.mxu0 }
 0x845   :  { %v9322_v43 = vadd.f32 %v9300_v59, %v9239_v10 }
 0x847   :  { %v9223_v44 = vpop.f32.mrf.mxu2  ;;  %v9405_v15 = vadd.f32 %v9383_v19, %v9322_v43  ;;  %v8992_v43 = vadd.f32 %v15027_v14, %v15003_v11  ;;  %v9734_v11 = vld [vmem:[%s15236_s7 + $0x90] sm:$0xff]  ;;  %v9761_v14 = vld [vmem:[%s15236_s7 + $0xa0] sm:$0xff] }
 0x848   :  { %v9241_v39 = vadd.f32 %v9223_v44, %v9158_v1  ;;  %v8989_v44 = vadd.f32 %v15021_v48, %v15000_v34  ;;  %v9668_v34 = vld [vmem:[%s15236_s7 + $0x40] sm:$0xff]  ;;  %9754 = vmatpush.msra.mxu1 %v9734_v11 }
 0x849   :  { %v9488_v40 = vadd.f32 %v9466_v6, %v9405_v15  ;;  %9915 = vmatpush.msra.mxu0 %v9668_v34 }
 0x84a   :  { %v9077_v25 = vadd.f32 %v15023_v37, %v8989_v44 }
 0x84b   :  { %v9392_v56 = vpop.f32.mrf.mxu1 }
 0x84c   :  { %v9303_v62 = vpop.f32.mrf.mxu3  ;;  %v9469_v3 = vpop.f32.mrf.mxu0 }
 0x84d   :  { %v9323_v12 = vadd.f32 %v9303_v62, %v9240_v60 }
 0x84f   :  { %v15035_v51 = vpop.f32.mrf.mxu2  ;;  %v9406_v63 = vadd.f32 %v9386_v52, %v9323_v12 }
 0x850   :  { %v9242_v45 = vadd.f32 %v15035_v51, %v9159_v17 }
 0x851   :  { %v9489_v42 = vadd.f32 %v9469_v3, %v9406_v63 }
 0x853   :  { %v9395_v28 = vpop.f32.mrf.mxu1 }
 0x854   :  { %v9306_v9 = vpop.f32.mrf.mxu3  ;;  %v9472_v0 = vpop.f32.mrf.mxu0 }
 0x855   :  { %v9324_v5 = vadd.f32 %v9306_v9, %v9241_v39  ;;  %v8995_v9 = vadd.f32 %v15033_v32, %v15006_v16 }
 0x857   :  { %v15044_v47 = vpop.f32.mrf.mxu2  ;;  %v9407_v23 = vadd.f32 %v9389_v58, %v9324_v5 }
 0x859   :  { %v9490_v62 = vadd.f32 %v9472_v0, %v9407_v23 }
 0x85b   :  { %v9398_v0 = vpop.f32.mrf.mxu1 }
 0x85c   :  { %v9309_v50 = vpop.f32.mrf.mxu3  ;;  %v9475_v10 = vpop.f32.mrf.mxu0 }
 0x85d   :  { %v9325_v48 = vadd.f32 %v9309_v50, %v9242_v45  ;;  %v9797_v45 = vld [vmem:[%s15236_s7 + $0xd8] sm:$0xff] }
 0x85f   :  { %v15049_v61 = vpop.f32.mrf.mxu2 }
 0x863   :  { %v9401_v5 = vpop.f32.mrf.mxu1 }
 0x864   :  { %v9312_v37 = vpop.f32.mrf.mxu3  ;;  %v9478_v60 = vpop.f32.mrf.mxu0 }
 0x867   :  { %v15051_v24 = vpop.f32.mrf.mxu2 }
 0x86c   :  { %v9481_v39 = vpop.f32.mrf.mxu0 }
 0x86f   :  { %v9546_v38 = vpop.f32.mrf.mxu2 }
 0x870   :  { %v9570_v36 = vadd.f32 %v9546_v38, %v9487_v49  ;;  %v9641_v49 = vld [vmem:[%s15236_s7 + $0x30] sm:$0xff]  ;;  %v9160_v38 = vadd.f32 %v15025_v7, %v9077_v25  ;;  %v9762_v7 = vld [vmem:[%s15236_s7 + $0xa8] sm:$0xff] }
 0x871   :  { %9661 = vmatpush.msrb.mxu3 %v9641_v49  ;;  %9983 = vmatpush.msrb.mxu0 %v9762_v7  ;;  %v9765_v25 = vld [vmem:[%s15236_s7 + $0xb0] sm:$0xff]  ;;  %v9699_v7 = vld [vmem:[%s15236_s7 + $0x60] sm:$0xff] }
 0x872   :  { %v9581_v33 = vadd.f32 %v15057_v4, %v9570_v36  ;;  %v9243_v52 = vadd.f32 %v15044_v47, %v9160_v38  ;;  %v9408_v36 = vadd.f32 %v9392_v56, %v9325_v48  ;;  %v9078_v47 = vadd.f32 %v15029_v18, %v8992_v43  ;;  %v9766_v56 = vld [vmem:[%s15236_s7 + $0xb8] sm:$0xff]  ;;  %v9796_v49 = vld [vmem:[%s15236_s7 + $0xd0] sm:$0xff] }
 0x873   :  { %9984 = vmatpush.msrb.mxu0 %v9761_v14  ;;  %v9079_v18 = vadd.f32 %v15037_v30, %v8995_v9  ;;  %v9703_v30 = vld [vmem:[%s15236_s7 + $0x70] sm:$0xff]  ;;  %v9827_v38 = vld [vmem:[%s15236_s7 + $0xf8] sm:$0xff]  ;;  %v9822_v9 = vld [vmem:[%s15236_s7 + $0xe0] sm:$0xff] }
 0x874   :  { %v9589_v20 = vmax.f32 %v9581_v33, 0.0  ;;  %v9491_v33 = vadd.f32 %v9475_v10, %v9408_v36  ;;  %v9161_v57 = vadd.f32 %v15031_v27, %v9078_v47  ;;  %v9484_v50 = vpop.f32.mrf.mxu0  ;;  %v9638_v36 = vld [vmem:[%s15236_s7 + $0x28] sm:$0xff]  ;;  %v9730_v47 = vld [vmem:[%s15236_s7 + $0x80] sm:$0xff] }
 0x875   :  { %v9162_v27 = vadd.f32 %v15039_v8, %v9079_v18 }
 0x876   :  { %9597 = vst [vmem:[#allocation2] sm:$0xff] %v9589_v20  ;;  %v9326_v20 = vadd.f32 %v9312_v37, %v9243_v52  ;;  %v9606_v52 = vld [vmem:[%s15236_s7] sm:$0xff] }
 0x877   :  { %v9549_v31 = vpop.f32.mrf.mxu2  ;;  %v9245_v16 = vadd.f32 %v15051_v24, %v9162_v27 }
 0x878   :  { %v9571_v26 = vadd.f32 %v9549_v31, %v9488_v40  ;;  %v9244_v31 = vadd.f32 %v15049_v61, %v9161_v57  ;;  %v9409_v55 = vadd.f32 %v9395_v28, %v9326_v20  ;;  %v9792_v20 = vld [vmem:[%s15236_s7 + $0xc0] sm:$0xff] }
 0x87a   :  { %v9582_v21 = vadd.f32 %v15057_v4, %v9571_v26  ;;  %v9315_v26 = vpop.f32.mrf.mxu3  ;;  %v9492_v1 = vadd.f32 %v9478_v60, %v9409_v55  ;;  %v9731_v60 = vld [vmem:[%s15236_s7 + $0x88] sm:$0xff] }
 0x87b   :  { %v9327_v58 = vadd.f32 %v9315_v26, %v9244_v31 }
 0x87c   :  { %v9590_v59 = vmax.f32 %v9582_v21, 0.0 }
 0x87d   :  { %v9410_v32 = vadd.f32 %v9398_v0, %v9327_v58 }
 0x87e   :  { %9598 = vst [vmem:[#allocation2 + $0x8] sm:$0xff] %v9590_v59  ;;  %v9704_v59 = vld [vmem:[%s15236_s7 + $0x78] sm:$0xff] }
 0x87f   :  { %v9552_v19 = vpop.f32.mrf.mxu2 }
 0x880   :  { %v9572_v6 = vadd.f32 %v9552_v19, %v9489_v42  ;;  %v9493_v42 = vadd.f32 %v9481_v39, %v9410_v32  ;;  %v10049_v32 = vld [vmem:[%s15238_s9 + $0x8] sm:$0xff] }
 0x882   :  { %v9583_v41 = vadd.f32 %v15057_v4, %v9572_v6  ;;  %v9318_v8 = vpop.f32.mrf.mxu3 }
 0x883   :  { %v9328_v19 = vadd.f32 %v9318_v8, %v9245_v16  ;;  %v10050_v16 = vld [vmem:[%s15238_s9 + $0x10] sm:$0xff] }
 0x884   :  { %v9591_v53 = vmax.f32 %v9583_v41, 0.0 }
 0x885   :  { %v9411_v17 = vadd.f32 %v9401_v5, %v9328_v19 }
 0x886   :  { %9599 = vst [vmem:[#allocation2 + $0x10] sm:$0xff] %v9591_v53 }
 0x887   :  { %v9555_v22 = vpop.f32.mrf.mxu2  ;;  %v9494_v10 = vadd.f32 %v9484_v50, %v9411_v17 }
 0x888   :  { %v9573_v51 = vadd.f32 %v9555_v22, %v9490_v62 }
 0x88a   :  { %v9584_v29 = vadd.f32 %v15057_v4, %v9573_v51 }
 0x88c   :  { %v9592_v3 = vmax.f32 %v9584_v29, 0.0  ;;  %v9607_v29 = vld [vmem:[%s15236_s7 + $0x8] sm:$0xff] }
 0x88e   :  { %9600 = vst [vmem:[#allocation2 + $0x18] sm:$0xff] %v9592_v3  ;;  %v9700_v3 = vld [vmem:[%s15236_s7 + $0x68] sm:$0xff] }
 0x88f   :  { %v9558_v15 = vpop.f32.mrf.mxu2 }
 0x890   :  { %v9574_v40 = vadd.f32 %v9558_v15, %v9491_v33  ;;  %v9793_v15 = vld [vmem:[%s15236_s7 + $0xc8] sm:$0xff] }
 0x892   :  { %v9585_v54 = vadd.f32 %v15057_v4, %v9574_v40  ;;  %v9823_v40 = vld [vmem:[%s15236_s7 + $0xe8] sm:$0xff] }
 0x894   :  { %v9593_v12 = vmax.f32 %v9585_v54, 0.0 }
 0x896   :  { %9601 = vst [vmem:[#allocation2 + $0x20] sm:$0xff] %v9593_v12 }
 0x897   :  { %v9561_v13 = vpop.f32.mrf.mxu2 }
 0x898   :  { %v9575_v21 = vadd.f32 %v9561_v13, %v9492_v1 }
 0x89a   :  { %v9586_v63 = vadd.f32 %v15057_v4, %v9575_v21 }
 0x89c   :  { %v9594_v61 = vmax.f32 %v9586_v63, 0.0  ;;  %v10051_v63 = vld [vmem:[%s15238_s9 + $0x18] sm:$0xff] }
 0x89d   :  { %v9609_v46 = vld [vmem:[#allocation2 + $0x1] ss:$36 sm:$0x3]  ;;  %v9640_v41 = vld [vmem:[#allocation2 + $0x3] ss:$36 sm:$0x3] }
 0x89e   :  { %9602 = vst [vmem:[#allocation2 + $0x28] sm:$0xff] %v9594_v61  ;;  %11146 = vmatmul.msk.f32.vlgmr.msra.gmra.mxu3 %vm8866_vm5, %v9609_v46  ;;  %v9605_v14 = vld [vmem:[#allocation2] ss:$36 sm:$0x3]  ;;  %v10084_v61 = vld [vmem:[%s15240_s11 + $0x18] sm:$0xff] }
 0x89f   :  { %v9564_v35 = vpop.f32.mrf.mxu2  ;;  %9722 = vmatpush.msra.mxu3 %v9704_v59  ;;  %v9636_v57 = vld [vmem:[#allocation2 + $0x2] ss:$36 sm:$0x3]  ;;  %v10083_v59 = vld [vmem:[%s15240_s11 + $0x10] sm:$0xff] }
 0x8a0   :  { %v9576_v24 = vadd.f32 %v9564_v35, %v9493_v42  ;;  %v10048_v46 = vld [vmem:[%s15238_s9] sm:$0xff] }
 0x8a1   :  { %9723 = vmatpush.msra.mxu3 %v9703_v30 }
 0x8a2   :  { %v9587_v6 = vadd.f32 %v15057_v4, %v9576_v24 }
 0x8a4   :  { %v9595_v44 = vmax.f32 %v9587_v6, 0.0 }
 0x8a5   :  { %v9671_v23 = vld [vmem:[#allocation2 + $0x7] ss:$36 sm:$0x3]  ;;  %v9667_v53 = vld [vmem:[#allocation2 + $0x6] ss:$36 sm:$0x3] }
 0x8a6   :  { %9603 = vst [vmem:[#allocation2 + $0x30] sm:$0xff] %v9595_v44  ;;  %11147 = vmatmul.msk.f32.vlgmr.msrb.gmra.mxu3 %vm8866_vm5, %v9640_v41  ;;  %11148 = vmatmul.msk.f32.vlgmr.msrb.gmra.mxu1 %vm8866_vm5, %v9671_v23  ;;  %v9702_v51 = vld [vmem:[#allocation2 + $0x9] ss:$36 sm:$0x3] }
 0x8a7   :  { %11156 = vmatmul.msk.f32.vlgmr.msra.gmra.mxu0 %vm8866_vm5, %v9667_v53  ;;  %v9567_v62 = vpop.f32.mrf.mxu2  ;;  %9784 = vmatpush.msrb.mxu3 %v9766_v56  ;;  %v9698_v54 = vld [vmem:[#allocation2 + $0x8] ss:$36 sm:$0x3] }
 0x8a8   :  { %v9577_v34 = vadd.f32 %v9567_v62, %v9494_v10  ;;  %9815 = vmatpush.msrb.mxu1 %v9797_v45  ;;  %10072 = vmatpush.msra.mxu0 %v10051_v63 }
 0x8a9   :  { %9785 = vmatpush.msrb.mxu3 %v9765_v25 }
 0x8aa   :  { %v9588_v22 = vadd.f32 %v15057_v4, %v9577_v34  ;;  %9816 = vmatpush.msrb.mxu1 %v9796_v49  ;;  %v9826_v4 = vld [vmem:[%s15236_s7 + $0xf0] sm:$0xff]  ;;  %10073 = vmatpush.msra.mxu0 %v10050_v16 }
 0x8ac   :  { %v9596_v48 = vmax.f32 %v9588_v22, 0.0  ;;  %10074 = vmatpush.msra.mxu0 %v10049_v32  ;;  %v11169_v22 = vld [vmem:[%s15237_s8] ss:$0 sm:$0xff] }
 0x8ad   :  { %v9733_v37 = vld [vmem:[#allocation2 + $0xd] ss:$36 sm:$0x3]  ;;  %v9760_v43 = vld [vmem:[#allocation2 + $0xe] ss:$36 sm:$0x3] }
 0x8ae   :  { %9604 = vst [vmem:[#allocation2 + $0x38] sm:$0x3] %v9596_v48  ;;  %11149 = vmatmul.msk.f32.vlgmr.msra.gmra.mxu3 %vm8866_vm5, %v9702_v51  ;;  %11150 = vmatmul.msk.f32.vlgmr.msra.gmra.mxu1 %vm8866_vm5, %v9733_v37  ;;  %v9764_v28 = vld [vmem:[#allocation2 + $0xf] ss:$36 sm:$0x3]  ;;  %v10081_v37 = vld [vmem:[%s15240_s11] sm:$0xff] }
 0x8af   :  { %11159 = vmatmul.msk.f32.vlgmr.msrb.gmra.mxu0 %vm8866_vm5, %v9760_v43  ;;  %9845 = vmatpush.msra.mxu3 %v9827_v38  ;;  %v9795_v33 = vld [vmem:[#allocation2 + $0x13] ss:$36 sm:$0x3]  ;;  %v9729_v31 = vld [vmem:[#allocation2 + $0xc] ss:$36 sm:$0x3] }
 0x8b0   :  { %9868 = vmatpush.msra.mxu1 %v9607_v29  ;;  %v9791_v55 = vld [vmem:[#allocation2 + $0x12] ss:$36 sm:$0x3]  ;;  %10075 = vmatpush.msra.mxu0 %v10048_v46  ;;  %v10082_v29 = vld [vmem:[%s15240_s11 + $0x8] sm:$0xff]  ;;  %v11170_v43 = vld [vmem:[%s15239_s10] ss:$0 sm:$0xff] }
 0x8b1   :  { %9846 = vmatpush.msra.mxu3 %v9826_v4  ;;  %s10120_s11 = sshll.u32 %s15242_s13, 4  ;;  %s10121_s11 = int_to_ptr.hbm [resolvable:$true] %s10120_s11 }
 0x8b2   :  { %9869 = vmatpush.msra.mxu1 %v9606_v52 }
 0x8b5   :  { %v9825_v11 = vld [vmem:[#allocation2 + $0x15] ss:$36 sm:$0x3]  ;;  %v9821_v12 = vld [vmem:[#allocation2 + $0x14] ss:$36 sm:$0x3] }
 0x8b6   :  { %11151 = vmatmul.msk.f32.vlgmr.msrb.gmra.mxu3 %vm8866_vm5, %v9764_v28  ;;  %11152 = vmatmul.msk.f32.vlgmr.msrb.gmra.mxu1 %vm8866_vm5, %v9795_v33 }
 0x8b7   :  { %9891 = vmatpush.msrb.mxu3 %v9638_v36  ;;  %9937 = vmatpush.msrb.mxu1 %v9700_v3  ;;  %v11171_v3 = vld [vmem:[%s15241_s12] ss:$0 sm:$0xff] }
 0x8b9   :  { %9892 = vmatpush.msrb.mxu3 %v9637_v2  ;;  %9938 = vmatpush.msrb.mxu1 %v9699_v7 }
 0x8be   :  { %11153 = vmatmul.msk.f32.vlgmr.msra.gmra.mxu3 %vm8866_vm5, %v9825_v11  ;;  %11154 = vmatmul.msk.f32.vlgmr.msra.gmra.mxu1 %vm8866_vm5, %v9605_v14 }
 0x8bf   :  { %9960 = vmatpush.msra.mxu3 %v9731_v60  ;;  %10006 = vmatpush.msra.mxu1 %v9793_v15 }
 0x8c1   :  { %9961 = vmatpush.msra.mxu3 %v9730_v47  ;;  %10007 = vmatpush.msra.mxu1 %v9792_v20 }
 0x8c6   :  { %11155 = vmatmul.msk.f32.vlgmr.msrb.gmra.mxu3 %vm8866_vm5, %v9636_v57  ;;  %11157 = vmatmul.msk.f32.vlgmr.msrb.gmra.mxu1 %vm8866_vm5, %v9698_v54 }
 0x8c7   :  { %10029 = vmatpush.msrb.mxu3 %v9823_v40  ;;  %10104 = vmatpush.msrb.mxu1 %v10084_v61 }
 0x8c9   :  { %10030 = vmatpush.msrb.mxu3 %v9822_v9  ;;  %10105 = vmatpush.msrb.mxu1 %v10083_v59 }
 0x8cb   :  { %10106 = vmatpush.msrb.mxu1 %v10082_v29 }
 0x8cd   :  { %10107 = vmatpush.msrb.mxu1 %v10081_v37 }
 0x8ce   :  { %11158 = vmatmul.msk.f32.vlgmr.msra.gmra.mxu3 %vm8866_vm5, %v9729_v31  ;;  %11160 = vmatmul.msk.f32.vlgmr.msra.gmra.mxu1 %vm8866_vm5, %v9791_v55 }
 0x8d6   :  { %11161 = vmatmul.msk.f32.vlgmr.msrb.gmra.mxu3 %vm8866_vm5, %v9821_v12 }
 0x921   :  { %v9632_v26 = vpop.f32.mrf.mxu3 }
 0x923   :  { %v9694_v1 = vpop.f32.mrf.mxu1 }
 0x924   :  { %v9917_v8 = vpop.f32.mrf.mxu0 }
 0x925   :  { %v9918_v17 = vadd.f32 %v9917_v8, %v9694_v1 }
 0x929   :  { %v9663_v13 = vpop.f32.mrf.mxu3 }
 0x92b   :  { %v9756_v18 = vpop.f32.mrf.mxu1 }
 0x92c   :  { %v9986_v44 = vpop.f32.mrf.mxu0 }
 0x931   :  { %v9725_v58 = vpop.f32.mrf.mxu3 }
 0x933   :  { %v9818_v21 = vpop.f32.mrf.mxu1 }
 0x939   :  { %v9787_v0 = vpop.f32.mrf.mxu3 }
 0x93a   :  { %v9987_v56 = vadd.f32 %v9986_v44, %v9787_v0 }
 0x93b   :  { %v9871_v27 = vpop.f32.mrf.mxu1 }
 0x93c   :  { %v9872_v5 = vadd.f32 %v9871_v27, %v9632_v26 }
 0x941   :  { %v9848_v39 = vpop.f32.mrf.mxu3 }
 0x943   :  { %v9940_v30 = vpop.f32.mrf.mxu1 }
 0x944   :  { %v9941_v6 = vadd.f32 %v9940_v30, %v9725_v58 }
 0x946   :  { %v10036_v10 = vadd.f32 %v9941_v6, %v9918_v17 }
 0x949   :  { %v9894_v42 = vpop.f32.mrf.mxu3 }
 0x94a   :  { %v9895_v19 = vadd.f32 %v9894_v42, %v9663_v13 }
 0x94b   :  { %v10009_v24 = vpop.f32.mrf.mxu1 }
 0x94c   :  { %v10035_v45 = vadd.f32 %v9895_v19, %v9872_v5  ;;  %v10010_v23 = vadd.f32 %v10009_v24, %v9818_v21 }
 0x94e   :  { %v10039_v49 = vadd.f32 %v10036_v10, %v10035_v45 }
 0x951   :  { %v9963_v35 = vpop.f32.mrf.mxu3 }
 0x952   :  { %v9964_v50 = vadd.f32 %v9963_v35, %v9756_v18 }
 0x954   :  { %v10037_v25 = vadd.f32 %v9987_v56, %v9964_v50 }
 0x959   :  { %v10032_v41 = vpop.f32.mrf.mxu3 }
 0x95a   :  { %v10033_v53 = vadd.f32 %v10032_v41, %v9848_v39 }
 0x95c   :  { %v10038_v62 = vadd.f32 %v10033_v53, %v10010_v23 }
 0x95e   :  { %v10040_v34 = vadd.f32 %v10038_v62, %v10037_v25 }
 0x960   :  { %v10041_v48 = vadd.f32 %v10040_v34, %v10039_v49 }
 0x962   :  { %v10046_v51 = vadd.f32 %v11169_v22, %v10041_v48 }
 0x964   :  { %v10047_v38 = vmax.f32 %v10046_v51, 0.0 }
 0x966   :  { %11162 = vmatmul.msk.f32.vlgmr.msra.gmra.mxu0 %vm10056_vm6, %v10047_v38 }
 0x9e3   :  { %v10077_v4 = vpop.f32.mrf.mxu0 }
 0x9e4   :  { %v10078_v52 = vadd.f32 %v11170_v43, %v10077_v4 }
 0x9e6   :  { %v10080_v36 = vmax.f32 %v10078_v52, 0.0 }
 0x9e8   :  { %11163 = vmatmul.msk.f32.vlgmr.msrb.gmra.mxu1 %vm10056_vm6, %v10080_v36 }
 0xa65   :  { %v10109_v28 = vpop.f32.mrf.mxu1 }
 0xa66   :  { %v10110_v33 = vadd.f32 %v11171_v3, %v10109_v28 }
 0xa68   :  { %10112 = vst [vmem:[#allocation5] sm:$0x3] %v10110_v33 }
 0xa69   :  { %10123 = dma.vmem_to_hbm [thread:$0]  %s10119_s0, 32, %s10121_s11, [#allocation6]  }
 0xa6a   :  { %11212 = dma.done.wait [#allocation6], 32  }
 0xa6b   :  { %11213 = vsyncadd [#allocation6], 4294967264 }
 0xa6c   :  { %10128 = vsyncpa [#allocation6], 1 }

</bundles_post_ra>
